<compile_context>
chip_gen: v5e
topology: v5e:2x2
jax: 0.10.0
libtpu: 0.0.40
codegen_flags: <defaults>
</compile_context>

<pallas_src>
import jax
import jax.numpy as jnp
import numpy as np
from jax.experimental import pallas as pl
from jax.experimental.pallas import tpu as pltpu


def _pack_conv_weights(w, W):
    """PyTorch (Cout, Cin, 3, 3, 3) conv weight -> (9, (W+2)*Cin, W*Cout) banded matrices.

    B[kd*3+kh, (wo+kw)*Cin + ci, wo*Cout + co] = w[co, ci, kd, kh, kw]
    so that  out_row(n,d,h)[wo*Cout+co] = sum_{kd,kh} padded_row(n, d+kd, h+kh) @ B[kd*3+kh]
    reproduces a stride-1, pad-1 3x3x3 convolution with (W, C) packed on the lane axis.
    """
    w = np.asarray(w, dtype=np.float32)
    Cout, Cin = w.shape[0], w.shape[1]
    B = np.zeros((9, (W + 2) * Cin, W * Cout), np.float32)
    for kd in range(3):
        for kh in range(3):
            tap = kd * 3 + kh
            for kw in range(3):
                blk = w[:, :, kd, kh, kw].T  # (Cin, Cout)
                for wo in range(W):
                    r0 = (wo + kw) * Cin
                    c0 = wo * Cout
                    B[tap, r0:r0 + Cin, c0:c0 + Cout] = blk
    return jnp.asarray(B)


def make_basic_block_kernel(N, D, H, W, C, eps):
    M = N * D * H            # rows of the lane-packed activation slab
    LO = W * C               # lane width of unpadded activations (lane-dense output slab)
    LW = (W + 2) * C         # lane width of W-padded activations (matmul K dim)
    inv_cnt = 1.0 / float(N * D * H * W)

    def kernel(x_ref, w1_ref, g1_ref, b1_ref, w2_ref, g2_ref, b2_ref,
               out_ref, pad_ref, acc_ref):
        # ---- zero only the d / h halo faces of the reused padded scratch (kept zero throughout) ----
        pad_ref[:, 0:1, :, :] = jnp.zeros((N, 1, H + 2, LW), jnp.float32)
        pad_ref[:, D + 1:D + 2, :, :] = jnp.zeros((N, 1, H + 2, LW), jnp.float32)
        pad_ref[:, 1:1 + D, 0:1, :] = jnp.zeros((N, D, 1, LW), jnp.float32)
        pad_ref[:, 1:1 + D, H + 1:H + 2, :] = jnp.zeros((N, D, 1, LW), jnp.float32)

        def write_interior(y2):
            # y2: (M, LO) lane-dense; W halo is added in-register so the store is a single
            # full-lane-width interior write (no lane-offset masked store).
            y4 = y2.reshape(N, D, H, LO)
            zc = jnp.zeros((N, D, H, C), jnp.float32)
            pad_ref[:, 1:1 + D, 1:1 + H, :] = jnp.concatenate([zc, y4, zc], axis=-1)

        def conv(w_ref):
            # 9 banded matmuls; kw taps + channels folded into the contraction.
            acc_ref[...] = jnp.zeros_like(acc_ref)
            for kd in range(3):
                for kh in range(3):
                    lhs = pad_ref[:, kd:kd + D, kh:kh + H, :].reshape(M, LW)
                    acc_ref[...] += jnp.dot(lhs, w_ref[kd * 3 + kh],
                                            preferred_element_type=jnp.float32)
            return acc_ref[...]

        def batchnorm(z, g_ref, b_ref):
            # One-pass batch stats (biased variance), fused per-channel scale/shift.
            s1 = jnp.sum(z, axis=0, keepdims=True)        # (1, LO): per (w, c) sums
            s2 = jnp.sum(z * z, axis=0, keepdims=True)    # (1, LO)
            cs1 = jnp.zeros((1, C), jnp.float32)
            cs2 = jnp.zeros((1, C), jnp.float32)
            for w in range(W):                            # fold the W lane-groups -> per channel
                cs1 = cs1 + s1[:, w * C:(w + 1) * C]
                cs2 = cs2 + s2[:, w * C:(w + 1) * C]
            mean = cs1 * inv_cnt
            var = cs2 * inv_cnt - mean * mean
            scale = g_ref[...] * jax.lax.rsqrt(var + eps)
            shift = b_ref[...] - mean * scale
            scale_t = jnp.concatenate([scale] * W, axis=-1)   # (1, LO)
            shift_t = jnp.concatenate([shift] * W, axis=-1)
            return z * scale_t + shift_t

        # conv1 -> bn1 -> relu, written straight into the halo scratch interior for conv2
        write_interior(x_ref[...])
        y = jnp.maximum(batchnorm(conv(w1_ref), g1_ref, b1_ref), 0.0)
        write_interior(y)

        # conv2 -> bn2 -> + residual (unpadded lane-dense input) -> relu, lane-dense store
        z = batchnorm(conv(w2_ref), g2_ref, b2_ref)
        out_ref[...] = jnp.maximum(z + x_ref[...], 0.0)

    return kernel


def basic_block_pallas(x_ncdhw, w1, gamma1, beta1, w2, gamma2, beta2, eps=1e-5):
    N, C, D, H, W = x_ncdhw.shape
    LO = W * C

    # NCDHW -> lane-packed (N*D*H, W*C) slab (W and C share the lane axis)
    x2 = (jnp.transpose(x_ncdhw, (0, 2, 3, 4, 1))
          .astype(jnp.float32)
          .reshape(N * D * H, LO))

    w1b = _pack_conv_weights(w1, W)
    w2b = _pack_conv_weights(w2, W)
    g1 = jnp.asarray(gamma1, jnp.float32).reshape(1, C)
    b1 = jnp.asarray(beta1, jnp.float32).reshape(1, C)
    g2 = jnp.asarray(gamma2, jnp.float32).reshape(1, C)
    b2 = jnp.asarray(beta2, jnp.float32).reshape(1, C)

    kernel = make_basic_block_kernel(N, D, H, W, C, eps)
    out2 = pl.pallas_call(
        kernel,
        out_shape=jax.ShapeDtypeStruct((N * D * H, LO), jnp.float32),
        in_specs=[pl.BlockSpec(memory_space=pltpu.MemorySpace.VMEM)] * 7,
        out_specs=pl.BlockSpec(memory_space=pltpu.MemorySpace.VMEM),
        scratch_shapes=[
            pltpu.VMEM((N, D + 2, H + 2, (W + 2) * C), jnp.float32),  # reused halo scratch
            pltpu.VMEM((N * D * H, LO), jnp.float32),                  # conv accumulator
        ],
        compiler_params=pltpu.CompilerParams(vmem_limit_bytes=64 * 1024 * 1024),
    )(x2, w1b, g1, b1, w2b, g2, b2)

    # (N*D*H, W*C) -> NCDHW
    out = out2.reshape(N, D, H, W, C)
    return jnp.transpose(out, (0, 4, 1, 2, 3))


def basic_block_reference(x, w1, gamma1, beta1, w2, gamma2, beta2, eps=1e-5):
    # Pure-JAX reference (same math as the PyTorch module in training mode), NCDHW layout.
    def conv(xx, ww):
        return jax.lax.conv_general_dilated(
            xx, ww, window_strides=(1, 1, 1),
            padding=((1, 1), (1, 1), (1, 1)),
            dimension_numbers=('NCDHW', 'OIDHW', 'NCDHW'))

    def bn(y, g, b):
        mean = jnp.mean(y, axis=(0, 2, 3, 4), keepdims=True)
        var = jnp.mean((y - mean) ** 2, axis=(0, 2, 3, 4), keepdims=True)
        return ((y - mean) * jax.lax.rsqrt(var + eps)
                * g.reshape(1, -1, 1, 1, 1) + b.reshape(1, -1, 1, 1, 1))

    out = jax.nn.relu(bn(conv(x, w1), gamma1, beta1))
    out = bn(conv(out, w2), gamma2, beta2)
    return jax.nn.relu(out + x)


if __name__ == "__main__":
    # small shapes: batch=2, inplanes=planes=16, D=H=W=8  (stride=1, downsample=None)
    # W*C = 128 -> fully lane-dense working slab.
    N, C, D, H, W = 2, 16, 8, 8, 8
    key = jax.random.PRNGKey(0)
    kx, k1, k2 = jax.random.split(key, 3)

    x = jax.random.normal(kx, (N, C, D, H, W), dtype=jnp.float32)
    # Conv3d kernel_size=3, bias=False
    w1 = 0.1 * jax.random.normal(k1, (C, C, 3, 3, 3), dtype=jnp.float32)
    w2 = 0.1 * jax.random.normal(k2, (C, C, 3, 3, 3), dtype=jnp.float32)
    # BatchNorm3d default affine init: gamma=1, beta=0
    gamma1 = jnp.ones((C,), jnp.float32)
    beta1 = jnp.zeros((C,), jnp.float32)
    gamma2 = jnp.ones((C,), jnp.float32)
    beta2 = jnp.zeros((C,), jnp.float32)

    out = basic_block_pallas(x, w1, gamma1, beta1, w2, gamma2, beta2)
    out = jax.block_until_ready(out)

    ref = basic_block_reference(x, w1, gamma1, beta1, w2, gamma2, beta2)
    ref = jax.block_until_ready(ref)

    assert out.shape == (N, C, D, H, W)
    np.testing.assert_allclose(np.asarray(out), np.asarray(ref), rtol=2e-3, atol=2e-3)

    print("KERNEL_OK")
</pallas_src>

<mosaic_0001>
module attributes {stable_mosaic.version = 11 : i64} {
  func.func @kernel(%arg0: memref<128x128xf32, #tpu.memory_space<vmem>>, %arg1: memref<9x160x128xf32, #tpu.memory_space<vmem>>, %arg2: memref<1x16xf32, #tpu.memory_space<vmem>>, %arg3: memref<1x16xf32, #tpu.memory_space<vmem>>, %arg4: memref<9x160x128xf32, #tpu.memory_space<vmem>>, %arg5: memref<1x16xf32, #tpu.memory_space<vmem>>, %arg6: memref<1x16xf32, #tpu.memory_space<vmem>>, %arg7: memref<128x128xf32, #tpu.memory_space<vmem>>, %arg8: memref<2x10x10x160xf32, #tpu.memory_space<vmem>>, %arg9: memref<128x128xf32, #tpu.memory_space<vmem>>) attributes {dimension_semantics = [], scalar_prefetch = 0 : i64, scratch_operands = 2 : i64, tpu.core_type = #tpu.core_type<tc>} {
    %cst = arith.constant 0.000000e+00 : f32
    %0 = vector.broadcast %cst : f32 to vector<2x1x10x160xf32>
    %c0 = arith.constant 0 : index
    %c0_0 = arith.constant 0 : index
    %c0_1 = arith.constant 0 : index
    %c0_2 = arith.constant 0 : index
    %1 = vector.load %arg8[%c0, %c0_0, %c0_1, %c0_2] : memref<2x10x10x160xf32, #tpu.memory_space<vmem>>, vector<2x1x10x160xf32>
    tpu.vector_store %arg8[%c0, %c0_0, %c0_1, %c0_2], %0 {strides = array<i32>} : memref<2x10x10x160xf32, #tpu.memory_space<vmem>>, vector<2x1x10x160xf32>,
    %cst_3 = arith.constant 0.000000e+00 : f32
    %2 = vector.broadcast %cst_3 : f32 to vector<2x1x10x160xf32>
    %c0_4 = arith.constant 0 : index
    %c9 = arith.constant 9 : index
    %c0_5 = arith.constant 0 : index
    %c0_6 = arith.constant 0 : index
    %3 = vector.load %arg8[%c0_4, %c9, %c0_5, %c0_6] : memref<2x10x10x160xf32, #tpu.memory_space<vmem>>, vector<2x1x10x160xf32>
    tpu.vector_store %arg8[%c0_4, %c9, %c0_5, %c0_6], %2 {strides = array<i32>} : memref<2x10x10x160xf32, #tpu.memory_space<vmem>>, vector<2x1x10x160xf32>,
    %cst_7 = arith.constant 0.000000e+00 : f32
    %4 = vector.broadcast %cst_7 : f32 to vector<2x8x1x160xf32>
    %c0_8 = arith.constant 0 : index
    %c1 = arith.constant 1 : index
    %c0_9 = arith.constant 0 : index
    %c0_10 = arith.constant 0 : index
    %5 = vector.load %arg8[%c0_8, %c1, %c0_9, %c0_10] : memref<2x10x10x160xf32, #tpu.memory_space<vmem>>, vector<2x8x1x160xf32>
    tpu.vector_store %arg8[%c0_8, %c1, %c0_9, %c0_10], %4 {strides = array<i32>} : memref<2x10x10x160xf32, #tpu.memory_space<vmem>>, vector<2x8x1x160xf32>,
    %cst_11 = arith.constant 0.000000e+00 : f32
    %6 = vector.broadcast %cst_11 : f32 to vector<2x8x1x160xf32>
    %c0_12 = arith.constant 0 : index
    %c1_13 = arith.constant 1 : index
    %c9_14 = arith.constant 9 : index
    %c0_15 = arith.constant 0 : index
    %7 = vector.load %arg8[%c0_12, %c1_13, %c9_14, %c0_15] : memref<2x10x10x160xf32, #tpu.memory_space<vmem>>, vector<2x8x1x160xf32>
    tpu.vector_store %arg8[%c0_12, %c1_13, %c9_14, %c0_15], %6 {strides = array<i32>} : memref<2x10x10x160xf32, #tpu.memory_space<vmem>>, vector<2x8x1x160xf32>,
    %c0_16 = arith.constant 0 : index
    %c0_17 = arith.constant 0 : index
    %8 = vector.load %arg0[%c0_16, %c0_17] : memref<128x128xf32, #tpu.memory_space<vmem>>, vector<128x128xf32>
    %9 = vector.shape_cast %8 : vector<128x128xf32> to vector<2x8x8x128xf32>
    %cst_18 = arith.constant 0.000000e+00 : f32
    %10 = vector.broadcast %cst_18 : f32 to vector<2x8x8x16xf32>
    %11 = tpu.concatenate %10, %9, %10 in 3 : vector<2x8x8x16xf32>, vector<2x8x8x128xf32>, vector<2x8x8x16xf32> -> vector<2x8x8x160xf32>
    %c0_19 = arith.constant 0 : index
    %c1_20 = arith.constant 1 : index
    %c1_21 = arith.constant 1 : index
    %c0_22 = arith.constant 0 : index
    %12 = vector.load %arg8[%c0_19, %c1_20, %c1_21, %c0_22] : memref<2x10x10x160xf32, #tpu.memory_space<vmem>>, vector<2x8x8x160xf32>
    tpu.vector_store %arg8[%c0_19, %c1_20, %c1_21, %c0_22], %11 {strides = array<i32>} : memref<2x10x10x160xf32, #tpu.memory_space<vmem>>, vector<2x8x8x160xf32>,
    %cst_23 = arith.constant 0.000000e+00 : f32
    %13 = vector.broadcast %cst_23 : f32 to vector<128x128xf32>
    %c0_24 = arith.constant 0 : index
    %c0_25 = arith.constant 0 : index
    %14 = vector.load %arg9[%c0_24, %c0_25] : memref<128x128xf32, #tpu.memory_space<vmem>>, vector<128x128xf32>
    tpu.vector_store %arg9[%c0_24, %c0_25], %13 {strides = array<i32>} : memref<128x128xf32, #tpu.memory_space<vmem>>, vector<128x128xf32>,
    %c0_26 = arith.constant 0 : index
    %c0_27 = arith.constant 0 : index
    %c0_28 = arith.constant 0 : index
    %c0_29 = arith.constant 0 : index
    %15 = vector.load %arg8[%c0_26, %c0_27, %c0_28, %c0_29] : memref<2x10x10x160xf32, #tpu.memory_space<vmem>>, vector<2x8x8x160xf32>
    %16 = vector.shape_cast %15 : vector<2x8x8x160xf32> to vector<128x160xf32>
    %c0_30 = arith.constant 0 : index
    %c0_31 = arith.constant 0 : index
    %17 = vector.load %arg9[%c0_30, %c0_31] : memref<128x128xf32, #tpu.memory_space<vmem>>, vector<128x128xf32>
    %c0_32 = arith.constant 0 : index
    %c0_33 = arith.constant 0 : index
    %c0_34 = arith.constant 0 : index
    %18 = vector.load %arg1[%c0_32, %c0_33, %c0_34] : memref<9x160x128xf32, #tpu.memory_space<vmem>>, vector<1x160x128xf32>
    %19 = vector.shape_cast %18 : vector<1x160x128xf32> to vector<160x128xf32>
    %cst_35 = arith.constant dense<0.000000e+00> : vector<128x128xf32>
    %20 = tpu.matmul %16, %19, %cst_35 {dimension_numbers = #tpu.dot_dimension_numbers<[1], [0], [0], [1], [0, 0, 1, 1], [], []>} : vector<128x160xf32>, vector<160x128xf32>, vector<128x128xf32> -> vector<128x128xf32>
    %21 = arith.addf %17, %20 : vector<128x128xf32>
    %c0_36 = arith.constant 0 : index
    %c0_37 = arith.constant 0 : index
    %22 = vector.load %arg9[%c0_36, %c0_37] : memref<128x128xf32, #tpu.memory_space<vmem>>, vector<128x128xf32>
    tpu.vector_store %arg9[%c0_36, %c0_37], %21 {strides = array<i32>} : memref<128x128xf32, #tpu.memory_space<vmem>>, vector<128x128xf32>,
    %c0_38 = arith.constant 0 : index
    %c0_39 = arith.constant 0 : index
    %c1_40 = arith.constant 1 : index
    %c0_41 = arith.constant 0 : index
    %23 = vector.load %arg8[%c0_38, %c0_39, %c1_40, %c0_41] : memref<2x10x10x160xf32, #tpu.memory_space<vmem>>, vector<2x8x8x160xf32>
    %24 = vector.shape_cast %23 : vector<2x8x8x160xf32> to vector<128x160xf32>
    %c0_42 = arith.constant 0 : index
    %c0_43 = arith.constant 0 : index
    %25 = vector.load %arg9[%c0_42, %c0_43] : memref<128x128xf32, #tpu.memory_space<vmem>>, vector<128x128xf32>
    %c1_44 = arith.constant 1 : index
    %c0_45 = arith.constant 0 : index
    %c0_46 = arith.constant 0 : index
    %26 = vector.load %arg1[%c1_44, %c0_45, %c0_46] : memref<9x160x128xf32, #tpu.memory_space<vmem>>, vector<1x160x128xf32>
    %27 = vector.shape_cast %26 : vector<1x160x128xf32> to vector<160x128xf32>
    %cst_47 = arith.constant dense<0.000000e+00> : vector<128x128xf32>
    %28 = tpu.matmul %24, %27, %cst_47 {dimension_numbers = #tpu.dot_dimension_numbers<[1], [0], [0], [1], [0, 0, 1, 1], [], []>} : vector<128x160xf32>, vector<160x128xf32>, vector<128x128xf32> -> vector<128x128xf32>
    %29 = arith.addf %25, %28 : vector<128x128xf32>
    %c0_48 = arith.constant 0 : index
    %c0_49 = arith.constant 0 : index
    %30 = vector.load %arg9[%c0_48, %c0_49] : memref<128x128xf32, #tpu.memory_space<vmem>>, vector<128x128xf32>
    tpu.vector_store %arg9[%c0_48, %c0_49], %29 {strides = array<i32>} : memref<128x128xf32, #tpu.memory_space<vmem>>, vector<128x128xf32>,
    %c0_50 = arith.constant 0 : index
    %c0_51 = arith.constant 0 : index
    %c2 = arith.constant 2 : index
    %c0_52 = arith.constant 0 : index
    %31 = vector.load %arg8[%c0_50, %c0_51, %c2, %c0_52] : memref<2x10x10x160xf32, #tpu.memory_space<vmem>>, vector<2x8x8x160xf32>
    %32 = vector.shape_cast %31 : vector<2x8x8x160xf32> to vector<128x160xf32>
    %c0_53 = arith.constant 0 : index
    %c0_54 = arith.constant 0 : index
    %33 = vector.load %arg9[%c0_53, %c0_54] : memref<128x128xf32, #tpu.memory_space<vmem>>, vector<128x128xf32>
    %c2_55 = arith.constant 2 : index
    %c0_56 = arith.constant 0 : index
    %c0_57 = arith.constant 0 : index
    %34 = vector.load %arg1[%c2_55, %c0_56, %c0_57] : memref<9x160x128xf32, #tpu.memory_space<vmem>>, vector<1x160x128xf32>
    %35 = vector.shape_cast %34 : vector<1x160x128xf32> to vector<160x128xf32>
    %cst_58 = arith.constant dense<0.000000e+00> : vector<128x128xf32>
    %36 = tpu.matmul %32, %35, %cst_58 {dimension_numbers = #tpu.dot_dimension_numbers<[1], [0], [0], [1], [0, 0, 1, 1], [], []>} : vector<128x160xf32>, vector<160x128xf32>, vector<128x128xf32> -> vector<128x128xf32>
    %37 = arith.addf %33, %36 : vector<128x128xf32>
    %c0_59 = arith.constant 0 : index
    %c0_60 = arith.constant 0 : index
    %38 = vector.load %arg9[%c0_59, %c0_60] : memref<128x128xf32, #tpu.memory_space<vmem>>, vector<128x128xf32>
    tpu.vector_store %arg9[%c0_59, %c0_60], %37 {strides = array<i32>} : memref<128x128xf32, #tpu.memory_space<vmem>>, vector<128x128xf32>,
    %c0_61 = arith.constant 0 : index
    %c1_62 = arith.constant 1 : index
    %c0_63 = arith.constant 0 : index
    %c0_64 = arith.constant 0 : index
    %39 = vector.load %arg8[%c0_61, %c1_62, %c0_63, %c0_64] : memref<2x10x10x160xf32, #tpu.memory_space<vmem>>, vector<2x8x8x160xf32>
    %40 = vector.shape_cast %39 : vector<2x8x8x160xf32> to vector<128x160xf32>
    %c0_65 = arith.constant 0 : index
    %c0_66 = arith.constant 0 : index
    %41 = vector.load %arg9[%c0_65, %c0_66] : memref<128x128xf32, #tpu.memory_space<vmem>>, vector<128x128xf32>
    %c3 = arith.constant 3 : index
    %c0_67 = arith.constant 0 : index
    %c0_68 = arith.constant 0 : index
    %42 = vector.load %arg1[%c3, %c0_67, %c0_68] : memref<9x160x128xf32, #tpu.memory_space<vmem>>, vector<1x160x128xf32>
    %43 = vector.shape_cast %42 : vector<1x160x128xf32> to vector<160x128xf32>
    %cst_69 = arith.constant dense<0.000000e+00> : vector<128x128xf32>
    %44 = tpu.matmul %40, %43, %cst_69 {dimension_numbers = #tpu.dot_dimension_numbers<[1], [0], [0], [1], [0, 0, 1, 1], [], []>} : vector<128x160xf32>, vector<160x128xf32>, vector<128x128xf32> -> vector<128x128xf32>
    %45 = arith.addf %41, %44 : vector<128x128xf32>
    %c0_70 = arith.constant 0 : index
    %c0_71 = arith.constant 0 : index
    %46 = vector.load %arg9[%c0_70, %c0_71] : memref<128x128xf32, #tpu.memory_space<vmem>>, vector<128x128xf32>
    tpu.vector_store %arg9[%c0_70, %c0_71], %45 {strides = array<i32>} : memref<128x128xf32, #tpu.memory_space<vmem>>, vector<128x128xf32>,
    %c0_72 = arith.constant 0 : index
    %c1_73 = arith.constant 1 : index
    %c1_74 = arith.constant 1 : index
    %c0_75 = arith.constant 0 : index
    %47 = vector.load %arg8[%c0_72, %c1_73, %c1_74, %c0_75] : memref<2x10x10x160xf32, #tpu.memory_space<vmem>>, vector<2x8x8x160xf32>
    %48 = vector.shape_cast %47 : vector<2x8x8x160xf32> to vector<128x160xf32>
    %c0_76 = arith.constant 0 : index
    %c0_77 = arith.constant 0 : index
    %49 = vector.load %arg9[%c0_76, %c0_77] : memref<128x128xf32, #tpu.memory_space<vmem>>, vector<128x128xf32>
    %c4 = arith.constant 4 : index
    %c0_78 = arith.constant 0 : index
    %c0_79 = arith.constant 0 : index
    %50 = vector.load %arg1[%c4, %c0_78, %c0_79] : memref<9x160x128xf32, #tpu.memory_space<vmem>>, vector<1x160x128xf32>
    %51 = vector.shape_cast %50 : vector<1x160x128xf32> to vector<160x128xf32>
    %cst_80 = arith.constant dense<0.000000e+00> : vector<128x128xf32>
    %52 = tpu.matmul %48, %51, %cst_80 {dimension_numbers = #tpu.dot_dimension_numbers<[1], [0], [0], [1], [0, 0, 1, 1], [], []>} : vector<128x160xf32>, vector<160x128xf32>, vector<128x128xf32> -> vector<128x128xf32>
    %53 = arith.addf %49, %52 : vector<128x128xf32>
    %c0_81 = arith.constant 0 : index
    %c0_82 = arith.constant 0 : index
    %54 = vector.load %arg9[%c0_81, %c0_82] : memref<128x128xf32, #tpu.memory_space<vmem>>, vector<128x128xf32>
    tpu.vector_store %arg9[%c0_81, %c0_82], %53 {strides = array<i32>} : memref<128x128xf32, #tpu.memory_space<vmem>>, vector<128x128xf32>,
    %c0_83 = arith.constant 0 : index
    %c1_84 = arith.constant 1 : index
    %c2_85 = arith.constant 2 : index
    %c0_86 = arith.constant 0 : index
    %55 = vector.load %arg8[%c0_83, %c1_84, %c2_85, %c0_86] : memref<2x10x10x160xf32, #tpu.memory_space<vmem>>, vector<2x8x8x160xf32>
    %56 = vector.shape_cast %55 : vector<2x8x8x160xf32> to vector<128x160xf32>
    %c0_87 = arith.constant 0 : index
    %c0_88 = arith.constant 0 : index
    %57 = vector.load %arg9[%c0_87, %c0_88] : memref<128x128xf32, #tpu.memory_space<vmem>>, vector<128x128xf32>
    %c5 = arith.constant 5 : index
    %c0_89 = arith.constant 0 : index
    %c0_90 = arith.constant 0 : index
    %58 = vector.load %arg1[%c5, %c0_89, %c0_90] : memref<9x160x128xf32, #tpu.memory_space<vmem>>, vector<1x160x128xf32>
    %59 = vector.shape_cast %58 : vector<1x160x128xf32> to vector<160x128xf32>
    %cst_91 = arith.constant dense<0.000000e+00> : vector<128x128xf32>
    %60 = tpu.matmul %56, %59, %cst_91 {dimension_numbers = #tpu.dot_dimension_numbers<[1], [0], [0], [1], [0, 0, 1, 1], [], []>} : vector<128x160xf32>, vector<160x128xf32>, vector<128x128xf32> -> vector<128x128xf32>
    %61 = arith.addf %57, %60 : vector<128x128xf32>
    %c0_92 = arith.constant 0 : index
    %c0_93 = arith.constant 0 : index
    %62 = vector.load %arg9[%c0_92, %c0_93] : memref<128x128xf32, #tpu.memory_space<vmem>>, vector<128x128xf32>
    tpu.vector_store %arg9[%c0_92, %c0_93], %61 {strides = array<i32>} : memref<128x128xf32, #tpu.memory_space<vmem>>, vector<128x128xf32>,
    %c0_94 = arith.constant 0 : index
    %c2_95 = arith.constant 2 : index
    %c0_96 = arith.constant 0 : index
    %c0_97 = arith.constant 0 : index
    %63 = vector.load %arg8[%c0_94, %c2_95, %c0_96, %c0_97] : memref<2x10x10x160xf32, #tpu.memory_space<vmem>>, vector<2x8x8x160xf32>
    %64 = vector.shape_cast %63 : vector<2x8x8x160xf32> to vector<128x160xf32>
    %c0_98 = arith.constant 0 : index
    %c0_99 = arith.constant 0 : index
    %65 = vector.load %arg9[%c0_98, %c0_99] : memref<128x128xf32, #tpu.memory_space<vmem>>, vector<128x128xf32>
    %c6 = arith.constant 6 : index
    %c0_100 = arith.constant 0 : index
    %c0_101 = arith.constant 0 : index
    %66 = vector.load %arg1[%c6, %c0_100, %c0_101] : memref<9x160x128xf32, #tpu.memory_space<vmem>>, vector<1x160x128xf32>
    %67 = vector.shape_cast %66 : vector<1x160x128xf32> to vector<160x128xf32>
    %cst_102 = arith.constant dense<0.000000e+00> : vector<128x128xf32>
    %68 = tpu.matmul %64, %67, %cst_102 {dimension_numbers = #tpu.dot_dimension_numbers<[1], [0], [0], [1], [0, 0, 1, 1], [], []>} : vector<128x160xf32>, vector<160x128xf32>, vector<128x128xf32> -> vector<128x128xf32>
    %69 = arith.addf %65, %68 : vector<128x128xf32>
    %c0_103 = arith.constant 0 : index
    %c0_104 = arith.constant 0 : index
    %70 = vector.load %arg9[%c0_103, %c0_104] : memref<128x128xf32, #tpu.memory_space<vmem>>, vector<128x128xf32>
    tpu.vector_store %arg9[%c0_103, %c0_104], %69 {strides = array<i32>} : memref<128x128xf32, #tpu.memory_space<vmem>>, vector<128x128xf32>,
    %c0_105 = arith.constant 0 : index
    %c2_106 = arith.constant 2 : index
    %c1_107 = arith.constant 1 : index
    %c0_108 = arith.constant 0 : index
    %71 = vector.load %arg8[%c0_105, %c2_106, %c1_107, %c0_108] : memref<2x10x10x160xf32, #tpu.memory_space<vmem>>, vector<2x8x8x160xf32>
    %72 = vector.shape_cast %71 : vector<2x8x8x160xf32> to vector<128x160xf32>
    %c0_109 = arith.constant 0 : index
    %c0_110 = arith.constant 0 : index
    %73 = vector.load %arg9[%c0_109, %c0_110] : memref<128x128xf32, #tpu.memory_space<vmem>>, vector<128x128xf32>
    %c7 = arith.constant 7 : index
    %c0_111 = arith.constant 0 : index
    %c0_112 = arith.constant 0 : index
    %74 = vector.load %arg1[%c7, %c0_111, %c0_112] : memref<9x160x128xf32, #tpu.memory_space<vmem>>, vector<1x160x128xf32>
    %75 = vector.shape_cast %74 : vector<1x160x128xf32> to vector<160x128xf32>
    %cst_113 = arith.constant dense<0.000000e+00> : vector<128x128xf32>
    %76 = tpu.matmul %72, %75, %cst_113 {dimension_numbers = #tpu.dot_dimension_numbers<[1], [0], [0], [1], [0, 0, 1, 1], [], []>} : vector<128x160xf32>, vector<160x128xf32>, vector<128x128xf32> -> vector<128x128xf32>
    %77 = arith.addf %73, %76 : vector<128x128xf32>
    %c0_114 = arith.constant 0 : index
    %c0_115 = arith.constant 0 : index
    %78 = vector.load %arg9[%c0_114, %c0_115] : memref<128x128xf32, #tpu.memory_space<vmem>>, vector<128x128xf32>
    tpu.vector_store %arg9[%c0_114, %c0_115], %77 {strides = array<i32>} : memref<128x128xf32, #tpu.memory_space<vmem>>, vector<128x128xf32>,
    %c0_116 = arith.constant 0 : index
    %c2_117 = arith.constant 2 : index
    %c2_118 = arith.constant 2 : index
    %c0_119 = arith.constant 0 : index
    %79 = vector.load %arg8[%c0_116, %c2_117, %c2_118, %c0_119] : memref<2x10x10x160xf32, #tpu.memory_space<vmem>>, vector<2x8x8x160xf32>
    %80 = vector.shape_cast %79 : vector<2x8x8x160xf32> to vector<128x160xf32>
    %c0_120 = arith.constant 0 : index
    %c0_121 = arith.constant 0 : index
    %81 = vector.load %arg9[%c0_120, %c0_121] : memref<128x128xf32, #tpu.memory_space<vmem>>, vector<128x128xf32>
    %c8 = arith.constant 8 : index
    %c0_122 = arith.constant 0 : index
    %c0_123 = arith.constant 0 : index
    %82 = vector.load %arg1[%c8, %c0_122, %c0_123] : memref<9x160x128xf32, #tpu.memory_space<vmem>>, vector<1x160x128xf32>
    %83 = vector.shape_cast %82 : vector<1x160x128xf32> to vector<160x128xf32>
    %cst_124 = arith.constant dense<0.000000e+00> : vector<128x128xf32>
    %84 = tpu.matmul %80, %83, %cst_124 {dimension_numbers = #tpu.dot_dimension_numbers<[1], [0], [0], [1], [0, 0, 1, 1], [], []>} : vector<128x160xf32>, vector<160x128xf32>, vector<128x128xf32> -> vector<128x128xf32>
    %85 = arith.addf %81, %84 : vector<128x128xf32>
    %c0_125 = arith.constant 0 : index
    %c0_126 = arith.constant 0 : index
    %86 = vector.load %arg9[%c0_125, %c0_126] : memref<128x128xf32, #tpu.memory_space<vmem>>, vector<128x128xf32>
    tpu.vector_store %arg9[%c0_125, %c0_126], %85 {strides = array<i32>} : memref<128x128xf32, #tpu.memory_space<vmem>>, vector<128x128xf32>,
    %c0_127 = arith.constant 0 : index
    %c0_128 = arith.constant 0 : index
    %87 = vector.load %arg9[%c0_127, %c0_128] : memref<128x128xf32, #tpu.memory_space<vmem>>, vector<128x128xf32>
    %cst_129 = arith.constant dense<0.000000e+00> : vector<128xf32>
    %88 = vector.multi_reduction <add>, %87, %cst_129 [0] : vector<128x128xf32> to vector<128xf32>
    %89 = vector.shape_cast %88 : vector<128xf32> to vector<1x128xf32>
    %90 = arith.mulf %87, %87 : vector<128x128xf32>
    %cst_130 = arith.constant dense<0.000000e+00> : vector<128xf32>
    %91 = vector.multi_reduction <add>, %90, %cst_130 [0] : vector<128x128xf32> to vector<128xf32>
    %92 = vector.shape_cast %91 : vector<128xf32> to vector<1x128xf32>
    %cst_131 = arith.constant 0.000000e+00 : f32
    %93 = vector.broadcast %cst_131 : f32 to vector<1x16xf32>
    %cst_132 = arith.constant 0.000000e+00 : f32
    %94 = vector.broadcast %cst_132 : f32 to vector<1x16xf32>
    %95 = vector.extract_strided_slice %89 {offsets = [0, 0], sizes = [1, 16], strides = [1, 1]} : vector<1x128xf32> to vector<1x16xf32>
    %96 = arith.addf %93, %95 : vector<1x16xf32>
    %97 = vector.extract_strided_slice %92 {offsets = [0, 0], sizes = [1, 16], strides = [1, 1]} : vector<1x128xf32> to vector<1x16xf32>
    %98 = arith.addf %94, %97 : vector<1x16xf32>
    %99 = vector.extract_strided_slice %89 {offsets = [0, 16], sizes = [1, 16], strides = [1, 1]} : vector<1x128xf32> to vector<1x16xf32>
    %100 = arith.addf %96, %99 : vector<1x16xf32>
    %101 = vector.extract_strided_slice %92 {offsets = [0, 16], sizes = [1, 16], strides = [1, 1]} : vector<1x128xf32> to vector<1x16xf32>
    %102 = arith.addf %98, %101 : vector<1x16xf32>
    %103 = vector.extract_strided_slice %89 {offsets = [0, 32], sizes = [1, 16], strides = [1, 1]} : vector<1x128xf32> to vector<1x16xf32>
    %104 = arith.addf %100, %103 : vector<1x16xf32>
    %105 = vector.extract_strided_slice %92 {offsets = [0, 32], sizes = [1, 16], strides = [1, 1]} : vector<1x128xf32> to vector<1x16xf32>
    %106 = arith.addf %102, %105 : vector<1x16xf32>
    %107 = vector.extract_strided_slice %89 {offsets = [0, 48], sizes = [1, 16], strides = [1, 1]} : vector<1x128xf32> to vector<1x16xf32>
    %108 = arith.addf %104, %107 : vector<1x16xf32>
    %109 = vector.extract_strided_slice %92 {offsets = [0, 48], sizes = [1, 16], strides = [1, 1]} : vector<1x128xf32> to vector<1x16xf32>
    %110 = arith.addf %106, %109 : vector<1x16xf32>
    %111 = vector.extract_strided_slice %89 {offsets = [0, 64], sizes = [1, 16], strides = [1, 1]} : vector<1x128xf32> to vector<1x16xf32>
    %112 = arith.addf %108, %111 : vector<1x16xf32>
    %113 = vector.extract_strided_slice %92 {offsets = [0, 64], sizes = [1, 16], strides = [1, 1]} : vector<1x128xf32> to vector<1x16xf32>
    %114 = arith.addf %110, %113 : vector<1x16xf32>
    %115 = vector.extract_strided_slice %89 {offsets = [0, 80], sizes = [1, 16], strides = [1, 1]} : vector<1x128xf32> to vector<1x16xf32>
    %116 = arith.addf %112, %115 : vector<1x16xf32>
    %117 = vector.extract_strided_slice %92 {offsets = [0, 80], sizes = [1, 16], strides = [1, 1]} : vector<1x128xf32> to vector<1x16xf32>
    %118 = arith.addf %114, %117 : vector<1x16xf32>
    %119 = vector.extract_strided_slice %89 {offsets = [0, 96], sizes = [1, 16], strides = [1, 1]} : vector<1x128xf32> to vector<1x16xf32>
    %120 = arith.addf %116, %119 : vector<1x16xf32>
    %121 = vector.extract_strided_slice %92 {offsets = [0, 96], sizes = [1, 16], strides = [1, 1]} : vector<1x128xf32> to vector<1x16xf32>
    %122 = arith.addf %118, %121 : vector<1x16xf32>
    %123 = vector.extract_strided_slice %89 {offsets = [0, 112], sizes = [1, 16], strides = [1, 1]} : vector<1x128xf32> to vector<1x16xf32>
    %124 = arith.addf %120, %123 : vector<1x16xf32>
    %125 = vector.extract_strided_slice %92 {offsets = [0, 112], sizes = [1, 16], strides = [1, 1]} : vector<1x128xf32> to vector<1x16xf32>
    %126 = arith.addf %122, %125 : vector<1x16xf32>
    %cst_133 = arith.constant 9.765625E-4 : f32
    %127 = vector.broadcast %cst_133 : f32 to vector<1x16xf32>
    %128 = arith.mulf %124, %127 : vector<1x16xf32>
    %cst_134 = arith.constant 9.765625E-4 : f32
    %129 = vector.broadcast %cst_134 : f32 to vector<1x16xf32>
    %130 = arith.mulf %126, %129 : vector<1x16xf32>
    %131 = arith.mulf %128, %128 : vector<1x16xf32>
    %132 = arith.subf %130, %131 : vector<1x16xf32>
    %c0_135 = arith.constant 0 : index
    %c0_136 = arith.constant 0 : index
    %133 = vector.load %arg2[%c0_135, %c0_136] : memref<1x16xf32, #tpu.memory_space<vmem>>, vector<1x16xf32>
    %cst_137 = arith.constant 9.99999974E-6 : f32
    %134 = vector.broadcast %cst_137 : f32 to vector<1x16xf32>
    %135 = arith.addf %132, %134 : vector<1x16xf32>
    %136 = math.rsqrt %135 : vector<1x16xf32>
    %137 = arith.mulf %133, %136 : vector<1x16xf32>
    %c0_138 = arith.constant 0 : index
    %c0_139 = arith.constant 0 : index
    %138 = vector.load %arg3[%c0_138, %c0_139] : memref<1x16xf32, #tpu.memory_space<vmem>>, vector<1x16xf32>
    %139 = arith.mulf %128, %137 : vector<1x16xf32>
    %140 = arith.subf %138, %139 : vector<1x16xf32>
    %141 = tpu.concatenate %137, %137, %137, %137, %137, %137, %137, %137 in 1 : vector<1x16xf32>, vector<1x16xf32>, vector<1x16xf32>, vector<1x16xf32>, vector<1x16xf32>, vector<1x16xf32>, vector<1x16xf32>, vector<1x16xf32> -> vector<1x128xf32>
    %142 = tpu.concatenate %140, %140, %140, %140, %140, %140, %140, %140 in 1 : vector<1x16xf32>, vector<1x16xf32>, vector<1x16xf32>, vector<1x16xf32>, vector<1x16xf32>, vector<1x16xf32>, vector<1x16xf32>, vector<1x16xf32> -> vector<1x128xf32>
    %143 = vector.broadcast %141 : vector<1x128xf32> to vector<128x128xf32>
    %144 = arith.mulf %87, %143 : vector<128x128xf32>
    %145 = vector.broadcast %142 : vector<1x128xf32> to vector<128x128xf32>
    %146 = arith.addf %144, %145 : vector<128x128xf32>
    %cst_140 = arith.constant 0.000000e+00 : f32
    %147 = vector.broadcast %cst_140 : f32 to vector<128x128xf32>
    %148 = arith.maximumf %146, %147 : vector<128x128xf32>
    %149 = vector.shape_cast %148 : vector<128x128xf32> to vector<2x8x8x128xf32>
    %cst_141 = arith.constant 0.000000e+00 : f32
    %150 = vector.broadcast %cst_141 : f32 to vector<2x8x8x16xf32>
    %151 = tpu.concatenate %150, %149, %150 in 3 : vector<2x8x8x16xf32>, vector<2x8x8x128xf32>, vector<2x8x8x16xf32> -> vector<2x8x8x160xf32>
    %c0_142 = arith.constant 0 : index
    %c1_143 = arith.constant 1 : index
    %c1_144 = arith.constant 1 : index
    %c0_145 = arith.constant 0 : index
    %152 = vector.load %arg8[%c0_142, %c1_143, %c1_144, %c0_145] : memref<2x10x10x160xf32, #tpu.memory_space<vmem>>, vector<2x8x8x160xf32>
    tpu.vector_store %arg8[%c0_142, %c1_143, %c1_144, %c0_145], %151 {strides = array<i32>} : memref<2x10x10x160xf32, #tpu.memory_space<vmem>>, vector<2x8x8x160xf32>,
    %cst_146 = arith.constant 0.000000e+00 : f32
    %153 = vector.broadcast %cst_146 : f32 to vector<128x128xf32>
    %c0_147 = arith.constant 0 : index
    %c0_148 = arith.constant 0 : index
    %154 = vector.load %arg9[%c0_147, %c0_148] : memref<128x128xf32, #tpu.memory_space<vmem>>, vector<128x128xf32>
    tpu.vector_store %arg9[%c0_147, %c0_148], %153 {strides = array<i32>} : memref<128x128xf32, #tpu.memory_space<vmem>>, vector<128x128xf32>,
    %c0_149 = arith.constant 0 : index
    %c0_150 = arith.constant 0 : index
    %c0_151 = arith.constant 0 : index
    %c0_152 = arith.constant 0 : index
    %155 = vector.load %arg8[%c0_149, %c0_150, %c0_151, %c0_152] : memref<2x10x10x160xf32, #tpu.memory_space<vmem>>, vector<2x8x8x160xf32>
    %156 = vector.shape_cast %155 : vector<2x8x8x160xf32> to vector<128x160xf32>
    %c0_153 = arith.constant 0 : index
    %c0_154 = arith.constant 0 : index
    %157 = vector.load %arg9[%c0_153, %c0_154] : memref<128x128xf32, #tpu.memory_space<vmem>>, vector<128x128xf32>
    %c0_155 = arith.constant 0 : index
    %c0_156 = arith.constant 0 : index
    %c0_157 = arith.constant 0 : index
    %158 = vector.load %arg4[%c0_155, %c0_156, %c0_157] : memref<9x160x128xf32, #tpu.memory_space<vmem>>, vector<1x160x128xf32>
    %159 = vector.shape_cast %158 : vector<1x160x128xf32> to vector<160x128xf32>
    %cst_158 = arith.constant dense<0.000000e+00> : vector<128x128xf32>
    %160 = tpu.matmul %156, %159, %cst_158 {dimension_numbers = #tpu.dot_dimension_numbers<[1], [0], [0], [1], [0, 0, 1, 1], [], []>} : vector<128x160xf32>, vector<160x128xf32>, vector<128x128xf32> -> vector<128x128xf32>
    %161 = arith.addf %157, %160 : vector<128x128xf32>
    %c0_159 = arith.constant 0 : index
    %c0_160 = arith.constant 0 : index
    %162 = vector.load %arg9[%c0_159, %c0_160] : memref<128x128xf32, #tpu.memory_space<vmem>>, vector<128x128xf32>
    tpu.vector_store %arg9[%c0_159, %c0_160], %161 {strides = array<i32>} : memref<128x128xf32, #tpu.memory_space<vmem>>, vector<128x128xf32>,
    %c0_161 = arith.constant 0 : index
    %c0_162 = arith.constant 0 : index
    %c1_163 = arith.constant 1 : index
    %c0_164 = arith.constant 0 : index
    %163 = vector.load %arg8[%c0_161, %c0_162, %c1_163, %c0_164] : memref<2x10x10x160xf32, #tpu.memory_space<vmem>>, vector<2x8x8x160xf32>
    %164 = vector.shape_cast %163 : vector<2x8x8x160xf32> to vector<128x160xf32>
    %c0_165 = arith.constant 0 : index
    %c0_166 = arith.constant 0 : index
    %165 = vector.load %arg9[%c0_165, %c0_166] : memref<128x128xf32, #tpu.memory_space<vmem>>, vector<128x128xf32>
    %c1_167 = arith.constant 1 : index
    %c0_168 = arith.constant 0 : index
    %c0_169 = arith.constant 0 : index
    %166 = vector.load %arg4[%c1_167, %c0_168, %c0_169] : memref<9x160x128xf32, #tpu.memory_space<vmem>>, vector<1x160x128xf32>
    %167 = vector.shape_cast %166 : vector<1x160x128xf32> to vector<160x128xf32>
    %cst_170 = arith.constant dense<0.000000e+00> : vector<128x128xf32>
    %168 = tpu.matmul %164, %167, %cst_170 {dimension_numbers = #tpu.dot_dimension_numbers<[1], [0], [0], [1], [0, 0, 1, 1], [], []>} : vector<128x160xf32>, vector<160x128xf32>, vector<128x128xf32> -> vector<128x128xf32>
    %169 = arith.addf %165, %168 : vector<128x128xf32>
    %c0_171 = arith.constant 0 : index
    %c0_172 = arith.constant 0 : index
    %170 = vector.load %arg9[%c0_171, %c0_172] : memref<128x128xf32, #tpu.memory_space<vmem>>, vector<128x128xf32>
    tpu.vector_store %arg9[%c0_171, %c0_172], %169 {strides = array<i32>} : memref<128x128xf32, #tpu.memory_space<vmem>>, vector<128x128xf32>,
    %c0_173 = arith.constant 0 : index
    %c0_174 = arith.constant 0 : index
    %c2_175 = arith.constant 2 : index
    %c0_176 = arith.constant 0 : index
    %171 = vector.load %arg8[%c0_173, %c0_174, %c2_175, %c0_176] : memref<2x10x10x160xf32, #tpu.memory_space<vmem>>, vector<2x8x8x160xf32>
    %172 = vector.shape_cast %171 : vector<2x8x8x160xf32> to vector<128x160xf32>
    %c0_177 = arith.constant 0 : index
    %c0_178 = arith.constant 0 : index
    %173 = vector.load %arg9[%c0_177, %c0_178] : memref<128x128xf32, #tpu.memory_space<vmem>>, vector<128x128xf32>
    %c2_179 = arith.constant 2 : index
    %c0_180 = arith.constant 0 : index
    %c0_181 = arith.constant 0 : index
    %174 = vector.load %arg4[%c2_179, %c0_180, %c0_181] : memref<9x160x128xf32, #tpu.memory_space<vmem>>, vector<1x160x128xf32>
    %175 = vector.shape_cast %174 : vector<1x160x128xf32> to vector<160x128xf32>
    %cst_182 = arith.constant dense<0.000000e+00> : vector<128x128xf32>
    %176 = tpu.matmul %172, %175, %cst_182 {dimension_numbers = #tpu.dot_dimension_numbers<[1], [0], [0], [1], [0, 0, 1, 1], [], []>} : vector<128x160xf32>, vector<160x128xf32>, vector<128x128xf32> -> vector<128x128xf32>
    %177 = arith.addf %173, %176 : vector<128x128xf32>
    %c0_183 = arith.constant 0 : index
    %c0_184 = arith.constant 0 : index
    %178 = vector.load %arg9[%c0_183, %c0_184] : memref<128x128xf32, #tpu.memory_space<vmem>>, vector<128x128xf32>
    tpu.vector_store %arg9[%c0_183, %c0_184], %177 {strides = array<i32>} : memref<128x128xf32, #tpu.memory_space<vmem>>, vector<128x128xf32>,
    %c0_185 = arith.constant 0 : index
    %c1_186 = arith.constant 1 : index
    %c0_187 = arith.constant 0 : index
    %c0_188 = arith.constant 0 : index
    %179 = vector.load %arg8[%c0_185, %c1_186, %c0_187, %c0_188] : memref<2x10x10x160xf32, #tpu.memory_space<vmem>>, vector<2x8x8x160xf32>
    %180 = vector.shape_cast %179 : vector<2x8x8x160xf32> to vector<128x160xf32>
    %c0_189 = arith.constant 0 : index
    %c0_190 = arith.constant 0 : index
    %181 = vector.load %arg9[%c0_189, %c0_190] : memref<128x128xf32, #tpu.memory_space<vmem>>, vector<128x128xf32>
    %c3_191 = arith.constant 3 : index
    %c0_192 = arith.constant 0 : index
    %c0_193 = arith.constant 0 : index
    %182 = vector.load %arg4[%c3_191, %c0_192, %c0_193] : memref<9x160x128xf32, #tpu.memory_space<vmem>>, vector<1x160x128xf32>
    %183 = vector.shape_cast %182 : vector<1x160x128xf32> to vector<160x128xf32>
    %cst_194 = arith.constant dense<0.000000e+00> : vector<128x128xf32>
    %184 = tpu.matmul %180, %183, %cst_194 {dimension_numbers = #tpu.dot_dimension_numbers<[1], [0], [0], [1], [0, 0, 1, 1], [], []>} : vector<128x160xf32>, vector<160x128xf32>, vector<128x128xf32> -> vector<128x128xf32>
    %185 = arith.addf %181, %184 : vector<128x128xf32>
    %c0_195 = arith.constant 0 : index
    %c0_196 = arith.constant 0 : index
    %186 = vector.load %arg9[%c0_195, %c0_196] : memref<128x128xf32, #tpu.memory_space<vmem>>, vector<128x128xf32>
    tpu.vector_store %arg9[%c0_195, %c0_196], %185 {strides = array<i32>} : memref<128x128xf32, #tpu.memory_space<vmem>>, vector<128x128xf32>,
    %c0_197 = arith.constant 0 : index
    %c1_198 = arith.constant 1 : index
    %c1_199 = arith.constant 1 : index
    %c0_200 = arith.constant 0 : index
    %187 = vector.load %arg8[%c0_197, %c1_198, %c1_199, %c0_200] : memref<2x10x10x160xf32, #tpu.memory_space<vmem>>, vector<2x8x8x160xf32>
    %188 = vector.shape_cast %187 : vector<2x8x8x160xf32> to vector<128x160xf32>
    %c0_201 = arith.constant 0 : index
    %c0_202 = arith.constant 0 : index
    %189 = vector.load %arg9[%c0_201, %c0_202] : memref<128x128xf32, #tpu.memory_space<vmem>>, vector<128x128xf32>
    %c4_203 = arith.constant 4 : index
    %c0_204 = arith.constant 0 : index
    %c0_205 = arith.constant 0 : index
    %190 = vector.load %arg4[%c4_203, %c0_204, %c0_205] : memref<9x160x128xf32, #tpu.memory_space<vmem>>, vector<1x160x128xf32>
    %191 = vector.shape_cast %190 : vector<1x160x128xf32> to vector<160x128xf32>
    %cst_206 = arith.constant dense<0.000000e+00> : vector<128x128xf32>
    %192 = tpu.matmul %188, %191, %cst_206 {dimension_numbers = #tpu.dot_dimension_numbers<[1], [0], [0], [1], [0, 0, 1, 1], [], []>} : vector<128x160xf32>, vector<160x128xf32>, vector<128x128xf32> -> vector<128x128xf32>
    %193 = arith.addf %189, %192 : vector<128x128xf32>
    %c0_207 = arith.constant 0 : index
    %c0_208 = arith.constant 0 : index
    %194 = vector.load %arg9[%c0_207, %c0_208] : memref<128x128xf32, #tpu.memory_space<vmem>>, vector<128x128xf32>
    tpu.vector_store %arg9[%c0_207, %c0_208], %193 {strides = array<i32>} : memref<128x128xf32, #tpu.memory_space<vmem>>, vector<128x128xf32>,
    %c0_209 = arith.constant 0 : index
    %c1_210 = arith.constant 1 : index
    %c2_211 = arith.constant 2 : index
    %c0_212 = arith.constant 0 : index
    %195 = vector.load %arg8[%c0_209, %c1_210, %c2_211, %c0_212] : memref<2x10x10x160xf32, #tpu.memory_space<vmem>>, vector<2x8x8x160xf32>
    %196 = vector.shape_cast %195 : vector<2x8x8x160xf32> to vector<128x160xf32>
    %c0_213 = arith.constant 0 : index
    %c0_214 = arith.constant 0 : index
    %197 = vector.load %arg9[%c0_213, %c0_214] : memref<128x128xf32, #tpu.memory_space<vmem>>, vector<128x128xf32>
    %c5_215 = arith.constant 5 : index
    %c0_216 = arith.constant 0 : index
    %c0_217 = arith.constant 0 : index
    %198 = vector.load %arg4[%c5_215, %c0_216, %c0_217] : memref<9x160x128xf32, #tpu.memory_space<vmem>>, vector<1x160x128xf32>
    %199 = vector.shape_cast %198 : vector<1x160x128xf32> to vector<160x128xf32>
    %cst_218 = arith.constant dense<0.000000e+00> : vector<128x128xf32>
    %200 = tpu.matmul %196, %199, %cst_218 {dimension_numbers = #tpu.dot_dimension_numbers<[1], [0], [0], [1], [0, 0, 1, 1], [], []>} : vector<128x160xf32>, vector<160x128xf32>, vector<128x128xf32> -> vector<128x128xf32>
    %201 = arith.addf %197, %200 : vector<128x128xf32>
    %c0_219 = arith.constant 0 : index
    %c0_220 = arith.constant 0 : index
    %202 = vector.load %arg9[%c0_219, %c0_220] : memref<128x128xf32, #tpu.memory_space<vmem>>, vector<128x128xf32>
    tpu.vector_store %arg9[%c0_219, %c0_220], %201 {strides = array<i32>} : memref<128x128xf32, #tpu.memory_space<vmem>>, vector<128x128xf32>,
    %c0_221 = arith.constant 0 : index
    %c2_222 = arith.constant 2 : index
    %c0_223 = arith.constant 0 : index
    %c0_224 = arith.constant 0 : index
    %203 = vector.load %arg8[%c0_221, %c2_222, %c0_223, %c0_224] : memref<2x10x10x160xf32, #tpu.memory_space<vmem>>, vector<2x8x8x160xf32>
    %204 = vector.shape_cast %203 : vector<2x8x8x160xf32> to vector<128x160xf32>
    %c0_225 = arith.constant 0 : index
    %c0_226 = arith.constant 0 : index
    %205 = vector.load %arg9[%c0_225, %c0_226] : memref<128x128xf32, #tpu.memory_space<vmem>>, vector<128x128xf32>
    %c6_227 = arith.constant 6 : index
    %c0_228 = arith.constant 0 : index
    %c0_229 = arith.constant 0 : index
    %206 = vector.load %arg4[%c6_227, %c0_228, %c0_229] : memref<9x160x128xf32, #tpu.memory_space<vmem>>, vector<1x160x128xf32>
    %207 = vector.shape_cast %206 : vector<1x160x128xf32> to vector<160x128xf32>
    %cst_230 = arith.constant dense<0.000000e+00> : vector<128x128xf32>
    %208 = tpu.matmul %204, %207, %cst_230 {dimension_numbers = #tpu.dot_dimension_numbers<[1], [0], [0], [1], [0, 0, 1, 1], [], []>} : vector<128x160xf32>, vector<160x128xf32>, vector<128x128xf32> -> vector<128x128xf32>
    %209 = arith.addf %205, %208 : vector<128x128xf32>
    %c0_231 = arith.constant 0 : index
    %c0_232 = arith.constant 0 : index
    %210 = vector.load %arg9[%c0_231, %c0_232] : memref<128x128xf32, #tpu.memory_space<vmem>>, vector<128x128xf32>
    tpu.vector_store %arg9[%c0_231, %c0_232], %209 {strides = array<i32>} : memref<128x128xf32, #tpu.memory_space<vmem>>, vector<128x128xf32>,
    %c0_233 = arith.constant 0 : index
    %c2_234 = arith.constant 2 : index
    %c1_235 = arith.constant 1 : index
    %c0_236 = arith.constant 0 : index
    %211 = vector.load %arg8[%c0_233, %c2_234, %c1_235, %c0_236] : memref<2x10x10x160xf32, #tpu.memory_space<vmem>>, vector<2x8x8x160xf32>
    %212 = vector.shape_cast %211 : vector<2x8x8x160xf32> to vector<128x160xf32>
    %c0_237 = arith.constant 0 : index
    %c0_238 = arith.constant 0 : index
    %213 = vector.load %arg9[%c0_237, %c0_238] : memref<128x128xf32, #tpu.memory_space<vmem>>, vector<128x128xf32>
    %c7_239 = arith.constant 7 : index
    %c0_240 = arith.constant 0 : index
    %c0_241 = arith.constant 0 : index
    %214 = vector.load %arg4[%c7_239, %c0_240, %c0_241] : memref<9x160x128xf32, #tpu.memory_space<vmem>>, vector<1x160x128xf32>
    %215 = vector.shape_cast %214 : vector<1x160x128xf32> to vector<160x128xf32>
    %cst_242 = arith.constant dense<0.000000e+00> : vector<128x128xf32>
    %216 = tpu.matmul %212, %215, %cst_242 {dimension_numbers = #tpu.dot_dimension_numbers<[1], [0], [0], [1], [0, 0, 1, 1], [], []>} : vector<128x160xf32>, vector<160x128xf32>, vector<128x128xf32> -> vector<128x128xf32>
    %217 = arith.addf %213, %216 : vector<128x128xf32>
    %c0_243 = arith.constant 0 : index
    %c0_244 = arith.constant 0 : index
    %218 = vector.load %arg9[%c0_243, %c0_244] : memref<128x128xf32, #tpu.memory_space<vmem>>, vector<128x128xf32>
    tpu.vector_store %arg9[%c0_243, %c0_244], %217 {strides = array<i32>} : memref<128x128xf32, #tpu.memory_space<vmem>>, vector<128x128xf32>,
    %c0_245 = arith.constant 0 : index
    %c2_246 = arith.constant 2 : index
    %c2_247 = arith.constant 2 : index
    %c0_248 = arith.constant 0 : index
    %219 = vector.load %arg8[%c0_245, %c2_246, %c2_247, %c0_248] : memref<2x10x10x160xf32, #tpu.memory_space<vmem>>, vector<2x8x8x160xf32>
    %220 = vector.shape_cast %219 : vector<2x8x8x160xf32> to vector<128x160xf32>
    %c0_249 = arith.constant 0 : index
    %c0_250 = arith.constant 0 : index
    %221 = vector.load %arg9[%c0_249, %c0_250] : memref<128x128xf32, #tpu.memory_space<vmem>>, vector<128x128xf32>
    %c8_251 = arith.constant 8 : index
    %c0_252 = arith.constant 0 : index
    %c0_253 = arith.constant 0 : index
    %222 = vector.load %arg4[%c8_251, %c0_252, %c0_253] : memref<9x160x128xf32, #tpu.memory_space<vmem>>, vector<1x160x128xf32>
    %223 = vector.shape_cast %222 : vector<1x160x128xf32> to vector<160x128xf32>
    %cst_254 = arith.constant dense<0.000000e+00> : vector<128x128xf32>
    %224 = tpu.matmul %220, %223, %cst_254 {dimension_numbers = #tpu.dot_dimension_numbers<[1], [0], [0], [1], [0, 0, 1, 1], [], []>} : vector<128x160xf32>, vector<160x128xf32>, vector<128x128xf32> -> vector<128x128xf32>
    %225 = arith.addf %221, %224 : vector<128x128xf32>
    %c0_255 = arith.constant 0 : index
    %c0_256 = arith.constant 0 : index
    %226 = vector.load %arg9[%c0_255, %c0_256] : memref<128x128xf32, #tpu.memory_space<vmem>>, vector<128x128xf32>
    tpu.vector_store %arg9[%c0_255, %c0_256], %225 {strides = array<i32>} : memref<128x128xf32, #tpu.memory_space<vmem>>, vector<128x128xf32>,
    %c0_257 = arith.constant 0 : index
    %c0_258 = arith.constant 0 : index
    %227 = vector.load %arg9[%c0_257, %c0_258] : memref<128x128xf32, #tpu.memory_space<vmem>>, vector<128x128xf32>
    %cst_259 = arith.constant dense<0.000000e+00> : vector<128xf32>
    %228 = vector.multi_reduction <add>, %227, %cst_259 [0] : vector<128x128xf32> to vector<128xf32>
    %229 = vector.shape_cast %228 : vector<128xf32> to vector<1x128xf32>
    %230 = arith.mulf %227, %227 : vector<128x128xf32>
    %cst_260 = arith.constant dense<0.000000e+00> : vector<128xf32>
    %231 = vector.multi_reduction <add>, %230, %cst_260 [0] : vector<128x128xf32> to vector<128xf32>
    %232 = vector.shape_cast %231 : vector<128xf32> to vector<1x128xf32>
    %cst_261 = arith.constant 0.000000e+00 : f32
    %233 = vector.broadcast %cst_261 : f32 to vector<1x16xf32>
    %cst_262 = arith.constant 0.000000e+00 : f32
    %234 = vector.broadcast %cst_262 : f32 to vector<1x16xf32>
    %235 = vector.extract_strided_slice %229 {offsets = [0, 0], sizes = [1, 16], strides = [1, 1]} : vector<1x128xf32> to vector<1x16xf32>
    %236 = arith.addf %233, %235 : vector<1x16xf32>
    %237 = vector.extract_strided_slice %232 {offsets = [0, 0], sizes = [1, 16], strides = [1, 1]} : vector<1x128xf32> to vector<1x16xf32>
    %238 = arith.addf %234, %237 : vector<1x16xf32>
    %239 = vector.extract_strided_slice %229 {offsets = [0, 16], sizes = [1, 16], strides = [1, 1]} : vector<1x128xf32> to vector<1x16xf32>
    %240 = arith.addf %236, %239 : vector<1x16xf32>
    %241 = vector.extract_strided_slice %232 {offsets = [0, 16], sizes = [1, 16], strides = [1, 1]} : vector<1x128xf32> to vector<1x16xf32>
    %242 = arith.addf %238, %241 : vector<1x16xf32>
    %243 = vector.extract_strided_slice %229 {offsets = [0, 32], sizes = [1, 16], strides = [1, 1]} : vector<1x128xf32> to vector<1x16xf32>
    %244 = arith.addf %240, %243 : vector<1x16xf32>
    %245 = vector.extract_strided_slice %232 {offsets = [0, 32], sizes = [1, 16], strides = [1, 1]} : vector<1x128xf32> to vector<1x16xf32>
    %246 = arith.addf %242, %245 : vector<1x16xf32>
    %247 = vector.extract_strided_slice %229 {offsets = [0, 48], sizes = [1, 16], strides = [1, 1]} : vector<1x128xf32> to vector<1x16xf32>
    %248 = arith.addf %244, %247 : vector<1x16xf32>
    %249 = vector.extract_strided_slice %232 {offsets = [0, 48], sizes = [1, 16], strides = [1, 1]} : vector<1x128xf32> to vector<1x16xf32>
    %250 = arith.addf %246, %249 : vector<1x16xf32>
    %251 = vector.extract_strided_slice %229 {offsets = [0, 64], sizes = [1, 16], strides = [1, 1]} : vector<1x128xf32> to vector<1x16xf32>
    %252 = arith.addf %248, %251 : vector<1x16xf32>
    %253 = vector.extract_strided_slice %232 {offsets = [0, 64], sizes = [1, 16], strides = [1, 1]} : vector<1x128xf32> to vector<1x16xf32>
    %254 = arith.addf %250, %253 : vector<1x16xf32>
    %255 = vector.extract_strided_slice %229 {offsets = [0, 80], sizes = [1, 16], strides = [1, 1]} : vector<1x128xf32> to vector<1x16xf32>
    %256 = arith.addf %252, %255 : vector<1x16xf32>
    %257 = vector.extract_strided_slice %232 {offsets = [0, 80], sizes = [1, 16], strides = [1, 1]} : vector<1x128xf32> to vector<1x16xf32>
    %258 = arith.addf %254, %257 : vector<1x16xf32>
    %259 = vector.extract_strided_slice %229 {offsets = [0, 96], sizes = [1, 16], strides = [1, 1]} : vector<1x128xf32> to vector<1x16xf32>
    %260 = arith.addf %256, %259 : vector<1x16xf32>
    %261 = vector.extract_strided_slice %232 {offsets = [0, 96], sizes = [1, 16], strides = [1, 1]} : vector<1x128xf32> to vector<1x16xf32>
    %262 = arith.addf %258, %261 : vector<1x16xf32>
    %263 = vector.extract_strided_slice %229 {offsets = [0, 112], sizes = [1, 16], strides = [1, 1]} : vector<1x128xf32> to vector<1x16xf32>
    %264 = arith.addf %260, %263 : vector<1x16xf32>
    %265 = vector.extract_strided_slice %232 {offsets = [0, 112], sizes = [1, 16], strides = [1, 1]} : vector<1x128xf32> to vector<1x16xf32>
    %266 = arith.addf %262, %265 : vector<1x16xf32>
    %cst_263 = arith.constant 9.765625E-4 : f32
    %267 = vector.broadcast %cst_263 : f32 to vector<1x16xf32>
    %268 = arith.mulf %264, %267 : vector<1x16xf32>
    %cst_264 = arith.constant 9.765625E-4 : f32
    %269 = vector.broadcast %cst_264 : f32 to vector<1x16xf32>
    %270 = arith.mulf %266, %269 : vector<1x16xf32>
    %271 = arith.mulf %268, %268 : vector<1x16xf32>
    %272 = arith.subf %270, %271 : vector<1x16xf32>
    %c0_265 = arith.constant 0 : index
    %c0_266 = arith.constant 0 : index
    %273 = vector.load %arg5[%c0_265, %c0_266] : memref<1x16xf32, #tpu.memory_space<vmem>>, vector<1x16xf32>
    %cst_267 = arith.constant 9.99999974E-6 : f32
    %274 = vector.broadcast %cst_267 : f32 to vector<1x16xf32>
    %275 = arith.addf %272, %274 : vector<1x16xf32>
    %276 = math.rsqrt %275 : vector<1x16xf32>
    %277 = arith.mulf %273, %276 : vector<1x16xf32>
    %c0_268 = arith.constant 0 : index
    %c0_269 = arith.constant 0 : index
    %278 = vector.load %arg6[%c0_268, %c0_269] : memref<1x16xf32, #tpu.memory_space<vmem>>, vector<1x16xf32>
    %279 = arith.mulf %268, %277 : vector<1x16xf32>
    %280 = arith.subf %278, %279 : vector<1x16xf32>
    %281 = tpu.concatenate %277, %277, %277, %277, %277, %277, %277, %277 in 1 : vector<1x16xf32>, vector<1x16xf32>, vector<1x16xf32>, vector<1x16xf32>, vector<1x16xf32>, vector<1x16xf32>, vector<1x16xf32>, vector<1x16xf32> -> vector<1x128xf32>
    %282 = tpu.concatenate %280, %280, %280, %280, %280, %280, %280, %280 in 1 : vector<1x16xf32>, vector<1x16xf32>, vector<1x16xf32>, vector<1x16xf32>, vector<1x16xf32>, vector<1x16xf32>, vector<1x16xf32>, vector<1x16xf32> -> vector<1x128xf32>
    %283 = vector.broadcast %281 : vector<1x128xf32> to vector<128x128xf32>
    %284 = arith.mulf %227, %283 : vector<128x128xf32>
    %285 = vector.broadcast %282 : vector<1x128xf32> to vector<128x128xf32>
    %286 = arith.addf %284, %285 : vector<128x128xf32>
    %c0_270 = arith.constant 0 : index
    %c0_271 = arith.constant 0 : index
    %287 = vector.load %arg0[%c0_270, %c0_271] : memref<128x128xf32, #tpu.memory_space<vmem>>, vector<128x128xf32>
    %288 = arith.addf %286, %287 : vector<128x128xf32>
    %cst_272 = arith.constant 0.000000e+00 : f32
    %289 = vector.broadcast %cst_272 : f32 to vector<128x128xf32>
    %290 = arith.maximumf %288, %289 : vector<128x128xf32>
    %c0_273 = arith.constant 0 : index
    %c0_274 = arith.constant 0 : index
    %291 = vector.load %arg7[%c0_273, %c0_274] : memref<128x128xf32, #tpu.memory_space<vmem>>, vector<128x128xf32>
    tpu.vector_store %arg7[%c0_273, %c0_274], %290 {strides = array<i32>} : memref<128x128xf32, #tpu.memory_space<vmem>>, vector<128x128xf32>,
    return
  }
}

</mosaic_0001>

<bundles_post_ra>
// kernel: tpu_custom_call.1
= control target key start
LH: loop header
LB: loop body
LE: loop exit
PB: predicated region body
PF: predicated region fallthrough
CT: control target
= control target key end

     0   :  { %12 = vsyncpa [#allocation5], 0  ;;  %s11513_s0 = inlined_call_operand.hbm [shape: f32[128,128], index: 0, kind: input, shape index: {}]   ;;  %s11514_s1 = inlined_call_operand.hbm [shape: f32[9,160,128], index: 1, kind: input, shape index: {}]   ;;  %s11515_s2 = inlined_call_operand.vmem [shape: f32[1,16], index: 2, kind: input, shape index: {}]   ;;  %s11516_s3 = inlined_call_operand.vmem [shape: f32[1,16], index: 3, kind: input, shape index: {}]   ;;  %s11517_s4 = inlined_call_operand.hbm [shape: f32[9,160,128], index: 4, kind: input, shape index: {}]   ;;  %s11518_s5 = inlined_call_operand.vmem [shape: f32[1,16], index: 5, kind: input, shape index: {}]   ;;  %s11519_s6 = inlined_call_operand.vmem [shape: f32[1,16], index: 6, kind: input, shape index: {}]   ;;  %s11520_s7 = inlined_call_operand.hbm [shape: f32[128,128], index: 7, kind: output, shape index: {}]  }
   0x1   :  { %13 = vsyncpa [#allocation8], 0 }
   0x2   :  { %14 = vsyncpa [#allocation6], 0  ;;  %s32_s26 = sshll.u32 %s11514_s1, 4  ;;  %s9146_s27 = smov [#allocation7]   ;;  %s33_s26 = int_to_ptr.hbm [resolvable:$true] %s32_s26 }
   0x3   :  { %s34_s28 = sshll.u32 %s9146_s27, 4  ;;  %s19_s8 = sshll.u32 %s11513_s0, 4  ;;  %s35_s28 = int_to_ptr.vmem [resolvable:$true] %s34_s28  ;;  %s20_s8 = int_to_ptr.hbm [resolvable:$true] %s19_s8 }
   0x4   :  { %s9147_s9 = smov 128   ;;  %s9148_s10 = smov 8  }
   0x5   :  { %40 = dma.hbm_to_vmem [thread:$0]  %s33_s26, 23040, %s35_s28, [#allocation8], %s9147_s9, %s9147_s9, %s9148_s10  }
   0x6   :  { %s9149_s11 = smov [#allocation4]   ;;  %s49_s1 = sshll.u32 %s11517_s4, 4  ;;  %s50_s1 = int_to_ptr.hbm [resolvable:$true] %s49_s1 }
   0x7   :  { %s21_s12 = sshll.u32 %s9149_s11, 4  ;;  %s9150_s0 = smov [#allocation9]   ;;  %s22_s12 = int_to_ptr.vmem [resolvable:$true] %s21_s12 }
   0x8   :  { %27 = dma.hbm_to_vmem [thread:$0]  %s20_s8, 2048, %s22_s12, [#allocation5], %s9147_s9, %s9147_s9, %s9148_s10  }
   0x9   :  { %s51_s15 = sshll.u32 %s9150_s0, 4  ;;  %s52_s15 = int_to_ptr.vmem [resolvable:$true] %s51_s15 }
   0xa   :  { %57 = dma.hbm_to_vmem [thread:$0]  %s50_s1, 23040, %s52_s15, [#allocation8], %s9147_s9, %s9147_s9, %s9148_s10  }
   0xb   :  { %9140 = dma.done.wait [#allocation5], 2048  }
   0xc   :  { %9141 = vsyncadd [#allocation5], 4294965248 }
   0xd   :  { %9142 = dma.done.wait [#allocation8], 46080  }
   0xe   :  { %9143 = vsyncadd [#allocation8], 4294921216  ;;  %v193_v0 = vld [vmem:[#allocation4] sm:$0xff]  ;;  %v195_v1 = vld [vmem:[#allocation4 + $0x10] sm:$0xff]  ;;  %s9151_s4 = smov 16   ;;  %v9152_v43 = vmov 0.0   ;;  %v94_v59 = vlaneseq }
   0xf   :  { %225 = vrot.lane.b32.xlu0 %v193_v0, %s9151_s4  ;;  %229 = vrot.lane.b32.xlu1 %v195_v1, %s9151_s4  ;;  %v197_v2 = vld [vmem:[#allocation4 + $0x20] sm:$0xff]  ;;  %v547_v3 = vld [vmem:[#allocation7 + $0x78] sm:$0xff]  ;;  %v546_v4 = vld [vmem:[#allocation7 + $0x70] sm:$0xff]  ;;  %74 = vst [vmem:[#allocation2] sm:$0xff] %v9152_v43  ;;  %vm75_vm0 = vcmask 261120   ;;  %vm890_vm1 = vcmask 1046528  }
  0x10   :  { %233 = vrot.lane.b32.xlu2 %v197_v2, %s9151_s4  ;;  %600 = vmatpush.msra.mxu0 %v547_v3  ;;  %v1035_v5 = vld [vmem:[#allocation7 + $0x118] sm:$0xff]  ;;  %v1034_v6 = vld [vmem:[#allocation7 + $0x110] sm:$0xff]  ;;  %v545_v7 = vld [vmem:[#allocation7 + $0x68] sm:$0xff]  ;;  %77 = vst [vmem:[#allocation2 + $0x10] sm:$0x3] %v9152_v43  ;;  %vm78_vm2 = vcmask 254976  }
  0x11   :  { %1072 = vmatpush.msra.mxu2 %v1035_v5  ;;  %v194_v8 = vld [vmem:[#allocation4 + $0x8] sm:$0xff]  ;;  %v196_v9 = vld [vmem:[#allocation4 + $0x18] sm:$0xff]  ;;  %v544_v11 = vld [vmem:[#allocation7 + $0x60] sm:$0xff]  ;;  %80 = vst [vmem:[#allocation2 + $0x140] sm:$0xff] %v9152_v43  ;;  %vm9254_vm3 = vcmp.lt.s32.totalorder %v94_v59, 160  ;;  %vm273_vm4 = vcmask 130048  }
  0x12   :  { %601 = vmatpush.msra.mxu0 %v546_v4  ;;  %v198_v10 = vld [vmem:[#allocation4 + $0x28] sm:$0xff]  ;;  %v543_v13 = vld [vmem:[#allocation7 + $0x58] sm:$0xff]  ;;  %v1032_v14 = vld [vmem:[#allocation7 + $0x100] sm:$0xff]  ;;  %82 = vst [vmem:[#allocation2 + $0x150] sm:$0x3] %v9152_v43  ;;  %vm403_vm5 = vcmask 261121  }
  0x13   :  { %1073 = vmatpush.msra.mxu2 %v1034_v6  ;;  %v1033_v12 = vld [vmem:[#allocation7 + $0x108] sm:$0xff]  ;;  %v542_v15 = vld [vmem:[#allocation7 + $0x50] sm:$0xff]  ;;  %v1031_v16 = vld [vmem:[#allocation7 + $0xf8] sm:$0xff]  ;;  %85 = vst [vmem:[#allocation2 + $0x120] sm:$0xff] %v9152_v43  ;;  %vm406_vm6 = vcmask 253952   ;;  %vm1362_vm7 = vcmask 1045504  }
  0x14   :  { %602 = vmatpush.msra.mxu0 %v545_v7  ;;  %v551_v17 = vld [vmem:[#allocation7 + $0x98] sm:$0xff]  ;;  %v541_v18 = vld [vmem:[#allocation7 + $0x48] sm:$0xff]  ;;  %v550_v19 = vld [vmem:[#allocation7 + $0x90] sm:$0xff]  ;;  %87 = vst [vmem:[#allocation2 + $0x130] sm:$0x3] %v9152_v43  ;;  %s9153_s16 = smov 80  }
  0x15   :  { %1074 = vmatpush.msra.mxu2 %v1033_v12  ;;  %677 = vmatpush.msra.mxu1 %v551_v17  ;;  %v199_v20 = vld [vmem:[#allocation4 + $0x30] sm:$0xff]  ;;  %v201_v21 = vld [vmem:[#allocation4 + $0x40] sm:$0xff]  ;;  %v1039_v22 = vld [vmem:[#allocation7 + $0x138] sm:$0xff]  ;;  %89 = vst [vmem:[#allocation2 + $0x260] sm:$0xff] %v9152_v43  ;;  %s9154_s17 = smov 96   ;;  %s9155_s18 = smov 112  }
  0x16   :  { %603 = vmatpush.msra.mxu0 %v544_v11  ;;  %v202_v23 = vld [vmem:[#allocation4 + $0x48] sm:$0xff]  ;;  %v1030_v24 = vld [vmem:[#allocation7 + $0xf0] sm:$0xff]  ;;  %v540_v25 = vld [vmem:[#allocation7 + $0x40] sm:$0xff]  ;;  %1149 = vmatpush.msra.mxu3 %v1039_v22  ;;  %91 = vst [vmem:[#allocation2 + $0x270] sm:$0x3] %v9152_v43  ;;  %s9156_s19 = smov 32  }
  0x17   :  { %227 = vrot.lane.b32.xlu0 %v194_v8, %s9151_s4  ;;  %231 = vrot.lane.b32.xlu1 %v196_v9, %s9151_s4  ;;  %v1029_v26 = vld [vmem:[#allocation7 + $0xe8] sm:$0xff]  ;;  %v539_v27 = vld [vmem:[#allocation7 + $0x38] sm:$0xff]  ;;  %v1028_v28 = vld [vmem:[#allocation7 + $0xe0] sm:$0xff]  ;;  %76 = vst.msk [vmem:[#allocation2 + $0x8] sm:$0xff] %vm75_vm0, %v9152_v43  ;;  %s9157_s20 = smov 48   ;;  %s9158_s21 = smov 64  }
  0x18   :  { %235 = vrot.lane.b32.xlu2 %v198_v10, %s9151_s4  ;;  %604 = vmatpush.msra.mxu0 %v543_v13  ;;  %v538_v29 = vld [vmem:[#allocation7 + $0x30] sm:$0xff]  ;;  %v1027_v30 = vld [vmem:[#allocation7 + $0xd8] sm:$0xff]  ;;  %v537_v33 = vld [vmem:[#allocation7 + $0x28] sm:$0xff]  ;;  %81 = vst.msk [vmem:[#allocation2 + $0x148] sm:$0xff] %vm75_vm0, %v9152_v43  ;;  %vm4328_vm11 = vcmask 392192   ;;  %vm4330_vm12 = vcmask 523264  }
  0x19   :  { %1075 = vmatpush.msra.mxu2 %v1032_v14  ;;  %678 = vmatpush.msra.mxu1 %v550_v19  ;;  %v203_v31 = vld [vmem:[#allocation4 + $0x50] sm:$0xff]  ;;  %v204_v32 = vld [vmem:[#allocation4 + $0x58] sm:$0xff]  ;;  %v536_v35 = vld [vmem:[#allocation7 + $0x20] sm:$0xff]  ;;  %86 = vst.msk [vmem:[#allocation2 + $0x128] sm:$0xff] %vm75_vm0, %v9152_v43  ;;  %vm4332_vm13 = vcmask 654336   ;;  %vm4334_vm14 = vcmask 785408  }
  0x1a   :  { %605 = vmatpush.msra.mxu0 %v542_v15  ;;  %v1026_v34 = vld [vmem:[#allocation7 + $0xd0] sm:$0xff]  ;;  %v1025_v36 = vld [vmem:[#allocation7 + $0xc8] sm:$0xff]  ;;  %v535_v37 = vld [vmem:[#allocation7 + $0x18] sm:$0xff]  ;;  %90 = vst.msk [vmem:[#allocation2 + $0x268] sm:$0xff] %vm75_vm0, %v9152_v43  ;;  %vm4336_vm15 = vcmask 916480   ;;  %s8670_s30 = sshll.u32 %s11520_s7, 4  ;;  %s8671_s30 = int_to_ptr.hbm [resolvable:$true] %s8670_s30 }
  0x1b   :  { %1076 = vmatpush.msra.mxu2 %v1031_v16  ;;  %v1024_v38 = vld [vmem:[#allocation7 + $0xc0] sm:$0xff]  ;;  %v534_v39 = vld [vmem:[#allocation7 + $0x10] sm:$0xff]  ;;  %v1023_v40 = vld [vmem:[#allocation7 + $0xb8] sm:$0xff]  ;;  %79 = vst.msk [vmem:[#allocation2 + $0x18] sm:$0x3] %vm78_vm2, %v9152_v43 }
  0x1c   :  { %606 = vmatpush.msra.mxu0 %v541_v18  ;;  %v206_v41 = vld [vmem:[#allocation4 + $0x68] sm:$0xff]  ;;  %v207_v42 = vld [vmem:[#allocation4 + $0x70] sm:$0xff]  ;;  %v532_v48 = vld [vmem:[#allocation7] sm:$0xff]  ;;  %83 = vst.msk [vmem:[#allocation2 + $0x158] sm:$0x3] %vm78_vm2, %v9152_v43 }
  0x1d   :  { %1077 = vmatpush.msra.mxu2 %v1030_v24  ;;  %v533_v44 = vld [vmem:[#allocation7 + $0x8] sm:$0xff]  ;;  %v1022_v46 = vld [vmem:[#allocation7 + $0xb0] sm:$0xff]  ;;  %v548_v49 = vld [vmem:[#allocation7 + $0x80] sm:$0xff]  ;;  %88 = vst.msk [vmem:[#allocation2 + $0x138] sm:$0x3] %vm78_vm2, %v9152_v43 }
  0x1e   :  { %607 = vmatpush.msra.mxu0 %v540_v25  ;;  %v549_v45 = vld [vmem:[#allocation7 + $0x88] sm:$0xff]  ;;  %v1038_v47 = vld [vmem:[#allocation7 + $0x130] sm:$0xff]  ;;  %v762_v52 = vld [vmem:[#allocation2] sm:$0xfe]  ;;  %92 = vst.msk [vmem:[#allocation2 + $0x278] sm:$0x3] %vm78_vm2, %v9152_v43 }
  0x1f   :  { %237 = vrot.lane.b32.xlu0 %v199_v20, %s9151_s4  ;;  %241 = vrot.lane.b32.xlu1 %v201_v21, %s9151_s4  ;;  %v1021_v50 = vld [vmem:[#allocation7 + $0xa8] sm:$0xff]  ;;  %v1020_v53 = vld [vmem:[#allocation7 + $0xa0] sm:$0xff]  ;;  %v891_v56 = vrot.slane %v762_v52, 1  ;;  %v764_v57 = vld [vmem:[#allocation2 + $0x10] sm:$0x1] }
  0x20   :  { %243 = vrot.lane.b32.xlu2 %v202_v23, %s9151_s4  ;;  %1078 = vmatpush.msra.mxu2 %v1029_v26  ;;  %v1037_v51 = vld [vmem:[#allocation7 + $0x128] sm:$0xff]  ;;  %v1036_v54 = vld [vmem:[#allocation7 + $0x120] sm:$0xff]  ;;  %v1511_v58 = vld [vmem:[#allocation7 + $0x1d8] sm:$0xff]  ;;  %v892_v60 = vrot.slane %v764_v57, 1 }
  0x21   :  { %608 = vmatpush.msra.mxu0 %v539_v27  ;;  %679 = vmatpush.msra.mxu1 %v549_v45  ;;  %v205_v55 = vld [vmem:[#allocation4 + $0x60] sm:$0xff]  ;;  %v485_v63 = vld [vmem:[#allocation2 + $0x8] sm:$0xff]  ;;  %98 = vst.msk [vmem:[#allocation2 + $0x20] ss:$8 sm:$0x3] %vm9254_vm3, %v9152_v43  ;;  %v1507_v5 = vld [vmem:[#allocation7 + $0x1b8] sm:$0xff] }
  0x22   :  { %1079 = vmatpush.msra.mxu2 %v1028_v28  ;;  %1150 = vmatpush.msra.mxu3 %v1038_v47  ;;  %v893_v61 = vsel %vm890_vm1, %v891_v56, %v892_v60  ;;  %v763_v0 = vld [vmem:[#allocation2 + $0x8] sm:$0xfe]  ;;  %101 = vst.msk [vmem:[#allocation2 + $0x40] ss:$8 sm:$0x3] %vm9254_vm3, %v9152_v43  ;;  %v1506_v7 = vld [vmem:[#allocation7 + $0x1b0] sm:$0xff] }
  0x23   :  { %609 = vmatpush.msra.mxu0 %v538_v29  ;;  %680 = vmatpush.msra.mxu1 %v548_v49  ;;  %v894_v1 = vrot.slane %v763_v0, 1  ;;  %104 = vst.msk [vmem:[#allocation2 + $0x60] ss:$8 sm:$0x3] %vm9254_vm3, %v9152_v43  ;;  %v765_v2 = vld [vmem:[#allocation2 + $0x18] sm:$0x1] }
  0x24   :  { %1080 = vmatpush.msra.mxu2 %v1027_v30  ;;  %1151 = vmatpush.msra.mxu3 %v1037_v51  ;;  %107 = vst.msk [vmem:[#allocation2 + $0x80] ss:$8 sm:$0x3] %vm9254_vm3, %v9152_v43  ;;  %v895_v3 = vrot.slane %v765_v2, 1  ;;  %v1505_v14 = vld [vmem:[#allocation7 + $0x1a8] sm:$0xff]  ;;  %v1503_v57 = vld [vmem:[#allocation7 + $0x198] sm:$0xff] }
  0x25   :  { %610 = vmatpush.msra.mxu0 %v537_v33  ;;  %8715 = vmatmul.msk.f32.vlgmr.msra.gmra.mxu1 %vm75_vm0, %v485_v63  ;;  %110 = vst.msk [vmem:[#allocation2 + $0xa0] ss:$8 sm:$0x3] %vm9254_vm3, %v9152_v43 }
  0x26   :  { %1081 = vmatpush.msra.mxu2 %v1026_v34  ;;  %1152 = vmatpush.msra.mxu3 %v1036_v54  ;;  %113 = vst.msk [vmem:[#allocation2 + $0xc0] ss:$8 sm:$0x3] %vm9254_vm3, %v9152_v43  ;;  %v896_v4 = vsel %vm890_vm1, %v894_v1, %v895_v3  ;;  %v1504_v34 = vld [vmem:[#allocation7 + $0x1a0] sm:$0xff] }
  0x27   :  { %245 = vrot.lane.b32.xlu0 %v203_v31, %s9151_s4  ;;  %247 = vrot.lane.b32.xlu1 %v204_v32, %s9151_s4  ;;  %116 = vst.msk [vmem:[#allocation2 + $0xe0] ss:$8 sm:$0x3] %vm9254_vm3, %v9152_v43  ;;  %v1510_v32 = vld [vmem:[#allocation7 + $0x1d0] sm:$0xff] }
  0x28   :  { %611 = vmatpush.msra.mxu0 %v536_v35  ;;  %1082 = vmatpush.msra.mxu2 %v1025_v36  ;;  %119 = vst.msk [vmem:[#allocation2 + $0x100] ss:$8 sm:$0x3] %vm9254_vm3, %v9152_v43 }
  0x29   :  { %249 = vrot.lane.b32.xlu2 %v205_v55, %s9151_s4  ;;  %1621 = vmatpush.msrb.mxu3 %v1511_v58  ;;  %122 = vst.msk [vmem:[#allocation2 + $0x160] ss:$8 sm:$0x3] %vm9254_vm3, %v9152_v43 }
  0x2a   :  { %612 = vmatpush.msra.mxu0 %v535_v37  ;;  %1083 = vmatpush.msra.mxu2 %v1024_v38  ;;  %125 = vst.msk [vmem:[#allocation2 + $0x180] ss:$8 sm:$0x3] %vm9254_vm3, %v9152_v43 }
  0x2b   :  { %8731 = vmatmul.msk.f32.vlgmr.msra.gmra.mxu3 %vm75_vm0, %v896_v4  ;;  %128 = vst.msk [vmem:[#allocation2 + $0x1a0] ss:$8 sm:$0x3] %vm9254_vm3, %v9152_v43  ;;  %1544 = vmatpush.msrb.mxu1 %v1507_v5 }
  0x2c   :  { %613 = vmatpush.msra.mxu0 %v534_v39  ;;  %1084 = vmatpush.msra.mxu2 %v1023_v40  ;;  %131 = vst.msk [vmem:[#allocation2 + $0x1c0] ss:$8 sm:$0x3] %vm9254_vm3, %v9152_v43 }
  0x2d   :  { %134 = vst.msk [vmem:[#allocation2 + $0x1e0] ss:$8 sm:$0x3] %vm9254_vm3, %v9152_v43  ;;  %1545 = vmatpush.msrb.mxu1 %v1506_v7  ;;  %1622 = vmatpush.msrb.mxu3 %v1510_v32 }
  0x2e   :  { %614 = vmatpush.msra.mxu0 %v533_v44  ;;  %1085 = vmatpush.msra.mxu2 %v1022_v46  ;;  %137 = vst.msk [vmem:[#allocation2 + $0x200] ss:$8 sm:$0x3] %vm9254_vm3, %v9152_v43 }
  0x2f   :  { %251 = vrot.lane.b32.xlu0 %v206_v41, %s9151_s4  ;;  %253 = vrot.lane.b32.xlu1 %v207_v42, %s9151_s4  ;;  %140 = vst.msk [vmem:[#allocation2 + $0x220] ss:$8 sm:$0x3] %vm9254_vm3, %v9152_v43 }
  0x30   :  { %615 = vmatpush.msra.mxu0 %v532_v48  ;;  %1086 = vmatpush.msra.mxu2 %v1021_v50  ;;  %143 = vst.msk [vmem:[#allocation2 + $0x240] ss:$8 sm:$0x3] %vm9254_vm3, %v9152_v43 }
  0x31   :  { %616 = vmatmul.f32.vlgmr.msra.gmra.mxu0 %v9152_v43  ;;  %146 = vst.msk [vmem:[#allocation2 + $0x31] ss:$8 sm:$0x3] %vm9254_vm3, %v9152_v43  ;;  %1546 = vmatpush.msrb.mxu1 %v1505_v14 }
  0x32   :  { %1087 = vmatpush.msra.mxu2 %v1020_v53  ;;  %149 = vst.msk [vmem:[#allocation2 + $0x51] ss:$8 sm:$0x3] %vm9254_vm3, %v9152_v43 }
  0x33   :  { %1088 = vmatmul.f32.vlgmr.msra.gmra.mxu2 %v893_v61  ;;  %152 = vst.msk [vmem:[#allocation2 + $0x71] ss:$8 sm:$0x3] %vm9254_vm3, %v9152_v43  ;;  %1547 = vmatpush.msrb.mxu1 %v1504_v34 }
  0x34   :  { %155 = vst.msk [vmem:[#allocation2 + $0x91] ss:$8 sm:$0x3] %vm9254_vm3, %v9152_v43 }
  0x35   :  { %158 = vst.msk [vmem:[#allocation2 + $0xb1] ss:$8 sm:$0x3] %vm9254_vm3, %v9152_v43  ;;  %1548 = vmatpush.msrb.mxu1 %v1503_v57 }
  0x36   :  { %161 = vst.msk [vmem:[#allocation2 + $0xd1] ss:$8 sm:$0x3] %vm9254_vm3, %v9152_v43 }
  0x37   :  { %164 = vst.msk [vmem:[#allocation2 + $0xf1] ss:$8 sm:$0x3] %vm9254_vm3, %v9152_v43 }
  0x38   :  { %167 = vst.msk [vmem:[#allocation2 + $0x111] ss:$8 sm:$0x3] %vm9254_vm3, %v9152_v43 }
  0x39   :  { %170 = vst.msk [vmem:[#allocation2 + $0x171] ss:$8 sm:$0x3] %vm9254_vm3, %v9152_v43 }
  0x3a   :  { %173 = vst.msk [vmem:[#allocation2 + $0x191] ss:$8 sm:$0x3] %vm9254_vm3, %v9152_v43 }
  0x3b   :  { %176 = vst.msk [vmem:[#allocation2 + $0x1b1] ss:$8 sm:$0x3] %vm9254_vm3, %v9152_v43 }
  0x3c   :  { %179 = vst.msk [vmem:[#allocation2 + $0x1d1] ss:$8 sm:$0x3] %vm9254_vm3, %v9152_v43 }
  0x3d   :  { %182 = vst.msk [vmem:[#allocation2 + $0x1f1] ss:$8 sm:$0x3] %vm9254_vm3, %v9152_v43 }
  0x3e   :  { %185 = vst.msk [vmem:[#allocation2 + $0x211] ss:$8 sm:$0x3] %vm9254_vm3, %v9152_v43 }
  0x3f   :  { %188 = vst.msk [vmem:[#allocation2 + $0x231] ss:$8 sm:$0x3] %vm9254_vm3, %v9152_v43 }
  0x40   :  { %191 = vst.msk [vmem:[#allocation2 + $0x251] ss:$8 sm:$0x3] %vm9254_vm3, %v9152_v43 }
  0x6a   :  { %v234_v26 = vpop.permute.xlu2 %233 }
  0x6b   :  { %v278_v56 = vsel %vm273_vm4, 0.0, %v234_v26  ;;  %v294_v58 = vsel %vm273_vm4, %v234_v26, 0.0 }
  0x6c   :  { %v346_v63 = vrot.slane %v278_v56, 7  ;;  %v347_v0 = vrot.slane %v294_v58, 7 }
  0x6e   :  { %420 = vst [vmem:[#allocation2 + $0xa0] sm:$0xfe] %v346_v63 }
  0x6f   :  { %421 = vst.msk [vmem:[#allocation2 + $0xa8] sm:$0xfe] %vm403_vm5, %v347_v0 }
  0x70   :  { %422 = vst [vmem:[#allocation2 + $0xb0] sm:$0x1] %v346_v63 }
  0x71   :  { %423 = vst.msk [vmem:[#allocation2 + $0xb8] sm:$0x1] %vm406_vm6, %v347_v0 }
  0x72   :  { %v236_v52 = vpop.permute.xlu2 %235 }
  0x73   :  { %v279_v60 = vsel %vm273_vm4, 0.0, %v236_v52  ;;  %v295_v61 = vsel %vm273_vm4, %v236_v52, 0.0  ;;  %v1509_v52 = vld [vmem:[#allocation7 + $0x1c8] sm:$0xff] }
  0x74   :  { %v348_v1 = vrot.slane %v279_v60, 7  ;;  %v349_v2 = vrot.slane %v295_v61, 7  ;;  %1623 = vmatpush.msrb.mxu3 %v1509_v52 }
  0x76   :  { %424 = vst [vmem:[#allocation2 + $0xc0] sm:$0xfe] %v348_v1 }
  0x77   :  { %425 = vst.msk [vmem:[#allocation2 + $0xc8] sm:$0xfe] %vm403_vm5, %v349_v2 }
  0x78   :  { %426 = vst [vmem:[#allocation2 + $0xd0] sm:$0x1] %v348_v1  ;;  %v1500_v1 = vld [vmem:[#allocation7 + $0x180] sm:$0xff] }
  0x79   :  { %427 = vst.msk [vmem:[#allocation2 + $0xd8] sm:$0x1] %vm406_vm6, %v349_v2 }
  0x7d   :  { %v786_v60 = vld [vmem:[#allocation2 + $0xc0] sm:$0xfe] }
  0x7e   :  { %v9445_v2 = vld [vmem:[#allocation2 + $0xc0] sm:$0xff] }
  0x7f   :  { %v788_v61 = vld [vmem:[#allocation2 + $0xd0] sm:$0x1] }
  0x80   :  { %v789_v63 = vld [vmem:[#allocation2 + $0xd8] sm:$0x1] }
  0x81   :  { %v226_v6 = vpop.permute.xlu0 %225  ;;  %v230_v12 = vpop.permute.xlu1 %229 }
  0x82   :  { %v274_v8 = vsel %vm273_vm4, 0.0, %v226_v6  ;;  %v290_v9 = vsel %vm273_vm4, %v226_v6, 0.0  ;;  %v276_v30 = vsel %vm273_vm4, 0.0, %v230_v12  ;;  %v292_v31 = vsel %vm273_vm4, %v230_v12, 0.0  ;;  %v1502_v12 = vld [vmem:[#allocation7 + $0x190] sm:$0xff] }
  0x83   :  { %v338_v10 = vrot.slane %v274_v8, 7  ;;  %v339_v11 = vrot.slane %v290_v9, 7  ;;  %v342_v37 = vrot.slane %v276_v30, 7  ;;  %v343_v38 = vrot.slane %v292_v31, 7  ;;  %1549 = vmatpush.msrb.mxu1 %v1502_v12 }
  0x85   :  { %402 = vst [vmem:[#allocation2 + $0x20] sm:$0xfe] %v338_v10 }
  0x86   :  { %404 = vst.msk [vmem:[#allocation2 + $0x28] sm:$0xfe] %vm403_vm5, %v339_v11 }
  0x87   :  { %405 = vst [vmem:[#allocation2 + $0x30] sm:$0x1] %v338_v10 }
  0x88   :  { %407 = vst.msk [vmem:[#allocation2 + $0x38] sm:$0x1] %vm406_vm6, %v339_v11 }
  0x89   :  { %v228_v13 = vpop.permute.xlu0 %227  ;;  %v232_v36 = vpop.permute.xlu1 %231  ;;  %412 = vst [vmem:[#allocation2 + $0x60] sm:$0xfe] %v342_v37 }
  0x8a   :  { %v275_v15 = vsel %vm273_vm4, 0.0, %v228_v13  ;;  %v291_v16 = vsel %vm273_vm4, %v228_v13, 0.0  ;;  %v277_v44 = vsel %vm273_vm4, 0.0, %v232_v36  ;;  %v293_v46 = vsel %vm273_vm4, %v232_v36, 0.0  ;;  %413 = vst.msk [vmem:[#allocation2 + $0x68] sm:$0xfe] %vm403_vm5, %v343_v38 }
  0x8b   :  { %v340_v17 = vrot.slane %v275_v15, 7  ;;  %v341_v18 = vrot.slane %v291_v16, 7  ;;  %v344_v51 = vrot.slane %v277_v44, 7  ;;  %v345_v55 = vrot.slane %v293_v46, 7  ;;  %414 = vst [vmem:[#allocation2 + $0x70] sm:$0x1] %v342_v37 }
  0x8c   :  { %v9343_v19 = vld [vmem:[#allocation2 + $0x20] sm:$0xff]  ;;  %415 = vst.msk [vmem:[#allocation2 + $0x78] sm:$0x1] %vm406_vm6, %v343_v38  ;;  %v200_v15 = vld [vmem:[#allocation4 + $0x38] sm:$0xff] }
  0x8d   :  { %v766_v20 = vld [vmem:[#allocation2 + $0x20] sm:$0xfe]  ;;  %408 = vst [vmem:[#allocation2 + $0x40] sm:$0xfe] %v340_v17  ;;  %619 = vmatmul.f32.gmra.mxu0 %v9343_v19  ;;  %v9349_v21 = vld [vmem:[#allocation2 + $0x28] sm:$0xff]  ;;  %239 = vrot.lane.b32.xlu0 %v200_v15, %s9151_s4 }
  0x8e   :  { %v897_v22 = vrot.slane %v766_v20, 1  ;;  %v767_v23 = vld [vmem:[#allocation2 + $0x28] sm:$0xfe]  ;;  %409 = vst.msk [vmem:[#allocation2 + $0x48] sm:$0xfe] %vm403_vm5, %v341_v18  ;;  %8716 = vmatmul.msk.f32.gmra.mxu1 %vm75_vm0, %v9349_v21 }
  0x8f   :  { %v768_v24 = vld [vmem:[#allocation2 + $0x30] sm:$0x1]  ;;  %v900_v25 = vrot.slane %v767_v23, 1  ;;  %410 = vst [vmem:[#allocation2 + $0x50] sm:$0x1] %v340_v17 }
  0x90   :  { %v898_v27 = vrot.slane %v768_v24, 1  ;;  %v769_v28 = vld [vmem:[#allocation2 + $0x38] sm:$0x1]  ;;  %411 = vst.msk [vmem:[#allocation2 + $0x58] sm:$0x1] %vm406_vm6, %v341_v18  ;;  %v9402_v4 = vld [vmem:[#allocation2 + $0x60] sm:$0xff] }
  0x91   :  { %v901_v29 = vrot.slane %v769_v28, 1  ;;  %v238_v62 = vpop.permute.xlu0 %237  ;;  %416 = vst [vmem:[#allocation2 + $0x80] sm:$0xfe] %v344_v51  ;;  %v774_v5 = vld [vmem:[#allocation2 + $0x60] sm:$0xfe]  ;;  %v9406_v7 = vld [vmem:[#allocation2 + $0x68] sm:$0xff]  ;;  %v242_v31 = vpop.permute.xlu1 %241 }
  0x92   :  { %v899_v33 = vsel %vm890_vm1, %v897_v22, %v898_v27  ;;  %417 = vst.msk [vmem:[#allocation2 + $0x88] sm:$0xfe] %vm403_vm5, %v345_v55  ;;  %v280_v3 = vsel %vm273_vm4, 0.0, %v238_v62  ;;  %v296_v6 = vsel %vm273_vm4, %v238_v62, 0.0  ;;  %v909_v8 = vrot.slane %v774_v5, 1  ;;  %v9448_v5 = vld [vmem:[#allocation2 + $0xc8] sm:$0xff] }
  0x93   :  { %1091 = vmatmul.f32.gmra.mxu2 %v899_v33  ;;  %v902_v35 = vsel %vm890_vm1, %v900_v25, %v901_v29  ;;  %418 = vst [vmem:[#allocation2 + $0x90] sm:$0x1] %v344_v51  ;;  %v775_v9 = vld [vmem:[#allocation2 + $0x68] sm:$0xfe]  ;;  %v776_v10 = vld [vmem:[#allocation2 + $0x70] sm:$0x1] }
  0x94   :  { %8732 = vmatmul.msk.f32.gmra.mxu3 %vm75_vm0, %v902_v35  ;;  %v9372_v39 = vld [vmem:[#allocation2 + $0x40] sm:$0xff]  ;;  %419 = vst.msk [vmem:[#allocation2 + $0x98] sm:$0x1] %vm406_vm6, %v345_v55  ;;  %v912_v11 = vrot.slane %v775_v9, 1  ;;  %v910_v13 = vrot.slane %v776_v10, 1  ;;  %v350_v22 = vrot.slane %v280_v3, 7 }
  0x95   :  { %v770_v40 = vld [vmem:[#allocation2 + $0x40] sm:$0xfe]  ;;  %622 = vmatmul.f32.gmra.mxu0 %v9372_v39  ;;  %v9378_v41 = vld [vmem:[#allocation2 + $0x48] sm:$0xff]  ;;  %v777_v14 = vld [vmem:[#allocation2 + $0x78] sm:$0x1]  ;;  %v351_v23 = vrot.slane %v296_v6, 7 }
  0x96   :  { %v903_v42 = vrot.slane %v770_v40, 1  ;;  %8717 = vmatmul.msk.f32.gmra.mxu1 %vm75_vm0, %v9378_v41  ;;  %v772_v45 = vld [vmem:[#allocation2 + $0x50] sm:$0x1]  ;;  %v771_v48 = vld [vmem:[#allocation2 + $0x48] sm:$0xfe]  ;;  %v913_v16 = vrot.slane %v777_v14, 1  ;;  %v911_v18 = vsel %vm890_vm1, %v909_v8, %v910_v13 }
  0x97   :  { %v904_v47 = vrot.slane %v772_v45, 1  ;;  %v773_v49 = vld [vmem:[#allocation2 + $0x58] sm:$0x1]  ;;  %v906_v50 = vrot.slane %v771_v48, 1  ;;  %428 = vst [vmem:[#allocation2 + $0xe0] sm:$0xfe] %v350_v22 }
  0x98   :  { %v907_v54 = vrot.slane %v773_v49, 1  ;;  %v778_v17 = vld [vmem:[#allocation2 + $0x80] sm:$0xfe]  ;;  %v914_v24 = vsel %vm890_vm1, %v912_v11, %v913_v16  ;;  %429 = vst.msk [vmem:[#allocation2 + $0xe8] sm:$0xfe] %vm403_vm5, %v351_v23  ;;  %v282_v34 = vsel %vm273_vm4, 0.0, %v242_v31 }
  0x99   :  { %v905_v53 = vsel %vm890_vm1, %v903_v42, %v904_v47  ;;  %v779_v20 = vld [vmem:[#allocation2 + $0x88] sm:$0xfe]  ;;  %v9415_v25 = vld [vmem:[#allocation2 + $0x80] sm:$0xff]  ;;  %v915_v28 = vrot.slane %v778_v17, 1  ;;  %430 = vst [vmem:[#allocation2 + $0xf0] sm:$0x1] %v350_v22  ;;  %v246_v9 = vpop.permute.xlu0 %245 }
  0x9a   :  { %v908_v59 = vsel %vm890_vm1, %v906_v50, %v907_v54  ;;  %v9417_v26 = vld [vmem:[#allocation2 + $0x88] sm:$0xff]  ;;  %v780_v27 = vld [vmem:[#allocation2 + $0x90] sm:$0x1]  ;;  %v918_v32 = vrot.slane %v779_v20, 1  ;;  %v298_v36 = vsel %vm273_vm4, %v242_v31, 0.0  ;;  %v354_v45 = vrot.slane %v282_v34, 7  ;;  %v248_v31 = vpop.permute.xlu1 %247 }
  0x9b   :  { %1094 = vmatmul.f32.gmra.mxu2 %v905_v53  ;;  %v916_v29 = vrot.slane %v780_v27, 1  ;;  %v781_v30 = vld [vmem:[#allocation2 + $0x98] sm:$0x1]  ;;  %v782_v38 = vld [vmem:[#allocation2 + $0xa0] sm:$0xfe]  ;;  %v355_v46 = vrot.slane %v298_v36, 7  ;;  %v244_v53 = vpop.permute.xlu2 %243 }
  0x9c   :  { %8733 = vmatmul.msk.f32.gmra.mxu3 %vm75_vm0, %v908_v59  ;;  %v919_v33 = vrot.slane %v781_v30, 1  ;;  %v784_v40 = vld [vmem:[#allocation2 + $0xb0] sm:$0x1]  ;;  %431 = vst.msk [vmem:[#allocation2 + $0xf8] sm:$0x1] %vm406_vm6, %v351_v23  ;;  %v9431_v47 = vld [vmem:[#allocation2 + $0xa0] sm:$0xff] }
  0x9d   :  { %625 = vmatmul.f32.gmra.mxu0 %v9402_v4  ;;  %v917_v35 = vsel %vm890_vm1, %v915_v28, %v916_v29  ;;  %v783_v42 = vld [vmem:[#allocation2 + $0xa8] sm:$0xfe]  ;;  %v785_v44 = vld [vmem:[#allocation2 + $0xb8] sm:$0x1]  ;;  %v921_v50 = vrot.slane %v782_v38, 1  ;;  %v922_v51 = vrot.slane %v784_v40, 1 }
  0x9e   :  { %8718 = vmatmul.msk.f32.gmra.mxu1 %vm75_vm0, %v9406_v7  ;;  %v920_v37 = vsel %vm890_vm1, %v918_v32, %v919_v33  ;;  %v1501_v48 = vld [vmem:[#allocation7 + $0x188] sm:$0xff]  ;;  %436 = vst [vmem:[#allocation2 + $0x160] sm:$0xfe] %v354_v45  ;;  %v924_v54 = vrot.slane %v783_v42, 1  ;;  %v925_v55 = vrot.slane %v785_v44, 1  ;;  %v283_v56 = vsel %vm273_vm4, 0.0, %v244_v53 }
  0x9f   :  { %v9434_v49 = vld [vmem:[#allocation2 + $0xa8] sm:$0xff]  ;;  %1550 = vmatpush.msrb.mxu1 %v1501_v48  ;;  %437 = vst.msk [vmem:[#allocation2 + $0x168] sm:$0xfe] %vm403_vm5, %v355_v46  ;;  %v923_v57 = vsel %vm890_vm1, %v921_v50, %v922_v51  ;;  %v299_v58 = vsel %vm273_vm4, %v244_v53, 0.0  ;;  %v356_v0 = vrot.slane %v283_v56, 7  ;;  %v927_v6 = vrot.slane %v786_v60, 1 }
  0xa0   :  { %438 = vst [vmem:[#allocation2 + $0x170] sm:$0x1] %v354_v45  ;;  %v926_v59 = vsel %vm890_vm1, %v924_v54, %v925_v55  ;;  %v787_v62 = vld [vmem:[#allocation2 + $0xc8] sm:$0xfe]  ;;  %v357_v3 = vrot.slane %v299_v58, 7  ;;  %v928_v8 = vrot.slane %v788_v61, 1 }
  0xa1   :  { %439 = vst.msk [vmem:[#allocation2 + $0x178] sm:$0x1] %vm406_vm6, %v355_v46  ;;  %1551 = vmatpush.msrb.mxu1 %v1500_v1  ;;  %v930_v10 = vrot.slane %v787_v62, 1  ;;  %v931_v11 = vrot.slane %v789_v63, 1  ;;  %v284_v12 = vsel %vm273_vm4, 0.0, %v246_v9  ;;  %v300_v13 = vsel %vm273_vm4, %v246_v9, 0.0 }
  0xa2   :  { %440 = vst [vmem:[#allocation2 + $0x180] sm:$0xfe] %v356_v0  ;;  %v358_v14 = vrot.slane %v284_v12, 7  ;;  %v359_v15 = vrot.slane %v300_v13, 7  ;;  %v1499_v16 = vld [vmem:[#allocation7 + $0x178] sm:$0xff]  ;;  %v929_v17 = vsel %vm890_vm1, %v927_v6, %v928_v8  ;;  %v9460_v27 = vld [vmem:[#allocation2 + $0xe0] sm:$0xff]  ;;  %v252_v13 = vpop.permute.xlu0 %251 }
  0xa3   :  { %1097 = vmatmul.f32.gmra.mxu2 %v911_v18  ;;  %441 = vst.msk [vmem:[#allocation2 + $0x188] sm:$0xfe] %vm403_vm5, %v357_v3  ;;  %1552 = vmatpush.msrb.mxu1 %v1499_v16  ;;  %v932_v18 = vsel %vm890_vm1, %v930_v10, %v931_v11  ;;  %v790_v20 = vld [vmem:[#allocation2 + $0xe0] sm:$0xfe]  ;;  %v792_v22 = vld [vmem:[#allocation2 + $0xf0] sm:$0x1]  ;;  %v250_v53 = vpop.permute.xlu2 %249 }
  0xa4   :  { %8734 = vmatmul.msk.f32.gmra.mxu3 %vm75_vm0, %v914_v24  ;;  %442 = vst [vmem:[#allocation2 + $0x190] sm:$0x1] %v356_v0  ;;  %v791_v23 = vld [vmem:[#allocation2 + $0xe8] sm:$0xfe]  ;;  %v793_v24 = vld [vmem:[#allocation2 + $0xf8] sm:$0x1] }
  0xa5   :  { %628 = vmatmul.f32.gmra.mxu0 %v9415_v25  ;;  %443 = vst.msk [vmem:[#allocation2 + $0x198] sm:$0x1] %vm406_vm6, %v357_v3  ;;  %v9463_v28 = vld [vmem:[#allocation2 + $0xe8] sm:$0xff]  ;;  %v933_v29 = vrot.slane %v790_v20, 1  ;;  %v934_v30 = vrot.slane %v792_v22, 1  ;;  %v936_v32 = vrot.slane %v791_v23, 1 }
  0xa6   :  { %8719 = vmatmul.msk.f32.gmra.mxu1 %vm75_vm0, %v9417_v26  ;;  %444 = vst [vmem:[#allocation2 + $0x1a0] sm:$0xfe] %v358_v14  ;;  %v937_v33 = vrot.slane %v793_v24, 1  ;;  %v285_v34 = vsel %vm273_vm4, 0.0, %v248_v31  ;;  %v1498_v38 = vld [vmem:[#allocation7 + $0x170] sm:$0xff]  ;;  %v501_v50 = vld [vmem:[#allocation2 + $0x148] sm:$0xff] }
  0xa7   :  { %445 = vst.msk [vmem:[#allocation2 + $0x1a8] sm:$0xfe] %vm403_vm5, %v359_v15  ;;  %v360_v36 = vrot.slane %v285_v34, 7  ;;  %v935_v40 = vsel %vm890_vm1, %v933_v29, %v934_v30  ;;  %1553 = vmatpush.msrb.mxu1 %v1498_v38  ;;  %v794_v44 = vld [vmem:[#allocation2 + $0x140] sm:$0xfe]  ;;  %v286_v56 = vsel %vm273_vm4, 0.0, %v250_v53 }
  0xa8   :  { %446 = vst [vmem:[#allocation2 + $0x1b0] sm:$0x1] %v358_v14  ;;  %v938_v42 = vsel %vm890_vm1, %v936_v32, %v937_v33  ;;  %v796_v45 = vld [vmem:[#allocation2 + $0x150] sm:$0x1]  ;;  %v795_v46 = vld [vmem:[#allocation2 + $0x148] sm:$0xfe] }
  0xa9   :  { %447 = vst.msk [vmem:[#allocation2 + $0x1b8] sm:$0x1] %vm406_vm6, %v359_v15  ;;  %v797_v48 = vld [vmem:[#allocation2 + $0x158] sm:$0x1]  ;;  %v939_v51 = vrot.slane %v794_v44, 1  ;;  %v940_v52 = vrot.slane %v796_v45, 1  ;;  %v254_v44 = vpop.permute.xlu1 %253 }
  0xaa   :  { %448 = vst [vmem:[#allocation2 + $0x1c0] sm:$0xfe] %v360_v36  ;;  %v942_v54 = vrot.slane %v795_v46, 1  ;;  %v943_v55 = vrot.slane %v797_v48, 1  ;;  %v362_v58 = vrot.slane %v286_v56, 7  ;;  %v1497_v60 = vld [vmem:[#allocation7 + $0x168] sm:$0xff] }
  0xab   :  { %1100 = vmatmul.f32.gmra.mxu2 %v917_v35  ;;  %v301_v35 = vsel %vm273_vm4, %v248_v31, 0.0  ;;  %450 = vst [vmem:[#allocation2 + $0x1d0] sm:$0x1] %v360_v36  ;;  %v1770_v61 = vld [vmem:[#allocation7 + $0x258] sm:$0xff]  ;;  %v941_v62 = vsel %vm890_vm1, %v939_v51, %v940_v52  ;;  %1554 = vmatpush.msrb.mxu1 %v1497_v60  ;;  %v798_v0 = vld [vmem:[#allocation2 + $0x160] sm:$0xfe] }
  0xac   :  { %8735 = vmatmul.msk.f32.gmra.mxu3 %vm75_vm0, %v920_v37  ;;  %v361_v37 = vrot.slane %v301_v35, 7  ;;  %452 = vst [vmem:[#allocation2 + $0x1e0] sm:$0xfe] %v362_v58  ;;  %1823 = vmatpush.msrb.mxu0 %v1770_v61  ;;  %v944_v63 = vsel %vm890_vm1, %v942_v54, %v943_v55  ;;  %v800_v1 = vld [vmem:[#allocation2 + $0x170] sm:$0x1]  ;;  %v9487_v9 = vld [vmem:[#allocation2 + $0x168] sm:$0xff] }
  0xad   :  { %631 = vmatmul.f32.gmra.mxu0 %v9431_v47  ;;  %v799_v3 = vld [vmem:[#allocation2 + $0x168] sm:$0xfe]  ;;  %v801_v6 = vld [vmem:[#allocation2 + $0x178] sm:$0x1]  ;;  %454 = vst [vmem:[#allocation2 + $0x1f0] sm:$0x1] %v362_v58 }
  0xae   :  { %8720 = vmatmul.msk.f32.gmra.mxu1 %vm75_vm0, %v9434_v49  ;;  %449 = vst.msk [vmem:[#allocation2 + $0x1c8] sm:$0xfe] %vm403_vm5, %v361_v37  ;;  %v1769_v8 = vld [vmem:[#allocation7 + $0x250] sm:$0xff]  ;;  %v945_v10 = vrot.slane %v798_v0, 1  ;;  %v946_v11 = vrot.slane %v800_v1, 1  ;;  %v1508_v12 = vld [vmem:[#allocation7 + $0x1c0] sm:$0xff] }
  0xaf   :  { %451 = vst.msk [vmem:[#allocation2 + $0x1d8] sm:$0x1] %vm406_vm6, %v361_v37  ;;  %1824 = vmatpush.msrb.mxu0 %v1769_v8  ;;  %v1768_v14 = vld [vmem:[#allocation7 + $0x248] sm:$0xff]  ;;  %v948_v15 = vrot.slane %v799_v3, 1  ;;  %v949_v16 = vrot.slane %v801_v6, 1  ;;  %1624 = vmatpush.msrb.mxu3 %v1508_v12  ;;  %v1767_v23 = vld [vmem:[#allocation7 + $0x240] sm:$0xff] }
  0xb0   :  { %v1496_v24 = vld [vmem:[#allocation7 + $0x160] sm:$0xff]  ;;  %v947_v29 = vsel %vm890_vm1, %v945_v10, %v946_v11  ;;  %v1766_v30 = vld [vmem:[#allocation7 + $0x238] sm:$0xff]  ;;  %v804_v33 = vld [vmem:[#allocation2 + $0x190] sm:$0x1]  ;;  %v304_v51 = vsel %vm273_vm4, %v254_v44, 0.0 }
  0xb1   :  { %1825 = vmatpush.msrb.mxu0 %v1768_v14  ;;  %1555 = vmatpush.msrb.mxu1 %v1496_v24  ;;  %v950_v31 = vsel %vm890_vm1, %v948_v15, %v949_v16  ;;  %v802_v32 = vld [vmem:[#allocation2 + $0x180] sm:$0xfe]  ;;  %v803_v34 = vld [vmem:[#allocation2 + $0x188] sm:$0xfe]  ;;  %v805_v35 = vld [vmem:[#allocation2 + $0x198] sm:$0x1] }
  0xb2   :  { %v9497_v36 = vld [vmem:[#allocation2 + $0x180] sm:$0xff]  ;;  %v1765_v37 = vld [vmem:[#allocation7 + $0x230] sm:$0xff]  ;;  %v9501_v38 = vld [vmem:[#allocation2 + $0x188] sm:$0xff]  ;;  %v954_v46 = vrot.slane %v803_v34, 1  ;;  %v955_v48 = vrot.slane %v805_v35, 1 }
  0xb3   :  { %1103 = vmatmul.f32.gmra.mxu2 %v923_v57  ;;  %v302_v57 = vsel %vm273_vm4, %v250_v53, 0.0  ;;  %1826 = vmatpush.msrb.mxu0 %v1767_v23  ;;  %v1764_v45 = vld [vmem:[#allocation7 + $0x228] sm:$0xff]  ;;  %v367_v53 = vrot.slane %v304_v51, 7  ;;  %v1763_v54 = vld [vmem:[#allocation7 + $0x220] sm:$0xff]  ;;  %v1495_v55 = vld [vmem:[#allocation7 + $0x158] sm:$0xff] }
  0xb4   :  { %8736 = vmatmul.msk.f32.gmra.mxu3 %vm75_vm0, %v926_v59  ;;  %v363_v59 = vrot.slane %v302_v57, 7  ;;  %1556 = vmatpush.msrb.mxu1 %v1495_v55  ;;  %v1762_v57 = vld [vmem:[#allocation7 + $0x218] sm:$0xff]  ;;  %v956_v58 = vsel %vm890_vm1, %v954_v46, %v955_v48  ;;  %v808_v60 = vld [vmem:[#allocation2 + $0x1b0] sm:$0x1]  ;;  %v807_v61 = vld [vmem:[#allocation2 + $0x1a8] sm:$0xfe] }
  0xb5   :  { %634 = vmatmul.f32.gmra.mxu0 %v9445_v2  ;;  %461 = vst.msk [vmem:[#allocation2 + $0x228] sm:$0xfe] %vm403_vm5, %v367_v53  ;;  %v1761_v0 = vld [vmem:[#allocation7 + $0x210] sm:$0xff]  ;;  %v9515_v1 = vld [vmem:[#allocation2 + $0x1a8] sm:$0xff]  ;;  %v958_v6 = vrot.slane %v808_v60, 1  ;;  %v960_v10 = vrot.slane %v807_v61, 1 }
  0xb6   :  { %8721 = vmatmul.msk.f32.gmra.mxu1 %vm75_vm0, %v9448_v5  ;;  %453 = vst.msk [vmem:[#allocation2 + $0x1e8] sm:$0xfe] %vm403_vm5, %v363_v59  ;;  %1827 = vmatpush.msrb.mxu0 %v1766_v30  ;;  %v1760_v8 = vld [vmem:[#allocation7 + $0x208] sm:$0xff]  ;;  %v1759_v12 = vld [vmem:[#allocation7 + $0x200] sm:$0xff]  ;;  %v1758_v15 = vld [vmem:[#allocation7 + $0x1f8] sm:$0xff] }
  0xb7   :  { %455 = vst.msk [vmem:[#allocation2 + $0x1f8] sm:$0x1] %vm406_vm6, %v363_v59  ;;  %v806_v59 = vld [vmem:[#allocation2 + $0x1a0] sm:$0xfe]  ;;  %v9524_v24 = vld [vmem:[#allocation2 + $0x1c8] sm:$0xff] }
  0xb8   :  { %1828 = vmatpush.msrb.mxu0 %v1765_v37  ;;  %463 = vst.msk [vmem:[#allocation2 + $0x238] sm:$0x1] %vm406_vm6, %v367_v53  ;;  %v957_v3 = vrot.slane %v806_v59, 1  ;;  %v9522_v23 = vld [vmem:[#allocation2 + $0x1c0] sm:$0xff]  ;;  %v1756_v34 = vld [vmem:[#allocation7 + $0x1e8] sm:$0xff] }
  0xb9   :  { %v816_v51 = vld [vmem:[#allocation2 + $0x1f0] sm:$0x1]  ;;  %v9532_v55 = vld [vmem:[#allocation2 + $0x1e0] sm:$0xff] }
  0xba   :  { %1829 = vmatpush.msrb.mxu0 %v1764_v45  ;;  %v959_v14 = vsel %vm890_vm1, %v957_v3, %v958_v6  ;;  %v1772_v45 = vld [vmem:[#allocation7 + $0x268] sm:$0xff] }
  0xbb   :  { %1106 = vmatmul.f32.gmra.mxu2 %v929_v17  ;;  %v287_v17 = vsel %vm273_vm4, 0.0, %v252_v13 }
  0xbc   :  { %8737 = vmatmul.msk.f32.gmra.mxu3 %vm75_vm0, %v932_v18  ;;  %v303_v18 = vsel %vm273_vm4, %v252_v13, 0.0  ;;  %v364_v20 = vrot.slane %v287_v17, 7  ;;  %1830 = vmatpush.msrb.mxu0 %v1763_v54  ;;  %v1494_v13 = vld [vmem:[#allocation7 + $0x150] sm:$0xff]  ;;  %v810_v17 = vld [vmem:[#allocation2 + $0x1c0] sm:$0xfe] }
  0xbd   :  { %637 = vmatmul.f32.gmra.mxu0 %v9460_v27  ;;  %v365_v22 = vrot.slane %v303_v18, 7  ;;  %1557 = vmatpush.msrb.mxu1 %v1494_v13  ;;  %v812_v18 = vld [vmem:[#allocation2 + $0x1d0] sm:$0x1]  ;;  %v963_v30 = vrot.slane %v810_v17, 1  ;;  %v815_v53 = vld [vmem:[#allocation2 + $0x1e8] sm:$0xfe] }
  0xbe   :  { %8722 = vmatmul.msk.f32.gmra.mxu1 %vm75_vm0, %v9463_v28  ;;  %456 = vst [vmem:[#allocation2 + $0x200] sm:$0xfe] %v364_v20  ;;  %1831 = vmatpush.msrb.mxu0 %v1762_v57  ;;  %v817_v54 = vld [vmem:[#allocation2 + $0x1f8] sm:$0x1]  ;;  %v972_v59 = vrot.slane %v815_v53, 1 }
  0xbf   :  { %457 = vst.msk [vmem:[#allocation2 + $0x208] sm:$0xfe] %vm403_vm5, %v365_v22  ;;  %v973_v60 = vrot.slane %v817_v54, 1  ;;  %v208_v17 = vld [vmem:[#allocation4 + $0x78] sm:$0xff]  ;;  %v1235_v54 = vld [vmem:[#allocation2 + $0x8] sm:$0xfc] }
  0xc0   :  { %458 = vst [vmem:[#allocation2 + $0x210] sm:$0x1] %v364_v20  ;;  %1832 = vmatpush.msrb.mxu0 %v1761_v0  ;;  %v811_v20 = vld [vmem:[#allocation2 + $0x1c8] sm:$0xfe]  ;;  %255 = vrot.lane.b32.xlu2 %v208_v17, %s9151_s4 }
  0xc1   :  { %459 = vst.msk [vmem:[#allocation2 + $0x218] sm:$0x1] %vm406_vm6, %v365_v22  ;;  %v813_v22 = vld [vmem:[#allocation2 + $0x1d8] sm:$0x1]  ;;  %v966_v35 = vrot.slane %v811_v20, 1 }
  0xc2   :  { %1833 = vmatpush.msrb.mxu0 %v1760_v8  ;;  %v967_v37 = vrot.slane %v813_v22, 1 }
  0xc3   :  { %1109 = vmatmul.f32.gmra.mxu2 %v935_v40  ;;  %v951_v40 = vrot.slane %v802_v32, 1  ;;  %v1774_v32 = vld [vmem:[#allocation7 + $0x278] sm:$0xff] }
  0xc4   :  { %8738 = vmatmul.msk.f32.gmra.mxu3 %vm75_vm0, %v938_v42  ;;  %v952_v42 = vrot.slane %v804_v33, 1  ;;  %1834 = vmatpush.msrb.mxu0 %v1759_v12  ;;  %v1493_v33 = vld [vmem:[#allocation7 + $0x148] sm:$0xff]  ;;  %v968_v48 = vsel %vm890_vm1, %v966_v35, %v967_v37 }
  0xc5   :  { %640 = vmatmul.f32.gmra.mxu0 %v9152_v43  ;;  %v9483_v43 = vld [vmem:[#allocation2 + $0x160] sm:$0xff]  ;;  %1900 = vmatpush.msrb.mxu2 %v1774_v32 }
  0xc6   :  { %8723 = vmatmul.msk.f32.gmra.mxu1 %vm75_vm0, %v501_v50  ;;  %v288_v50 = vsel %vm273_vm4, 0.0, %v254_v44  ;;  %v953_v56 = vsel %vm890_vm1, %v951_v40, %v952_v42  ;;  %1835 = vmatpush.msrb.mxu0 %v1758_v15  ;;  %v1773_v40 = vld [vmem:[#allocation7 + $0x270] sm:$0xff]  ;;  %v1492_v42 = vld [vmem:[#allocation7 + $0x140] sm:$0xff]  ;;  %v819_v6 = vld [vmem:[#allocation2 + $0x208] sm:$0xfe] }
  0xc7   :  { %v366_v52 = vrot.slane %v288_v50, 7  ;;  %1558 = vmatpush.msrb.mxu1 %v1493_v33  ;;  %v1755_v44 = vld [vmem:[#allocation7 + $0x1e0] sm:$0xff]  ;;  %1901 = vmatpush.msrb.mxu2 %v1773_v40  ;;  %v820_v3 = vld [vmem:[#allocation2 + $0x210] sm:$0x1]  ;;  %v9556_v33 = vld [vmem:[#allocation2 + $0x228] sm:$0xff] }
  0xc8   :  { %v814_v50 = vld [vmem:[#allocation2 + $0x1e0] sm:$0xfe]  ;;  %9003 = vmatpush.msra.mxu3 %v1774_v32  ;;  %v821_v8 = vld [vmem:[#allocation2 + $0x218] sm:$0x1]  ;;  %v976_v13 = vrot.slane %v820_v3, 1 }
  0xc9   :  { %460 = vst [vmem:[#allocation2 + $0x220] sm:$0xfe] %v366_v52  ;;  %1559 = vmatpush.msrb.mxu1 %v1492_v42  ;;  %1902 = vmatpush.msrb.mxu2 %v1772_v45  ;;  %v969_v57 = vrot.slane %v814_v50, 1  ;;  %v818_v0 = vld [vmem:[#allocation2 + $0x200] sm:$0xfe]  ;;  %v979_v15 = vrot.slane %v821_v8, 1  ;;  %v9575_v8 = vpop.f32.mrf.mxu2 }
  0xca   :  { %462 = vst [vmem:[#allocation2 + $0x230] sm:$0x1] %v366_v52  ;;  %v1771_v52 = vld [vmem:[#allocation7 + $0x260] sm:$0xff]  ;;  %9004 = vmatpush.msra.mxu3 %v1773_v40  ;;  %v975_v12 = vrot.slane %v818_v0, 1 }
  0xcb   :  { %1112 = vmatmul.f32.gmra.mxu2 %v941_v62  ;;  %v809_v62 = vld [vmem:[#allocation2 + $0x1b8] sm:$0x1]  ;;  %v1234_v42 = vld [vmem:[#allocation2] sm:$0xfc] }
  0xcc   :  { %8739 = vmatmul.msk.f32.gmra.mxu3 %vm75_vm0, %v944_v63  ;;  %v9511_v63 = vld [vmem:[#allocation2 + $0x1a0] sm:$0xff]  ;;  %v961_v11 = vrot.slane %v809_v62, 1  ;;  %1903 = vmatpush.msrb.mxu2 %v1771_v52  ;;  %v974_v62 = vsel %vm890_vm1, %v972_v59, %v973_v60  ;;  %v1363_v50 = vrot.slane %v1234_v42, 2  ;;  %v1366_v59 = vrot.slane %v1235_v54, 2  ;;  %v1243_v42 = vld [vmem:[#allocation2 + $0x48] sm:$0xfc] }
  0xcd   :  { %643 = vmatmul.f32.gmra.mxu0 %v9483_v43  ;;  %9005 = vmatpush.msra.mxu3 %v1772_v45  ;;  %v9559_v45 = vpop.f32.mrf.mxu0 }
  0xce   :  { %8724 = vmatmul.msk.f32.gmra.mxu1 %vm75_vm0, %v9487_v9  ;;  %v962_v16 = vsel %vm890_vm1, %v960_v10, %v961_v11  ;;  %v9542_v10 = vld [vmem:[#allocation2 + $0x200] sm:$0xff]  ;;  %v9545_v11 = vld [vmem:[#allocation2 + $0x208] sm:$0xff] }
  0xcf   :  { %9006 = vmatpush.msra.mxu3 %v1771_v52  ;;  %v2256_v52 = vld [vmem:[#allocation7 + $0x2f0] sm:$0xff] }
  0xd0   :  { %v822_v22 = vld [vmem:[#allocation2 + $0x220] sm:$0xfe] }
  0xd1   :  { %v9553_v32 = vld [vmem:[#allocation2 + $0x220] sm:$0xff] }
  0xd3   :  { %1115 = vmatmul.f32.gmra.mxu2 %v947_v29  ;;  %v1757_v29 = vld [vmem:[#allocation7 + $0x1f0] sm:$0xff] }
  0xd4   :  { %8740 = vmatmul.msk.f32.gmra.mxu3 %vm75_vm0, %v950_v31  ;;  %v964_v31 = vrot.slane %v812_v18, 1  ;;  %1836 = vmatpush.msrb.mxu0 %v1757_v29  ;;  %v977_v18 = vsel %vm890_vm1, %v975_v12, %v976_v13  ;;  %v824_v29 = vld [vmem:[#allocation2 + $0x230] sm:$0x1]  ;;  %v9577_v12 = vpop.f32.mrf.mxu3 }
  0xd5   :  { %646 = vmatmul.f32.gmra.mxu0 %v9497_v36  ;;  %v982_v35 = vrot.slane %v824_v29, 1  ;;  %v1244_v29 = vld [vmem:[#allocation2 + $0x50] sm:$0x3] }
  0xd6   :  { %8725 = vmatmul.msk.f32.gmra.mxu1 %vm75_vm0, %v9501_v38  ;;  %1837 = vmatpush.msrb.mxu0 %v1756_v34  ;;  %v965_v46 = vsel %vm890_vm1, %v963_v30, %v964_v31  ;;  %v823_v30 = vld [vmem:[#allocation2 + $0x228] sm:$0xfe]  ;;  %v825_v31 = vld [vmem:[#allocation2 + $0x238] sm:$0x1]  ;;  %v981_v34 = vrot.slane %v822_v22, 1 }
  0xd7   :  { %v984_v37 = vrot.slane %v823_v30, 1  ;;  %v985_v40 = vrot.slane %v825_v31, 1  ;;  %v1242_v22 = vld [vmem:[#allocation2 + $0x40] sm:$0xfc] }
  0xd8   :  { %1838 = vmatpush.msrb.mxu0 %v1755_v44  ;;  %v1236_v44 = vld [vmem:[#allocation2 + $0x10] sm:$0x3] }
  0xd9   :  { %v986_v53 = vsel %vm890_vm1, %v984_v37, %v985_v40 }
  0xdb   :  { %1118 = vmatmul.f32.gmra.mxu2 %v953_v56  ;;  %v9535_v56 = vld [vmem:[#allocation2 + $0x1e8] sm:$0xff] }
  0xdc   :  { %8741 = vmatmul.msk.f32.gmra.mxu3 %vm75_vm0, %v956_v58  ;;  %v970_v58 = vrot.slane %v816_v51, 1  ;;  %v1364_v51 = vrot.slane %v1236_v44, 2  ;;  %v1245_v44 = vld [vmem:[#allocation2 + $0x58] sm:$0x3] }
  0xdd   :  { %649 = vmatmul.f32.gmra.mxu0 %v9511_v63 }
  0xde   :  { %8726 = vmatmul.msk.f32.gmra.mxu1 %vm75_vm0, %v9515_v1  ;;  %v971_v61 = vsel %vm890_vm1, %v969_v57, %v970_v58  ;;  %v1237_v57 = vld [vmem:[#allocation2 + $0x18] sm:$0x3]  ;;  %v1365_v58 = vsel %vm1362_vm7, %v1363_v50, %v1364_v51 }
  0xdf   :  { %v1367_v60 = vrot.slane %v1237_v57, 2  ;;  %v1378_v57 = vrot.slane %v1243_v42, 2 }
  0xe1   :  { %v1368_v3 = vsel %vm1362_vm7, %v1366_v59, %v1367_v60  ;;  %v1246_v59 = vld [vmem:[#allocation2 + $0x60] sm:$0xfc]  ;;  %v1248_v60 = vld [vmem:[#allocation2 + $0x70] sm:$0x3] }
  0xe3   :  { %1121 = vmatmul.f32.gmra.mxu2 %v959_v14  ;;  %v978_v14 = vrot.slane %v819_v6, 1 }
  0xe4   :  { %8742 = vmatmul.msk.f32.gmra.mxu3 %vm75_vm0, %v962_v16  ;;  %v2257_v16 = vld [vmem:[#allocation7 + $0x2f8] sm:$0xff] }
  0xe5   :  { %652 = vmatmul.f32.gmra.mxu0 %v9522_v23  ;;  %2294 = vmatpush.msra.mxu1 %v2257_v16  ;;  %v980_v20 = vsel %vm890_vm1, %v978_v14, %v979_v15  ;;  %v2255_v15 = vld [vmem:[#allocation7 + $0x2e8] sm:$0xff]  ;;  %v1241_v16 = vld [vmem:[#allocation2 + $0x38] sm:$0x3] }
  0xe6   :  { %8727 = vmatmul.msk.f32.gmra.mxu1 %vm75_vm0, %v9524_v24 }
  0xe7   :  { %2295 = vmatpush.msra.mxu1 %v2256_v52 }
  0xe9   :  { %2296 = vmatpush.msra.mxu1 %v2255_v15 }
  0xeb   :  { %1124 = vmatmul.f32.gmra.mxu2 %v965_v46  ;;  %v9563_v46 = vpop.f32.mrf.mxu1 }
  0xec   :  { %8743 = vmatmul.msk.f32.gmra.mxu3 %vm75_vm0, %v968_v48  ;;  %v983_v48 = vsel %vm890_vm1, %v981_v34, %v982_v35  ;;  %v1375_v34 = vrot.slane %v1242_v22, 2  ;;  %v2254_v35 = vld [vmem:[#allocation7 + $0x2e0] sm:$0xff] }
  0xed   :  { %655 = vmatmul.f32.gmra.mxu0 %v9532_v55  ;;  %2297 = vmatpush.msra.mxu1 %v2254_v35 }
  0xee   :  { %8728 = vmatmul.msk.f32.gmra.mxu1 %vm75_vm0, %v9535_v56 }
  0xf3   :  { %1127 = vmatmul.f32.gmra.mxu2 %v971_v61  ;;  %v1238_v61 = vld [vmem:[#allocation2 + $0x20] sm:$0xfc] }
  0xf4   :  { %8744 = vmatmul.msk.f32.gmra.mxu3 %vm75_vm0, %v974_v62  ;;  %v1240_v62 = vld [vmem:[#allocation2 + $0x30] sm:$0x3]  ;;  %v1369_v13 = vrot.slane %v1238_v61, 2  ;;  %v1381_v61 = vrot.slane %v1246_v59, 2 }
  0xf5   :  { %658 = vmatmul.f32.gmra.mxu0 %v9542_v10  ;;  %v1370_v14 = vrot.slane %v1240_v62, 2  ;;  %v1382_v62 = vrot.slane %v1248_v60, 2  ;;  %v2251_v60 = vld [vmem:[#allocation7 + $0x2c8] sm:$0xff] }
  0xf6   :  { %8729 = vmatmul.msk.f32.gmra.mxu1 %vm75_vm0, %v9545_v11 }
  0xf7   :  { %v1371_v17 = vsel %vm1362_vm7, %v1369_v13, %v1370_v14 }
  0xfb   :  { %1130 = vmatmul.f32.gmra.mxu2 %v977_v18 }
  0xfc   :  { %8745 = vmatmul.msk.f32.gmra.mxu3 %vm75_vm0, %v980_v20  ;;  %v1373_v20 = vrot.slane %v1241_v16, 2  ;;  %v1249_v16 = vld [vmem:[#allocation2 + $0x78] sm:$0x3] }
  0xfd   :  { %661 = vmatmul.f32.gmra.mxu0 %v9553_v32  ;;  %v1385_v22 = vrot.slane %v1249_v16, 2 }
  0xfe   :  { %8730 = vmatmul.msk.f32.gmra.mxu1 %vm75_vm0, %v9556_v33 }
 0x103   :  { %1133 = vmatmul.f32.gmra.mxu2 %v983_v48  ;;  %v240_v48 = vpop.permute.xlu0 %239 }
 0x104   :  { %8746 = vmatmul.msk.f32.gmra.mxu3 %vm75_vm0, %v986_v53  ;;  %v281_v51 = vsel %vm273_vm4, 0.0, %v240_v48  ;;  %v297_v52 = vsel %vm273_vm4, %v240_v48, 0.0 }
 0x105   :  { %1839 = vmatmul.f32.vlgmr.msrb.gmra.mxu0 %v9343_v19  ;;  %v1239_v19 = vld [vmem:[#allocation2 + $0x28] sm:$0xfc]  ;;  %v352_v54 = vrot.slane %v281_v51, 7 }
 0x106   :  { %1560 = vmatmul.f32.vlgmr.msrb.gmra.mxu1 %v1365_v58  ;;  %v1372_v18 = vrot.slane %v1239_v19, 2  ;;  %v1379_v58 = vrot.slane %v1245_v44, 2  ;;  %v1247_v19 = vld [vmem:[#allocation2 + $0x68] sm:$0xfc]  ;;  %v1253_v44 = vld [vmem:[#allocation2 + $0x98] sm:$0x3] }
 0x107   :  { %432 = vst [vmem:[#allocation2 + $0x100] sm:$0xfe] %v352_v54 }
 0x108   :  { %v1374_v37 = vsel %vm1362_vm7, %v1372_v18, %v1373_v20  ;;  %434 = vst [vmem:[#allocation2 + $0x110] sm:$0x1] %v352_v54  ;;  %v1380_v13 = vsel %vm1362_vm7, %v1378_v57, %v1379_v58  ;;  %v1383_v20 = vsel %vm1362_vm7, %v1381_v61, %v1382_v62  ;;  %v1391_v54 = vrot.slane %v1253_v44, 2 }
 0x10a   :  { %v9570_v0 = vpop.f32.mrf.mxu0 }
 0x10b   :  { %v9573_v6 = vpop.f32.mrf.mxu1  ;;  %8763 = vmatmul.msk.f32.vlgmr.msrb.gmra.mxu2 %vm75_vm0, %v9349_v21  ;;  %v1376_v21 = vrot.slane %v1244_v29, 2  ;;  %v1250_v29 = vld [vmem:[#allocation2 + $0x80] sm:$0xfc] }
 0x10c   :  { %8747 = vmatmul.msk.f32.vlgmr.msrb.gmra.mxu3 %vm75_vm0, %v1368_v3  ;;  %v2253_v3 = vld [vmem:[#allocation7 + $0x2d8] sm:$0xff] }
 0x10d   :  { %1842 = vmatmul.f32.gmra.mxu0 %v9372_v39  ;;  %v1377_v53 = vsel %vm1362_vm7, %v1375_v34, %v1376_v21  ;;  %2298 = vmatpush.msra.mxu1 %v2253_v3  ;;  %v1252_v34 = vld [vmem:[#allocation2 + $0x90] sm:$0x3]  ;;  %v1387_v21 = vrot.slane %v1250_v29, 2  ;;  %v1255_v3 = vld [vmem:[#allocation2 + $0xa8] sm:$0xfc] }
 0x10e   :  { %1563 = vmatmul.f32.gmra.mxu1 %v1371_v17  ;;  %v1388_v35 = vrot.slane %v1252_v34, 2 }
 0x110   :  { %v1389_v51 = vsel %vm1362_vm7, %v1387_v21, %v1388_v35  ;;  %v2250_v21 = vld [vmem:[#allocation7 + $0x2c0] sm:$0xff] }
 0x112   :  { %v9584_v30 = vpop.f32.mrf.mxu0 }
 0x113   :  { %v9586_v31 = vpop.f32.mrf.mxu1  ;;  %8764 = vmatmul.msk.f32.gmra.mxu2 %vm75_vm0, %v9378_v41  ;;  %v353_v41 = vrot.slane %v297_v52, 7 }
 0x114   :  { %8748 = vmatmul.msk.f32.gmra.mxu3 %vm75_vm0, %v1374_v37  ;;  %v2252_v37 = vld [vmem:[#allocation7 + $0x2d0] sm:$0xff] }
 0x115   :  { %1845 = vmatmul.f32.gmra.mxu0 %v9402_v4  ;;  %433 = vst.msk [vmem:[#allocation2 + $0x108] sm:$0xfe] %vm403_vm5, %v353_v41  ;;  %2299 = vmatpush.msra.mxu1 %v2252_v37 }
 0x116   :  { %v1092_v40 = vpop.f32.mrf.mxu2  ;;  %1566 = vmatmul.f32.gmra.mxu1 %v1377_v53  ;;  %435 = vst.msk [vmem:[#allocation2 + $0x118] sm:$0x1] %vm406_vm6, %v353_v41  ;;  %v1254_v41 = vld [vmem:[#allocation2 + $0xa0] sm:$0xfc] }
 0x117   :  { %v1157_v39 = vpop.f32.mrf.mxu3  ;;  %v1393_v58 = vrot.slane %v1254_v41, 2  ;;  %2300 = vmatpush.msra.mxu1 %v2251_v60 }
 0x118   :  { %v9592_v50 = vadd.f32 %v1157_v39, %v1092_v40 }
 0x119   :  { %2301 = vmatpush.msra.mxu1 %v2250_v21 }
 0x11a   :  { %v9602_v4 = vpop.f32.mrf.mxu0 }
 0x11b   :  { %8765 = vmatmul.msk.f32.gmra.mxu2 %vm75_vm0, %v9406_v7  ;;  %v9606_v15 = vpop.f32.mrf.mxu1  ;;  %v1384_v7 = vrot.slane %v1247_v19, 2 }
 0x11c   :  { %8749 = vmatmul.msk.f32.gmra.mxu3 %vm75_vm0, %v1380_v13  ;;  %v1257_v13 = vld [vmem:[#allocation2 + $0xb8] sm:$0x3] }
 0x11d   :  { %1848 = vmatmul.f32.gmra.mxu0 %v9415_v25  ;;  %v1386_v40 = vsel %vm1362_vm7, %v1384_v7, %v1385_v22  ;;  %v1251_v25 = vld [vmem:[#allocation2 + $0x88] sm:$0xfc]  ;;  %v1258_v7 = vld [vmem:[#allocation2 + $0xc0] sm:$0xfc] }
 0x11e   :  { %v1095_v14 = vpop.f32.mrf.mxu2  ;;  %1569 = vmatmul.f32.gmra.mxu1 %v1383_v20  ;;  %v1390_v53 = vrot.slane %v1251_v25, 2  ;;  %v1397_v20 = vrot.slane %v1257_v13, 2  ;;  %v1399_v29 = vrot.slane %v1258_v7, 2  ;;  %v1261_v25 = vld [vmem:[#allocation2 + $0xd8] sm:$0x3] }
 0x11f   :  { %v1160_v17 = vpop.f32.mrf.mxu3  ;;  %v1263_v13 = vld [vmem:[#allocation2 + $0xe8] sm:$0xfc] }
 0x120   :  { %v9608_v18 = vadd.f32 %v1160_v17, %v1095_v14  ;;  %v1392_v61 = vsel %vm1362_vm7, %v1390_v53, %v1391_v54  ;;  %v1396_v17 = vrot.slane %v1255_v3, 2  ;;  %v1403_v53 = vrot.slane %v1261_v25, 2  ;;  %v1262_v54 = vld [vmem:[#allocation2 + $0xe0] sm:$0xfc]  ;;  %v1269_v25 = vld [vmem:[#allocation2 + $0x158] sm:$0x3] }
 0x121   :  { %v1720_v3 = vld [vmem:[#allocation2 + $0x100] sm:$0xff] }
 0x122   :  { %v9615_v39 = vpop.f32.mrf.mxu0  ;;  %v1398_v35 = vsel %vm1362_vm7, %v1396_v17, %v1397_v20 }
 0x123   :  { %8766 = vmatmul.msk.f32.gmra.mxu2 %vm75_vm0, %v9417_v26  ;;  %v9618_v42 = vpop.f32.mrf.mxu1  ;;  %v1256_v26 = vld [vmem:[#allocation2 + $0xb0] sm:$0x3] }
 0x124   :  { %8750 = vmatmul.msk.f32.gmra.mxu3 %vm75_vm0, %v1386_v40  ;;  %v1394_v59 = vrot.slane %v1256_v26, 2  ;;  %v1259_v40 = vld [vmem:[#allocation2 + $0xc8] sm:$0xfc]  ;;  %v1405_v26 = vrot.slane %v1262_v54, 2 }
 0x125   :  { %1851 = vmatmul.f32.gmra.mxu0 %v9431_v47 }
 0x126   :  { %v1098_v48 = vpop.f32.mrf.mxu2  ;;  %1572 = vmatmul.f32.gmra.mxu1 %v1389_v51  ;;  %v1395_v19 = vsel %vm1362_vm7, %v1393_v58, %v1394_v59  ;;  %v2249_v59 = vld [vmem:[#allocation7 + $0x2b8] sm:$0xff] }
 0x127   :  { %v1163_v52 = vpop.f32.mrf.mxu3  ;;  %2302 = vmatpush.msra.mxu1 %v2249_v59  ;;  %v1270_v59 = vld [vmem:[#allocation2 + $0x160] sm:$0xfc] }
 0x128   :  { %v9622_v57 = vadd.f32 %v1163_v52, %v1098_v48  ;;  %v1402_v52 = vrot.slane %v1259_v40, 2  ;;  %v1267_v40 = vld [vmem:[#allocation2 + $0x148] sm:$0xfc] }
 0x129   :  { %v1414_v54 = vrot.slane %v1267_v40, 2 }
 0x12a   :  { %v9627_v62 = vpop.f32.mrf.mxu0  ;;  %v1404_v60 = vsel %vm1362_vm7, %v1402_v52, %v1403_v53 }
 0x12b   :  { %8767 = vmatmul.msk.f32.gmra.mxu2 %vm75_vm0, %v9434_v49  ;;  %v9630_v47 = vpop.f32.mrf.mxu1  ;;  %v1260_v49 = vld [vmem:[#allocation2 + $0xd0] sm:$0x3] }
 0x12c   :  { %8751 = vmatmul.msk.f32.gmra.mxu3 %vm75_vm0, %v1392_v61  ;;  %v1400_v34 = vrot.slane %v1260_v49, 2  ;;  %v1408_v49 = vrot.slane %v1263_v13, 2 }
 0x12d   :  { %1854 = vmatmul.f32.gmra.mxu0 %v9445_v2 }
 0x12e   :  { %v1101_v14 = vpop.f32.mrf.mxu2  ;;  %1575 = vmatmul.f32.gmra.mxu1 %v1395_v19  ;;  %v1401_v48 = vsel %vm1362_vm7, %v1399_v29, %v1400_v34  ;;  %v1266_v19 = vld [vmem:[#allocation2 + $0x140] sm:$0xfc]  ;;  %v1721_v34 = vld [vmem:[#allocation2 + $0x108] sm:$0xff] }
 0x12f   :  { %v1166_v16 = vpop.f32.mrf.mxu3  ;;  %v1411_v21 = vrot.slane %v1266_v19, 2 }
 0x130   :  { %v9634_v22 = vadd.f32 %v1166_v16, %v1101_v14  ;;  %v1265_v14 = vld [vmem:[#allocation2 + $0xf8] sm:$0x3]  ;;  %v1268_v16 = vld [vmem:[#allocation2 + $0x150] sm:$0x3] }
 0x132   :  { %v9639_v37 = vpop.f32.mrf.mxu0 }
 0x133   :  { %8768 = vmatmul.msk.f32.gmra.mxu2 %vm75_vm0, %v9448_v5  ;;  %v9642_v2 = vpop.f32.mrf.mxu1  ;;  %v1264_v5 = vld [vmem:[#allocation2 + $0xf0] sm:$0x3] }
 0x134   :  { %8752 = vmatmul.msk.f32.gmra.mxu3 %vm75_vm0, %v1398_v35  ;;  %v1406_v58 = vrot.slane %v1264_v5, 2  ;;  %v1412_v35 = vrot.slane %v1268_v16, 2  ;;  %v1415_v5 = vrot.slane %v1269_v25, 2  ;;  %v2247_v16 = vld [vmem:[#allocation7 + $0x2a8] sm:$0xff] }
 0x135   :  { %1857 = vmatmul.f32.gmra.mxu0 %v9460_v27 }
 0x136   :  { %v1104_v44 = vpop.f32.mrf.mxu2  ;;  %1578 = vmatmul.f32.gmra.mxu1 %v1401_v48  ;;  %v1407_v20 = vsel %vm1362_vm7, %v1405_v26, %v1406_v58  ;;  %v1413_v53 = vsel %vm1362_vm7, %v1411_v21, %v1412_v35  ;;  %v1416_v13 = vsel %vm1362_vm7, %v1414_v54, %v1415_v5  ;;  %v2726_v35 = vld [vmem:[#allocation7 + $0x388] sm:$0xff] }
 0x137   :  { %v1169_v51 = vpop.f32.mrf.mxu3 }
 0x138   :  { %v9646_v41 = vadd.f32 %v1169_v51, %v1104_v44  ;;  %v2248_v44 = vld [vmem:[#allocation7 + $0x2b0] sm:$0xff] }
 0x139   :  { %2303 = vmatpush.msra.mxu1 %v2248_v44  ;;  %v1274_v44 = vld [vmem:[#allocation2 + $0x180] sm:$0xfc] }
 0x13a   :  { %v9651_v61 = vpop.f32.mrf.mxu0  ;;  %v1423_v54 = vrot.slane %v1274_v44, 2 }
 0x13b   :  { %8769 = vmatmul.msk.f32.gmra.mxu2 %vm75_vm0, %v9463_v28  ;;  %v9654_v27 = vpop.f32.mrf.mxu1  ;;  %v1409_v28 = vrot.slane %v1265_v14, 2  ;;  %v1417_v14 = vrot.slane %v1270_v59, 2  ;;  %2304 = vmatpush.msra.mxu1 %v2247_v16  ;;  %v2724_v59 = vld [vmem:[#allocation7 + $0x378] sm:$0xff]  ;;  %v2723_v16 = vld [vmem:[#allocation7 + $0x370] sm:$0xff] }
 0x13c   :  { %8753 = vmatmul.msk.f32.gmra.mxu3 %vm75_vm0, %v1404_v60  ;;  %v1272_v60 = vld [vmem:[#allocation2 + $0x170] sm:$0x3] }
 0x13d   :  { %1860 = vmatmul.f32.gmra.mxu0 %v1720_v3  ;;  %v1410_v48 = vsel %vm1362_vm7, %v1408_v49, %v1409_v28  ;;  %v1418_v19 = vrot.slane %v1272_v60, 2  ;;  %v1273_v49 = vld [vmem:[#allocation2 + $0x178] sm:$0x3]  ;;  %v2727_v28 = vld [vmem:[#allocation7 + $0x390] sm:$0xff] }
 0x13e   :  { %v1107_v17 = vpop.f32.mrf.mxu2  ;;  %1581 = vmatmul.f32.gmra.mxu1 %v1407_v20  ;;  %v1421_v25 = vrot.slane %v1273_v49, 2 }
 0x13f   :  { %v1172_v7 = vpop.f32.mrf.mxu3  ;;  %v1419_v21 = vsel %vm1362_vm7, %v1417_v14, %v1418_v19  ;;  %v1275_v14 = vld [vmem:[#allocation2 + $0x188] sm:$0xfc]  ;;  %v1277_v19 = vld [vmem:[#allocation2 + $0x198] sm:$0x3] }
 0x140   :  { %v9657_v29 = vadd.f32 %v1172_v7, %v1107_v17  ;;  %v2728_v17 = vld [vmem:[#allocation7 + $0x398] sm:$0xff]  ;;  %v1271_v7 = vld [vmem:[#allocation2 + $0x168] sm:$0xfc]  ;;  %v1427_v44 = vrot.slane %v1277_v19, 2 }
 0x141   :  { %2765 = vmatpush.msra.mxu0 %v2728_v17  ;;  %v256_v17 = vpop.permute.xlu2 %255  ;;  %v1279_v19 = vld [vmem:[#allocation2 + $0x1a8] sm:$0xfc] }
 0x142   :  { %v9661_v51 = vpop.f32.mrf.mxu0  ;;  %v305_v49 = vsel %vm273_vm4, %v256_v17, 0.0 }
 0x143   :  { %8770 = vmatmul.msk.f32.gmra.mxu2 %vm75_vm0, %v1721_v34  ;;  %v9664_v52 = vpop.f32.mrf.mxu1  ;;  %2766 = vmatpush.msra.mxu0 %v2727_v28 }
 0x144   :  { %8754 = vmatmul.msk.f32.gmra.mxu3 %vm75_vm0, %v1410_v48  ;;  %v1276_v48 = vld [vmem:[#allocation2 + $0x190] sm:$0x3] }
 0x145   :  { %1863 = vmatmul.f32.gmra.mxu0 %v9483_v43  ;;  %v1424_v5 = vrot.slane %v1276_v48, 2  ;;  %v1280_v48 = vld [vmem:[#allocation2 + $0x1b0] sm:$0x3] }
 0x146   :  { %v1110_v26 = vpop.f32.mrf.mxu2  ;;  %1584 = vmatmul.f32.gmra.mxu1 %v1413_v53  ;;  %2767 = vmatpush.msra.mxu0 %v2726_v35  ;;  %v369_v35 = vrot.slane %v305_v49, 7  ;;  %v2732_v49 = vld [vmem:[#allocation7 + $0x3b8] sm:$0xff] }
 0x147   :  { %v1175_v58 = vpop.f32.mrf.mxu3  ;;  %2842 = vmatpush.msra.mxu2 %v2732_v49  ;;  %v2715_v49 = vld [vmem:[#allocation7 + $0x330] sm:$0xff] }
 0x148   :  { %v9668_v3 = vadd.f32 %v1175_v58, %v1110_v26  ;;  %v2725_v26 = vld [vmem:[#allocation7 + $0x380] sm:$0xff]  ;;  %465 = vst.msk [vmem:[#allocation2 + $0x248] sm:$0xfe] %vm403_vm5, %v369_v35 }
 0x149   :  { %v2246_v58 = vld [vmem:[#allocation7 + $0x2a0] sm:$0xff]  ;;  %2768 = vmatpush.msra.mxu0 %v2725_v26  ;;  %467 = vst.msk [vmem:[#allocation2 + $0x258] sm:$0x1] %vm406_vm6, %v369_v35 }
 0x14a   :  { %v9673_v20 = vpop.f32.mrf.mxu0  ;;  %2305 = vmatpush.msra.mxu1 %v2246_v58 }
 0x14b   :  { %8771 = vmatmul.msk.f32.gmra.mxu2 %vm75_vm0, %v9487_v9  ;;  %v9676_v43 = vpop.f32.mrf.mxu1  ;;  %v1420_v9 = vrot.slane %v1271_v7, 2  ;;  %2769 = vmatpush.msra.mxu0 %v2724_v59  ;;  %v289_v7 = vsel %vm273_vm4, 0.0, %v256_v17  ;;  %v2720_v59 = vld [vmem:[#allocation7 + $0x358] sm:$0xff] }
 0x14c   :  { %8755 = vmatmul.msk.f32.gmra.mxu3 %vm75_vm0, %v1416_v13  ;;  %v1281_v17 = vld [vmem:[#allocation2 + $0x1b8] sm:$0x3] }
 0x14d   :  { %1866 = vmatmul.f32.gmra.mxu0 %v9497_v36  ;;  %v1422_v60 = vsel %vm1362_vm7, %v1420_v9, %v1421_v25  ;;  %v1426_v25 = vrot.slane %v1275_v14, 2  ;;  %v1433_v35 = vrot.slane %v1281_v17, 2  ;;  %v1283_v17 = vld [vmem:[#allocation2 + $0x1c8] sm:$0xfc] }
 0x14e   :  { %v1113_v34 = vpop.f32.mrf.mxu2  ;;  %1587 = vmatmul.f32.gmra.mxu1 %v1419_v21  ;;  %v368_v21 = vrot.slane %v289_v7, 7  ;;  %2770 = vmatpush.msra.mxu0 %v2723_v16  ;;  %v2719_v7 = vld [vmem:[#allocation7 + $0x350] sm:$0xff] }
 0x14f   :  { %v1178_v40 = vpop.f32.mrf.mxu3 }
 0x150   :  { %v9680_v53 = vadd.f32 %v1178_v40, %v1113_v34  ;;  %v1278_v34 = vld [vmem:[#allocation2 + $0x1a0] sm:$0xfc]  ;;  %v2722_v40 = vld [vmem:[#allocation7 + $0x368] sm:$0xff]  ;;  %464 = vst [vmem:[#allocation2 + $0x240] sm:$0xfe] %v368_v21 }
 0x151   :  { %v1429_v58 = vrot.slane %v1278_v34, 2  ;;  %2771 = vmatpush.msra.mxu0 %v2722_v40  ;;  %466 = vst [vmem:[#allocation2 + $0x250] sm:$0x1] %v368_v21  ;;  %v1432_v21 = vrot.slane %v1279_v19, 2  ;;  %v1282_v40 = vld [vmem:[#allocation2 + $0x1c0] sm:$0xfc] }
 0x152   :  { %v9685_v36 = vpop.f32.mrf.mxu0 }
 0x153   :  { %8772 = vmatmul.msk.f32.gmra.mxu2 %vm75_vm0, %v9501_v38  ;;  %v9688_v13 = vpop.f32.mrf.mxu1  ;;  %v1425_v38 = vsel %vm1362_vm7, %v1423_v54, %v1424_v5  ;;  %v1430_v54 = vrot.slane %v1280_v48, 2  ;;  %v2245_v5 = vld [vmem:[#allocation7 + $0x298] sm:$0xff] }
 0x154   :  { %8756 = vmatmul.msk.f32.gmra.mxu3 %vm75_vm0, %v1422_v60  ;;  %v1428_v60 = vsel %vm1362_vm7, %v1426_v25, %v1427_v44  ;;  %2306 = vmatpush.msra.mxu1 %v2245_v5  ;;  %v1435_v44 = vrot.slane %v1282_v40, 2  ;;  %v2717_v5 = vld [vmem:[#allocation7 + $0x340] sm:$0xff] }
 0x155   :  { %1869 = vmatmul.f32.gmra.mxu0 %v9511_v63  ;;  %v2721_v63 = vld [vmem:[#allocation7 + $0x360] sm:$0xff] }
 0x156   :  { %v1116_v28 = vpop.f32.mrf.mxu2  ;;  %1590 = vmatmul.f32.gmra.mxu1 %v1425_v38  ;;  %2772 = vmatpush.msra.mxu0 %v2721_v63  ;;  %v1431_v38 = vsel %vm1362_vm7, %v1429_v58, %v1430_v54  ;;  %v2731_v63 = vld [vmem:[#allocation7 + $0x3b0] sm:$0xff]  ;;  %v2730_v58 = vld [vmem:[#allocation7 + $0x3a8] sm:$0xff] }
 0x157   :  { %v1181_v9 = vpop.f32.mrf.mxu3  ;;  %v2244_v54 = vld [vmem:[#allocation7 + $0x290] sm:$0xff]  ;;  %2843 = vmatpush.msra.mxu2 %v2731_v63 }
 0x158   :  { %v9694_v26 = vadd.f32 %v1181_v9, %v1116_v28  ;;  %2773 = vmatpush.msra.mxu0 %v2720_v59  ;;  %v1284_v9 = vld [vmem:[#allocation2 + $0x1d0] sm:$0x3]  ;;  %v1434_v59 = vsel %vm1362_vm7, %v1432_v21, %v1433_v35  ;;  %2307 = vmatpush.msra.mxu1 %v2244_v54  ;;  %v1438_v35 = vrot.slane %v1283_v17, 2 }
 0x159   :  { %v1436_v48 = vrot.slane %v1284_v9, 2  ;;  %2844 = vmatpush.msra.mxu2 %v2730_v58  ;;  %v1286_v9 = vld [vmem:[#allocation2 + $0x1e0] sm:$0xfc]  ;;  %v1287_v58 = vld [vmem:[#allocation2 + $0x1e8] sm:$0xfc] }
 0x15a   :  { %v9700_v14 = vpop.f32.mrf.mxu0  ;;  %2774 = vmatpush.msra.mxu0 %v2719_v7  ;;  %v1285_v7 = vld [vmem:[#allocation2 + $0x1d8] sm:$0x3] }
 0x15b   :  { %8773 = vmatmul.msk.f32.gmra.mxu2 %vm75_vm0, %v9515_v1  ;;  %v9704_v16 = vpop.f32.mrf.mxu1  ;;  %v2718_v1 = vld [vmem:[#allocation7 + $0x348] sm:$0xff]  ;;  %v1439_v40 = vrot.slane %v1285_v7, 2  ;;  %v1289_v7 = vld [vmem:[#allocation2 + $0x1f8] sm:$0x3] }
 0x15c   :  { %8757 = vmatmul.msk.f32.gmra.mxu3 %vm75_vm0, %v1428_v60  ;;  %2775 = vmatpush.msra.mxu0 %v2718_v1  ;;  %v2716_v60 = vld [vmem:[#allocation7 + $0x338] sm:$0xff] }
 0x15d   :  { %1872 = vmatmul.f32.gmra.mxu0 %v9522_v23 }
 0x15e   :  { %v1119_v28 = vpop.f32.mrf.mxu2  ;;  %1593 = vmatmul.f32.gmra.mxu1 %v1431_v38  ;;  %2776 = vmatpush.msra.mxu0 %v2717_v5  ;;  %v2243_v38 = vld [vmem:[#allocation7 + $0x288] sm:$0xff]  ;;  %v1288_v5 = vld [vmem:[#allocation2 + $0x1f0] sm:$0x3] }
 0x15f   :  { %v1184_v34 = vpop.f32.mrf.mxu3  ;;  %2308 = vmatpush.msra.mxu1 %v2243_v38  ;;  %v1442_v54 = vrot.slane %v1288_v5, 2 }
 0x160   :  { %v9708_v25 = vadd.f32 %v1184_v34, %v1119_v28  ;;  %2777 = vmatpush.msra.mxu0 %v2716_v60  ;;  %v2729_v28 = vld [vmem:[#allocation7 + $0x3a0] sm:$0xff]  ;;  %v2714_v34 = vld [vmem:[#allocation7 + $0x328] sm:$0xff] }
 0x161   :  { %2845 = vmatpush.msra.mxu2 %v2729_v28  ;;  %v2242_v60 = vld [vmem:[#allocation7 + $0x280] sm:$0xff]  ;;  %v2260_v28 = vld [vmem:[#allocation7 + $0x310] sm:$0xff] }
 0x162   :  { %v9713_v23 = vpop.f32.mrf.mxu0  ;;  %2778 = vmatpush.msra.mxu0 %v2715_v49  ;;  %2309 = vmatpush.msra.mxu1 %v2242_v60  ;;  %v2261_v49 = vld [vmem:[#allocation7 + $0x318] sm:$0xff] }
 0x163   :  { %8774 = vmatmul.msk.f32.gmra.mxu2 %vm75_vm0, %v9524_v24  ;;  %11523 = vst [vmem:[#allocation14_spill] sm:$0xff] %v9713_v23  ;;  %v9716_v19 = vpop.f32.mrf.mxu1  ;;  %v1437_v24 = vsel %vm1362_vm7, %v1435_v44, %v1436_v48  ;;  %v2713_v44 = vld [vmem:[#allocation7 + $0x320] sm:$0xff]  ;;  %2371 = vmatpush.msrb.mxu3 %v2261_v49 }
 0x164   :  { %8758 = vmatmul.msk.f32.gmra.mxu3 %vm75_vm0, %v1434_v59  ;;  %11524 = vst [vmem:[#allocation15_spill] sm:$0xff] %v9716_v19  ;;  %2779 = vmatpush.msra.mxu0 %v2714_v34  ;;  %v1441_v59 = vrot.slane %v1286_v9, 2  ;;  %v1445_v34 = vrot.slane %v1289_v7, 2 }
 0x165   :  { %1875 = vmatmul.f32.gmra.mxu0 %v9532_v55  ;;  %v1440_v55 = vsel %vm1362_vm7, %v1438_v35, %v1439_v40  ;;  %v1292_v35 = vld [vmem:[#allocation2 + $0x210] sm:$0x3]  ;;  %2372 = vmatpush.msrb.mxu3 %v2260_v28 }
 0x166   :  { %v1122_v1 = vpop.f32.mrf.mxu2  ;;  %1596 = vmatmul.f32.gmra.mxu1 %v1437_v24  ;;  %2780 = vmatpush.msra.mxu0 %v2713_v44  ;;  %v1448_v5 = vrot.slane %v1292_v35, 2 }
 0x167   :  { %v1187_v21 = vpop.f32.mrf.mxu3 }
 0x168   :  { %v9720_v63 = vadd.f32 %v1187_v21, %v1122_v1  ;;  %v1443_v1 = vsel %vm1362_vm7, %v1441_v59, %v1442_v54  ;;  %v1290_v21 = vld [vmem:[#allocation2 + $0x200] sm:$0xfc]  ;;  %v1291_v59 = vld [vmem:[#allocation2 + $0x208] sm:$0xfc]  ;;  %v1293_v54 = vld [vmem:[#allocation2 + $0x218] sm:$0x3] }
 0x169   :  { %v1447_v9 = vrot.slane %v1290_v21, 2 }
 0x16a   :  { %v9725_v48 = vpop.f32.mrf.mxu0 }
 0x16b   :  { %8775 = vmatmul.msk.f32.gmra.mxu2 %vm75_vm0, %v9535_v56  ;;  %11525 = vst [vmem:[#allocation16_spill] sm:$0xff] %v9725_v48  ;;  %v9728_v17 = vpop.f32.mrf.mxu1  ;;  %v1444_v56 = vrot.slane %v1287_v58, 2  ;;  %v2258_v58 = vld [vmem:[#allocation7 + $0x300] sm:$0xff]  ;;  %v1449_v49 = vsel %vm1362_vm7, %v1447_v9, %v1448_v5  ;;  %v2459_v5 = vld [vmem:[#allocation2 + $0x38] sm:$0x3] }
 0x16c   :  { %8759 = vmatmul.msk.f32.gmra.mxu3 %vm75_vm0, %v1440_v55  ;;  %11526 = vst [vmem:[#allocation17_spill] sm:$0xff] %v9728_v17  ;;  %v2259_v55 = vld [vmem:[#allocation7 + $0x308] sm:$0xff]  ;;  %v1736_v9 = vld [vmem:[#allocation2 + $0x240] sm:$0xff] }
 0x16d   :  { %1878 = vmatmul.f32.gmra.mxu0 %v9542_v10  ;;  %v1446_v60 = vsel %vm1362_vm7, %v1444_v56, %v1445_v34  ;;  %2373 = vmatpush.msrb.mxu3 %v2259_v55  ;;  %v1297_v55 = vld [vmem:[#allocation2 + $0x238] sm:$0x3] }
 0x16e   :  { %v1125_v38 = vpop.f32.mrf.mxu2  ;;  %1599 = vmatmul.f32.gmra.mxu1 %v1443_v1  ;;  %v1294_v1 = vld [vmem:[#allocation2 + $0x220] sm:$0xfc] }
 0x16f   :  { %v1190_v24 = vpop.f32.mrf.mxu3  ;;  %2374 = vmatpush.msrb.mxu3 %v2258_v58  ;;  %v1453_v34 = vrot.slane %v1294_v1, 2  ;;  %v2992_v58 = vld [vmem:[#allocation7 + $0x438] sm:$0xff] }
 0x170   :  { %v9732_v40 = vadd.f32 %v1190_v24, %v1125_v38  ;;  %v1450_v38 = vrot.slane %v1291_v59, 2  ;;  %v1296_v24 = vld [vmem:[#allocation2 + $0x230] sm:$0x3]  ;;  %3045 = vmatpush.msrb.mxu1 %v2992_v58 }
 0x171   :  { %v1454_v21 = vrot.slane %v1296_v24, 2 }
 0x172   :  { %11527 = vst [vmem:[#allocation18_spill] sm:$0xff] %v9732_v40  ;;  %v9737_v44 = vpop.f32.mrf.mxu0  ;;  %v1995_v40 = vld [vmem:[#allocation2 + $0x70] sm:$0x1] }
 0x173   :  { %8776 = vmatmul.msk.f32.gmra.mxu2 %vm75_vm0, %v9545_v11  ;;  %11528 = vst [vmem:[#allocation19_spill] sm:$0xff] %v9737_v44  ;;  %v9740_v10 = vpop.f32.mrf.mxu1  ;;  %v1451_v11 = vrot.slane %v1293_v54, 2  ;;  %v1295_v54 = vld [vmem:[#allocation2 + $0x228] sm:$0xfc] }
 0x174   :  { %8760 = vmatmul.msk.f32.gmra.mxu3 %vm75_vm0, %v1446_v60  ;;  %11529 = vst [vmem:[#allocation20_spill] sm:$0xff] %v9740_v10  ;;  %v1456_v24 = vrot.slane %v1295_v54, 2  ;;  %v1985_v10 = vld [vmem:[#allocation2 + $0x20] sm:$0xfe]  ;;  %v2991_v54 = vld [vmem:[#allocation7 + $0x430] sm:$0xff] }
 0x175   :  { %1881 = vmatmul.f32.gmra.mxu0 %v9553_v32  ;;  %v1452_v35 = vsel %vm1362_vm7, %v1450_v38, %v1451_v11  ;;  %v2457_v32 = vld [vmem:[#allocation2 + $0x28] sm:$0xfc]  ;;  %v2588_v38 = vrot.slane %v2459_v5, 2  ;;  %v2458_v11 = vld [vmem:[#allocation2 + $0x30] sm:$0x3]  ;;  %v2113_v17 = vrot.slane %v1985_v10, 1  ;;  %3046 = vmatpush.msrb.mxu1 %v2991_v54 }
 0x176   :  { %v1128_v7 = vpop.f32.mrf.mxu2  ;;  %1602 = vmatmul.f32.gmra.mxu1 %v1449_v49  ;;  %v1455_v49 = vsel %vm1362_vm7, %v1453_v34, %v1454_v21 }
 0x177   :  { %v1193_v28 = vpop.f32.mrf.mxu3 }
 0x178   :  { %v9744_v56 = vadd.f32 %v1193_v28, %v1128_v7  ;;  %v2587_v28 = vrot.slane %v2457_v32, 2  ;;  %v2463_v32 = vld [vmem:[#allocation2 + $0x58] sm:$0x3] }
 0x17a   :  { %11530 = vst [vmem:[#allocation21_spill] sm:$0xff] %v9744_v56  ;;  %v9749_v60 = vpop.f32.mrf.mxu0  ;;  %v2585_v56 = vrot.slane %v2458_v11, 2  ;;  %v2589_v58 = vsel %vm1362_vm7, %v2587_v28, %v2588_v38  ;;  %v2594_v28 = vrot.slane %v2463_v32, 2  ;;  %v2460_v38 = vld [vmem:[#allocation2 + $0x40] sm:$0xfc]  ;;  %v683_v32 = vadd.f32 %v9563_v46, %v9559_v45 }
 0x17b   :  { %8777 = vmatmul.msk.f32.gmra.mxu2 %vm75_vm0, %v9556_v33  ;;  %11531 = vst [vmem:[#allocation22_spill] sm:$0xff] %v9749_v60  ;;  %v9752_v59 = vpop.f32.mrf.mxu1  ;;  %v2456_v33 = vld [vmem:[#allocation2 + $0x20] sm:$0xfc]  ;;  %v1457_v60 = vrot.slane %v1297_v55, 2  ;;  %v2466_v46 = vld [vmem:[#allocation2 + $0x70] sm:$0x3] }
 0x17c   :  { %8761 = vmatmul.msk.f32.gmra.mxu3 %vm75_vm0, %v1452_v35  ;;  %11532 = vst [vmem:[#allocation23_spill] sm:$0xff] %v9752_v59  ;;  %v1987_v35 = vld [vmem:[#allocation2 + $0x30] sm:$0x1]  ;;  %v2584_v59 = vrot.slane %v2456_v33, 2  ;;  %v1989_v11 = vld [vmem:[#allocation2 + $0x40] sm:$0xfe] }
 0x17d   :  { %1884 = vmatmul.f32.gmra.mxu0 %v1736_v9  ;;  %v2114_v48 = vrot.slane %v1987_v35, 1  ;;  %v1458_v34 = vsel %vm1362_vm7, %v1456_v24, %v1457_v60  ;;  %v2461_v9 = vld [vmem:[#allocation2 + $0x48] sm:$0xfc]  ;;  %v2462_v60 = vld [vmem:[#allocation2 + $0x50] sm:$0x3] }
 0x17e   :  { %v1131_v7 = vpop.f32.mrf.mxu2  ;;  %1605 = vmatmul.f32.gmra.mxu1 %v1455_v49  ;;  %v2586_v55 = vsel %vm1362_vm7, %v2584_v59, %v2585_v56  ;;  %v2593_v10 = vrot.slane %v2461_v9, 2  ;;  %v1737_v35 = vld [vmem:[#allocation2 + $0x248] sm:$0xff]  ;;  %v2119_v59 = vrot.slane %v1989_v11, 1  ;;  %v2467_v9 = vld [vmem:[#allocation2 + $0x78] sm:$0x3] }
 0x17f   :  { %v1196_v1 = vpop.f32.mrf.mxu3  ;;  %v2115_v49 = vsel %vm890_vm1, %v2113_v17, %v2114_v48  ;;  %v2465_v17 = vld [vmem:[#allocation2 + $0x68] sm:$0xfc]  ;;  %v2464_v45 = vld [vmem:[#allocation2 + $0x60] sm:$0xfc] }
 0x180   :  { %v9755_v44 = vadd.f32 %v1196_v1, %v1131_v7  ;;  %v1991_v1 = vld [vmem:[#allocation2 + $0x50] sm:$0x1]  ;;  %v2595_v56 = vsel %vm1362_vm7, %v2593_v10, %v2594_v28  ;;  %v2990_v10 = vld [vmem:[#allocation7 + $0x428] sm:$0xff]  ;;  %v2599_v11 = vrot.slane %v2465_v17, 2 }
 0x181   :  { %v2120_v54 = vrot.slane %v1991_v1, 1  ;;  %3047 = vmatpush.msrb.mxu1 %v2990_v10  ;;  %v2600_v1 = vrot.slane %v2467_v9, 2 }
 0x182   :  { %11533 = vst [vmem:[#allocation24_spill] sm:$0xff] %v9755_v44  ;;  %v1840_v21 = vpop.f32.mrf.mxu0  ;;  %v2996_v44 = vld [vmem:[#allocation7 + $0x458] sm:$0xff] }
 0x183   :  { %8795 = vmatmul.msk.f32.vlgmr.msra.gmra.mxu2 %vm75_vm0, %v2589_v58  ;;  %v1561_v5 = vpop.f32.mrf.mxu1  ;;  %v2590_v58 = vrot.slane %v2460_v38, 2  ;;  %v1988_v38 = vld [vmem:[#allocation2 + $0x38] sm:$0x1]  ;;  %v2601_v10 = vsel %vm1362_vm7, %v2599_v11, %v2600_v1  ;;  %v2468_v1 = vld [vmem:[#allocation2 + $0x80] sm:$0xfc] }
 0x184   :  { %8762 = vmatmul.msk.f32.gmra.mxu3 %vm75_vm0, %v1458_v34  ;;  %v2591_v34 = vrot.slane %v2462_v60, 2 }
 0x185   :  { %2781 = vmatmul.f32.vlgmr.msra.gmra.mxu0 %v2586_v55  ;;  %v1155_v55 = vadd.f32 %v9577_v12, %v9575_v8 }
 0x186   :  { %v1134_v7 = vpop.f32.mrf.mxu2  ;;  %2310 = vmatmul.f32.vlgmr.msra.gmra.mxu1 %v2115_v49  ;;  %v1986_v49 = vld [vmem:[#allocation2 + $0x28] sm:$0xfe]  ;;  %v2592_v28 = vsel %vm1362_vm7, %v2590_v58, %v2591_v34  ;;  %v2596_v58 = vrot.slane %v2464_v45, 2  ;;  %v2470_v45 = vld [vmem:[#allocation2 + $0x90] sm:$0x3] }
 0x187   :  { %v1199_v33 = vpop.f32.mrf.mxu3  ;;  %v2116_v12 = vrot.slane %v1986_v49, 1  ;;  %v1202_v19 = vadd.f32 %v1155_v55, %v683_v32  ;;  %v2471_v49 = vld [vmem:[#allocation2 + $0x98] sm:$0x3]  ;;  %v2989_v55 = vld [vmem:[#allocation7 + $0x420] sm:$0xff] }
 0x188   :  { %v9763_v24 = vadd.f32 %v1199_v33, %v1134_v7  ;;  %v2121_v33 = vsel %vm890_vm1, %v2119_v59, %v2120_v54  ;;  %v2126_v54 = vrot.slane %v1995_v40, 1  ;;  %v1992_v32 = vld [vmem:[#allocation2 + $0x58] sm:$0x1]  ;;  %3048 = vmatpush.msrb.mxu1 %v2989_v55  ;;  %v686_v40 = vadd.f32 %v9573_v6, %v9570_v0 }
 0x189   :  { %v2606_v11 = vrot.slane %v2471_v49, 2  ;;  %v2603_v0 = vrot.slane %v2470_v45, 2  ;;  %v2473_v49 = vld [vmem:[#allocation2 + $0xa8] sm:$0xfc]  ;;  %v1996_v55 = vld [vmem:[#allocation2 + $0x78] sm:$0x1] }
 0x18a   :  { %11534 = vst [vmem:[#allocation25_spill] sm:$0xff] %v9763_v24  ;;  %v1843_v48 = vpop.f32.mrf.mxu0  ;;  %v1993_v24 = vld [vmem:[#allocation2 + $0x60] sm:$0xfe]  ;;  %v2474_v45 = vld [vmem:[#allocation2 + $0xb0] sm:$0x3] }
 0x18b   :  { %8796 = vmatmul.msk.f32.gmra.mxu2 %vm75_vm0, %v2595_v56  ;;  %v1564_v7 = vpop.f32.mrf.mxu1  ;;  %v2125_v59 = vrot.slane %v1993_v24, 1 }
 0x18c   :  { %8778 = vmatmul.msk.f32.vlgmr.msra.gmra.mxu3 %vm75_vm0, %v1737_v35  ;;  %v2117_v35 = vrot.slane %v1988_v38, 1 }
 0x18d   :  { %3122 = vmatpush.msra.mxu3 %v2996_v44  ;;  %2784 = vmatmul.f32.gmra.mxu0 %v2592_v28  ;;  %v2597_v44 = vrot.slane %v2466_v46, 2  ;;  %v2469_v28 = vld [vmem:[#allocation2 + $0x88] sm:$0xfc] }
 0x18e   :  { %v1905_v60 = vpop.f32.mrf.mxu2  ;;  %2313 = vmatmul.f32.gmra.mxu1 %v2121_v33  ;;  %v2118_v17 = vsel %vm890_vm1, %v2116_v12, %v2117_v35  ;;  %v2605_v33 = vrot.slane %v2469_v28, 2  ;;  %v2123_v12 = vrot.slane %v1992_v32, 1  ;;  %v1997_v35 = vld [vmem:[#allocation2 + $0x80] sm:$0xfe] }
 0x18f   :  { %v1626_v56 = vpop.f32.mrf.mxu3  ;;  %v1906_v8 = vadd.f32 %v1905_v60, %v1840_v21  ;;  %v1990_v21 = vld [vmem:[#allocation2 + $0x48] sm:$0xfe]  ;;  %v2127_v60 = vsel %vm890_vm1, %v2125_v59, %v2126_v54  ;;  %v2131_v54 = vrot.slane %v1997_v35, 1  ;;  %v2001_v35 = vld [vmem:[#allocation2 + $0xa0] sm:$0xfe] }
 0x190   :  { %v1627_v23 = vadd.f32 %v1626_v56, %v1561_v5  ;;  %v2607_v59 = vsel %vm1362_vm7, %v2605_v33, %v2606_v11  ;;  %v2611_v33 = vrot.slane %v2473_v49, 2 }
 0x192   :  { %v1674_v34 = vadd.f32 %v1627_v23, %v1202_v19  ;;  %v1846_v9 = vpop.f32.mrf.mxu0  ;;  %v2995_v23 = vld [vmem:[#allocation7 + $0x450] sm:$0xff]  ;;  %v2598_v19 = vsel %vm1362_vm7, %v2596_v58, %v2597_v44  ;;  %v1203_v44 = vadd.f32 %v9592_v50, %v686_v40  ;;  %v689_v40 = vadd.f32 %v9586_v31, %v9584_v30 }
 0x193   :  { %8797 = vmatmul.msk.f32.gmra.mxu2 %vm75_vm0, %v2601_v10  ;;  %v1567_v5 = vpop.f32.mrf.mxu1  ;;  %3123 = vmatpush.msra.mxu3 %v2995_v23  ;;  %v1999_v58 = vld [vmem:[#allocation2 + $0x90] sm:$0x1]  ;;  %v2602_v10 = vrot.slane %v2468_v1, 2  ;;  %v2988_v23 = vld [vmem:[#allocation7 + $0x418] sm:$0xff]  ;;  %v2472_v1 = vld [vmem:[#allocation2 + $0xa0] sm:$0xfc] }
 0x194   :  { %v9777_v38 = vadd.f32 %v1906_v8, %v1674_v34  ;;  %8779 = vmatmul.msk.f32.vlgmr.msrb.gmra.mxu3 %vm75_vm0, %v2118_v17  ;;  %v2122_v8 = vrot.slane %v1990_v21, 1  ;;  %v2132_v17 = vrot.slane %v1999_v58, 1  ;;  %v2475_v21 = vld [vmem:[#allocation2 + $0xb8] sm:$0x3]  ;;  %3049 = vmatpush.msrb.mxu1 %v2988_v23  ;;  %v2003_v58 = vld [vmem:[#allocation2 + $0xb0] sm:$0x1]  ;;  %v692_v23 = vadd.f32 %v9606_v15, %v9602_v4 }
 0x195   :  { %2787 = vmatmul.f32.gmra.mxu0 %v2598_v19  ;;  %v2604_v19 = vsel %vm1362_vm7, %v2602_v10, %v2603_v0  ;;  %v2612_v11 = vrot.slane %v2475_v21, 2  ;;  %v2608_v10 = vrot.slane %v2472_v1, 2  ;;  %v2609_v30 = vrot.slane %v2474_v45, 2  ;;  %v2000_v21 = vld [vmem:[#allocation2 + $0x98] sm:$0x1] }
 0x196   :  { %v1908_v24 = vpop.f32.mrf.mxu2  ;;  %2316 = vmatmul.f32.gmra.mxu1 %v2127_v60  ;;  %v2124_v28 = vsel %vm890_vm1, %v2122_v8, %v2123_v12  ;;  %v2133_v60 = vsel %vm890_vm1, %v2131_v54, %v2132_v17  ;;  %v2129_v12 = vrot.slane %v1996_v55, 1  ;;  %v2477_v17 = vld [vmem:[#allocation2 + $0xc8] sm:$0xfc]  ;;  %v2987_v55 = vld [vmem:[#allocation7 + $0x410] sm:$0xff] }
 0x197   :  { %v1629_v46 = vpop.f32.mrf.mxu3  ;;  %v1909_v56 = vadd.f32 %v1908_v24, %v1843_v48  ;;  %v2613_v0 = vsel %vm1362_vm7, %v2611_v33, %v2612_v11  ;;  %v2476_v33 = vld [vmem:[#allocation2 + $0xc0] sm:$0xfc]  ;;  %v2478_v11 = vld [vmem:[#allocation2 + $0xd0] sm:$0x3]  ;;  %3050 = vmatpush.msrb.mxu1 %v2987_v55 }
 0x198   :  { %v1630_v34 = vadd.f32 %v1629_v46, %v1564_v7  ;;  %v1994_v7 = vld [vmem:[#allocation2 + $0x68] sm:$0xfe]  ;;  %v2614_v4 = vrot.slane %v2476_v33, 2  ;;  %v2615_v15 = vrot.slane %v2478_v11, 2 }
 0x199   :  { %v2128_v8 = vrot.slane %v1994_v7, 1  ;;  %v2610_v7 = vsel %vm1362_vm7, %v2608_v10, %v2609_v30 }
 0x19a   :  { %v1675_v6 = vadd.f32 %v1630_v34, %v1203_v44  ;;  %v1849_v48 = vpop.f32.mrf.mxu0  ;;  %v1204_v44 = vadd.f32 %v9608_v18, %v689_v40 }
 0x19b   :  { %8798 = vmatmul.msk.f32.gmra.mxu2 %vm75_vm0, %v2607_v59  ;;  %v1570_v50 = vpop.f32.mrf.mxu1  ;;  %v2138_v59 = vrot.slane %v2003_v58, 1  ;;  %v2130_v54 = vsel %vm890_vm1, %v2128_v8, %v2129_v12  ;;  %v2005_v8 = vld [vmem:[#allocation2 + $0xc0] sm:$0xfe]  ;;  %v2007_v12 = vld [vmem:[#allocation2 + $0xd0] sm:$0x1] }
 0x19c   :  { %v9788_v32 = vadd.f32 %v1909_v56, %v1675_v6  ;;  %8780 = vmatmul.msk.f32.gmra.mxu3 %vm75_vm0, %v2124_v28  ;;  %v2137_v6 = vrot.slane %v2001_v35, 1  ;;  %v2479_v28 = vld [vmem:[#allocation2 + $0xd8] sm:$0x3]  ;;  %v1205_v35 = vadd.f32 %v9622_v57, %v692_v23  ;;  %v2143_v10 = vrot.slane %v2005_v8, 1 }
 0x19d   :  { %2790 = vmatmul.f32.gmra.mxu0 %v2604_v19  ;;  %v2144_v30 = vrot.slane %v2007_v12, 1  ;;  %v2487_v12 = vld [vmem:[#allocation2 + $0x118] sm:$0x3] }
 0x19e   :  { %v1911_v24 = vpop.f32.mrf.mxu2  ;;  %2319 = vmatmul.f32.gmra.mxu1 %v2133_v60  ;;  %v2139_v40 = vsel %vm890_vm1, %v2137_v6, %v2138_v59  ;;  %v2618_v60 = vrot.slane %v2479_v28, 2  ;;  %v2483_v6 = vld [vmem:[#allocation2 + $0xf8] sm:$0x3]  ;;  %v2616_v28 = vsel %vm1362_vm7, %v2614_v4, %v2615_v15 }
 0x19f   :  { %v1632_v46 = vpop.f32.mrf.mxu3  ;;  %v1912_v56 = vadd.f32 %v1911_v24, %v1846_v9  ;;  %v2617_v24 = vrot.slane %v2477_v17, 2  ;;  %v2986_v17 = vld [vmem:[#allocation7 + $0x408] sm:$0xff]  ;;  %v2624_v23 = vrot.slane %v2483_v6, 2  ;;  %v2486_v6 = vld [vmem:[#allocation2 + $0x110] sm:$0x3] }
 0x1a0   :  { %v1633_v34 = vadd.f32 %v1632_v46, %v1567_v5  ;;  %v1998_v5 = vld [vmem:[#allocation2 + $0x88] sm:$0xfe]  ;;  %3051 = vmatpush.msrb.mxu1 %v2986_v17  ;;  %v698_v17 = vadd.f32 %v9630_v47, %v9627_v62  ;;  %v2627_v62 = vrot.slane %v2486_v6, 2 }
 0x1a1   :  { %v2134_v46 = vrot.slane %v1998_v5, 1  ;;  %v695_v5 = vadd.f32 %v9618_v42, %v9615_v39  ;;  %v2485_v42 = vld [vmem:[#allocation2 + $0x108] sm:$0xfc] }
 0x1a2   :  { %v1676_v31 = vadd.f32 %v1633_v34, %v1204_v44  ;;  %v1852_v9 = vpop.f32.mrf.mxu0  ;;  %v2619_v34 = vsel %vm1362_vm7, %v2617_v24, %v2618_v60 }
 0x1a3   :  { %8799 = vmatmul.msk.f32.gmra.mxu2 %vm75_vm0, %v2613_v0  ;;  %v1573_v18 = vpop.f32.mrf.mxu1  ;;  %v2481_v0 = vld [vmem:[#allocation2 + $0xe8] sm:$0xfc] }
 0x1a4   :  { %v9799_v49 = vadd.f32 %v1912_v56, %v1676_v31  ;;  %8781 = vmatmul.msk.f32.gmra.mxu3 %vm75_vm0, %v2130_v54  ;;  %v2135_v56 = vrot.slane %v2000_v21, 1  ;;  %v2004_v54 = vld [vmem:[#allocation2 + $0xb8] sm:$0x1]  ;;  %v2623_v55 = vrot.slane %v2481_v0, 2  ;;  %v2630_v0 = vrot.slane %v2487_v12, 2 }
 0x1a5   :  { %2793 = vmatmul.f32.gmra.mxu0 %v2610_v7  ;;  %v2145_v7 = vsel %vm890_vm1, %v2143_v10, %v2144_v30  ;;  %v2141_v11 = vrot.slane %v2004_v54, 1  ;;  %v2008_v10 = vld [vmem:[#allocation2 + $0xd8] sm:$0x1]  ;;  %v2484_v30 = vld [vmem:[#allocation2 + $0x100] sm:$0xfc]  ;;  %v2994_v54 = vld [vmem:[#allocation7 + $0x448] sm:$0xff] }
 0x1a6   :  { %v1914_v19 = vpop.f32.mrf.mxu2  ;;  %2322 = vmatmul.f32.gmra.mxu1 %v2139_v40  ;;  %v2136_v31 = vsel %vm890_vm1, %v2134_v46, %v2135_v56  ;;  %v2482_v40 = vld [vmem:[#allocation2 + $0xf0] sm:$0x3]  ;;  %v1206_v46 = vadd.f32 %v9634_v22, %v695_v5  ;;  %v2013_v5 = vld [vmem:[#allocation2 + $0x100] sm:$0xfe]  ;;  %3124 = vmatpush.msra.mxu3 %v2994_v54 }
 0x1a7   :  { %v1635_v1 = vpop.f32.mrf.mxu3  ;;  %v1915_v45 = vadd.f32 %v1914_v19, %v1849_v48  ;;  %v2480_v19 = vld [vmem:[#allocation2 + $0xe0] sm:$0xfc]  ;;  %v2621_v39 = vrot.slane %v2482_v40, 2  ;;  %v1207_v40 = vadd.f32 %v9646_v41, %v698_v17  ;;  %v2489_v41 = vld [vmem:[#allocation2 + $0x168] sm:$0xfc] }
 0x1a8   :  { %v1636_v58 = vadd.f32 %v1635_v1, %v1570_v50  ;;  %v2002_v50 = vld [vmem:[#allocation2 + $0xa8] sm:$0xfe]  ;;  %v2009_v1 = vld [vmem:[#allocation2 + $0xe0] sm:$0xfe]  ;;  %v2620_v8 = vrot.slane %v2480_v19, 2  ;;  %v2147_v19 = vrot.slane %v2008_v10, 1 }
 0x1a9   :  { %v2140_v33 = vrot.slane %v2002_v50, 1  ;;  %v2149_v4 = vrot.slane %v2009_v1, 1  ;;  %v2985_v50 = vld [vmem:[#allocation7 + $0x400] sm:$0xff]  ;;  %v2155_v1 = vrot.slane %v2013_v5, 1 }
 0x1aa   :  { %v1677_v44 = vadd.f32 %v1636_v58, %v1205_v35  ;;  %v9810_v48 = vpop.f32.mrf.mxu0  ;;  %v2625_v58 = vsel %vm1362_vm7, %v2623_v55, %v2624_v23  ;;  %3052 = vmatpush.msrb.mxu1 %v2985_v50  ;;  %v2017_v17 = vld [vmem:[#allocation2 + $0x160] sm:$0xfe] }
 0x1ab   :  { %8800 = vmatmul.msk.f32.gmra.mxu2 %vm75_vm0, %v2619_v34  ;;  %v1576_v57 = vpop.f32.mrf.mxu1  ;;  %v2006_v34 = vld [vmem:[#allocation2 + $0xc8] sm:$0xfe] }
 0x1ac   :  { %v9812_v59 = vadd.f32 %v1915_v45, %v1677_v44  ;;  %8782 = vmatmul.msk.f32.gmra.mxu3 %vm75_vm0, %v2136_v31  ;;  %v2011_v45 = vld [vmem:[#allocation2 + $0xf0] sm:$0x1]  ;;  %v2142_v44 = vsel %vm890_vm1, %v2140_v33, %v2141_v11  ;;  %v2146_v23 = vrot.slane %v2006_v34, 1  ;;  %v2626_v33 = vrot.slane %v2484_v30, 2  ;;  %v2488_v30 = vld [vmem:[#allocation2 + $0x160] sm:$0xfc] }
 0x1ad   :  { %2796 = vmatmul.f32.gmra.mxu0 %v2616_v28  ;;  %v2150_v15 = vrot.slane %v2011_v45, 1  ;;  %v2622_v28 = vsel %vm1362_vm7, %v2620_v8, %v2621_v39  ;;  %v2635_v34 = vrot.slane %v2489_v41, 2 }
 0x1ae   :  { %v1917_v21 = vpop.f32.mrf.mxu2  ;;  %2325 = vmatmul.f32.gmra.mxu1 %v2145_v7  ;;  %v2628_v39 = vsel %vm1362_vm7, %v2626_v33, %v2627_v62  ;;  %v2493_v33 = vld [vmem:[#allocation2 + $0x188] sm:$0xfc]  ;;  %v2495_v62 = vld [vmem:[#allocation2 + $0x198] sm:$0x3] }
 0x1af   :  { %v1638_v24 = vpop.f32.mrf.mxu3  ;;  %v1918_v60 = vadd.f32 %v1917_v21, %v1852_v9  ;;  %v2015_v21 = vld [vmem:[#allocation2 + $0x110] sm:$0x1]  ;;  %v2151_v55 = vsel %vm890_vm1, %v2149_v4, %v2150_v15  ;;  %v2984_v4 = vld [vmem:[#allocation7 + $0x3f8] sm:$0xff]  ;;  %v701_v15 = vadd.f32 %v9642_v2, %v9639_v37  ;;  %v2161_v2 = vrot.slane %v2017_v17, 1 }
 0x1b0   :  { %v1639_v56 = vadd.f32 %v1638_v24, %v1573_v18  ;;  %v2629_v18 = vrot.slane %v2485_v42, 2  ;;  %v2156_v45 = vrot.slane %v2015_v21, 1  ;;  %v2491_v42 = vld [vmem:[#allocation2 + $0x178] sm:$0x3]  ;;  %3053 = vmatpush.msrb.mxu1 %v2984_v4  ;;  %v2641_v41 = vrot.slane %v2493_v33, 2 }
 0x1b1   :  { %v2636_v10 = vrot.slane %v2491_v42, 2  ;;  %v1208_v5 = vadd.f32 %v9657_v29, %v701_v15  ;;  %v2642_v42 = vrot.slane %v2495_v62, 2  ;;  %v2021_v15 = vld [vmem:[#allocation2 + $0x180] sm:$0xfe] }
 0x1b2   :  { %v1678_v35 = vadd.f32 %v1639_v56, %v1206_v46  ;;  %v1858_v9 = vpop.f32.mrf.mxu0  ;;  %v2631_v11 = vsel %vm1362_vm7, %v2629_v18, %v2630_v0  ;;  %v2148_v56 = vsel %vm890_vm1, %v2146_v23, %v2147_v19  ;;  %v2490_v18 = vld [vmem:[#allocation2 + $0x170] sm:$0x3] }
 0x1b3   :  { %8801 = vmatmul.msk.f32.gmra.mxu2 %vm75_vm0, %v2625_v58  ;;  %v1579_v22 = vpop.f32.mrf.mxu1  ;;  %v2012_v58 = vld [vmem:[#allocation2 + $0xf8] sm:$0x1]  ;;  %v2637_v37 = vsel %vm1362_vm7, %v2635_v34, %v2636_v10 }
 0x1b4   :  { %v9823_v31 = vadd.f32 %v1918_v60, %v1678_v35  ;;  %8783 = vmatmul.msk.f32.gmra.mxu3 %vm75_vm0, %v2142_v44  ;;  %v2010_v35 = vld [vmem:[#allocation2 + $0xe8] sm:$0xfe]  ;;  %v2153_v54 = vrot.slane %v2012_v58, 1 }
 0x1b5   :  { %2799 = vmatmul.f32.gmra.mxu0 %v2622_v28  ;;  %v2152_v50 = vrot.slane %v2010_v35, 1  ;;  %v2019_v28 = vld [vmem:[#allocation2 + $0x170] sm:$0x1] }
 0x1b6   :  { %v1920_v7 = vpop.f32.mrf.mxu2  ;;  %2328 = vmatmul.f32.gmra.mxu1 %v2151_v55  ;;  %v2633_v55 = vrot.slane %v2490_v18, 2  ;;  %v2162_v19 = vrot.slane %v2019_v28, 1  ;;  %v2494_v35 = vld [vmem:[#allocation2 + $0x190] sm:$0x3]  ;;  %v2020_v28 = vld [vmem:[#allocation2 + $0x178] sm:$0x1] }
 0x1b7   :  { %v1641_v24 = vpop.f32.mrf.mxu3  ;;  %v1921_v60 = vadd.f32 %v1920_v7, %v9810_v48  ;;  %v2632_v7 = vrot.slane %v2488_v30, 2 }
 0x1b8   :  { %v1642_v47 = vadd.f32 %v1641_v24, %v1576_v57  ;;  %v2157_v57 = vsel %vm890_vm1, %v2155_v1, %v2156_v45  ;;  %v2016_v24 = vld [vmem:[#allocation2 + $0x118] sm:$0x1] }
 0x1b9   :  { %v2159_v45 = vrot.slane %v2016_v24, 1 }
 0x1ba   :  { %v1679_v46 = vadd.f32 %v1642_v47, %v1207_v40  ;;  %v1861_v8 = vpop.f32.mrf.mxu0  ;;  %v2014_v40 = vld [vmem:[#allocation2 + $0x108] sm:$0xfe] }
 0x1bb   :  { %8802 = vmatmul.msk.f32.gmra.mxu2 %vm75_vm0, %v2631_v11  ;;  %v1582_v48 = vpop.f32.mrf.mxu1  ;;  %v2634_v11 = vsel %vm1362_vm7, %v2632_v7, %v2633_v55  ;;  %v2158_v1 = vrot.slane %v2014_v40, 1  ;;  %v2982_v7 = vld [vmem:[#allocation7 + $0x3e8] sm:$0xff]  ;;  %v3479_v55 = vld [vmem:[#allocation7 + $0x4d8] sm:$0xff] }
 0x1bc   :  { %v9836_v12 = vadd.f32 %v1921_v60, %v1679_v46  ;;  %8784 = vmatmul.msk.f32.gmra.mxu3 %vm75_vm0, %v2148_v56  ;;  %v2154_v60 = vsel %vm890_vm1, %v2152_v50, %v2153_v54  ;;  %v704_v46 = vadd.f32 %v9654_v27, %v9651_v61  ;;  %v2639_v61 = vrot.slane %v2494_v35, 2  ;;  %v2497_v54 = vld [vmem:[#allocation2 + $0x1a8] sm:$0xfc]  ;;  %3516 = vmatpush.msrb.mxu0 %v3479_v55 }
 0x1bd   :  { %2802 = vmatmul.f32.gmra.mxu0 %v2628_v39  ;;  %v2163_v39 = vsel %vm890_vm1, %v2161_v2, %v2162_v19  ;;  %v2160_v30 = vsel %vm890_vm1, %v2158_v1, %v2159_v45  ;;  %v2647_v2 = vrot.slane %v2497_v54, 2  ;;  %v2025_v1 = vld [vmem:[#allocation2 + $0x1a0] sm:$0xfe]  ;;  %v2027_v45 = vld [vmem:[#allocation2 + $0x1b0] sm:$0x1] }
 0x1be   :  { %v1923_v44 = vpop.f32.mrf.mxu2  ;;  %2331 = vmatmul.f32.gmra.mxu1 %v2157_v57  ;;  %v2492_v57 = vld [vmem:[#allocation2 + $0x180] sm:$0xfc]  ;;  %v1209_v34 = vadd.f32 %v9668_v3, %v704_v46  ;;  %v707_v3 = vadd.f32 %v9664_v52, %v9661_v51  ;;  %v2498_v52 = vld [vmem:[#allocation2 + $0x1b0] sm:$0x3]  ;;  %v2173_v35 = vrot.slane %v2025_v1, 1 }
 0x1bf   :  { %v1644_v0 = vpop.f32.mrf.mxu3  ;;  %v1924_v6 = vadd.f32 %v1923_v44, %v1858_v9  ;;  %v2023_v44 = vld [vmem:[#allocation2 + $0x190] sm:$0x1]  ;;  %v2638_v18 = vrot.slane %v2492_v57, 2  ;;  %v2496_v51 = vld [vmem:[#allocation2 + $0x1a0] sm:$0xfc] }
 0x1c0   :  { %v1645_v21 = vadd.f32 %v1644_v0, %v1579_v22  ;;  %v2983_v22 = vld [vmem:[#allocation7 + $0x3f0] sm:$0xff]  ;;  %v2643_v0 = vsel %vm1362_vm7, %v2641_v41, %v2642_v42  ;;  %v2168_v50 = vrot.slane %v2023_v44, 1  ;;  %v1210_v46 = vadd.f32 %v9680_v53, %v707_v3  ;;  %v2022_v44 = vld [vmem:[#allocation2 + $0x188] sm:$0xfe] }
 0x1c1   :  { %3054 = vmatpush.msrb.mxu1 %v2983_v22  ;;  %v2645_v41 = vrot.slane %v2498_v52, 2  ;;  %v2502_v3 = vld [vmem:[#allocation2 + $0x1d0] sm:$0x3] }
 0x1c2   :  { %v1680_v23 = vadd.f32 %v1645_v21, %v1208_v5  ;;  %v1864_v9 = vpop.f32.mrf.mxu0  ;;  %v2499_v5 = vld [vmem:[#allocation2 + $0x1b8] sm:$0x3]  ;;  %v2651_v52 = vrot.slane %v2502_v3, 2 }
 0x1c3   :  { %8803 = vmatmul.msk.f32.gmra.mxu2 %vm75_vm0, %v2637_v37  ;;  %v1585_v29 = vpop.f32.mrf.mxu1  ;;  %v2640_v37 = vsel %vm1362_vm7, %v2638_v18, %v2639_v61  ;;  %3055 = vmatpush.msrb.mxu1 %v2982_v7  ;;  %v2648_v24 = vrot.slane %v2499_v5, 2  ;;  %v2981_v18 = vld [vmem:[#allocation7 + $0x3e0] sm:$0xff]  ;;  %v3475_v61 = vld [vmem:[#allocation7 + $0x4b8] sm:$0xff]  ;;  %v3474_v7 = vld [vmem:[#allocation7 + $0x4b0] sm:$0xff] }
 0x1c4   :  { %v9846_v47 = vadd.f32 %v1924_v6, %v1680_v23  ;;  %8785 = vmatmul.msk.f32.gmra.mxu3 %vm75_vm0, %v2154_v60  ;;  %v2167_v6 = vrot.slane %v2021_v15, 1  ;;  %v3478_v23 = vld [vmem:[#allocation7 + $0x4d0] sm:$0xff]  ;;  %v3477_v60 = vld [vmem:[#allocation7 + $0x4c8] sm:$0xff]  ;;  %v2500_v5 = vld [vmem:[#allocation2 + $0x1c0] sm:$0xfc] }
 0x1c5   :  { %2805 = vmatmul.f32.gmra.mxu0 %v2634_v11  ;;  %v2165_v11 = vrot.slane %v2020_v28, 1  ;;  %v2649_v57 = vsel %vm1362_vm7, %v2647_v2, %v2648_v24  ;;  %3056 = vmatpush.msrb.mxu1 %v2981_v18  ;;  %v3473_v24 = vld [vmem:[#allocation7 + $0x4a8] sm:$0xff]  ;;  %v3470_v18 = vld [vmem:[#allocation7 + $0x490] sm:$0xff] }
 0x1c6   :  { %v1926_v56 = vpop.f32.mrf.mxu2  ;;  %2334 = vmatmul.f32.gmra.mxu1 %v2163_v39  ;;  %v2169_v40 = vsel %vm890_vm1, %v2167_v6, %v2168_v50  ;;  %3517 = vmatpush.msrb.mxu0 %v3478_v23  ;;  %v2644_v39 = vrot.slane %v2496_v51, 2  ;;  %v2993_v6 = vld [vmem:[#allocation7 + $0x440] sm:$0xff]  ;;  %v710_v50 = vadd.f32 %v9676_v43, %v9673_v20  ;;  %v2650_v51 = vrot.slane %v2500_v5, 2 }
 0x1c7   :  { %v1647_v58 = vpop.f32.mrf.mxu3  ;;  %v1927_v4 = vadd.f32 %v1926_v56, %v1861_v8  ;;  %v2018_v8 = vld [vmem:[#allocation2 + $0x168] sm:$0xfe]  ;;  %3125 = vmatpush.msra.mxu3 %v2993_v6 }
 0x1c8   :  { %v1648_v10 = vadd.f32 %v1647_v58, %v1582_v48  ;;  %v2164_v22 = vrot.slane %v2018_v8, 1  ;;  %3518 = vmatpush.msrb.mxu0 %v3477_v60  ;;  %v2174_v58 = vrot.slane %v2027_v45, 1  ;;  %v1211_v20 = vadd.f32 %v9694_v26, %v710_v50  ;;  %v2026_v45 = vld [vmem:[#allocation2 + $0x1a8] sm:$0xfe]  ;;  %v2028_v26 = vld [vmem:[#allocation2 + $0x1b8] sm:$0x1] }
 0x1c9   :  { %v2177_v6 = vrot.slane %v2028_v26, 1  ;;  %v2033_v50 = vld [vmem:[#allocation2 + $0x1e0] sm:$0xfe] }
 0x1ca   :  { %v1681_v27 = vadd.f32 %v1648_v10, %v1209_v34  ;;  %v9857_v17 = vpop.f32.mrf.mxu0  ;;  %v2024_v34 = vld [vmem:[#allocation2 + $0x198] sm:$0x1]  ;;  %v2175_v8 = vsel %vm890_vm1, %v2173_v35, %v2174_v58 }
 0x1cb   :  { %8804 = vmatmul.msk.f32.gmra.mxu2 %vm75_vm0, %v2643_v0  ;;  %v9864_v21 = vpop.f32.mrf.mxu1  ;;  %v2503_v10 = vld [vmem:[#allocation2 + $0x1d8] sm:$0x3]  ;;  %v2171_v2 = vrot.slane %v2024_v34, 1 }
 0x1cc   :  { %v9861_v48 = vadd.f32 %v1927_v4, %v1681_v27  ;;  %8786 = vmatmul.msk.f32.gmra.mxu3 %vm75_vm0, %v2160_v30  ;;  %v2501_v4 = vld [vmem:[#allocation2 + $0x1c8] sm:$0xfc]  ;;  %v3476_v30 = vld [vmem:[#allocation7 + $0x4c0] sm:$0xff]  ;;  %v2646_v27 = vsel %vm1362_vm7, %v2644_v39, %v2645_v41  ;;  %v2654_v28 = vrot.slane %v2503_v10, 2  ;;  %v2980_v41 = vld [vmem:[#allocation7 + $0x3d8] sm:$0xff] }
 0x1cd   :  { %2808 = vmatmul.f32.gmra.mxu0 %v2640_v37  ;;  %v2653_v0 = vrot.slane %v2501_v4, 2  ;;  %v2170_v37 = vrot.slane %v2022_v44, 1  ;;  %v3472_v39 = vld [vmem:[#allocation7 + $0x4a0] sm:$0xff]  ;;  %3057 = vmatpush.msrb.mxu1 %v2980_v41  ;;  %v3483_v58 = vld [vmem:[#allocation7 + $0x4f8] sm:$0xff]  ;;  %v713_v4 = vadd.f32 %v9688_v13, %v9685_v36 }
 0x1ce   :  { %v1929_v19 = vpop.f32.mrf.mxu2  ;;  %2337 = vmatmul.f32.gmra.mxu1 %v2169_v40  ;;  %3519 = vmatpush.msrb.mxu0 %v3476_v30  ;;  %v2031_v40 = vld [vmem:[#allocation2 + $0x1d0] sm:$0x1]  ;;  %v2504_v10 = vld [vmem:[#allocation2 + $0x1e0] sm:$0xfc] }
 0x1cf   :  { %v1650_v33 = vpop.f32.mrf.mxu3  ;;  %v1930_v62 = vadd.f32 %v1929_v19, %v1864_v9  ;;  %v2166_v9 = vsel %vm890_vm1, %v2164_v22, %v2165_v11  ;;  %v2029_v19 = vld [vmem:[#allocation2 + $0x1c0] sm:$0xfe]  ;;  %v2180_v22 = vrot.slane %v2031_v40, 1  ;;  %v2172_v11 = vsel %vm890_vm1, %v2170_v37, %v2171_v2  ;;  %v2506_v30 = vld [vmem:[#allocation2 + $0x1f0] sm:$0x3]  ;;  %3593 = vmatpush.msrb.mxu2 %v3483_v58 }
 0x1d0   :  { %v1651_v56 = vadd.f32 %v1650_v33, %v1585_v29  ;;  %3520 = vmatpush.msrb.mxu0 %v3475_v61  ;;  %v2655_v33 = vsel %vm1362_vm7, %v2653_v0, %v2654_v28  ;;  %v2176_v0 = vrot.slane %v2026_v45, 1  ;;  %v1212_v36 = vadd.f32 %v9708_v25, %v713_v4  ;;  %v2509_v25 = vld [vmem:[#allocation2 + $0x208] sm:$0xfc]  ;;  %v2511_v40 = vld [vmem:[#allocation2 + $0x218] sm:$0x3]  ;;  %v3480_v41 = vld [vmem:[#allocation7 + $0x4e0] sm:$0xff] }
 0x1d1   :  { %v2656_v28 = vrot.slane %v2504_v10, 2  ;;  %v2657_v5 = vrot.slane %v2506_v30, 2  ;;  %v2665_v26 = vrot.slane %v2509_v25, 2  ;;  %v2037_v4 = vld [vmem:[#allocation2 + $0x200] sm:$0xfe]  ;;  %v3465_v30 = vld [vmem:[#allocation7 + $0x468] sm:$0xff] }
 0x1d2   :  { %v1682_v42 = vadd.f32 %v1651_v56, %v1210_v46  ;;  %v9872_v15 = vpop.f32.mrf.mxu0  ;;  %3521 = vmatpush.msrb.mxu0 %v3474_v7  ;;  %v2507_v46 = vld [vmem:[#allocation2 + $0x1f8] sm:$0x3]  ;;  %v2178_v37 = vsel %vm890_vm1, %v2176_v0, %v2177_v6  ;;  %v2977_v0 = vld [vmem:[#allocation7 + $0x3c0] sm:$0xff] }
 0x1d3   :  { %8805 = vmatmul.msk.f32.gmra.mxu2 %vm75_vm0, %v2649_v57  ;;  %v9877_v29 = vpop.f32.mrf.mxu1  ;;  %v2652_v57 = vsel %vm1362_vm7, %v2650_v51, %v2651_v52  ;;  %v2660_v34 = vrot.slane %v2507_v46, 2  ;;  %v3481_v51 = vld [vmem:[#allocation7 + $0x4e8] sm:$0xff]  ;;  %v2658_v52 = vsel %vm1362_vm7, %v2656_v28, %v2657_v5  ;;  %v2666_v46 = vrot.slane %v2511_v40, 2  ;;  %v3464_v28 = vld [vmem:[#allocation7 + $0x460] sm:$0xff]  ;;  %v2514_v40 = vld [vmem:[#allocation2 + $0x230] sm:$0x3] }
 0x1d4   :  { %v9874_v53 = vadd.f32 %v1930_v62, %v1682_v42  ;;  %8787 = vmatmul.msk.f32.gmra.mxu3 %vm75_vm0, %v2166_v9  ;;  %v2179_v62 = vrot.slane %v2029_v19, 1  ;;  %3522 = vmatpush.msrb.mxu0 %v3473_v24  ;;  %v3471_v42 = vld [vmem:[#allocation7 + $0x498] sm:$0xff]  ;;  %v3468_v24 = vld [vmem:[#allocation7 + $0x480] sm:$0xff] }
 0x1d5   :  { %2811 = vmatmul.f32.gmra.mxu0 %v2646_v27  ;;  %v2032_v19 = vld [vmem:[#allocation2 + $0x1d8] sm:$0x1]  ;;  %v2512_v25 = vld [vmem:[#allocation2 + $0x220] sm:$0xfc] }
 0x1d6   :  { %v1932_v54 = vpop.f32.mrf.mxu2  ;;  %2340 = vmatmul.f32.gmra.mxu1 %v2175_v8  ;;  %3523 = vmatpush.msrb.mxu0 %v3472_v39  ;;  %v2181_v44 = vsel %vm890_vm1, %v2179_v62, %v2180_v22  ;;  %v3469_v8 = vld [vmem:[#allocation7 + $0x488] sm:$0xff]  ;;  %v2979_v62 = vld [vmem:[#allocation7 + $0x3d0] sm:$0xff]  ;;  %v3467_v22 = vld [vmem:[#allocation7 + $0x478] sm:$0xff]  ;;  %v2183_v58 = vrot.slane %v2032_v19, 1 }
 0x1d7   :  { %v1653_v55 = vpop.f32.mrf.mxu3  ;;  %v1933_v23 = vadd.f32 %v1932_v54, %v9857_v17  ;;  %v2505_v17 = vld [vmem:[#allocation2 + $0x1e8] sm:$0xfc]  ;;  %v2035_v54 = vld [vmem:[#allocation2 + $0x1f0] sm:$0x1]  ;;  %3058 = vmatpush.msrb.mxu1 %v2979_v62  ;;  %v11537_v62 = vld [vmem:[#allocation18_spill] sm:$0xff] }
 0x1d8   :  { %v1654_v43 = vadd.f32 %v1653_v55, %v9864_v21  ;;  %v2659_v35 = vrot.slane %v2505_v17, 2  ;;  %3524 = vmatpush.msrb.mxu0 %v3471_v42  ;;  %v2185_v55 = vrot.slane %v2033_v50, 1  ;;  %v716_v17 = vadd.f32 %v9704_v16, %v9700_v14  ;;  %v2510_v39 = vld [vmem:[#allocation2 + $0x210] sm:$0x3]  ;;  %v2978_v42 = vld [vmem:[#allocation7 + $0x3c8] sm:$0xff] }
 0x1d9   :  { %3059 = vmatpush.msrb.mxu1 %v2978_v42  ;;  %v2663_v10 = vrot.slane %v2510_v39, 2  ;;  %v2513_v50 = vld [vmem:[#allocation2 + $0x228] sm:$0xfc] }
 0x1da   :  { %v1683_v60 = vadd.f32 %v1654_v43, %v1211_v20  ;;  %v9889_v1 = vpop.f32.mrf.mxu0  ;;  %3525 = vmatpush.msrb.mxu0 %v3470_v18  ;;  %v2661_v7 = vsel %vm1362_vm7, %v2659_v35, %v2660_v34  ;;  %v3482_v43 = vld [vmem:[#allocation7 + $0x4f0] sm:$0xff]  ;;  %v1213_v14 = vadd.f32 %v9720_v63, %v716_v17 }
 0x1db   :  { %8806 = vmatmul.msk.f32.gmra.mxu2 %vm75_vm0, %v2655_v33  ;;  %v9894_v56 = vpop.f32.mrf.mxu1  ;;  %v2508_v33 = vld [vmem:[#allocation2 + $0x200] sm:$0xfc]  ;;  %3060 = vmatpush.msrb.mxu1 %v2977_v0  ;;  %v2518_v0 = vld [vmem:[#allocation2 + $0x250] sm:$0x3] }
 0x1dc   :  { %v9891_v21 = vadd.f32 %v1933_v23, %v1683_v60  ;;  %8788 = vmatmul.msk.f32.gmra.mxu3 %vm75_vm0, %v2172_v11  ;;  %v2186_v23 = vrot.slane %v2035_v54, 1  ;;  %3526 = vmatpush.msrb.mxu0 %v3469_v8  ;;  %v2662_v34 = vrot.slane %v2508_v33, 2  ;;  %v2036_v8 = vld [vmem:[#allocation2 + $0x1f8] sm:$0x1]  ;;  %v2043_v33 = vld [vmem:[#allocation2 + $0x230] sm:$0x1] }
 0x1dd   :  { %2814 = vmatmul.f32.gmra.mxu0 %v2652_v57  ;;  %3594 = vmatpush.msrb.mxu2 %v3482_v43 }
 0x1de   :  { %v1935_v9 = vpop.f32.mrf.mxu2  ;;  %2343 = vmatmul.f32.gmra.mxu1 %v2181_v44  ;;  %3527 = vmatpush.msrb.mxu0 %v3468_v24  ;;  %v2187_v45 = vsel %vm890_vm1, %v2185_v55, %v2186_v23  ;;  %v3466_v44 = vld [vmem:[#allocation7 + $0x470] sm:$0xff]  ;;  %v2664_v5 = vsel %vm1362_vm7, %v2662_v34, %v2663_v10  ;;  %v11539_v34 = vld [vmem:[#allocation17_spill] sm:$0xff] }
 0x1df   :  { %v1656_v61 = vpop.f32.mrf.mxu3  ;;  %v1936_v27 = vadd.f32 %v1935_v9, %v9872_v15  ;;  %v2030_v15 = vld [vmem:[#allocation2 + $0x1c8] sm:$0xfe]  ;;  %v2039_v9 = vld [vmem:[#allocation2 + $0x210] sm:$0x1]  ;;  %3595 = vmatpush.msrb.mxu2 %v3481_v51 }
 0x1e0   :  { %v1657_v13 = vadd.f32 %v1656_v61, %v9877_v29  ;;  %v2182_v60 = vrot.slane %v2030_v15, 1  ;;  %3528 = vmatpush.msrb.mxu0 %v3467_v22  ;;  %v2667_v61 = vsel %vm1362_vm7, %v2665_v26, %v2666_v46 }
 0x1e1   :  { %3596 = vmatpush.msrb.mxu2 %v3480_v41  ;;  %v2198_v41 = vrot.slane %v2043_v33, 1  ;;  %v2044_v33 = vld [vmem:[#allocation2 + $0x238] sm:$0x1] }
 0x1e2   :  { %v1684_v3 = vadd.f32 %v1657_v13, %v1212_v36  ;;  %v9906_v2 = vpop.f32.mrf.mxu0  ;;  %3529 = vmatpush.msrb.mxu0 %v3466_v44  ;;  %v2184_v6 = vsel %vm890_vm1, %v2182_v60, %v2183_v58  ;;  %v2034_v13 = vld [vmem:[#allocation2 + $0x1e8] sm:$0xfe]  ;;  %v2041_v60 = vld [vmem:[#allocation2 + $0x220] sm:$0xfe]  ;;  %v3954_v44 = vld [vmem:[#allocation7 + $0x598] sm:$0xff] }
 0x1e3   :  { %8807 = vmatmul.msk.f32.gmra.mxu2 %vm75_vm0, %v2661_v7  ;;  %v9911_v20 = vpop.f32.mrf.mxu1  ;;  %v11536_v7 = vld [vmem:[#allocation15_spill] sm:$0xff]  ;;  %v2188_v51 = vrot.slane %v2034_v13, 1  ;;  %v2197_v39 = vrot.slane %v2041_v60, 1  ;;  %4064 = vmatpush.msrb.mxu3 %v3954_v44  ;;  %v11543_v44 = vld [vmem:[#allocation24_spill] sm:$0xff] }
 0x1e4   :  { %v9908_v29 = vadd.f32 %v1936_v27, %v1684_v3  ;;  %8789 = vmatmul.msk.f32.gmra.mxu3 %vm75_vm0, %v2178_v37  ;;  %v2192_v27 = vrot.slane %v2039_v9, 1  ;;  %3530 = vmatpush.msrb.mxu0 %v3465_v30  ;;  %v11535_v3 = vld [vmem:[#allocation14_spill] sm:$0xff]  ;;  %v2671_v37 = vrot.slane %v2513_v50, 2  ;;  %v2040_v9 = vld [vmem:[#allocation2 + $0x218] sm:$0x1] }
 0x1e5   :  { %2817 = vmatmul.f32.gmra.mxu0 %v2658_v52  ;;  %v719_v55 = vadd.f32 %v11536_v7, %v11535_v3  ;;  %v2189_v52 = vrot.slane %v2036_v8, 1  ;;  %v2195_v13 = vrot.slane %v2040_v9, 1  ;;  %v2045_v8 = vld [vmem:[#allocation2 + $0x240] sm:$0xfe]  ;;  %v2042_v60 = vld [vmem:[#allocation2 + $0x228] sm:$0xfe] }
 0x1e6   :  { %v1938_v11 = vpop.f32.mrf.mxu2  ;;  %2346 = vmatmul.f32.gmra.mxu1 %v2187_v45  ;;  %3531 = vmatpush.msrb.mxu0 %v3464_v28  ;;  %v2669_v45 = vrot.slane %v2514_v40, 2  ;;  %v2047_v28 = vld [vmem:[#allocation2 + $0x250] sm:$0x1]  ;;  %v3950_v40 = vld [vmem:[#allocation7 + $0x578] sm:$0xff]  ;;  %v2201_v9 = vrot.slane %v2044_v33, 1 }
 0x1e7   :  { %v1659_v57 = vpop.f32.mrf.mxu3  ;;  %v1939_v35 = vadd.f32 %v1938_v11, %v9889_v1  ;;  %v2191_v1 = vrot.slane %v2037_v4, 1  ;;  %v1214_v22 = vadd.f32 %v11537_v62, %v719_v55  ;;  %v2668_v11 = vrot.slane %v2512_v25, 2  ;;  %3987 = vmatpush.msra.mxu1 %v3950_v40 }
 0x1e8   :  { %v1660_v16 = vadd.f32 %v1659_v57, %v9894_v56  ;;  %v2515_v56 = vld [vmem:[#allocation2 + $0x238] sm:$0x3]  ;;  %v2190_v42 = vsel %vm890_vm1, %v2188_v51, %v2189_v52  ;;  %v2517_v57 = vld [vmem:[#allocation2 + $0x248] sm:$0xfc]  ;;  %v2204_v25 = vrot.slane %v2047_v28, 1  ;;  %v11544_v28 = vld [vmem:[#allocation22_spill] sm:$0xff] }
 0x1e9   :  { %v2193_v15 = vsel %vm890_vm1, %v2191_v1, %v2192_v27  ;;  %v2672_v19 = vrot.slane %v2515_v56, 2  ;;  %v2516_v27 = vld [vmem:[#allocation2 + $0x240] sm:$0xfc]  ;;  %v3210_v51 = vld [vmem:[#allocation2 + $0x58] sm:$0x1] }
 0x1ea   :  { %v1685_v18 = vadd.f32 %v1660_v16, %v1213_v14  ;;  %v1879_v63 = vpop.f32.mrf.mxu0  ;;  %v2670_v14 = vsel %vm1362_vm7, %v2668_v11, %v2669_v45  ;;  %v11538_v16 = vld [vmem:[#allocation16_spill] sm:$0xff]  ;;  %v2674_v55 = vrot.slane %v2516_v27, 2 }
 0x1eb   :  { %8808 = vmatmul.msk.f32.gmra.mxu2 %vm75_vm0, %v2667_v61  ;;  %v1600_v36 = vpop.f32.mrf.mxu1  ;;  %v2673_v46 = vsel %vm1362_vm7, %v2671_v37, %v2672_v19  ;;  %v722_v10 = vadd.f32 %v11539_v34, %v11538_v16  ;;  %v2677_v61 = vrot.slane %v2517_v57, 2  ;;  %v2203_v19 = vrot.slane %v2045_v8, 1 }
 0x1ec   :  { %v9923_v54 = vadd.f32 %v1939_v35, %v1685_v18  ;;  %8790 = vmatmul.msk.f32.gmra.mxu3 %vm75_vm0, %v2184_v6  ;;  %v2519_v35 = vld [vmem:[#allocation2 + $0x258] sm:$0x3]  ;;  %v2199_v18 = vsel %vm890_vm1, %v2197_v39, %v2198_v41  ;;  %v3339_v39 = vrot.slane %v3210_v51, 1  ;;  %v3207_v41 = vld [vmem:[#allocation2 + $0x40] sm:$0xfe] }
 0x1ed   :  { %2820 = vmatmul.f32.gmra.mxu0 %v2664_v5  ;;  %v2678_v1 = vrot.slane %v2519_v35, 2  ;;  %v11540_v5 = vld [vmem:[#allocation21_spill] sm:$0xff]  ;;  %v3335_v34 = vrot.slane %v3207_v41, 1 }
 0x1ee   :  { %v1941_v23 = vpop.f32.mrf.mxu2  ;;  %2349 = vmatmul.f32.gmra.mxu1 %v2193_v15  ;;  %v1215_v3 = vadd.f32 %v11540_v5, %v722_v10  ;;  %v11545_v5 = vld [vmem:[#allocation23_spill] sm:$0xff] }
 0x1ef   :  { %v1662_v43 = vpop.f32.mrf.mxu3  ;;  %v1942_v24 = vadd.f32 %v1941_v23, %v9906_v2  ;;  %v2675_v23 = vrot.slane %v2518_v0, 2  ;;  %v2679_v37 = vsel %vm1362_vm7, %v2677_v61, %v2678_v1  ;;  %v3949_v61 = vld [vmem:[#allocation7 + $0x570] sm:$0xff]  ;;  %v3212_v0 = vld [vmem:[#allocation2 + $0x68] sm:$0xfe] }
 0x1f0   :  { %v1663_v17 = vadd.f32 %v1662_v43, %v9911_v20  ;;  %v2038_v20 = vld [vmem:[#allocation2 + $0x208] sm:$0xfe]  ;;  %3988 = vmatpush.msra.mxu1 %v3949_v61 }
 0x1f1   :  { %v2194_v56 = vrot.slane %v2038_v20, 1  ;;  %v2676_v62 = vsel %vm1362_vm7, %v2674_v55, %v2675_v23  ;;  %v2200_v20 = vrot.slane %v2042_v60, 1  ;;  %v3344_v55 = vrot.slane %v3212_v0, 1 }
 0x1f2   :  { %v1686_v26 = vadd.f32 %v1663_v17, %v1214_v22  ;;  %v1882_v2 = vpop.f32.mrf.mxu0  ;;  %v11541_v22 = vld [vmem:[#allocation19_spill] sm:$0xff]  ;;  %v11542_v17 = vld [vmem:[#allocation20_spill] sm:$0xff] }
 0x1f3   :  { %8809 = vmatmul.msk.f32.gmra.mxu2 %vm75_vm0, %v2673_v46  ;;  %v1603_v4 = vpop.f32.mrf.mxu1  ;;  %v2196_v43 = vsel %vm890_vm1, %v2194_v56, %v2195_v13  ;;  %v725_v11 = vadd.f32 %v11542_v17, %v11541_v22  ;;  %v2202_v1 = vsel %vm890_vm1, %v2200_v20, %v2201_v9  ;;  %v2048_v56 = vld [vmem:[#allocation2 + $0x258] sm:$0x1]  ;;  %v2928_v13 = vld [vmem:[#allocation2 + $0x40] sm:$0xff] }
 0x1f4   :  { %v9936_v58 = vadd.f32 %v1942_v24, %v1686_v26  ;;  %8791 = vmatmul.msk.f32.gmra.mxu3 %vm75_vm0, %v2190_v42  ;;  %v3208_v24 = vld [vmem:[#allocation2 + $0x48] sm:$0xfe]  ;;  %v2205_v26 = vsel %vm890_vm1, %v2203_v19, %v2204_v25  ;;  %v3209_v42 = vld [vmem:[#allocation2 + $0x50] sm:$0x1]  ;;  %v3215_v9 = vld [vmem:[#allocation2 + $0x80] sm:$0xfe] }
 0x1f5   :  { %2823 = vmatmul.f32.gmra.mxu0 %v2670_v14  ;;  %v3338_v46 = vrot.slane %v3208_v24, 1  ;;  %v1216_v14 = vadd.f32 %v11543_v44, %v725_v11  ;;  %v3336_v10 = vrot.slane %v3209_v42, 1  ;;  %v11546_v24 = vld [vmem:[#allocation25_spill] sm:$0xff]  ;;  %v3948_v11 = vld [vmem:[#allocation7 + $0x568] sm:$0xff]  ;;  %v2930_v42 = vld [vmem:[#allocation2 + $0x60] sm:$0xff] }
 0x1f6   :  { %v1944_v30 = vpop.f32.mrf.mxu2  ;;  %2352 = vmatmul.f32.gmra.mxu1 %v2199_v18  ;;  %v3217_v44 = vld [vmem:[#allocation2 + $0x90] sm:$0x1] }
 0x1f7   :  { %v1665_v6 = vpop.f32.mrf.mxu3  ;;  %v1945_v50 = vadd.f32 %v1944_v30, %v1879_v63  ;;  %v3340_v18 = vsel %vm890_vm1, %v3338_v46, %v3339_v39  ;;  %v3337_v8 = vsel %vm890_vm1, %v3335_v34, %v3336_v10  ;;  %v3216_v46 = vld [vmem:[#allocation2 + $0x88] sm:$0xfe]  ;;  %v3218_v39 = vld [vmem:[#allocation2 + $0x98] sm:$0x1]  ;;  %3989 = vmatpush.msra.mxu1 %v3948_v11  ;;  %v3347_v10 = vrot.slane %v3215_v9, 1 }
 0x1f8   :  { %v1666_v7 = vadd.f32 %v1665_v6, %v1600_v36  ;;  %v3214_v6 = vld [vmem:[#allocation2 + $0x78] sm:$0x1]  ;;  %v3351_v20 = vrot.slane %v3218_v39, 1  ;;  %v3225_v39 = vld [vmem:[#allocation2 + $0xd0] sm:$0x1] }
 0x1f9   :  { %v3345_v23 = vrot.slane %v3214_v6, 1  ;;  %v3220_v6 = vld [vmem:[#allocation2 + $0xa8] sm:$0xfe] }
 0x1fa   :  { %v1687_v15 = vadd.f32 %v1666_v7, %v1215_v3  ;;  %v9947_v63 = vpop.f32.mrf.mxu0  ;;  %v728_v3 = vadd.f32 %v11545_v5, %v11544_v28  ;;  %v3356_v5 = vrot.slane %v3220_v6, 1 }
 0x1fb   :  { %8810 = vmatmul.msk.f32.gmra.mxu2 %vm75_vm0, %v2679_v37  ;;  %v1606_v36 = vpop.f32.mrf.mxu1  ;;  %v3213_v37 = vld [vmem:[#allocation2 + $0x70] sm:$0x1]  ;;  %v3346_v17 = vsel %vm890_vm1, %v3344_v55, %v3345_v23 }
 0x1fc   :  { %v9949_v52 = vadd.f32 %v1945_v50, %v1687_v15  ;;  %8792 = vmatmul.msk.f32.gmra.mxu3 %vm75_vm0, %v2196_v43  ;;  %v3211_v15 = vld [vmem:[#allocation2 + $0x60] sm:$0xfe]  ;;  %v2207_v43 = vrot.slane %v2048_v56, 1  ;;  %v1217_v51 = vadd.f32 %v11546_v24, %v728_v3  ;;  %v3221_v55 = vld [vmem:[#allocation2 + $0xb0] sm:$0x1]  ;;  %v2931_v24 = vld [vmem:[#allocation2 + $0x68] sm:$0xff] }
 0x1fd   :  { %2826 = vmatmul.f32.gmra.mxu0 %v2676_v62  ;;  %v3341_v33 = vrot.slane %v3211_v15, 1  ;;  %v3342_v62 = vrot.slane %v3213_v37, 1 }
 0x1fe   :  { %v1947_v45 = vpop.f32.mrf.mxu2  ;;  %2355 = vmatmul.f32.gmra.mxu1 %v2205_v26 }
 0x1ff   :  { %v1668_v57 = vpop.f32.mrf.mxu3  ;;  %v1948_v35 = vadd.f32 %v1947_v45, %v1882_v2 }
 0x200   :  { %v1669_v16 = vadd.f32 %v1668_v57, %v1603_v4  ;;  %v2046_v4 = vld [vmem:[#allocation2 + $0x248] sm:$0xfe] }
 0x201   :  { %v2206_v40 = vrot.slane %v2046_v4, 1  ;;  %v3222_v4 = vld [vmem:[#allocation2 + $0xb8] sm:$0x1] }
 0x202   :  { %v1688_v30 = vadd.f32 %v1669_v16, %v1216_v14  ;;  %v2782_v27 = vpop.f32.mrf.mxu0  ;;  %v3357_v3 = vrot.slane %v3222_v4, 1  ;;  %v3227_v4 = vld [vmem:[#allocation2 + $0xe0] sm:$0xfe] }
 0x203   :  { %8827 = vmatmul.msk.f32.vlgmr.msrb.gmra.mxu2 %vm75_vm0, %v3340_v18  ;;  %v9963_v50 = vpop.f32.mrf.mxu1  ;;  %v2208_v45 = vsel %vm890_vm1, %v2206_v40, %v2207_v43  ;;  %v3354_v40 = vrot.slane %v3221_v55, 1 }
 0x204   :  { %v9960_v2 = vadd.f32 %v1948_v35, %v1688_v30  ;;  %8793 = vmatmul.msk.f32.gmra.mxu3 %vm75_vm0, %v2202_v1  ;;  %v3350_v35 = vrot.slane %v3216_v46, 1  ;;  %v3348_v30 = vrot.slane %v3217_v44, 1  ;;  %v3947_v1 = vld [vmem:[#allocation7 + $0x560] sm:$0xff] }
 0x205   :  { %3532 = vmatmul.f32.vlgmr.msrb.gmra.mxu0 %v3337_v8  ;;  %3990 = vmatpush.msra.mxu1 %v3947_v1  ;;  %v3223_v46 = vld [vmem:[#allocation2 + $0xc0] sm:$0xfe] }
 0x206   :  { %v2847_v7 = vpop.f32.mrf.mxu2  ;;  %3061 = vmatmul.f32.vlgmr.msrb.gmra.mxu1 %v2928_v13  ;;  %v3352_v61 = vsel %vm890_vm1, %v3350_v35, %v3351_v20  ;;  %v3953_v13 = vld [vmem:[#allocation7 + $0x590] sm:$0xff]  ;;  %v3349_v8 = vsel %vm890_vm1, %v3347_v10, %v3348_v30  ;;  %v3359_v35 = vrot.slane %v3223_v46, 1  ;;  %v3360_v20 = vrot.slane %v3225_v39, 1  ;;  %v3228_v30 = vld [vmem:[#allocation2 + $0xe8] sm:$0xfe] }
 0x207   :  { %v1671_v19 = vpop.f32.mrf.mxu3  ;;  %v9968_v25 = vadd.f32 %v2847_v7, %v2782_v27  ;;  %v2929_v27 = vld [vmem:[#allocation2 + $0x48] sm:$0xff]  ;;  %4065 = vmatpush.msrb.mxu3 %v3953_v13  ;;  %v3219_v7 = vld [vmem:[#allocation2 + $0xa0] sm:$0xfe]  ;;  %v3229_v13 = vld [vmem:[#allocation2 + $0xf0] sm:$0x1] }
 0x208   :  { %v1672_v60 = vadd.f32 %v1671_v19, %v1606_v36  ;;  %v3343_v36 = vsel %vm890_vm1, %v3341_v33, %v3342_v62  ;;  %v3353_v19 = vrot.slane %v3219_v7, 1  ;;  %v3224_v33 = vld [vmem:[#allocation2 + $0xc8] sm:$0xfe]  ;;  %v3226_v62 = vld [vmem:[#allocation2 + $0xd8] sm:$0x1] }
 0x20a   :  { %v1689_v22 = vadd.f32 %v1672_v60, %v1217_v51  ;;  %v2785_v26 = vpop.f32.mrf.mxu0  ;;  %v3358_v51 = vsel %vm890_vm1, %v3356_v5, %v3357_v3  ;;  %v3355_v11 = vsel %vm890_vm1, %v3353_v19, %v3354_v40  ;;  %v3365_v5 = vrot.slane %v3227_v4, 1  ;;  %v3232_v40 = vld [vmem:[#allocation2 + $0x108] sm:$0xfe] }
 0x20b   :  { %8828 = vmatmul.msk.f32.gmra.mxu2 %vm75_vm0, %v3346_v17  ;;  %v9975_v41 = vpop.f32.mrf.mxu1  ;;  %v3366_v3 = vrot.slane %v3229_v13, 1 }
 0x20c   :  { %8794 = vmatmul.msk.f32.gmra.mxu3 %vm75_vm0, %v2208_v45 }
 0x20d   :  { %3535 = vmatmul.f32.gmra.mxu0 %v3343_v36 }
 0x20e   :  { %v2850_v57 = vpop.f32.mrf.mxu2  ;;  %3064 = vmatmul.f32.gmra.mxu1 %v2930_v42 }
 0x20f   :  { %v1950_v14 = vpop.f32.mrf.mxu3  ;;  %v9978_v16 = vadd.f32 %v2850_v57, %v2785_v26  ;;  %v3363_v26 = vrot.slane %v3226_v62, 1 }
 0x210   :  { %v1951_v34 = vadd.f32 %v1950_v14, %v9947_v63  ;;  %v2932_v63 = vld [vmem:[#allocation2 + $0x80] sm:$0xff]  ;;  %v3945_v14 = vld [vmem:[#allocation7 + $0x550] sm:$0xff] }
 0x212   :  { %v9981_v18 = vadd.f32 %v1951_v34, %v1689_v22  ;;  %v2788_v0 = vpop.f32.mrf.mxu0  ;;  %v3946_v22 = vld [vmem:[#allocation7 + $0x558] sm:$0xff]  ;;  %v2933_v34 = vld [vmem:[#allocation2 + $0x88] sm:$0xff] }
 0x213   :  { %8829 = vmatmul.msk.f32.gmra.mxu2 %vm75_vm0, %v3352_v61  ;;  %v9986_v56 = vpop.f32.mrf.mxu1  ;;  %3991 = vmatpush.msra.mxu1 %v3946_v22  ;;  %v3230_v61 = vld [vmem:[#allocation2 + $0xf8] sm:$0x1]  ;;  %v3231_v22 = vld [vmem:[#allocation2 + $0x100] sm:$0xfe] }
 0x214   :  { %8811 = vmatmul.msk.f32.vlgmr.msra.gmra.mxu3 %vm75_vm0, %v2929_v27  ;;  %v3361_v27 = vsel %vm890_vm1, %v3359_v35, %v3360_v20  ;;  %v3369_v6 = vrot.slane %v3230_v61, 1  ;;  %v3371_v46 = vrot.slane %v3231_v22, 1  ;;  %v3943_v20 = vld [vmem:[#allocation7 + $0x540] sm:$0xff]  ;;  %v3237_v61 = vld [vmem:[#allocation2 + $0x130] sm:$0x1] }
 0x215   :  { %3538 = vmatmul.f32.gmra.mxu0 %v3349_v8  ;;  %3992 = vmatpush.msra.mxu1 %v3945_v14  ;;  %v3378_v13 = vrot.slane %v3237_v61, 1  ;;  %v10047_v22 = vld [vmem:[#allocation2] sm:$0xff] }
 0x216   :  { %v2853_v28 = vpop.f32.mrf.mxu2  ;;  %3067 = vmatmul.f32.gmra.mxu1 %v2932_v63 }
 0x217   :  { %v2376_v23 = vpop.f32.mrf.mxu3  ;;  %v9989_v15 = vadd.f32 %v2853_v28, %v2788_v0 }
 0x218   :  { %v2377_v37 = vadd.f32 %v2376_v23, %v9963_v50  ;;  %v2934_v50 = vld [vmem:[#allocation2 + $0xa0] sm:$0xff]  ;;  %v3944_v23 = vld [vmem:[#allocation7 + $0x548] sm:$0xff] }
 0x219   :  { %3993 = vmatpush.msra.mxu1 %v3944_v23 }
 0x21a   :  { %v9993_v43 = vadd.f32 %v2377_v37, %v9777_v38  ;;  %v2791_v60 = vpop.f32.mrf.mxu0  ;;  %v3362_v38 = vrot.slane %v3224_v33, 1  ;;  %v2935_v37 = vld [vmem:[#allocation2 + $0xa8] sm:$0xff] }
 0x21b   :  { %8830 = vmatmul.msk.f32.gmra.mxu2 %vm75_vm0, %v3358_v51  ;;  %v9998_v17 = vpop.f32.mrf.mxu1  ;;  %3994 = vmatpush.msra.mxu1 %v3943_v20  ;;  %v3246_v20 = vld [vmem:[#allocation2 + $0x1b8] sm:$0x1] }
 0x21c   :  { %8812 = vmatmul.msk.f32.gmra.mxu3 %vm75_vm0, %v2931_v24  ;;  %v3364_v44 = vsel %vm890_vm1, %v3362_v38, %v3363_v26  ;;  %v3234_v24 = vld [vmem:[#allocation2 + $0x118] sm:$0x1]  ;;  %v3236_v26 = vld [vmem:[#allocation2 + $0x128] sm:$0xfe] }
 0x21d   :  { %3541 = vmatmul.f32.gmra.mxu0 %v3355_v11  ;;  %v3375_v62 = vrot.slane %v3234_v24, 1  ;;  %v3380_v14 = vrot.slane %v3236_v26, 1 }
 0x21e   :  { %v2856_v45 = vpop.f32.mrf.mxu2  ;;  %3070 = vmatmul.f32.gmra.mxu1 %v2934_v50  ;;  %v3233_v50 = vld [vmem:[#allocation2 + $0x110] sm:$0x1] }
 0x21f   :  { %v2379_v42 = vpop.f32.mrf.mxu3  ;;  %v10001_v36 = vadd.f32 %v2856_v45, %v2791_v60  ;;  %v3367_v60 = vsel %vm890_vm1, %v3365_v5, %v3366_v3  ;;  %v3372_v39 = vrot.slane %v3233_v50, 1  ;;  %v3942_v3 = vld [vmem:[#allocation7 + $0x538] sm:$0xff] }
 0x220   :  { %v2380_v57 = vadd.f32 %v2379_v42, %v9975_v41  ;;  %v2936_v41 = vld [vmem:[#allocation2 + $0xc0] sm:$0xff]  ;;  %v3238_v42 = vld [vmem:[#allocation2 + $0x138] sm:$0x1]  ;;  %3995 = vmatpush.msra.mxu1 %v3942_v3 }
 0x222   :  { %v10005_v9 = vadd.f32 %v2380_v57, %v9788_v32  ;;  %v2794_v10 = vpop.f32.mrf.mxu0  ;;  %v3368_v32 = vrot.slane %v3228_v30, 1  ;;  %v3235_v30 = vld [vmem:[#allocation2 + $0x120] sm:$0xfe] }
 0x223   :  { %8831 = vmatmul.msk.f32.gmra.mxu2 %vm75_vm0, %v3364_v44  ;;  %v10010_v1 = vpop.f32.mrf.mxu1  ;;  %v2937_v44 = vld [vmem:[#allocation2 + $0xc8] sm:$0xff]  ;;  %v3377_v4 = vrot.slane %v3235_v30, 1  ;;  %v3245_v30 = vld [vmem:[#allocation2 + $0x1b0] sm:$0x1] }
 0x224   :  { %8813 = vmatmul.msk.f32.gmra.mxu3 %vm75_vm0, %v2933_v34  ;;  %v3370_v55 = vsel %vm890_vm1, %v3368_v32, %v3369_v6 }
 0x225   :  { %3544 = vmatmul.f32.gmra.mxu0 %v3361_v27  ;;  %v3373_v27 = vsel %vm890_vm1, %v3371_v46, %v3372_v39  ;;  %v3379_v23 = vsel %vm890_vm1, %v3377_v4, %v3378_v13  ;;  %v3941_v39 = vld [vmem:[#allocation7 + $0x530] sm:$0xff]  ;;  %v3940_v13 = vld [vmem:[#allocation7 + $0x528] sm:$0xff] }
 0x226   :  { %v2859_v0 = vpop.f32.mrf.mxu2  ;;  %3073 = vmatmul.f32.gmra.mxu1 %v2936_v41  ;;  %v3952_v41 = vld [vmem:[#allocation7 + $0x588] sm:$0xff] }
 0x227   :  { %v2382_v63 = vpop.f32.mrf.mxu3  ;;  %v10013_v8 = vadd.f32 %v2859_v0, %v2794_v10  ;;  %4066 = vmatpush.msrb.mxu3 %v3952_v41  ;;  %v2940_v0 = vld [vmem:[#allocation2 + $0x100] sm:$0xff]  ;;  %3996 = vmatpush.msra.mxu1 %v3941_v39 }
 0x228   :  { %v2383_v28 = vadd.f32 %v2382_v63, %v9986_v56  ;;  %v2938_v56 = vld [vmem:[#allocation2 + $0xe0] sm:$0xff] }
 0x229   :  { %3997 = vmatpush.msra.mxu1 %v3940_v13  ;;  %v3951_v39 = vld [vmem:[#allocation7 + $0x580] sm:$0xff] }
 0x22a   :  { %v10017_v7 = vadd.f32 %v2383_v28, %v9799_v49  ;;  %v2797_v19 = vpop.f32.mrf.mxu0  ;;  %v3374_v49 = vrot.slane %v3232_v40, 1  ;;  %4067 = vmatpush.msrb.mxu3 %v3951_v39  ;;  %v2950_v13 = vld [vmem:[#allocation2 + $0x1e0] sm:$0xff] }
 0x22b   :  { %8832 = vmatmul.msk.f32.gmra.mxu2 %vm75_vm0, %v3370_v55  ;;  %v10022_v51 = vpop.f32.mrf.mxu1  ;;  %v2939_v55 = vld [vmem:[#allocation2 + $0xe8] sm:$0xff]  ;;  %v3259_v39 = vld [vmem:[#allocation2 + $0x220] sm:$0xfe] }
 0x22c   :  { %8814 = vmatmul.msk.f32.gmra.mxu3 %vm75_vm0, %v2935_v37  ;;  %v3376_v35 = vsel %vm890_vm1, %v3374_v49, %v3375_v62  ;;  %v3240_v37 = vld [vmem:[#allocation2 + $0x188] sm:$0xfe] }
 0x22d   :  { %3547 = vmatmul.f32.gmra.mxu0 %v3367_v60 }
 0x22e   :  { %v2862_v33 = vpop.f32.mrf.mxu2  ;;  %3076 = vmatmul.f32.gmra.mxu1 %v2938_v56 }
 0x22f   :  { %v2385_v11 = vpop.f32.mrf.mxu3  ;;  %v10025_v45 = vadd.f32 %v2862_v33, %v2797_v19  ;;  %v3242_v19 = vld [vmem:[#allocation2 + $0x198] sm:$0x1]  ;;  %v3239_v33 = vld [vmem:[#allocation2 + $0x180] sm:$0xfe] }
 0x230   :  { %v2386_v38 = vadd.f32 %v2385_v11, %v9998_v17  ;;  %v3381_v17 = vrot.slane %v3238_v42, 1  ;;  %v3387_v60 = vrot.slane %v3242_v19, 1  ;;  %v3383_v11 = vrot.slane %v3239_v33, 1  ;;  %v2941_v42 = vld [vmem:[#allocation2 + $0x108] sm:$0xff]  ;;  %v3247_v19 = vld [vmem:[#allocation2 + $0x1c0] sm:$0xfe] }
 0x232   :  { %v10029_v57 = vadd.f32 %v2386_v38, %v9812_v59  ;;  %v2800_v10 = vpop.f32.mrf.mxu0  ;;  %v3382_v28 = vsel %vm890_vm1, %v3380_v14, %v3381_v17  ;;  %v2944_v14 = vld [vmem:[#allocation2 + $0x180] sm:$0xff]  ;;  %v3393_v17 = vrot.slane %v3246_v20, 1 }
 0x233   :  { %8833 = vmatmul.msk.f32.gmra.mxu2 %vm75_vm0, %v3376_v35  ;;  %v2329_v34 = vpop.f32.mrf.mxu1  ;;  %v3244_v35 = vld [vmem:[#allocation2 + $0x1a8] sm:$0xfe]  ;;  %v3251_v20 = vld [vmem:[#allocation2 + $0x1e0] sm:$0xfe] }
 0x234   :  { %8815 = vmatmul.msk.f32.gmra.mxu3 %vm75_vm0, %v2937_v44 }
 0x235   :  { %3550 = vmatmul.f32.gmra.mxu0 %v3373_v27  ;;  %v2943_v27 = vld [vmem:[#allocation2 + $0x128] sm:$0xff] }
 0x236   :  { %v2865_v59 = vpop.f32.mrf.mxu2  ;;  %3079 = vmatmul.f32.gmra.mxu1 %v2940_v0  ;;  %v3390_v0 = vrot.slane %v3245_v30, 1 }
 0x237   :  { %v2388_v32 = vpop.f32.mrf.mxu3  ;;  %v10035_v6 = vadd.f32 %v2865_v59, %v2800_v10  ;;  %v3392_v10 = vrot.slane %v3244_v35, 1 }
 0x238   :  { %v2389_v63 = vadd.f32 %v2388_v32, %v10010_v1  ;;  %v3386_v1 = vrot.slane %v3240_v37, 1 }
 0x239   :  { %v3394_v4 = vsel %vm890_vm1, %v3392_v10, %v3393_v17  ;;  %v3401_v17 = vrot.slane %v3251_v20, 1 }
 0x23a   :  { %v10040_v5 = vadd.f32 %v2389_v63, %v9823_v31  ;;  %v2803_v24 = vpop.f32.mrf.mxu0  ;;  %v3241_v31 = vld [vmem:[#allocation2 + $0x190] sm:$0x1]  ;;  %v3388_v46 = vsel %vm890_vm1, %v3386_v1, %v3387_v60  ;;  %v3248_v63 = vld [vmem:[#allocation2 + $0x1c8] sm:$0xfe]  ;;  %v3395_v1 = vrot.slane %v3247_v19, 1 }
 0x23b   :  { %8834 = vmatmul.msk.f32.gmra.mxu2 %vm75_vm0, %v3382_v28  ;;  %v2332_v40 = vpop.f32.mrf.mxu1  ;;  %v3384_v38 = vrot.slane %v3241_v31, 1  ;;  %v3250_v28 = vld [vmem:[#allocation2 + $0x1d8] sm:$0x1] }
 0x23c   :  { %8816 = vmatmul.msk.f32.gmra.mxu3 %vm75_vm0, %v2939_v55  ;;  %v2946_v55 = vld [vmem:[#allocation2 + $0x1a0] sm:$0xff]  ;;  %v3399_v37 = vrot.slane %v3250_v28, 1 }
 0x23d   :  { %3553 = vmatmul.f32.gmra.mxu0 %v3379_v23  ;;  %v3398_v23 = vrot.slane %v3248_v63, 1 }
 0x23e   :  { %v2868_v56 = vpop.f32.mrf.mxu2  ;;  %3082 = vmatmul.f32.gmra.mxu1 %v10047_v22 }
 0x23f   :  { %v2391_v49 = vpop.f32.mrf.mxu3  ;;  %v10045_v62 = vadd.f32 %v2868_v56, %v2803_v24  ;;  %v3400_v31 = vsel %vm890_vm1, %v3398_v23, %v3399_v37 }
 0x240   :  { %v2392_v50 = vadd.f32 %v2391_v49, %v10022_v51  ;;  %v3385_v51 = vsel %vm890_vm1, %v3383_v11, %v3384_v38  ;;  %v3939_v49 = vld [vmem:[#allocation7 + $0x520] sm:$0xff]  ;;  %v3252_v11 = vld [vmem:[#allocation2 + $0x1e8] sm:$0xfe]  ;;  %v3254_v38 = vld [vmem:[#allocation2 + $0x1f8] sm:$0x1] }
 0x241   :  { %3998 = vmatpush.msra.mxu1 %v3939_v49  ;;  %v3405_v35 = vrot.slane %v3254_v38, 1 }
 0x242   :  { %v10052_v26 = vadd.f32 %v2392_v50, %v9836_v12  ;;  %v3243_v12 = vld [vmem:[#allocation2 + $0x1a0] sm:$0xfe]  ;;  %v2945_v50 = vld [vmem:[#allocation2 + $0x188] sm:$0xff] }
 0x243   :  { %8835 = vmatmul.msk.f32.gmra.mxu2 %vm75_vm0, %v3388_v46  ;;  %v2335_v44 = vpop.f32.mrf.mxu1  ;;  %v3389_v59 = vrot.slane %v3243_v12, 1 }
 0x244   :  { %8817 = vmatmul.msk.f32.gmra.mxu3 %vm75_vm0, %v2941_v42  ;;  %v2948_v42 = vld [vmem:[#allocation2 + $0x1c0] sm:$0xff] }
 0x245   :  { %3556 = vmatmul.f32.gmra.mxu0 %v3385_v51 }
 0x246   :  { %3085 = vmatmul.f32.gmra.mxu1 %v2944_v14  ;;  %v3253_v14 = vld [vmem:[#allocation2 + $0x1f0] sm:$0x1] }
 0x247   :  { %v2394_v61 = vpop.f32.mrf.mxu3  ;;  %v3402_v12 = vrot.slane %v3253_v14, 1 }
 0x248   :  { %v2395_v41 = vadd.f32 %v2394_v61, %v2329_v34  ;;  %v3391_v34 = vsel %vm890_vm1, %v3389_v59, %v3390_v0  ;;  %v3256_v59 = vld [vmem:[#allocation2 + $0x208] sm:$0xfe]  ;;  %v3258_v0 = vld [vmem:[#allocation2 + $0x218] sm:$0x1] }
 0x249   :  { %v3410_v63 = vrot.slane %v3256_v59, 1  ;;  %v3411_v28 = vrot.slane %v3258_v0, 1 }
 0x24a   :  { %v10059_v32 = vadd.f32 %v2395_v41, %v9846_v47  ;;  %v3249_v47 = vld [vmem:[#allocation2 + $0x1d0] sm:$0x1]  ;;  %v3938_v41 = vld [vmem:[#allocation7 + $0x518] sm:$0xff] }
 0x24b   :  { %8836 = vmatmul.msk.f32.gmra.mxu2 %vm75_vm0, %v3394_v4  ;;  %v2338_v3 = vpop.f32.mrf.mxu1  ;;  %v3396_v60 = vrot.slane %v3249_v47, 1  ;;  %3999 = vmatpush.msra.mxu1 %v3938_v41 }
 0x24c   :  { %8818 = vmatmul.msk.f32.gmra.mxu3 %vm75_vm0, %v2943_v27  ;;  %v2947_v27 = vld [vmem:[#allocation2 + $0x1a8] sm:$0xff] }
 0x24d   :  { %3559 = vmatmul.f32.gmra.mxu0 %v3391_v34 }
 0x24e   :  { %3088 = vmatmul.f32.gmra.mxu1 %v2946_v55  ;;  %v3257_v55 = vld [vmem:[#allocation2 + $0x210] sm:$0x1] }
 0x24f   :  { %v2397_v24 = vpop.f32.mrf.mxu3  ;;  %v3408_v19 = vrot.slane %v3257_v55, 1  ;;  %v3268_v55 = vld [vmem:[#allocation2 + $0x268] sm:$0xfe] }
 0x250   :  { %v2398_v56 = vadd.f32 %v2397_v24, %v2332_v40  ;;  %v3397_v40 = vsel %vm890_vm1, %v3395_v1, %v3396_v60  ;;  %v3412_v24 = vsel %vm890_vm1, %v3410_v63, %v3411_v28  ;;  %v2949_v1 = vld [vmem:[#allocation2 + $0x1c8] sm:$0xff] }
 0x251   :  { %v3260_v60 = vld [vmem:[#allocation2 + $0x228] sm:$0xfe] }
 0x252   :  { %v10066_v33 = vadd.f32 %v2398_v56, %v9861_v48  ;;  %v3404_v48 = vrot.slane %v3252_v11, 1  ;;  %v3937_v56 = vld [vmem:[#allocation7 + $0x510] sm:$0xff]  ;;  %v2952_v11 = vld [vmem:[#allocation2 + $0x200] sm:$0xff] }
 0x253   :  { %8837 = vmatmul.msk.f32.gmra.mxu2 %vm75_vm0, %v3400_v31  ;;  %v2341_v46 = vpop.f32.mrf.mxu1  ;;  %v3262_v31 = vld [vmem:[#allocation2 + $0x238] sm:$0x1]  ;;  %4000 = vmatpush.msra.mxu1 %v3937_v56  ;;  %v3428_v56 = vrot.slane %v3268_v55, 1 }
 0x254   :  { %8819 = vmatmul.msk.f32.gmra.mxu3 %vm75_vm0, %v2945_v50  ;;  %v3406_v61 = vsel %vm890_vm1, %v3404_v48, %v3405_v35  ;;  %v3936_v50 = vld [vmem:[#allocation7 + $0x508] sm:$0xff]  ;;  %v3417_v38 = vrot.slane %v3262_v31, 1  ;;  %v3413_v35 = vrot.slane %v3259_v39, 1  ;;  %v3269_v31 = vld [vmem:[#allocation2 + $0x270] sm:$0x1] }
 0x255   :  { %3562 = vmatmul.f32.gmra.mxu0 %v3397_v40  ;;  %4001 = vmatpush.msra.mxu1 %v3936_v50 }
 0x256   :  { %3091 = vmatmul.f32.gmra.mxu1 %v2948_v42  ;;  %v3261_v42 = vld [vmem:[#allocation2 + $0x230] sm:$0x1] }
 0x257   :  { %v2400_v51 = vpop.f32.mrf.mxu3  ;;  %v3414_v20 = vrot.slane %v3261_v42, 1 }
 0x258   :  { %v2401_v10 = vadd.f32 %v2400_v51, %v2335_v44  ;;  %v3403_v44 = vsel %vm890_vm1, %v3401_v17, %v3402_v12  ;;  %v2951_v17 = vld [vmem:[#allocation2 + $0x1e8] sm:$0xff] }
 0x259   :  { %v3264_v12 = vld [vmem:[#allocation2 + $0x248] sm:$0xfe] }
 0x25a   :  { %v10073_v30 = vadd.f32 %v2401_v10, %v9874_v53  ;;  %v3255_v53 = vld [vmem:[#allocation2 + $0x200] sm:$0xfe]  ;;  %v3422_v59 = vrot.slane %v3264_v12, 1  ;;  %v2957_v12 = vld [vmem:[#allocation2 + $0x248] sm:$0xff] }
 0x25b   :  { %8838 = vmatmul.msk.f32.gmra.mxu2 %vm75_vm0, %v3406_v61  ;;  %v2344_v4 = vpop.f32.mrf.mxu1  ;;  %v3407_v37 = vrot.slane %v3255_v53, 1  ;;  %v3935_v10 = vld [vmem:[#allocation7 + $0x500] sm:$0xff]  ;;  %v3266_v61 = vld [vmem:[#allocation2 + $0x258] sm:$0x1] }
 0x25c   :  { %8820 = vmatmul.msk.f32.gmra.mxu3 %vm75_vm0, %v2947_v27  ;;  %4002 = vmatpush.msra.mxu1 %v3935_v10  ;;  %v2954_v27 = vld [vmem:[#allocation2 + $0x220] sm:$0xff]  ;;  %v3423_v0 = vrot.slane %v3266_v61, 1 }
 0x25d   :  { %3565 = vmatmul.f32.gmra.mxu0 %v3403_v44 }
 0x25e   :  { %3094 = vmatmul.f32.gmra.mxu1 %v2950_v13  ;;  %v3265_v13 = vld [vmem:[#allocation2 + $0x250] sm:$0x1] }
 0x25f   :  { %v2403_v34 = vpop.f32.mrf.mxu3  ;;  %v3420_v53 = vrot.slane %v3265_v13, 1 }
 0x260   :  { %v2404_v23 = vadd.f32 %v2403_v34, %v2338_v3  ;;  %v3409_v3 = vsel %vm890_vm1, %v3407_v37, %v3408_v19  ;;  %v3270_v34 = vld [vmem:[#allocation2 + $0x278] sm:$0x1]  ;;  %v3424_v37 = vsel %vm890_vm1, %v3422_v59, %v3423_v0  ;;  %v2953_v19 = vld [vmem:[#allocation2 + $0x208] sm:$0xff] }
 0x261   :  { %v2959_v59 = vld [vmem:[#allocation2 + $0x268] sm:$0xff] }
 0x262   :  { %v10080_v47 = vadd.f32 %v2404_v23, %v9891_v21  ;;  %v3416_v21 = vrot.slane %v3260_v60, 1  ;;  %v3267_v60 = vld [vmem:[#allocation2 + $0x260] sm:$0xfe] }
 0x263   :  { %8839 = vmatmul.msk.f32.gmra.mxu2 %vm75_vm0, %v3412_v24  ;;  %v2347_v49 = vpop.f32.mrf.mxu1 }
 0x264   :  { %8821 = vmatmul.msk.f32.gmra.mxu3 %vm75_vm0, %v2949_v1  ;;  %v3418_v51 = vsel %vm890_vm1, %v3416_v21, %v3417_v38  ;;  %v3429_v1 = vrot.slane %v3270_v34, 1  ;;  %v3426_v21 = vrot.slane %v3269_v31, 1  ;;  %v3686_v34 = vld [vmem:[#allocation2 + $0x80] sm:$0xfc]  ;;  %v10141_v31 = vadd.f32 %v10013_v8, %v10040_v5  ;;  %v3687_v5 = vld [vmem:[#allocation2 + $0x88] sm:$0xfc] }
 0x265   :  { %3568 = vmatmul.f32.gmra.mxu0 %v3409_v3  ;;  %v3425_v3 = vrot.slane %v3267_v60, 1  ;;  %v3685_v60 = vld [vmem:[#allocation2 + $0x78] sm:$0x3] }
 0x266   :  { %3097 = vmatmul.f32.gmra.mxu1 %v2952_v11  ;;  %v3430_v39 = vsel %vm890_vm1, %v3428_v56, %v3429_v1 }
 0x267   :  { %v2406_v40 = vpop.f32.mrf.mxu3 }
 0x268   :  { %v2407_v48 = vadd.f32 %v2406_v40, %v2341_v46  ;;  %v3415_v46 = vsel %vm890_vm1, %v3413_v35, %v3414_v20  ;;  %v2955_v40 = vld [vmem:[#allocation2 + $0x228] sm:$0xff]  ;;  %v3680_v20 = vld [vmem:[#allocation2 + $0x50] sm:$0x3] }
 0x26a   :  { %v10087_v14 = vadd.f32 %v2407_v48, %v9908_v29  ;;  %v3263_v29 = vld [vmem:[#allocation2 + $0x240] sm:$0xfe]  ;;  %v10113_v48 = vadd.f32 %v9978_v16, %v10005_v9  ;;  %v10122_v16 = vadd.f32 %v9989_v15, %v10017_v7  ;;  %v10131_v15 = vadd.f32 %v10001_v36, %v10029_v57  ;;  %v3683_v57 = vld [vmem:[#allocation2 + $0x68] sm:$0xfc] }
 0x26b   :  { %8840 = vmatmul.msk.f32.gmra.mxu2 %vm75_vm0, %v3418_v51  ;;  %v2350_v41 = vpop.f32.mrf.mxu1  ;;  %v3419_v28 = vrot.slane %v3263_v29, 1 }
 0x26c   :  { %11547 = vst [vmem:[#allocation14_spill] sm:$0xff] %v10087_v14  ;;  %8822 = vmatmul.msk.f32.gmra.mxu3 %vm75_vm0, %v2951_v17  ;;  %v3807_v17 = vrot.slane %v3680_v20, 2 }
 0x26d   :  { %3571 = vmatmul.f32.gmra.mxu0 %v3415_v46  ;;  %v3421_v50 = vsel %vm890_vm1, %v3419_v28, %v3420_v53  ;;  %v3684_v46 = vld [vmem:[#allocation2 + $0x70] sm:$0x3] }
 0x26e   :  { %3100 = vmatmul.f32.gmra.mxu1 %v2954_v27  ;;  %v3813_v29 = vrot.slane %v3684_v46, 2  ;;  %v10157_v46 = vpop.f32.mrf.mxu0 }
 0x26f   :  { %v2409_v44 = vpop.f32.mrf.mxu3 }
 0x270   :  { %v2410_v63 = vadd.f32 %v2409_v44, %v2344_v4  ;;  %v10101_v4 = vadd.f32 %v9968_v25, %v9993_v43  ;;  %v3427_v25 = vsel %vm890_vm1, %v3425_v3, %v3426_v21  ;;  %v3679_v44 = vld [vmem:[#allocation2 + $0x48] sm:$0xfc]  ;;  %v3690_v3 = vld [vmem:[#allocation2 + $0xa0] sm:$0xfc]  ;;  %v3692_v21 = vld [vmem:[#allocation2 + $0xb0] sm:$0x3] }
 0x271   :  { %v3809_v53 = vrot.slane %v3679_v44, 2 }
 0x272   :  { %v10094_v23 = vadd.f32 %v2410_v63, %v9923_v54  ;;  %v2956_v54 = vld [vmem:[#allocation2 + $0x240] sm:$0xff]  ;;  %v3681_v63 = vld [vmem:[#allocation2 + $0x58] sm:$0x3] }
 0x273   :  { %8841 = vmatmul.msk.f32.gmra.mxu2 %vm75_vm0, %v3424_v37  ;;  %v2353_v24 = vpop.f32.mrf.mxu1  ;;  %v3810_v55 = vrot.slane %v3681_v63, 2 }
 0x274   :  { %11548 = vst [vmem:[#allocation15_spill] sm:$0xff] %v10094_v23  ;;  %8823 = vmatmul.msk.f32.gmra.mxu3 %vm75_vm0, %v2953_v19 }
 0x275   :  { %3574 = vmatmul.f32.gmra.mxu0 %v3421_v50  ;;  %v3811_v1 = vsel %vm1362_vm7, %v3809_v53, %v3810_v55 }
 0x276   :  { %3103 = vmatmul.f32.gmra.mxu1 %v2956_v54 }
 0x277   :  { %v2412_v11 = vpop.f32.mrf.mxu3 }
 0x278   :  { %v2413_v38 = vadd.f32 %v2412_v11, %v2347_v49  ;;  %v3678_v49 = vld [vmem:[#allocation2 + $0x40] sm:$0xfc]  ;;  %v3815_v11 = vrot.slane %v3683_v57, 2 }
 0x279   :  { %v3806_v10 = vrot.slane %v3678_v49, 2  ;;  %v10151_v49 = vadd.f32 %v10025_v45, %v10052_v26  ;;  %v10160_v45 = vpop.f32.mrf.mxu2 }
 0x27a   :  { %v10106_v42 = vadd.f32 %v2413_v38, %v9936_v58 }
 0x27b   :  { %8842 = vmatmul.msk.f32.gmra.mxu2 %vm75_vm0, %v3430_v39  ;;  %v2356_v43 = vpop.f32.mrf.mxu1  ;;  %v3808_v9 = vsel %vm1362_vm7, %v3806_v10, %v3807_v17  ;;  %v3821_v10 = vrot.slane %v3687_v5, 2  ;;  %v3694_v17 = vld [vmem:[#allocation2 + $0xc0] sm:$0xfc]  ;;  %v3708_v5 = vld [vmem:[#allocation2 + $0x130] sm:$0x3] }
 0x27c   :  { %11549 = vst [vmem:[#allocation18_spill] sm:$0xff] %v10106_v42  ;;  %8824 = vmatmul.msk.f32.gmra.mxu3 %vm75_vm0, %v2955_v40  ;;  %v3824_v40 = vrot.slane %v3690_v3, 2 }
 0x27d   :  { %3577 = vmatmul.f32.gmra.mxu0 %v3427_v25  ;;  %v3825_v25 = vrot.slane %v3692_v21, 2 }
 0x27e   :  { %3106 = vmatmul.f32.gmra.mxu1 %v10047_v22  ;;  %v3682_v22 = vld [vmem:[#allocation2 + $0x60] sm:$0xfc] }
 0x27f   :  { %v2415_v35 = vpop.f32.mrf.mxu3  ;;  %v3812_v0 = vrot.slane %v3682_v22, 2  ;;  %v3826_v20 = vsel %vm1362_vm7, %v3824_v40, %v3825_v25  ;;  %v3699_v40 = vld [vmem:[#allocation2 + $0xe8] sm:$0xfc]  ;;  %v3701_v25 = vld [vmem:[#allocation2 + $0xf8] sm:$0x3] }
 0x280   :  { %v2416_v58 = vadd.f32 %v2415_v35, %v2350_v41  ;;  %v3689_v35 = vld [vmem:[#allocation2 + $0x98] sm:$0x3] }
 0x281   :  { %v3814_v7 = vsel %vm1362_vm7, %v3812_v0, %v3813_v29  ;;  %v3693_v0 = vld [vmem:[#allocation2 + $0xb8] sm:$0x3]  ;;  %v10165_v29 = vadd.f32 %v10035_v6, %v10059_v32  ;;  %v3695_v32 = vld [vmem:[#allocation2 + $0xc8] sm:$0xfc]  ;;  %v10179_v57 = vpop.f32.mrf.mxu2 }
 0x282   :  { %v10117_v51 = vadd.f32 %v2416_v58, %v9949_v52  ;;  %v3828_v63 = vrot.slane %v3693_v0, 2  ;;  %v3705_v0 = vld [vmem:[#allocation2 + $0x118] sm:$0x3] }
 0x283   :  { %v3062_v61 = vpop.f32.mrf.mxu1 }
 0x284   :  { %11550 = vst [vmem:[#allocation16_spill] sm:$0xff] %v10117_v51  ;;  %8825 = vmatmul.msk.f32.gmra.mxu3 %vm75_vm0, %v2957_v12  ;;  %v3696_v12 = vld [vmem:[#allocation2 + $0xd0] sm:$0x3] }
 0x285   :  { %v3831_v22 = vrot.slane %v3696_v12, 2  ;;  %v3849_v12 = vrot.slane %v3708_v5, 2  ;;  %v3711_v5 = vld [vmem:[#allocation2 + $0x188] sm:$0xfc] }
 0x286   :  { %4003 = vmatmul.f32.vlgmr.msra.gmra.mxu1 %v3808_v9 }
 0x287   :  { %v2418_v27 = vpop.f32.mrf.mxu3 }
 0x288   :  { %v2419_v41 = vadd.f32 %v2418_v27, %v2353_v24  ;;  %v3818_v24 = vrot.slane %v3686_v34, 2  ;;  %v3830_v27 = vrot.slane %v3694_v17, 2 }
 0x28a   :  { %v10126_v52 = vadd.f32 %v2419_v41, %v9960_v2  ;;  %v3688_v2 = vld [vmem:[#allocation2 + $0x90] sm:$0x3] }
 0x28b   :  { %v3065_v13 = vpop.f32.mrf.mxu1  ;;  %v3819_v56 = vrot.slane %v3688_v2, 2 }
 0x28c   :  { %11551 = vst [vmem:[#allocation17_spill] sm:$0xff] %v10126_v52  ;;  %8826 = vmatmul.msk.f32.gmra.mxu3 %vm75_vm0, %v2959_v59  ;;  %v3691_v59 = vld [vmem:[#allocation2 + $0xa8] sm:$0xfc] }
 0x28d   :  { %v3820_v50 = vsel %vm1362_vm7, %v3818_v24, %v3819_v56  ;;  %v3827_v44 = vrot.slane %v3691_v59, 2  ;;  %v3697_v24 = vld [vmem:[#allocation2 + $0xd8] sm:$0x3]  ;;  %v10175_v56 = vadd.f32 %v10045_v62, %v10066_v33  ;;  %v3703_v59 = vld [vmem:[#allocation2 + $0x108] sm:$0xfc] }
 0x28e   :  { %4006 = vmatmul.f32.gmra.mxu1 %v3814_v7  ;;  %v3698_v7 = vld [vmem:[#allocation2 + $0xe0] sm:$0xfc] }
 0x28f   :  { %v2421_v28 = vpop.f32.mrf.mxu3  ;;  %v3836_v34 = vrot.slane %v3698_v7, 2 }
 0x290   :  { %v2422_v37 = vadd.f32 %v2421_v28, %v2356_v43  ;;  %v3700_v28 = vld [vmem:[#allocation2 + $0xf0] sm:$0x3] }
 0x291   :  { %v3837_v2 = vrot.slane %v3700_v28, 2 }
 0x292   :  { %v10135_v19 = vadd.f32 %v2422_v37, %v9981_v18  ;;  %v3816_v18 = vrot.slane %v3685_v60, 2  ;;  %v3829_v37 = vsel %vm1362_vm7, %v3827_v44, %v3828_v63  ;;  %v3833_v60 = vrot.slane %v3695_v32, 2  ;;  %v3710_v63 = vld [vmem:[#allocation2 + $0x180] sm:$0xfc]  ;;  %v3709_v32 = vld [vmem:[#allocation2 + $0x138] sm:$0x3] }
 0x293   :  { %v3068_v36 = vpop.f32.mrf.mxu1  ;;  %v3846_v44 = vrot.slane %v3705_v0, 2 }
 0x294   :  { %11552 = vst [vmem:[#allocation21_spill] sm:$0xff] %v10135_v19  ;;  %8843 = vmatmul.msk.f32.vlgmr.msrb.gmra.mxu3 %vm75_vm0, %v3811_v1  ;;  %v3817_v43 = vsel %vm1362_vm7, %v3815_v11, %v3816_v18  ;;  %v10177_v1 = vpop.f32.mrf.mxu0  ;;  %v3704_v11 = vld [vmem:[#allocation2 + $0x110] sm:$0x3] }
 0x296   :  { %4009 = vmatmul.f32.gmra.mxu1 %v3820_v50  ;;  %v3834_v50 = vrot.slane %v3697_v24, 2 }
 0x297   :  { %v3127_v54 = vpop.f32.mrf.mxu3 }
 0x298   :  { %v3128_v38 = vadd.f32 %v3127_v54, %v3062_v61  ;;  %v3702_v54 = vld [vmem:[#allocation2 + $0x100] sm:$0xfc]  ;;  %v3835_v62 = vsel %vm1362_vm7, %v3833_v60, %v3834_v50  ;;  %v3852_v60 = vrot.slane %v3709_v32, 2 }
 0x299   :  { %v3842_v21 = vrot.slane %v3702_v54, 2  ;;  %v3714_v54 = vld [vmem:[#allocation2 + $0x1a0] sm:$0xfc] }
 0x29a   :  { %v10145_v39 = vadd.f32 %v3128_v38, %v10101_v4  ;;  %v3822_v4 = vrot.slane %v3689_v35, 2  ;;  %v3843_v38 = vrot.slane %v3704_v11, 2  ;;  %v3716_v11 = vld [vmem:[#allocation2 + $0x1b0] sm:$0x3] }
 0x29b   :  { %v3071_v8 = vpop.f32.mrf.mxu1 }
 0x29c   :  { %8844 = vmatmul.msk.f32.gmra.mxu3 %vm75_vm0, %v3817_v43  ;;  %v3823_v41 = vsel %vm1362_vm7, %v3821_v10, %v3822_v4  ;;  %v3706_v43 = vld [vmem:[#allocation2 + $0x120] sm:$0xfc]  ;;  %v3844_v35 = vsel %vm1362_vm7, %v3842_v21, %v3843_v38  ;;  %v10190_v10 = vpop.f32.mrf.mxu2  ;;  %v3860_v38 = vrot.slane %v3714_v54, 2 }
 0x29d   :  { %v3848_v17 = vrot.slane %v3706_v43, 2 }
 0x29e   :  { %4012 = vmatmul.f32.gmra.mxu1 %v3826_v20  ;;  %v10188_v20 = vpop.f32.mrf.mxu0 }
 0x29f   :  { %v3130_v58 = vpop.f32.mrf.mxu3 }
 0x2a0   :  { %v3131_v61 = vadd.f32 %v3130_v58, %v3065_v13 }
 0x2a2   :  { %v10155_v9 = vadd.f32 %v3131_v61, %v10113_v48  ;;  %v3832_v48 = vsel %vm1362_vm7, %v3830_v27, %v3831_v22 }
 0x2a3   :  { %v3074_v26 = vpop.f32.mrf.mxu1 }
 0x2a4   :  { %8845 = vmatmul.msk.f32.gmra.mxu3 %vm75_vm0, %v3823_v41  ;;  %v3850_v41 = vsel %vm1362_vm7, %v3848_v17, %v3849_v12 }
 0x2a6   :  { %4015 = vmatmul.f32.gmra.mxu1 %v3832_v48  ;;  %v10198_v28 = vpop.f32.mrf.mxu0 }
 0x2a7   :  { %v3133_v13 = vpop.f32.mrf.mxu3 }
 0x2a8   :  { %v3134_v53 = vadd.f32 %v3133_v13, %v3068_v36  ;;  %v3845_v13 = vrot.slane %v3703_v59, 2 }
 0x2aa   :  { %v10169_v55 = vadd.f32 %v3134_v53, %v10122_v16  ;;  %v3838_v16 = vsel %vm1362_vm7, %v3836_v34, %v3837_v2  ;;  %v3854_v34 = vrot.slane %v3710_v63, 2  ;;  %v3847_v24 = vsel %vm1362_vm7, %v3845_v13, %v3846_v44  ;;  %v3717_v13 = vld [vmem:[#allocation2 + $0x1b8] sm:$0x3] }
 0x2ab   :  { %v3077_v6 = vpop.f32.mrf.mxu1 }
 0x2ac   :  { %8846 = vmatmul.msk.f32.gmra.mxu3 %vm75_vm0, %v3829_v37  ;;  %v3707_v37 = vld [vmem:[#allocation2 + $0x128] sm:$0xfc] }
 0x2ae   :  { %4018 = vmatmul.f32.gmra.mxu1 %v3838_v16 }
 0x2af   :  { %v3136_v36 = vpop.f32.mrf.mxu3 }
 0x2b0   :  { %v3137_v18 = vadd.f32 %v3136_v36, %v3071_v8  ;;  %v3839_v8 = vrot.slane %v3699_v40, 2  ;;  %v3851_v36 = vrot.slane %v3707_v37, 2  ;;  %v10214_v40 = vpop.f32.mrf.mxu0 }
 0x2b2   :  { %v10183_v3 = vadd.f32 %v3137_v18, %v10131_v15  ;;  %v3840_v15 = vrot.slane %v3701_v25, 2  ;;  %v3853_v18 = vsel %vm1362_vm7, %v3851_v36, %v3852_v60  ;;  %v3719_v60 = vld [vmem:[#allocation2 + $0x1c8] sm:$0xfc] }
 0x2b3   :  { %v3080_v33 = vpop.f32.mrf.mxu1 }
 0x2b4   :  { %8847 = vmatmul.msk.f32.gmra.mxu3 %vm75_vm0, %v3835_v62  ;;  %v3841_v27 = vsel %vm1362_vm7, %v3839_v8, %v3840_v15  ;;  %v3861_v62 = vrot.slane %v3716_v11, 2  ;;  %v3857_v8 = vrot.slane %v3711_v5, 2 }
 0x2b6   :  { %4021 = vmatmul.f32.gmra.mxu1 %v3844_v35  ;;  %v3713_v35 = vld [vmem:[#allocation2 + $0x198] sm:$0x3] }
 0x2b7   :  { %v3139_v58 = vpop.f32.mrf.mxu3  ;;  %v3858_v15 = vrot.slane %v3713_v35, 2 }
 0x2b8   :  { %v3140_v4 = vadd.f32 %v3139_v58, %v3074_v26  ;;  %v3712_v26 = vld [vmem:[#allocation2 + $0x190] sm:$0x3]  ;;  %v3862_v58 = vsel %vm1362_vm7, %v3860_v38, %v3861_v62  ;;  %v10229_v44 = vpop.f32.mrf.mxu0  ;;  %v3726_v38 = vld [vmem:[#allocation2 + $0x200] sm:$0xfc] }
 0x2b9   :  { %v3855_v2 = vrot.slane %v3712_v26, 2  ;;  %v3859_v59 = vsel %vm1362_vm7, %v3857_v8, %v3858_v15  ;;  %v3728_v62 = vld [vmem:[#allocation2 + $0x210] sm:$0x3]  ;;  %v3878_v35 = vrot.slane %v3726_v38, 2  ;;  %v3723_v15 = vld [vmem:[#allocation2 + $0x1e8] sm:$0xfc] }
 0x2ba   :  { %v10193_v61 = vadd.f32 %v3140_v4, %v10141_v31  ;;  %v10200_v31 = vpop.f32.mrf.mxu2  ;;  %v3720_v4 = vld [vmem:[#allocation2 + $0x1d0] sm:$0x3] }
 0x2bb   :  { %v3083_v22 = vpop.f32.mrf.mxu1 }
 0x2bc   :  { %11553 = vst [vmem:[#allocation19_spill] sm:$0xff] %v10193_v61  ;;  %8848 = vmatmul.msk.f32.gmra.mxu3 %vm75_vm0, %v3841_v27 }
 0x2be   :  { %4024 = vmatmul.f32.gmra.mxu1 %v3850_v41  ;;  %v3867_v41 = vrot.slane %v3720_v4, 2 }
 0x2bf   :  { %v3142_v48 = vpop.f32.mrf.mxu3 }
 0x2c0   :  { %v3143_v7 = vadd.f32 %v3142_v48, %v3077_v6  ;;  %v3856_v6 = vsel %vm1362_vm7, %v3854_v34, %v3855_v2  ;;  %v3715_v48 = vld [vmem:[#allocation2 + $0x1a8] sm:$0xfc]  ;;  %v3722_v34 = vld [vmem:[#allocation2 + $0x1e0] sm:$0xfc]  ;;  %v3724_v2 = vld [vmem:[#allocation2 + $0x1f0] sm:$0x3]  ;;  %v10241_v54 = vpop.f32.mrf.mxu0 }
 0x2c1   :  { %v3872_v37 = vrot.slane %v3722_v34, 2  ;;  %v3873_v32 = vrot.slane %v3724_v2, 2 }
 0x2c2   :  { %v10203_v53 = vadd.f32 %v3143_v7, %v10151_v49  ;;  %v10216_v25 = vpop.f32.mrf.mxu2  ;;  %v3864_v7 = vrot.slane %v3717_v13, 2 }
 0x2c3   :  { %v10207_v16 = vpop.f32.mrf.mxu1 }
 0x2c4   :  { %11554 = vst [vmem:[#allocation20_spill] sm:$0xff] %v10203_v53  ;;  %8849 = vmatmul.msk.f32.gmra.mxu3 %vm75_vm0, %v3847_v24 }
 0x2c6   :  { %4027 = vmatmul.f32.gmra.mxu1 %v3856_v6  ;;  %v3721_v6 = vld [vmem:[#allocation2 + $0x1d8] sm:$0x3] }
 0x2c7   :  { %v3145_v50 = vpop.f32.mrf.mxu3 }
 0x2c8   :  { %v3146_v49 = vadd.f32 %v3145_v50, %v3080_v33  ;;  %v3874_v50 = vsel %vm1362_vm7, %v3872_v37, %v3873_v32  ;;  %v10254_v13 = vpop.f32.mrf.mxu0  ;;  %v3727_v37 = vld [vmem:[#allocation2 + $0x208] sm:$0xfc]  ;;  %v3729_v32 = vld [vmem:[#allocation2 + $0x218] sm:$0x3] }
 0x2ca   :  { %v10212_v21 = vadd.f32 %v3146_v49, %v10165_v29  ;;  %v3718_v29 = vld [vmem:[#allocation2 + $0x1c0] sm:$0xfc]  ;;  %v10231_v63 = vpop.f32.mrf.mxu2  ;;  %v3869_v49 = vrot.slane %v3719_v60, 2 }
 0x2cb   :  { %v10219_v43 = vpop.f32.mrf.mxu1  ;;  %v3866_v27 = vrot.slane %v3718_v29, 2  ;;  %v3725_v29 = vld [vmem:[#allocation2 + $0x1f8] sm:$0x3] }
 0x2cc   :  { %11555 = vst [vmem:[#allocation24_spill] sm:$0xff] %v10212_v21  ;;  %8850 = vmatmul.msk.f32.gmra.mxu3 %vm75_vm0, %v3853_v18  ;;  %v3870_v18 = vrot.slane %v3721_v6, 2  ;;  %v3881_v6 = vrot.slane %v3727_v37, 2 }
 0x2cd   :  { %11556 = vst [vmem:[#allocation22_spill] sm:$0xff] %v10219_v43  ;;  %v3868_v26 = vsel %vm1362_vm7, %v3866_v27, %v3867_v41  ;;  %v3875_v27 = vrot.slane %v3723_v15, 2  ;;  %v3876_v41 = vrot.slane %v3725_v29, 2  ;;  %v3731_v29 = vld [vmem:[#allocation2 + $0x228] sm:$0xfc] }
 0x2ce   :  { %4030 = vmatmul.f32.gmra.mxu1 %v3862_v58  ;;  %v3879_v58 = vrot.slane %v3728_v62, 2 }
 0x2cf   :  { %v3148_v33 = vpop.f32.mrf.mxu3  ;;  %v3877_v34 = vsel %vm1362_vm7, %v3875_v27, %v3876_v41  ;;  %v3738_v27 = vld [vmem:[#allocation2 + $0x260] sm:$0xfc]  ;;  %v3740_v41 = vld [vmem:[#allocation2 + $0x270] sm:$0x3] }
 0x2d0   :  { %v3149_v17 = vadd.f32 %v3148_v33, %v3083_v22  ;;  %v3871_v33 = vsel %vm1362_vm7, %v3869_v49, %v3870_v18  ;;  %v3880_v4 = vsel %vm1362_vm7, %v3878_v35, %v3879_v58  ;;  %v3734_v49 = vld [vmem:[#allocation2 + $0x240] sm:$0xfc]  ;;  %v3736_v18 = vld [vmem:[#allocation2 + $0x250] sm:$0x3]  ;;  %v10265_v35 = vpop.f32.mrf.mxu0  ;;  %v3897_v37 = vrot.slane %v3740_v41, 2 }
 0x2d1   :  { %v3890_v38 = vrot.slane %v3734_v49, 2  ;;  %v3891_v62 = vrot.slane %v3736_v18, 2 }
 0x2d2   :  { %v10223_v12 = vadd.f32 %v3149_v17, %v10175_v56  ;;  %v3863_v56 = vrot.slane %v3715_v48, 2  ;;  %v10245_v5 = vpop.f32.mrf.mxu2  ;;  %v3732_v48 = vld [vmem:[#allocation2 + $0x230] sm:$0x3] }
 0x2d3   :  { %v10227_v0 = vpop.f32.mrf.mxu1 }
 0x2d4   :  { %11557 = vst [vmem:[#allocation23_spill] sm:$0xff] %v10223_v12  ;;  %8851 = vmatmul.msk.f32.gmra.mxu3 %vm75_vm0, %v3859_v59  ;;  %v3865_v24 = vsel %vm1362_vm7, %v3863_v56, %v3864_v7  ;;  %v3730_v59 = vld [vmem:[#allocation2 + $0x220] sm:$0xfc]  ;;  %v3885_v7 = vrot.slane %v3732_v48, 2 }
 0x2d5   :  { %11558 = vst [vmem:[#allocation25_spill] sm:$0xff] %v10227_v0  ;;  %v3884_v56 = vrot.slane %v3730_v59, 2  ;;  %v3892_v59 = vsel %vm1362_vm7, %v3890_v38, %v3891_v62 }
 0x2d6   :  { %4033 = vmatmul.f32.gmra.mxu1 %v3868_v26 }
 0x2d7   :  { %v10234_v22 = vpop.f32.mrf.mxu3 }
 0x2d8   :  { %11559 = vst [vmem:[#allocation26_spill] sm:$0xff] %v10234_v22  ;;  %v10281_v18 = vpop.f32.mrf.mxu0 }
 0x2da   :  { %v10256_v26 = vpop.f32.mrf.mxu2 }
 0x2db   :  { %v10238_v36 = vpop.f32.mrf.mxu1 }
 0x2dc   :  { %8852 = vmatmul.msk.f32.gmra.mxu3 %vm75_vm0, %v3865_v24  ;;  %11560 = vst [vmem:[#allocation27_spill] sm:$0xff] %v10238_v36  ;;  %v3886_v24 = vsel %vm1362_vm7, %v3884_v56, %v3885_v7  ;;  %v3887_v56 = vrot.slane %v3731_v29, 2 }
 0x2de   :  { %4036 = vmatmul.f32.gmra.mxu1 %v3874_v50  ;;  %v3882_v50 = vrot.slane %v3729_v32, 2 }
 0x2df   :  { %v10243_v11 = vpop.f32.mrf.mxu3 }
 0x2e0   :  { %11561 = vst [vmem:[#allocation28_spill] sm:$0xff] %v10243_v11  ;;  %v3883_v58 = vsel %vm1362_vm7, %v3881_v6, %v3882_v50  ;;  %v3735_v6 = vld [vmem:[#allocation2 + $0x248] sm:$0xfc]  ;;  %v3737_v50 = vld [vmem:[#allocation2 + $0x258] sm:$0x3] }
 0x2e1   :  { %v3894_v29 = vrot.slane %v3737_v50, 2 }
 0x2e3   :  { %v10249_v8 = vpop.f32.mrf.mxu1 }
 0x2e4   :  { %8853 = vmatmul.msk.f32.gmra.mxu3 %vm75_vm0, %v3871_v33  ;;  %11562 = vst [vmem:[#allocation29_spill] sm:$0xff] %v10249_v8  ;;  %v10268_v33 = vpop.f32.mrf.mxu2 }
 0x2e6   :  { %4039 = vmatmul.f32.gmra.mxu1 %v3880_v4  ;;  %v3733_v4 = vld [vmem:[#allocation2 + $0x238] sm:$0x3] }
 0x2e7   :  { %v10252_v17 = vpop.f32.mrf.mxu3  ;;  %v3888_v7 = vrot.slane %v3733_v4, 2  ;;  %v3739_v4 = vld [vmem:[#allocation2 + $0x268] sm:$0xfc] }
 0x2e8   :  { %11563 = vst [vmem:[#allocation30_spill] sm:$0xff] %v10252_v17 }
 0x2e9   :  { %v3889_v32 = vsel %vm1362_vm7, %v3887_v56, %v3888_v7  ;;  %v3899_v56 = vrot.slane %v3739_v4, 2 }
 0x2eb   :  { %v10260_v2 = vpop.f32.mrf.mxu1 }
 0x2ec   :  { %8854 = vmatmul.msk.f32.gmra.mxu3 %vm75_vm0, %v3877_v34  ;;  %11564 = vst [vmem:[#allocation31_spill] sm:$0xff] %v10260_v2  ;;  %v3896_v34 = vrot.slane %v3738_v27, 2  ;;  %v10283_v38 = vpop.f32.mrf.mxu2  ;;  %v3741_v27 = vld [vmem:[#allocation2 + $0x278] sm:$0x3] }
 0x2ed   :  { %v3900_v7 = vrot.slane %v3741_v27, 2 }
 0x2ee   :  { %4042 = vmatmul.f32.gmra.mxu1 %v3886_v24  ;;  %v3898_v49 = vsel %vm1362_vm7, %v3896_v34, %v3897_v37 }
 0x2ef   :  { %v10263_v60 = vpop.f32.mrf.mxu3  ;;  %v3901_v19 = vsel %vm1362_vm7, %v3899_v56, %v3900_v7 }
 0x2f0   :  { %11565 = vst [vmem:[#allocation32_spill] sm:$0xff] %v10263_v60 }
 0x2f3   :  { %v10271_v15 = vpop.f32.mrf.mxu1 }
 0x2f4   :  { %8855 = vmatmul.msk.f32.gmra.mxu3 %vm75_vm0, %v3883_v58  ;;  %11566 = vst [vmem:[#allocation33_spill] sm:$0xff] %v10271_v15  ;;  %v3893_v58 = vrot.slane %v3735_v6, 2  ;;  %v3604_v37 = vpop.f32.mrf.mxu2 }
 0x2f6   :  { %4045 = vmatmul.f32.gmra.mxu1 %v3892_v59  ;;  %v3895_v41 = vsel %vm1362_vm7, %v3893_v58, %v3894_v29 }
 0x2f7   :  { %v10274_v48 = vpop.f32.mrf.mxu3 }
 0x2f8   :  { %11567 = vst [vmem:[#allocation34_spill] sm:$0xff] %v10274_v48 }
 0x2fb   :  { %v10278_v24 = vpop.f32.mrf.mxu1 }
 0x2fc   :  { %8856 = vmatmul.msk.f32.gmra.mxu3 %vm75_vm0, %v3889_v32  ;;  %11568 = vst [vmem:[#allocation35_spill] sm:$0xff] %v10278_v24  ;;  %v3539_v32 = vpop.f32.mrf.mxu0  ;;  %v3607_v24 = vpop.f32.mrf.mxu2 }
 0x2fe   :  { %4048 = vmatmul.f32.gmra.mxu1 %v3898_v49 }
 0x2ff   :  { %v10285_v62 = vpop.f32.mrf.mxu3 }
 0x300   :  { %11569 = vst [vmem:[#allocation36_spill] sm:$0xff] %v10285_v62 }
 0x303   :  { %v4004_v59 = vpop.f32.mrf.mxu1 }
 0x304   :  { %8857 = vmatmul.msk.f32.gmra.mxu3 %vm75_vm0, %v3895_v41  ;;  %v3542_v49 = vpop.f32.mrf.mxu0  ;;  %v3610_v41 = vpop.f32.mrf.mxu2 }
 0x307   :  { %v10289_v34 = vpop.f32.mrf.mxu3 }
 0x308   :  { %11570 = vst [vmem:[#allocation37_spill] sm:$0xff] %v10289_v34 }
 0x30b   :  { %v4007_v6 = vpop.f32.mrf.mxu1 }
 0x30c   :  { %8858 = vmatmul.msk.f32.gmra.mxu3 %vm75_vm0, %v3901_v19  ;;  %v3545_v29 = vpop.f32.mrf.mxu0  ;;  %v3613_v34 = vpop.f32.mrf.mxu2 }
 0x30f   :  { %v10293_v50 = vpop.f32.mrf.mxu3 }
 0x310   :  { %11571 = vst [vmem:[#allocation38_spill] sm:$0xff] %v10293_v50 }
 0x313   :  { %v4010_v15 = vpop.f32.mrf.mxu1 }
 0x314   :  { %v3548_v2 = vpop.f32.mrf.mxu0  ;;  %v3616_v7 = vpop.f32.mrf.mxu2 }
 0x317   :  { %v4069_v58 = vpop.f32.mrf.mxu3 }
 0x31b   :  { %v4013_v62 = vpop.f32.mrf.mxu1 }
 0x31c   :  { %v3551_v19 = vpop.f32.mrf.mxu0  ;;  %v3619_v36 = vpop.f32.mrf.mxu2 }
 0x31f   :  { %v4072_v4 = vpop.f32.mrf.mxu3 }
 0x323   :  { %v10295_v27 = vpop.f32.mrf.mxu1 }
 0x324   :  { %11572 = vst [vmem:[#allocation39_spill] sm:$0xff] %v10295_v27  ;;  %v3554_v60 = vpop.f32.mrf.mxu0  ;;  %v3622_v21 = vpop.f32.mrf.mxu2 }
 0x327   :  { %v4075_v48 = vpop.f32.mrf.mxu3 }
 0x32b   :  { %v10297_v8 = vpop.f32.mrf.mxu1 }
 0x32c   :  { %11573 = vst [vmem:[#allocation40_spill] sm:$0xff] %v10297_v8  ;;  %v3557_v0 = vpop.f32.mrf.mxu0  ;;  %v3625_v43 = vpop.f32.mrf.mxu2 }
 0x32f   :  { %v4078_v56 = vpop.f32.mrf.mxu3 }
 0x333   :  { %v10299_v52 = vpop.f32.mrf.mxu1 }
 0x334   :  { %11574 = vst [vmem:[#allocation41_spill] sm:$0xff] %v10299_v52  ;;  %v3560_v11 = vpop.f32.mrf.mxu0  ;;  %v3628_v23 = vpop.f32.mrf.mxu2 }
 0x337   :  { %v4081_v50 = vpop.f32.mrf.mxu3 }
 0x33b   :  { %v10301_v12 = vpop.f32.mrf.mxu1 }
 0x33c   :  { %11575 = vst [vmem:[#allocation42_spill] sm:$0xff] %v10301_v12  ;;  %v3563_v42 = vpop.f32.mrf.mxu0  ;;  %v10321_v14 = vpop.f32.mrf.mxu2 }
 0x33d   :  { %11584 = vst [vmem:[#allocation51_spill] sm:$0xff] %v10321_v14  ;;  %v4073_v14 = vadd.f32 %v4072_v4, %v4007_v6  ;;  %v11599_v4 = vld [vmem:[#allocation41_spill] sm:$0xff] }
 0x33f   :  { %v10303_v17 = vpop.f32.mrf.mxu3 }
 0x340   :  { %11576 = vst [vmem:[#allocation43_spill] sm:$0xff] %v10303_v17 }
 0x343   :  { %v10307_v53 = vpop.f32.mrf.mxu1 }
 0x344   :  { %11578 = vst [vmem:[#allocation45_spill] sm:$0xff] %v10307_v53  ;;  %v10319_v17 = vpop.f32.mrf.mxu0 }
 0x347   :  { %v10305_v51 = vpop.f32.mrf.mxu3 }
 0x348   :  { %11577 = vst [vmem:[#allocation44_spill] sm:$0xff] %v10305_v51 }
 0x34b   :  { %v10311_v61 = vpop.f32.mrf.mxu1 }
 0x34c   :  { %11580 = vst [vmem:[#allocation47_spill] sm:$0xff] %v10311_v61  ;;  %v10327_v22 = vpop.f32.mrf.mxu0  ;;  %v2872_v61 = vadd.f32 %v10160_v45, %v10157_v46  ;;  %v3599_v46 = vadd.f32 %v10268_v33, %v10265_v35  ;;  %v4079_v33 = vadd.f32 %v4078_v56, %v4013_v62  ;;  %v11590_v62 = vld [vmem:[#allocation39_spill] sm:$0xff] }
 0x34f   :  { %v10309_v8 = vpop.f32.mrf.mxu3 }
 0x350   :  { %11579 = vst [vmem:[#allocation46_spill] sm:$0xff] %v10309_v8  ;;  %v10329_v8 = vpop.f32.mrf.mxu2 }
 0x351   :  { %11587 = vst [vmem:[#allocation54_spill] sm:$0xff] %v10329_v8  ;;  %v2887_v8 = vadd.f32 %v10231_v63, %v10229_v44  ;;  %v3646_v44 = vadd.f32 %v3599_v46, %v10145_v39 }
 0x353   :  { %v10315_v27 = vpop.f32.mrf.mxu1 }
 0x354   :  { %11582 = vst [vmem:[#allocation49_spill] sm:$0xff] %v10315_v27  ;;  %v2875_v27 = vadd.f32 %v10179_v57, %v10177_v1  ;;  %v3605_v1 = vadd.f32 %v3604_v37, %v3539_v32  ;;  %v4070_v57 = vadd.f32 %v4069_v58, %v4004_v59  ;;  %v3626_v59 = vadd.f32 %v3625_v43, %v3560_v11  ;;  %v10373_v32 = vpop.f32.mrf.mxu0  ;;  %v11595_v37 = vld [vmem:[#allocation43_spill] sm:$0xff]  ;;  %v11596_v11 = vld [vmem:[#allocation22_spill] sm:$0xff] }
 0x356   :  { %v3648_v35 = vadd.f32 %v3605_v1, %v10169_v55 }
 0x357   :  { %v10313_v52 = vpop.f32.mrf.mxu3 }
 0x358   :  { %11581 = vst [vmem:[#allocation48_spill] sm:$0xff] %v10313_v52  ;;  %v3602_v52 = vadd.f32 %v10283_v38, %v10281_v18  ;;  %v2890_v18 = vadd.f32 %v10245_v5, %v10241_v54  ;;  %v2904_v54 = vadd.f32 %v2875_v27, %v10080_v47  ;;  %v3620_v5 = vadd.f32 %v3619_v36, %v3554_v60  ;;  %v11589_v38 = vld [vmem:[#allocation14_spill] sm:$0xff]  ;;  %v11600_v27 = vld [vmem:[#allocation44_spill] sm:$0xff] }
 0x359   :  { %v4088_v56 = vadd.f32 %v11600_v27, %v11599_v4 }
 0x35b   :  { %v10323_v51 = vpop.f32.mrf.mxu1 }
 0x35c   :  { %11585 = vst [vmem:[#allocation52_spill] sm:$0xff] %v10323_v51  ;;  %v2881_v51 = vadd.f32 %v10200_v31, %v10198_v28  ;;  %v10354_v28 = vadd.f32 %v10256_v26, %v10254_v13  ;;  %v3608_v31 = vadd.f32 %v3607_v24, %v3542_v49  ;;  %v10364_v13 = vadd.f32 %v4070_v57, %v3646_v44  ;;  %v3575_v27 = vpop.f32.mrf.mxu0 }
 0x35d   :  { %v3623_v24 = vadd.f32 %v3622_v21, %v3557_v0  ;;  %v11592_v21 = vld [vmem:[#allocation18_spill] sm:$0xff] }
 0x35e   :  { %v4186_v49 = vmul.f32 %v10364_v13, %v10364_v13 }
 0x35f   :  { %v10317_v12 = vpop.f32.mrf.mxu3 }
 0x360   :  { %11583 = vst [vmem:[#allocation50_spill] sm:$0xff] %v10317_v12  ;;  %v2878_v12 = vadd.f32 %v10190_v10, %v10188_v20  ;;  %v3647_v20 = vadd.f32 %v3602_v52, %v10155_v9  ;;  %v4076_v10 = vadd.f32 %v4075_v48, %v4010_v15  ;;  %v3614_v52 = vadd.f32 %v3613_v34, %v3548_v2 }
 0x361   :  { %v3617_v9 = vadd.f32 %v3616_v7, %v3551_v19  ;;  %v2903_v15 = vadd.f32 %v2872_v61, %v10073_v30  ;;  %v3649_v48 = vadd.f32 %v3608_v31, %v10183_v3  ;;  %v4082_v2 = vadd.f32 %v4081_v50, %v11590_v62  ;;  %v11591_v30 = vld [vmem:[#allocation15_spill] sm:$0xff]  ;;  %v10376_v61 = vpop.f32.mrf.mxu2  ;;  %v11597_v50 = vld [vmem:[#allocation28_spill] sm:$0xff] }
 0x362   :  { %v10359_v63 = vadd.f32 %v4073_v14, %v3647_v20  ;;  %v10366_v26 = vadd.f32 %v4076_v10, %v3648_v35  ;;  %v11588_v14 = vld [vmem:[#allocation26_spill] sm:$0xff]  ;;  %v2905_v55 = vadd.f32 %v2878_v12, %v11589_v38  ;;  %v2906_v47 = vadd.f32 %v2881_v51, %v11591_v30  ;;  %v11594_v12 = vld [vmem:[#allocation40_spill] sm:$0xff]  ;;  %v11602_v20 = vld [vmem:[#allocation51_spill] sm:$0xff] }
 0x363   :  { %v3152_v39 = vadd.f32 %v11588_v14, %v10207_v16  ;;  %v10380_v60 = vadd.f32 %v4079_v33, %v3649_v48  ;;  %v3629_v3 = vadd.f32 %v3628_v23, %v3563_v42  ;;  %v11593_v16 = vld [vmem:[#allocation19_spill] sm:$0xff]  ;;  %v4085_v6 = vadd.f32 %v11595_v37, %v11594_v12  ;;  %v11601_v19 = vld [vmem:[#allocation16_spill] sm:$0xff]  ;;  %v11604_v35 = vld [vmem:[#allocation42_spill] sm:$0xff] }
 0x364   :  { %v4187_v36 = vmul.f32 %v10359_v63, %v10359_v63  ;;  %v3155_v51 = vadd.f32 %v11597_v50, %v11596_v11  ;;  %v4165_v58 = vadd.f32 %v10359_v63, %v10364_v13  ;;  %v4188_v23 = vmul.f32 %v10366_v26, %v10366_v26  ;;  %v11605_v33 = vld [vmem:[#allocation46_spill] sm:$0xff]  ;;  %v11606_v14 = vld [vmem:[#allocation25_spill] sm:$0xff]  ;;  %v11612_v12 = vld [vmem:[#allocation32_spill] sm:$0xff] }
 0x365   :  { %v3183_v42 = vadd.f32 %v3152_v39, %v2903_v15  ;;  %v2908_v7 = vadd.f32 %v2887_v8, %v11601_v19  ;;  %v4189_v57 = vmul.f32 %v10380_v60, %v10380_v60  ;;  %v3632_v10 = vadd.f32 %v11602_v20, %v10319_v17  ;;  %v11607_v8 = vld [vmem:[#allocation30_spill] sm:$0xff]  ;;  %v11608_v17 = vld [vmem:[#allocation23_spill] sm:$0xff] }
 0x366   :  { %v4202_v46 = vadd.f32 %v4187_v36, %v4186_v49  ;;  %v4166_v1 = vadd.f32 %v4165_v58, %v10366_v26  ;;  %v3184_v48 = vadd.f32 %v3155_v51, %v2904_v54  ;;  %v3158_v39 = vadd.f32 %v11607_v8, %v11606_v14  ;;  %v11613_v54 = vld [vmem:[#allocation17_spill] sm:$0xff]  ;;  %v11617_v19 = vld [vmem:[#allocation34_spill] sm:$0xff] }
 0x367   :  { %v10325_v53 = vpop.f32.mrf.mxu3  ;;  %v3653_v36 = vadd.f32 %v3620_v5, %v11608_v17  ;;  %v3654_v58 = vadd.f32 %v3623_v24, %v3183_v42  ;;  %v11621_v8 = vld [vmem:[#allocation49_spill] sm:$0xff] }
 0x368   :  { %11586 = vst [vmem:[#allocation53_spill] sm:$0xff] %v10325_v53  ;;  %v2884_v53 = vadd.f32 %v10216_v25, %v10214_v40  ;;  %v3611_v40 = vadd.f32 %v3610_v41, %v3545_v29  ;;  %v10356_v25 = vpop.f32.mrf.mxu1  ;;  %v11598_v29 = vld [vmem:[#allocation20_spill] sm:$0xff]  ;;  %v4203_v38 = vadd.f32 %v4202_v46, %v4188_v23  ;;  %v4167_v62 = vadd.f32 %v4166_v1, %v10380_v60  ;;  %v11614_v23 = vld [vmem:[#allocation47_spill] sm:$0xff]  ;;  %v11624_v17 = vld [vmem:[#allocation37_spill] sm:$0xff] }
 0x369   :  { %v3651_v41 = vadd.f32 %v3614_v52, %v11598_v29  ;;  %v4091_v52 = vadd.f32 %v11605_v33, %v11604_v35  ;;  %v11615_v29 = vld [vmem:[#allocation50_spill] sm:$0xff]  ;;  %v3185_v4 = vadd.f32 %v3158_v39, %v2905_v55  ;;  %v3640_v1 = vpop.f32.mrf.mxu2  ;;  %v3655_v42 = vadd.f32 %v3626_v59, %v3184_v48 }
 0x36a   :  { %v2907_v0 = vadd.f32 %v2884_v53, %v11592_v21  ;;  %v3650_v34 = vadd.f32 %v3611_v40, %v11593_v16  ;;  %v11603_v40 = vld [vmem:[#allocation24_spill] sm:$0xff]  ;;  %v11609_v21 = vld [vmem:[#allocation45_spill] sm:$0xff]  ;;  %v4204_v11 = vadd.f32 %v4203_v38, %v4189_v57  ;;  %v4097_v5 = vadd.f32 %v11615_v29, %v11614_v23  ;;  %v11620_v33 = vld [vmem:[#allocation54_spill] sm:$0xff] }
 0x36b   :  { %v10407_v31 = vadd.f32 %v4085_v6, %v3651_v41  ;;  %v3652_v44 = vadd.f32 %v3617_v9, %v11603_v40  ;;  %v11610_v9 = vld [vmem:[#allocation48_spill] sm:$0xff]  ;;  %v2909_v6 = vadd.f32 %v2890_v18, %v11613_v54  ;;  %v10428_v49 = vadd.f32 %v4091_v52, %v3653_v36  ;;  %v11618_v18 = vld [vmem:[#allocation31_spill] sm:$0xff] }
 0x36c   :  { %v10396_v53 = vadd.f32 %v4082_v2, %v3650_v34  ;;  %v4094_v16 = vadd.f32 %v11610_v9, %v11609_v21  ;;  %v11611_v34 = vld [vmem:[#allocation27_spill] sm:$0xff]  ;;  %v11619_v57 = vld [vmem:[#allocation36_spill] sm:$0xff]  ;;  %v3635_v55 = vadd.f32 %v11620_v33, %v10327_v22  ;;  %v10450_v9 = vadd.f32 %v4097_v5, %v3655_v42 }
 0x36d   :  { %v10417_v30 = vadd.f32 %v4088_v56, %v3652_v44  ;;  %v3161_v37 = vadd.f32 %v11612_v12, %v11611_v34  ;;  %v4191_v51 = vmul.f32 %v10407_v31, %v10407_v31  ;;  %v11616_v56 = vld [vmem:[#allocation29_spill] sm:$0xff]  ;;  %v3167_v20 = vadd.f32 %v11619_v57, %v11618_v18  ;;  %v11625_v22 = vld [vmem:[#allocation52_spill] sm:$0xff]  ;;  %v11626_v23 = vld [vmem:[#allocation35_spill] sm:$0xff] }
 0x36e   :  { %v4190_v2 = vmul.f32 %v10396_v53, %v10396_v53  ;;  %v4168_v50 = vadd.f32 %v4167_v62, %v10396_v53  ;;  %v3164_v46 = vadd.f32 %v11617_v19, %v11616_v56  ;;  %v10439_v24 = vadd.f32 %v4094_v16, %v3654_v58  ;;  %v11623_v62 = vld [vmem:[#allocation33_spill] sm:$0xff] }
 0x36f   :  { %v10347_v45 = vpop.f32.mrf.mxu3  ;;  %v4192_v35 = vmul.f32 %v10417_v30, %v10417_v30  ;;  %v3186_v52 = vadd.f32 %v3161_v37, %v2906_v47  ;;  %v11622_v39 = vld [vmem:[#allocation53_spill] sm:$0xff]  ;;  %v3170_v36 = vadd.f32 %v11624_v17, %v11623_v62  ;;  %v3656_v48 = vadd.f32 %v3629_v3, %v3185_v4 }
 0x370   :  { %v4043_v15 = vpop.f32.mrf.mxu1  ;;  %v4169_v40 = vadd.f32 %v4168_v50, %v10407_v31  ;;  %v4205_v44 = vadd.f32 %v4204_v11, %v4190_v2  ;;  %v4100_v38 = vadd.f32 %v11622_v39, %v11621_v8  ;;  %v4193_v2 = vmul.f32 %v10428_v49, %v10428_v49  ;;  %v11628_v57 = vld [vmem:[#allocation21_spill] sm:$0xff] }
 0x371   :  { %v3187_v16 = vadd.f32 %v3164_v46, %v2907_v0  ;;  %v4103_v47 = vadd.f32 %v10347_v45, %v11625_v22  ;;  %v3638_v34 = vadd.f32 %v10376_v61, %v10373_v32  ;;  %v3188_v12 = vadd.f32 %v3167_v20, %v2908_v7  ;;  %v11627_v45 = vld [vmem:[#allocation38_spill] sm:$0xff]  ;;  %v3578_v7 = vpop.f32.mrf.mxu0  ;;  %v3643_v4 = vpop.f32.mrf.mxu2 }
 0x372   :  { %v4170_v14 = vadd.f32 %v4169_v40, %v10417_v30  ;;  %v4206_v21 = vadd.f32 %v4205_v44, %v4191_v51  ;;  %v4194_v54 = vmul.f32 %v10439_v24, %v10439_v24  ;;  %v10460_v51 = vadd.f32 %v4100_v38, %v3656_v48 }
 0x373   :  { %v3657_v0 = vadd.f32 %v3632_v10, %v3186_v52  ;;  %v3189_v58 = vadd.f32 %v3170_v36, %v2909_v6  ;;  %v3173_v29 = vadd.f32 %v11627_v45, %v11626_v23  ;;  %v4195_v32 = vmul.f32 %v10450_v9, %v10450_v9 }
 0x374   :  { %v4171_v59 = vadd.f32 %v4170_v14, %v10428_v49  ;;  %v4207_v37 = vadd.f32 %v4206_v21, %v4192_v35  ;;  %v3658_v46 = vadd.f32 %v3635_v55, %v3187_v16  ;;  %v3641_v18 = vadd.f32 %v3640_v1, %v3575_v27 }
 0x375   :  { %v10469_v19 = vadd.f32 %v4103_v47, %v3657_v0  ;;  %v3659_v6 = vadd.f32 %v3638_v34, %v3188_v12  ;;  %v4196_v40 = vmul.f32 %v10460_v51, %v10460_v51  ;;  %v3644_v33 = vadd.f32 %v3643_v4, %v3578_v7 }
 0x376   :  { %v4172_v50 = vadd.f32 %v4171_v59, %v10439_v24  ;;  %v4208_v5 = vadd.f32 %v4207_v37, %v4193_v2 }
 0x377   :  { %v10386_v43 = vpop.f32.mrf.mxu3 }
 0x378   :  { %v4046_v11 = vpop.f32.mrf.mxu1  ;;  %v4106_v3 = vadd.f32 %v10386_v43, %v10356_v25  ;;  %v4173_v56 = vadd.f32 %v4172_v50, %v10450_v9  ;;  %v2910_v25 = vadd.f32 %v10354_v28, %v11628_v57  ;;  %v4209_v43 = vadd.f32 %v4208_v5, %v4194_v54 }
 0x379   :  { %v3660_v28 = vadd.f32 %v3641_v18, %v3189_v58 }
 0x37a   :  { %v4174_v20 = vadd.f32 %v4173_v56, %v10460_v51  ;;  %v10476_v44 = vadd.f32 %v4106_v3, %v3658_v46  ;;  %v3190_v42 = vadd.f32 %v3173_v29, %v2910_v25  ;;  %v4210_v52 = vadd.f32 %v4209_v43, %v4195_v32 }
 0x37c   :  { %v4175_v55 = vadd.f32 %v4174_v20, %v10469_v19  ;;  %v4211_v1 = vadd.f32 %v4210_v52, %v4196_v40  ;;  %v4198_v8 = vmul.f32 %v10476_v44, %v10476_v44  ;;  %v3661_v38 = vadd.f32 %v3644_v33, %v3190_v42 }
 0x37e   :  { %v4176_v14 = vadd.f32 %v4175_v55, %v10476_v44 }
 0x37f   :  { %v4108_v41 = vpop.f32.mrf.mxu3 }
 0x380   :  { %v4109_v10 = vadd.f32 %v4108_v41, %v4043_v15  ;;  %v4197_v15 = vmul.f32 %v10469_v19, %v10469_v19  ;;  %v4049_v27 = vpop.f32.mrf.mxu1 }
 0x382   :  { %v10481_v41 = vadd.f32 %v4109_v10, %v3659_v6  ;;  %v4212_v17 = vadd.f32 %v4211_v1, %v4197_v15 }
 0x384   :  { %v4177_v36 = vadd.f32 %v4176_v14, %v10481_v41  ;;  %v4199_v21 = vmul.f32 %v10481_v41, %v10481_v41  ;;  %v4213_v16 = vadd.f32 %v4212_v17, %v4198_v8 }
 0x386   :  { %v4214_v47 = vadd.f32 %v4213_v16, %v4199_v21 }
 0x387   :  { %v4111_v61 = vpop.f32.mrf.mxu3 }
 0x388   :  { %v4112_v35 = vadd.f32 %v4111_v61, %v4046_v11 }
 0x38a   :  { %v10486_v39 = vadd.f32 %v4112_v35, %v3660_v28 }
 0x38c   :  { %v4178_v59 = vadd.f32 %v4177_v36, %v10486_v39  ;;  %v4200_v48 = vmul.f32 %v10486_v39, %v10486_v39 }
 0x38e   :  { %v4215_v37 = vadd.f32 %v4214_v47, %v4200_v48 }
 0x38f   :  { %v4114_v62 = vpop.f32.mrf.mxu3 }
 0x390   :  { %v4115_v2 = vadd.f32 %v4114_v62, %v4049_v27 }
 0x392   :  { %v10494_v22 = vadd.f32 %v4115_v2, %v3661_v38 }
 0x394   :  { %v4179_v34 = vadd.f32 %v4178_v59, %v10494_v22  ;;  %v4201_v12 = vmul.f32 %v10494_v22, %v10494_v22 }
 0x396   :  { %v4180_v54 = vrot.slane %v4179_v34, 4  ;;  %v4216_v50 = vadd.f32 %v4215_v37, %v4201_v12 }
 0x398   :  { %v4181_v11 = vadd.f32 %v4180_v54, %v4179_v34  ;;  %v4217_v58 = vrot.slane %v4216_v50, 4 }
 0x39a   :  { %v4182_v0 = vrot.slane %v4181_v11, 2  ;;  %v4218_v29 = vadd.f32 %v4217_v58, %v4216_v50 }
 0x39c   :  { %v4183_v3 = vadd.f32 %v4182_v0, %v4181_v11  ;;  %v4219_v5 = vrot.slane %v4218_v29, 2  ;;  %v4287_v0 = vld [vmem:[%s11515_s2] sm:$0x1] }
 0x39e   :  { %v4184_v23 = vrot.slane %v4183_v3, 1  ;;  %v4220_v32 = vadd.f32 %v4219_v5, %v4218_v29  ;;  %v4300_v5 = vld [vmem:[%s11516_s3] sm:$0x1] }
 0x3a0   :  { %v4185_v45 = vadd.f32 %v4184_v23, %v4183_v3  ;;  %v4221_v61 = vrot.slane %v4220_v32, 1 }
 0x3a2   :  { %4243 = vrot.lane.b32.xlu2 %v4185_v45, %s9153_s16  ;;  %4235 = vrot.lane.b32.xlu0 %v4185_v45, %s9154_s17  ;;  %v4222_v7 = vadd.f32 %v4221_v61, %v4220_v32 }
 0x3a3   :  { %4226 = vrot.lane.b32.xlu1 %v4185_v45, %s9155_s18 }
 0x3aa   :  { %4267 = vrot.lane.b32.xlu2 %v4185_v45, %s9156_s19  ;;  %4259 = vrot.lane.b32.xlu0 %v4185_v45, %s9157_s20 }
 0x3ab   :  { %4251 = vrot.lane.b32.xlu1 %v4185_v45, %s9158_s21 }
 0x3b2   :  { %4231 = vrot.lane.b32.xlu2 %v4222_v7, %s9155_s18  ;;  %4247 = vrot.lane.b32.xlu0 %v4222_v7, %s9153_s16 }
 0x3b3   :  { %4239 = vrot.lane.b32.xlu1 %v4222_v7, %s9154_s17 }
 0x3ba   :  { %4255 = vrot.lane.b32.xlu2 %v4222_v7, %s9158_s21  ;;  %4271 = vrot.lane.b32.xlu0 %v4222_v7, %s9156_s19 }
 0x3bb   :  { %4263 = vrot.lane.b32.xlu1 %v4222_v7, %s9157_s20 }
 0x3c2   :  { %4279 = vrot.lane.b32.xlu2 %v4222_v7, %s9151_s4 }
 0x3c3   :  { %4275 = vrot.lane.b32.xlu1 %v4185_v45, %s9151_s4 }
 0x3fc   :  { %v4244_v4 = vpop.permute.xlu2 %4243 }
 0x404   :  { %v4268_v10 = vpop.permute.xlu2 %4267 }
 0x40c   :  { %v4232_v25 = vpop.permute.xlu2 %4231 }
 0x40d   :  { %v4234_v6 = vadd.f32 %v4232_v25, %v4222_v7  ;;  %v4757_v7 = vld [vmem:[#allocation9 + $0x98] sm:$0xff]  ;;  %v4752_v25 = vld [vmem:[#allocation9 + $0x70] sm:$0xff] }
 0x40e   :  { %4883 = vmatpush.msra.mxu2 %v4757_v7 }
 0x414   :  { %v4236_v56 = vpop.permute.xlu0 %4235  ;;  %v4256_v55 = vpop.permute.xlu2 %4255 }
 0x415   :  { %v4227_v46 = vpop.permute.xlu1 %4226 }
 0x416   :  { %v4229_v43 = vadd.f32 %v4227_v46, %v4185_v45 }
 0x418   :  { %v4238_v40 = vadd.f32 %v4236_v56, %v4229_v43 }
 0x41a   :  { %v4246_v52 = vadd.f32 %v4244_v4, %v4238_v40 }
 0x41c   :  { %v4260_v18 = vpop.permute.xlu0 %4259  ;;  %v4280_v17 = vpop.permute.xlu2 %4279 }
 0x41d   :  { %v4252_v57 = vpop.permute.xlu1 %4251 }
 0x41e   :  { %v4254_v15 = vadd.f32 %v4252_v57, %v4246_v52 }
 0x420   :  { %v4262_v14 = vadd.f32 %v4260_v18, %v4254_v15 }
 0x422   :  { %v4270_v62 = vadd.f32 %v4268_v10, %v4262_v14  ;;  %v4753_v10 = vld [vmem:[#allocation9 + $0x78] sm:$0xff] }
 0x423   :  { %4806 = vmatpush.msra.mxu0 %v4753_v10 }
 0x424   :  { %v4248_v42 = vpop.permute.xlu0 %4247 }
 0x425   :  { %v4240_v20 = vpop.permute.xlu1 %4239  ;;  %4807 = vmatpush.msra.mxu0 %v4752_v25  ;;  %v4746_v25 = vld [vmem:[#allocation9 + $0x40] sm:$0xff] }
 0x426   :  { %v4242_v35 = vadd.f32 %v4240_v20, %v4234_v6 }
 0x428   :  { %v4250_v33 = vadd.f32 %v4248_v42, %v4242_v35  ;;  %v4751_v42 = vld [vmem:[#allocation9 + $0x68] sm:$0xff] }
 0x429   :  { %4808 = vmatpush.msra.mxu0 %v4751_v42  ;;  %v4754_v42 = vld [vmem:[#allocation9 + $0x80] sm:$0xff] }
 0x42a   :  { %v4258_v28 = vadd.f32 %v4256_v55, %v4250_v33  ;;  %v4756_v33 = vld [vmem:[#allocation9 + $0x90] sm:$0xff] }
 0x42b   :  { %4884 = vmatpush.msra.mxu2 %v4756_v33 }
 0x42c   :  { %v4272_v8 = vpop.permute.xlu0 %4271 }
 0x42d   :  { %v4264_v27 = vpop.permute.xlu1 %4263 }
 0x42e   :  { %v4266_v1 = vadd.f32 %v4264_v27, %v4258_v28 }
 0x430   :  { %v4274_v38 = vadd.f32 %v4272_v8, %v4266_v1 }
 0x432   :  { %v4282_v21 = vadd.f32 %v4280_v17, %v4274_v38 }
 0x434   :  { %v4284_v59 = vmul.f32 0.0009765625, %v4282_v21 }
 0x435   :  { %v4276_v36 = vpop.permute.xlu1 %4275 }
 0x436   :  { %v4278_v2 = vadd.f32 %v4276_v36, %v4270_v62  ;;  %v4750_v62 = vld [vmem:[#allocation9 + $0x60] sm:$0xff] }
 0x437   :  { %4809 = vmatpush.msra.mxu0 %v4750_v62 }
 0x438   :  { %v4283_v16 = vmul.f32 0.0009765625, %v4278_v2 }
 0x43a   :  { %v4285_v48 = vmul.f32 %v4283_v16, %v4283_v16 }
 0x43c   :  { %v4286_v47 = vsub.f32 %v4284_v59, %v4285_v48 }
 0x43e   :  { %v4288_v34 = vadd.f32 1e-05, %v4286_v47 }
 0x440   :  { %9037 = vrsqrt.f32 %v4288_v34  ;;  %vm4295_vm9 = vweird.f32 %v4288_v34 }
 0x446   :  { %v9038_v12 = vpop.eup %9037 }
 0x447   :  { %v4290_v37 = vmul.f32 %v9038_v12, %v4288_v34  ;;  %vm4296_vm8 = vweird.f32 %v9038_v12 }
 0x448   :  { %vm4297_vm10 = vmor %vm4295_vm9, %vm4296_vm8 }
 0x449   :  { %v4291_v54 = vmul.f32 %v9038_v12, %v4290_v37  ;;  %v4749_v37 = vld [vmem:[#allocation9 + $0x58] sm:$0xff] }
 0x44a   :  { %4810 = vmatpush.msra.mxu0 %v4749_v37  ;;  %v5233_v37 = vld [vmem:[#allocation9 + $0xe0] sm:$0xff] }
 0x44b   :  { %v4292_v11 = vmul.f32 0.5, %v4291_v54 }
 0x44d   :  { %v4293_v50 = vsub.f32 1.5, %v4292_v11 }
 0x44f   :  { %v4294_v3 = vmul.f32 %v9038_v12, %v4293_v50 }
 0x451   :  { %v4298_v58 = vsel %vm4297_vm10, %v9038_v12, %v4294_v3 }
 0x452   :  { %v4299_v23 = vmul.f32 %v4298_v58, %v4287_v0 }
 0x454   :  { %v4304_v45 = vperm.slane %v4299_v23, 0  ;;  %v4301_v29 = vmul.f32 %v4299_v23, %v4283_v16 }
 0x456   :  { %4311 = vrot.lane.b32.xlu2 %v4304_v45, %s9157_s20  ;;  %4308 = vrot.lane.b32.xlu1 %v4304_v45, %s9156_s19  ;;  %v4302_v32 = vsub.f32 %v4300_v5, %v4301_v29 }
 0x457   :  { %4305 = vrot.lane.b32.xlu0 %v4304_v45, %s9151_s4 }
 0x458   :  { %v4339_v61 = vperm.slane %v4302_v32, 0 }
 0x45e   :  { %4320 = vrot.lane.b32.xlu2 %v4304_v45, %s9154_s17  ;;  %4314 = vrot.lane.b32.xlu1 %v4304_v45, %s9158_s21 }
 0x45f   :  { %4317 = vrot.lane.b32.xlu0 %v4304_v45, %s9153_s16 }
 0x466   :  { %4323 = vrot.lane.b32.xlu1 %v4304_v45, %s9155_s18  ;;  %4343 = vrot.lane.b32.xlu2 %v4339_v61, %s9156_s19 }
 0x467   :  { %4340 = vrot.lane.b32.xlu0 %v4339_v61, %s9151_s4 }
 0x46e   :  { %4346 = vrot.lane.b32.xlu1 %v4339_v61, %s9157_s20  ;;  %4352 = vrot.lane.b32.xlu2 %v4339_v61, %s9153_s16 }
 0x46f   :  { %4349 = vrot.lane.b32.xlu0 %v4339_v61, %s9158_s21 }
 0x476   :  { %4358 = vrot.lane.b32.xlu1 %v4339_v61, %s9155_s18 }
 0x477   :  { %4355 = vrot.lane.b32.xlu0 %v4339_v61, %s9154_s17 }
 0x4b0   :  { %v4312_v46 = vpop.permute.xlu2 %4311 }
 0x4b8   :  { %v4321_v43 = vpop.permute.xlu2 %4320 }
 0x4c0   :  { %v4344_v55 = vpop.permute.xlu2 %4343 }
 0x4c8   :  { %v4309_v4 = vpop.permute.xlu1 %4308  ;;  %v4353_v2 = vpop.permute.xlu2 %4352 }
 0x4c9   :  { %v4306_v56 = vpop.permute.xlu0 %4305 }
 0x4ca   :  { %v4326_v6 = vsel %vm273_vm4, %v4299_v23, %v4306_v56 }
 0x4cb   :  { %v4327_v35 = vsel %vm75_vm0, %v4326_v6, %v4309_v4 }
 0x4cc   :  { %v4329_v52 = vsel %vm4328_vm11, %v4327_v35, %v4312_v46  ;;  %v5238_v35 = vld [vmem:[#allocation9 + $0x108] sm:$0xff] }
 0x4d0   :  { %v4315_v18 = vpop.permute.xlu1 %4314 }
 0x4d1   :  { %v4318_v57 = vpop.permute.xlu0 %4317  ;;  %v4331_v15 = vsel %vm4330_vm12, %v4329_v52, %v4315_v18  ;;  %v4747_v18 = vld [vmem:[#allocation9 + $0x48] sm:$0xff]  ;;  %v4744_v52 = vld [vmem:[#allocation9 + $0x30] sm:$0xff] }
 0x4d2   :  { %v4333_v1 = vsel %vm4332_vm13, %v4331_v15, %v4318_v57  ;;  %v4755_v57 = vld [vmem:[#allocation9 + $0x88] sm:$0xff]  ;;  %v5237_v15 = vld [vmem:[#allocation9 + $0x100] sm:$0xff] }
 0x4d3   :  { %v4335_v17 = vsel %vm4334_vm14, %v4333_v1, %v4321_v43  ;;  %4885 = vmatpush.msra.mxu2 %v4755_v57  ;;  %v4743_v1 = vld [vmem:[#allocation9 + $0x28] sm:$0xff] }
 0x4d5   :  { %4886 = vmatpush.msra.mxu2 %v4754_v42 }
 0x4d8   :  { %v4324_v20 = vpop.permute.xlu1 %4323 }
 0x4d9   :  { %v4341_v40 = vpop.permute.xlu0 %4340  ;;  %v4337_v36 = vsel %vm4336_vm15, %v4335_v17, %v4324_v20  ;;  %v5240_v20 = vld [vmem:[#allocation9 + $0x118] sm:$0xff] }
 0x4da   :  { %v4361_v28 = vsel %vm273_vm4, %v4302_v32, %v4341_v40  ;;  %v10544_v16 = vperm.slane %v4337_v36, 0  ;;  %v4748_v32 = vld [vmem:[#allocation9 + $0x50] sm:$0xff]  ;;  %v4745_v40 = vld [vmem:[#allocation9 + $0x38] sm:$0xff]  ;;  %5277 = vmatpush.msrb.mxu1 %v5240_v20  ;;  %v4742_v36 = vld [vmem:[#allocation9 + $0x20] sm:$0xff] }
 0x4db   :  { %v4362_v8 = vsel %vm75_vm0, %v4361_v28, %v4344_v55  ;;  %4811 = vmatpush.msra.mxu0 %v4748_v32  ;;  %v4739_v32 = vld [vmem:[#allocation9 + $0x8] sm:$0xff] }
 0x4dc   :  { %v4371_v11 = vmul.f32 %v10544_v16, %v10366_v26  ;;  %v4370_v50 = vmul.f32 %v10544_v16, %v10359_v63  ;;  %v4369_v0 = vmul.f32 %v10544_v16, %v10364_v13  ;;  %v4374_v63 = vmul.f32 %v10544_v16, %v10407_v31 }
 0x4dd   :  { %v4373_v13 = vmul.f32 %v10544_v16, %v10396_v53  ;;  %v4372_v26 = vmul.f32 %v10544_v16, %v10380_v60  ;;  %v4378_v53 = vmul.f32 %v10544_v16, %v10450_v9  ;;  %v4377_v60 = vmul.f32 %v10544_v16, %v10439_v24  ;;  %4812 = vmatpush.msra.mxu0 %v4747_v18  ;;  %v5239_v24 = vld [vmem:[#allocation9 + $0x110] sm:$0xff] }
 0x4de   :  { %v4375_v31 = vmul.f32 %v10544_v16, %v10417_v30  ;;  %5278 = vmatpush.msrb.mxu1 %v5239_v24  ;;  %v4381_v28 = vmul.f32 %v10544_v16, %v10476_v44 }
 0x4df   :  { %4813 = vmatpush.msra.mxu0 %v4746_v25  ;;  %v4971_v25 = vld [vmem:[#allocation2 + $0x18] sm:$0x1] }
 0x4e0   :  { %v4347_v27 = vpop.permute.xlu1 %4346  ;;  %5279 = vmatpush.msrb.mxu1 %v5238_v35 }
 0x4e1   :  { %v4350_v14 = vpop.permute.xlu0 %4349  ;;  %v4363_v38 = vsel %vm4328_vm11, %v4362_v8, %v4347_v27  ;;  %4814 = vmatpush.msra.mxu0 %v4745_v40  ;;  %v4380_v27 = vmul.f32 %v10544_v16, %v10469_v19  ;;  %v4379_v8 = vmul.f32 %v10544_v16, %v10460_v51  ;;  %v5235_v19 = vld [vmem:[#allocation9 + $0xf0] sm:$0xff]  ;;  %v5234_v51 = vld [vmem:[#allocation9 + $0xe8] sm:$0xff]  ;;  %v5715_v40 = vld [vmem:[#allocation9 + $0x1d8] sm:$0xff] }
 0x4e2   :  { %v4364_v21 = vsel %vm4330_vm12, %v4363_v38, %v4350_v14  ;;  %v5244_v14 = vld [vmem:[#allocation9 + $0x138] sm:$0xff]  ;;  %5280 = vmatpush.msrb.mxu1 %v5237_v15  ;;  %5825 = vmatpush.msrb.mxu2 %v5715_v40 }
 0x4e3   :  { %v4365_v48 = vsel %vm4332_vm13, %v4364_v21, %v4353_v2  ;;  %4815 = vmatpush.msra.mxu0 %v4744_v52  ;;  %v5236_v38 = vld [vmem:[#allocation9 + $0xf8] sm:$0xff]  ;;  %5354 = vmatpush.msra.mxu3 %v5244_v14 }
 0x4e4   :  { %5281 = vmatpush.msrb.mxu1 %v5236_v38  ;;  %v4741_v21 = vld [vmem:[#allocation9 + $0x18] sm:$0xff] }
 0x4e5   :  { %4816 = vmatpush.msra.mxu0 %v4743_v1  ;;  %v5711_v52 = vld [vmem:[#allocation9 + $0x1b8] sm:$0xff] }
 0x4e6   :  { %5282 = vmatpush.msrb.mxu1 %v5235_v19 }
 0x4e7   :  { %4817 = vmatpush.msra.mxu0 %v4742_v36 }
 0x4e8   :  { %v4359_v59 = vpop.permute.xlu1 %4358  ;;  %5283 = vmatpush.msrb.mxu1 %v5234_v51 }
 0x4e9   :  { %v4356_v47 = vpop.permute.xlu0 %4355  ;;  %4818 = vmatpush.msra.mxu0 %v4741_v21 }
 0x4ea   :  { %v4366_v34 = vsel %vm4334_vm14, %v4365_v48, %v4356_v47  ;;  %v4740_v47 = vld [vmem:[#allocation9 + $0x10] sm:$0xff]  ;;  %5284 = vmatpush.msrb.mxu1 %v5233_v37 }
 0x4eb   :  { %v4367_v12 = vsel %vm4336_vm15, %v4366_v34, %v4359_v59  ;;  %v4376_v34 = vmul.f32 %v10544_v16, %v10428_v49  ;;  %4819 = vmatpush.msra.mxu0 %v4740_v47  ;;  %v5231_v49 = vld [vmem:[#allocation9 + $0xd0] sm:$0xff] }
 0x4ec   :  { %v10549_v54 = vperm.slane %v4367_v12, 0  ;;  %v4383_v12 = vmul.f32 %v10544_v16, %v10486_v39 }
 0x4ed   :  { %4820 = vmatpush.msra.mxu0 %v4739_v32 }
 0x4ee   :  { %v4388_v3 = vadd.f32 %v10549_v54, %v4371_v11  ;;  %v4387_v58 = vadd.f32 %v10549_v54, %v4370_v50  ;;  %v4386_v23 = vadd.f32 %v10549_v54, %v4369_v0  ;;  %v4391_v61 = vadd.f32 %v10549_v54, %v4374_v63  ;;  %v5228_v63 = vld [vmem:[#allocation9 + $0xb8] sm:$0xff] }
 0x4ef   :  { %v4390_v7 = vadd.f32 %v10549_v54, %v4373_v13  ;;  %v4389_v4 = vadd.f32 %v10549_v54, %v4372_v26  ;;  %v4395_v43 = vadd.f32 %v10549_v54, %v4378_v53  ;;  %v4394_v6 = vadd.f32 %v10549_v54, %v4377_v60  ;;  %v4970_v53 = vld [vmem:[#allocation2 + $0x10] sm:$0x1]  ;;  %v4969_v60 = vld [vmem:[#allocation2 + $0x8] sm:$0xfe] }
 0x4f0   :  { %v4404_v45 = vmax.f32 %v4388_v3, 0.0  ;;  %v4403_v29 = vmax.f32 %v4387_v58, 0.0  ;;  %v4402_v5 = vmax.f32 %v4386_v23, 0.0  ;;  %v4407_v56 = vmax.f32 %v4391_v61, 0.0  ;;  %v5232_v3 = vld [vmem:[#allocation9 + $0xd8] sm:$0xff]  ;;  %v5227_v61 = vld [vmem:[#allocation9 + $0xb0] sm:$0xff] }
 0x4f1   :  { %v4406_v46 = vmax.f32 %v4390_v7, 0.0  ;;  %v4405_v10 = vmax.f32 %v4389_v4, 0.0  ;;  %v4392_v9 = vadd.f32 %v10549_v54, %v4375_v31  ;;  %v4411_v30 = vmax.f32 %v4395_v43, 0.0  ;;  %5285 = vmatpush.msrb.mxu1 %v5232_v3  ;;  %v5243_v7 = vld [vmem:[#allocation9 + $0x130] sm:$0xff]  ;;  %v4738_v4 = vld [vmem:[#allocation9] sm:$0xff] }
 0x4f2   :  { %4438 = vrot.lane.b32.xlu1 %v4404_v45, %s9151_s4  ;;  %4436 = vrot.lane.b32.xlu0 %v4403_v29, %s9151_s4  ;;  %v4410_v33 = vmax.f32 %v4394_v6, 0.0  ;;  %v4398_v62 = vadd.f32 %v10549_v54, %v4381_v28  ;;  %v4397_v17 = vadd.f32 %v10549_v54, %v4380_v27  ;;  %v4396_v44 = vadd.f32 %v10549_v54, %v4379_v8  ;;  %v5230_v45 = vld [vmem:[#allocation9 + $0xc8] sm:$0xff]  ;;  %v10616_v31 = vld [vmem:[#allocation2] sm:$0xff] }
 0x4f3   :  { %4434 = vrot.lane.b32.xlu2 %v4402_v5, %s9151_s4  ;;  %v4408_v55 = vmax.f32 %v4392_v9, 0.0  ;;  %v4382_v11 = vmul.f32 %v10544_v16, %v10481_v41  ;;  %v4393_v50 = vadd.f32 %v10549_v54, %v4376_v34  ;;  %v4400_v0 = vadd.f32 %v10549_v54, %v4383_v12  ;;  %5286 = vmatpush.msrb.mxu1 %v5231_v49  ;;  %v5229_v41 = vld [vmem:[#allocation9 + $0xc0] sm:$0xff] }
 0x4f4   :  { %v4414_v2 = vmax.f32 %v4398_v62, 0.0  ;;  %v4413_v59 = vmax.f32 %v4397_v17, 0.0  ;;  %v4412_v48 = vmax.f32 %v4396_v44, 0.0  ;;  %v4384_v5 = vmul.f32 %v10544_v16, %v10494_v22  ;;  %5355 = vmatpush.msra.mxu3 %v5243_v7  ;;  %v5242_v22 = vld [vmem:[#allocation9 + $0x128] sm:$0xff]  ;;  %v5225_v16 = vld [vmem:[#allocation9 + $0xa0] sm:$0xff]  ;;  %4821 = vmatpush.msra.mxu0 %v4738_v4 }
 0x4f5   :  { %v4399_v58 = vadd.f32 %v10549_v54, %v4382_v11  ;;  %v4409_v23 = vmax.f32 %v4393_v50, 0.0  ;;  %v4416_v39 = vmax.f32 %v4400_v0, 0.0  ;;  %5287 = vmatpush.msrb.mxu1 %v5230_v45  ;;  %4822 = vmatmul.f32.vlgmr.msra.gmra.mxu0 %v10616_v31  ;;  %v5097_v57 = vrot.slane %v4970_v53, 1  ;;  %v5710_v11 = vld [vmem:[#allocation9 + $0x1b0] sm:$0xff] }
 0x4f6   :  { %v4401_v13 = vadd.f32 %v10549_v54, %v4384_v5  ;;  %v4968_v54 = vld [vmem:[#allocation2] sm:$0xfe]  ;;  %5356 = vmatpush.msra.mxu3 %v5242_v22  ;;  %v5099_v43 = vrot.slane %v4969_v60, 1  ;;  %v5100_v6 = vrot.slane %v4971_v25, 1  ;;  %5748 = vmatpush.msrb.mxu0 %v5711_v52 }
 0x4f7   :  { %v4415_v29 = vmax.f32 %v4399_v58, 0.0  ;;  %5288 = vmatpush.msrb.mxu1 %v5229_v41  ;;  %v5096_v18 = vrot.slane %v4968_v54, 1 }
 0x4f8   :  { %v4417_v26 = vmax.f32 %v4401_v13, 0.0  ;;  %v5101_v9 = vsel %vm890_vm1, %v5099_v43, %v5100_v6  ;;  %5749 = vmatpush.msrb.mxu0 %v5710_v11 }
 0x4f9   :  { %5289 = vmatpush.msrb.mxu1 %v5228_v63  ;;  %v5098_v20 = vsel %vm890_vm1, %v5096_v18, %v5097_v57 }
 0x4fa   :  { %4444 = vrot.lane.b32.xlu1 %v4407_v56, %s9151_s4  ;;  %4442 = vrot.lane.b32.xlu0 %v4406_v46, %s9151_s4  ;;  %v4691_v56 = vld [vmem:[#allocation2 + $0x8] sm:$0xff] }
 0x4fb   :  { %4440 = vrot.lane.b32.xlu2 %v4405_v10, %s9151_s4  ;;  %5290 = vmatpush.msrb.mxu1 %v5227_v61  ;;  %v5226_v46 = vld [vmem:[#allocation9 + $0xa8] sm:$0xff]  ;;  %v5241_v10 = vld [vmem:[#allocation9 + $0x120] sm:$0xff] }
 0x4fc   :  { %8859 = vmatmul.msk.f32.vlgmr.msra.gmra.mxu2 %vm75_vm0, %v4691_v56  ;;  %5357 = vmatpush.msra.mxu3 %v5241_v10 }
 0x4fd   :  { %5291 = vmatpush.msrb.mxu1 %v5226_v46  ;;  %8875 = vmatmul.msk.f32.vlgmr.msra.gmra.mxu3 %vm75_vm0, %v5101_v9 }
 0x4ff   :  { %5292 = vmatpush.msrb.mxu1 %v5225_v16 }
 0x500   :  { %5293 = vmatmul.f32.vlgmr.msrb.gmra.mxu1 %v5098_v20 }
 0x502   :  { %4452 = vrot.lane.b32.xlu1 %v4411_v30, %s9151_s4  ;;  %4450 = vrot.lane.b32.xlu0 %v4410_v33, %s9151_s4 }
 0x503   :  { %4446 = vrot.lane.b32.xlu2 %v4408_v55, %s9151_s4 }
 0x50a   :  { %4458 = vrot.lane.b32.xlu1 %v4414_v2, %s9151_s4  ;;  %4456 = vrot.lane.b32.xlu0 %v4413_v59, %s9151_s4 }
 0x50b   :  { %4454 = vrot.lane.b32.xlu2 %v4412_v48, %s9151_s4 }
 0x512   :  { %4448 = vrot.lane.b32.xlu1 %v4409_v23, %s9151_s4  ;;  %4462 = vrot.lane.b32.xlu0 %v4416_v39, %s9151_s4 }
 0x513   :  { %4460 = vrot.lane.b32.xlu2 %v4415_v29, %s9151_s4 }
 0x51b   :  { %4464 = vrot.lane.b32.xlu2 %v4417_v26, %s9151_s4  ;;  %v5709_v26 = vld [vmem:[#allocation9 + $0x1a8] sm:$0xff] }
 0x51c   :  { %5750 = vmatpush.msrb.mxu0 %v5709_v26 }
 0x54d   :  { %v4435_v24 = vpop.permute.xlu2 %4434 }
 0x54e   :  { %v4482_v35 = vsel %vm273_vm4, 0.0, %v4435_v24  ;;  %v4498_v42 = vsel %vm273_vm4, %v4435_v24, 0.0 }
 0x54f   :  { %v4546_v30 = vrot.slane %v4482_v35, 7  ;;  %v4547_v33 = vrot.slane %v4498_v42, 7 }
 0x551   :  { %4612 = vst [vmem:[#allocation2 + $0x30] sm:$0x1] %v4546_v30 }
 0x552   :  { %4613 = vst.msk [vmem:[#allocation2 + $0x38] sm:$0x1] %vm406_vm6, %v4547_v33 }
 0x553   :  { %4610 = vst [vmem:[#allocation2 + $0x20] sm:$0xfe] %v4546_v30 }
 0x554   :  { %4611 = vst.msk [vmem:[#allocation2 + $0x28] sm:$0xfe] %vm403_vm5, %v4547_v33 }
 0x555   :  { %v4441_v55 = vpop.permute.xlu2 %4440 }
 0x556   :  { %v4485_v15 = vsel %vm273_vm4, 0.0, %v4441_v55  ;;  %v4501_v28 = vsel %vm273_vm4, %v4441_v55, 0.0 }
 0x557   :  { %v4552_v27 = vrot.slane %v4485_v15, 7  ;;  %v4553_v1 = vrot.slane %v4501_v28, 7 }
 0x558   :  { %v4974_v14 = vld [vmem:[#allocation2 + $0x30] sm:$0x1] }
 0x559   :  { %4622 = vst [vmem:[#allocation2 + $0x80] sm:$0xfe] %v4552_v27  ;;  %v5103_v8 = vrot.slane %v4974_v14, 1  ;;  %v4975_v38 = vld [vmem:[#allocation2 + $0x38] sm:$0x1] }
 0x55a   :  { %4623 = vst.msk [vmem:[#allocation2 + $0x88] sm:$0xfe] %vm403_vm5, %v4553_v1  ;;  %v10629_v62 = vld [vmem:[#allocation2 + $0x20] sm:$0xff]  ;;  %v5106_v36 = vrot.slane %v4975_v38, 1 }
 0x55b   :  { %v4972_v17 = vld [vmem:[#allocation2 + $0x20] sm:$0xfe]  ;;  %4624 = vst [vmem:[#allocation2 + $0x90] sm:$0x1] %v4552_v27  ;;  %4825 = vmatmul.f32.gmra.mxu0 %v10629_v62  ;;  %v10632_v44 = vld [vmem:[#allocation2 + $0x28] sm:$0xff] }
 0x55c   :  { %v5102_v19 = vrot.slane %v4972_v17, 1  ;;  %v4973_v21 = vld [vmem:[#allocation2 + $0x28] sm:$0xfe]  ;;  %4625 = vst.msk [vmem:[#allocation2 + $0x98] sm:$0x1] %vm406_vm6, %v4553_v1  ;;  %8860 = vmatmul.msk.f32.gmra.mxu2 %vm75_vm0, %v10632_v44 }
 0x55d   :  { %v5105_v2 = vrot.slane %v4973_v21, 1  ;;  %v4447_v51 = vpop.permute.xlu2 %4446  ;;  %v5714_v21 = vld [vmem:[#allocation9 + $0x1d0] sm:$0xff] }
 0x55e   :  { %v5104_v59 = vsel %vm890_vm1, %v5102_v19, %v5103_v8  ;;  %v4488_v47 = vsel %vm273_vm4, 0.0, %v4447_v51  ;;  %v4504_v34 = vsel %vm273_vm4, %v4447_v51, 0.0  ;;  %5826 = vmatpush.msrb.mxu2 %v5714_v21 }
 0x55f   :  { %5296 = vmatmul.f32.gmra.mxu1 %v5104_v59  ;;  %v5107_v48 = vsel %vm890_vm1, %v5105_v2, %v5106_v36  ;;  %v4558_v12 = vrot.slane %v4488_v47, 7  ;;  %v4559_v37 = vrot.slane %v4504_v34, 7 }
 0x560   :  { %8876 = vmatmul.msk.f32.gmra.mxu3 %vm75_vm0, %v5107_v48  ;;  %v5708_v48 = vld [vmem:[#allocation9 + $0x1a0] sm:$0xff] }
 0x561   :  { %4634 = vst [vmem:[#allocation2 + $0xe0] sm:$0xfe] %v4558_v12  ;;  %5751 = vmatpush.msrb.mxu0 %v5708_v48 }
 0x562   :  { %4635 = vst.msk [vmem:[#allocation2 + $0xe8] sm:$0xfe] %vm403_vm5, %v4559_v37 }
 0x563   :  { %4636 = vst [vmem:[#allocation2 + $0xf0] sm:$0x1] %v4558_v12 }
 0x564   :  { %4637 = vst.msk [vmem:[#allocation2 + $0xf8] sm:$0x1] %vm406_vm6, %v4559_v37  ;;  %v4439_v50 = vpop.permute.xlu1 %4438  ;;  %v4437_v0 = vpop.permute.xlu0 %4436  ;;  %v5707_v37 = vld [vmem:[#allocation9 + $0x198] sm:$0xff] }
 0x565   :  { %v4484_v3 = vsel %vm273_vm4, 0.0, %v4439_v50  ;;  %v4500_v58 = vsel %vm273_vm4, %v4439_v50, 0.0  ;;  %v4483_v49 = vsel %vm273_vm4, 0.0, %v4437_v0  ;;  %v4499_v45 = vsel %vm273_vm4, %v4437_v0, 0.0  ;;  %v4455_v29 = vpop.permute.xlu2 %4454  ;;  %5752 = vmatpush.msrb.mxu0 %v5707_v37 }
 0x566   :  { %v4550_v23 = vrot.slane %v4484_v3, 7  ;;  %v4551_v39 = vrot.slane %v4500_v58, 7  ;;  %v4548_v41 = vrot.slane %v4483_v49, 7  ;;  %v4549_v5 = vrot.slane %v4499_v45, 7 }
 0x567   :  { %v4492_v63 = vsel %vm273_vm4, 0.0, %v4455_v29  ;;  %v4508_v13 = vsel %vm273_vm4, %v4455_v29, 0.0 }
 0x568   :  { %4618 = vst [vmem:[#allocation2 + $0x60] sm:$0xfe] %v4550_v23  ;;  %v4566_v32 = vrot.slane %v4492_v63, 7  ;;  %v4567_v4 = vrot.slane %v4508_v13, 7  ;;  %v4984_v63 = vld [vmem:[#allocation2 + $0x80] sm:$0xfe] }
 0x569   :  { %4619 = vst.msk [vmem:[#allocation2 + $0x68] sm:$0xfe] %vm403_vm5, %v4551_v39  ;;  %v4986_v13 = vld [vmem:[#allocation2 + $0x90] sm:$0x1] }
 0x56a   :  { %4620 = vst [vmem:[#allocation2 + $0x70] sm:$0x1] %v4550_v23 }
 0x56b   :  { %4621 = vst.msk [vmem:[#allocation2 + $0x78] sm:$0x1] %vm406_vm6, %v4551_v39 }
 0x56c   :  { %4614 = vst [vmem:[#allocation2 + $0x40] sm:$0xfe] %v4548_v41  ;;  %v4445_v61 = vpop.permute.xlu1 %4444  ;;  %v4443_v7 = vpop.permute.xlu0 %4442 }
 0x56d   :  { %4615 = vst.msk [vmem:[#allocation2 + $0x48] sm:$0xfe] %vm403_vm5, %v4549_v5  ;;  %v4487_v56 = vsel %vm273_vm4, 0.0, %v4445_v61  ;;  %v4503_v46 = vsel %vm273_vm4, %v4445_v61, 0.0  ;;  %v4486_v22 = vsel %vm273_vm4, 0.0, %v4443_v7  ;;  %v4461_v10 = vpop.permute.xlu2 %4460  ;;  %v4502_v53 = vsel %vm273_vm4, %v4443_v7, 0.0 }
 0x56e   :  { %4616 = vst [vmem:[#allocation2 + $0x50] sm:$0x1] %v4548_v41  ;;  %v4556_v16 = vrot.slane %v4487_v56, 7  ;;  %v4557_v54 = vrot.slane %v4503_v46, 7  ;;  %v4554_v60 = vrot.slane %v4486_v22, 7  ;;  %v4495_v18 = vsel %vm273_vm4, 0.0, %v4461_v10 }
 0x56f   :  { %4617 = vst.msk [vmem:[#allocation2 + $0x58] sm:$0x1] %vm406_vm6, %v4549_v5  ;;  %v4555_v9 = vrot.slane %v4502_v53, 7  ;;  %v4511_v35 = vsel %vm273_vm4, %v4461_v10, 0.0  ;;  %v4572_v52 = vrot.slane %v4495_v18, 7  ;;  %v10678_v2 = vld [vmem:[#allocation2 + $0x60] sm:$0xff] }
 0x570   :  { %4650 = vst [vmem:[#allocation2 + $0x1a0] sm:$0xfe] %v4566_v32  ;;  %v4980_v27 = vld [vmem:[#allocation2 + $0x60] sm:$0xfe]  ;;  %v4573_v14 = vrot.slane %v4511_v35, 7  ;;  %v10681_v34 = vld [vmem:[#allocation2 + $0x68] sm:$0xff] }
 0x571   :  { %4651 = vst.msk [vmem:[#allocation2 + $0x1a8] sm:$0xfe] %vm403_vm5, %v4567_v4  ;;  %v4982_v1 = vld [vmem:[#allocation2 + $0x70] sm:$0x1]  ;;  %v4981_v17 = vld [vmem:[#allocation2 + $0x68] sm:$0xfe] }
 0x572   :  { %4652 = vst [vmem:[#allocation2 + $0x1b0] sm:$0x1] %v4566_v32  ;;  %v4983_v19 = vld [vmem:[#allocation2 + $0x78] sm:$0x1]  ;;  %v5114_v59 = vrot.slane %v4980_v27, 1  ;;  %v5115_v51 = vrot.slane %v4982_v1, 1 }
 0x573   :  { %4653 = vst.msk [vmem:[#allocation2 + $0x1b8] sm:$0x1] %vm406_vm6, %v4567_v4  ;;  %v10661_v57 = vld [vmem:[#allocation2 + $0x40] sm:$0xff]  ;;  %v5117_v12 = vrot.slane %v4981_v17, 1  ;;  %v5118_v58 = vrot.slane %v4983_v19, 1  ;;  %v10698_v56 = vld [vmem:[#allocation2 + $0x88] sm:$0xff] }
 0x574   :  { %v4976_v25 = vld [vmem:[#allocation2 + $0x40] sm:$0xfe]  ;;  %4630 = vst [vmem:[#allocation2 + $0xc0] sm:$0xfe] %v4556_v16  ;;  %4828 = vmatmul.f32.gmra.mxu0 %v10661_v57  ;;  %v10664_v43 = vld [vmem:[#allocation2 + $0x48] sm:$0xff]  ;;  %v4453_v33 = vpop.permute.xlu1 %4452  ;;  %v4451_v28 = vpop.permute.xlu0 %4450  ;;  %v5116_v49 = vsel %vm890_vm1, %v5114_v59, %v5115_v51  ;;  %v5706_v46 = vld [vmem:[#allocation9 + $0x190] sm:$0xff] }
 0x575   :  { %v5108_v6 = vrot.slane %v4976_v25, 1  ;;  %v4977_v20 = vld [vmem:[#allocation2 + $0x48] sm:$0xfe]  ;;  %4631 = vst.msk [vmem:[#allocation2 + $0xc8] sm:$0xfe] %vm403_vm5, %v4557_v54  ;;  %8861 = vmatmul.msk.f32.gmra.mxu2 %vm75_vm0, %v10664_v43  ;;  %v4491_v38 = vsel %vm273_vm4, 0.0, %v4453_v33  ;;  %v4465_v3 = vpop.permute.xlu2 %4464  ;;  %v5119_v5 = vsel %vm890_vm1, %v5117_v12, %v5118_v58  ;;  %5753 = vmatpush.msrb.mxu0 %v5706_v46 }
 0x576   :  { %v4978_v40 = vld [vmem:[#allocation2 + $0x50] sm:$0x1]  ;;  %v5111_v24 = vrot.slane %v4977_v20, 1  ;;  %4632 = vst [vmem:[#allocation2 + $0xd0] sm:$0x1] %v4556_v16  ;;  %v4507_v36 = vsel %vm273_vm4, %v4453_v33, 0.0 }
 0x577   :  { %v5109_v42 = vrot.slane %v4978_v40, 1  ;;  %v4979_v30 = vld [vmem:[#allocation2 + $0x58] sm:$0x1]  ;;  %4633 = vst.msk [vmem:[#allocation2 + $0xd8] sm:$0x1] %vm406_vm6, %v4557_v54  ;;  %v4564_v47 = vrot.slane %v4491_v38, 7 }
 0x578   :  { %v5112_v55 = vrot.slane %v4979_v30, 1  ;;  %4626 = vst [vmem:[#allocation2 + $0xa0] sm:$0xfe] %v4554_v60  ;;  %v4565_v11 = vrot.slane %v4507_v36, 7  ;;  %v4490_v50 = vsel %vm273_vm4, 0.0, %v4451_v28  ;;  %v4506_v0 = vsel %vm273_vm4, %v4451_v28, 0.0 }
 0x579   :  { %v5110_v15 = vsel %vm890_vm1, %v5108_v6, %v5109_v42  ;;  %4627 = vst.msk [vmem:[#allocation2 + $0xa8] sm:$0xfe] %vm403_vm5, %v4555_v9  ;;  %v4562_v23 = vrot.slane %v4490_v50, 7  ;;  %v4563_v39 = vrot.slane %v4506_v0, 7  ;;  %v4497_v45 = vsel %vm273_vm4, 0.0, %v4465_v3  ;;  %v10696_v4 = vld [vmem:[#allocation2 + $0x80] sm:$0xff] }
 0x57a   :  { %5299 = vmatmul.f32.gmra.mxu1 %v5110_v15  ;;  %v5113_v8 = vsel %vm890_vm1, %v5111_v24, %v5112_v55  ;;  %4628 = vst [vmem:[#allocation2 + $0xb0] sm:$0x1] %v4554_v60  ;;  %v4513_v29 = vsel %vm273_vm4, %v4465_v3, 0.0  ;;  %v4985_v32 = vld [vmem:[#allocation2 + $0x88] sm:$0xfe]  ;;  %v4576_v7 = vrot.slane %v4497_v45, 7 }
 0x57b   :  { %8877 = vmatmul.msk.f32.gmra.mxu3 %vm75_vm0, %v5113_v8  ;;  %4629 = vst.msk [vmem:[#allocation2 + $0xb8] sm:$0x1] %vm406_vm6, %v4555_v9  ;;  %v4987_v61 = vld [vmem:[#allocation2 + $0x98] sm:$0x1]  ;;  %v5120_v10 = vrot.slane %v4984_v63, 1  ;;  %v5121_v54 = vrot.slane %v4986_v13, 1 }
 0x57c   :  { %4662 = vst [vmem:[#allocation2 + $0x200] sm:$0xfe] %v4572_v52  ;;  %4831 = vmatmul.f32.gmra.mxu0 %v10678_v2  ;;  %v4459_v41 = vpop.permute.xlu1 %4458  ;;  %v4457_v26 = vpop.permute.xlu0 %4456  ;;  %v4577_v53 = vrot.slane %v4513_v29, 7  ;;  %v5123_v60 = vrot.slane %v4985_v32, 1  ;;  %v5124_v18 = vrot.slane %v4987_v61, 1  ;;  %v5705_v35 = vld [vmem:[#allocation9 + $0x188] sm:$0xff] }
 0x57d   :  { %4663 = vst.msk [vmem:[#allocation2 + $0x208] sm:$0xfe] %vm403_vm5, %v4573_v14  ;;  %8862 = vmatmul.msk.f32.gmra.mxu2 %vm75_vm0, %v10681_v34  ;;  %v4494_v22 = vsel %vm273_vm4, 0.0, %v4459_v41  ;;  %v4510_v16 = vsel %vm273_vm4, %v4459_v41, 0.0  ;;  %v4493_v20 = vsel %vm273_vm4, 0.0, %v4457_v26  ;;  %v4509_v9 = vsel %vm273_vm4, %v4457_v26, 0.0  ;;  %5754 = vmatpush.msrb.mxu0 %v5705_v35 }
 0x57e   :  { %4664 = vst [vmem:[#allocation2 + $0x210] sm:$0x1] %v4572_v52  ;;  %v4570_v25 = vrot.slane %v4494_v22, 7  ;;  %v4571_v6 = vrot.slane %v4510_v16, 7  ;;  %v5122_v40 = vsel %vm890_vm1, %v5120_v10, %v5121_v54  ;;  %v5125_v42 = vsel %vm890_vm1, %v5123_v60, %v5124_v18  ;;  %v5713_v15 = vld [vmem:[#allocation9 + $0x1c8] sm:$0xff]  ;;  %v5704_v1 = vld [vmem:[#allocation9 + $0x180] sm:$0xff] }
 0x57f   :  { %4665 = vst.msk [vmem:[#allocation2 + $0x218] sm:$0x1] %vm406_vm6, %v4573_v14  ;;  %v4988_v24 = vld [vmem:[#allocation2 + $0xa0] sm:$0xfe]  ;;  %v4568_v28 = vrot.slane %v4493_v20, 7  ;;  %5827 = vmatpush.msrb.mxu2 %v5713_v15  ;;  %v4569_v14 = vrot.slane %v4509_v9, 7  ;;  %5755 = vmatpush.msrb.mxu0 %v5704_v1 }
 0x580   :  { %4646 = vst [vmem:[#allocation2 + $0x180] sm:$0xfe] %v4564_v47  ;;  %v4989_v33 = vld [vmem:[#allocation2 + $0xa8] sm:$0xfe]  ;;  %v10714_v27 = vld [vmem:[#allocation2 + $0xa0] sm:$0xff]  ;;  %v5126_v17 = vrot.slane %v4988_v24, 1 }
 0x581   :  { %4647 = vst.msk [vmem:[#allocation2 + $0x188] sm:$0xfe] %vm403_vm5, %v4565_v11  ;;  %v4990_v30 = vld [vmem:[#allocation2 + $0xb0] sm:$0x1]  ;;  %v10717_v38 = vld [vmem:[#allocation2 + $0xa8] sm:$0xff]  ;;  %v5129_v59 = vrot.slane %v4989_v33, 1 }
 0x582   :  { %5302 = vmatmul.f32.gmra.mxu1 %v5116_v49  ;;  %4648 = vst [vmem:[#allocation2 + $0x190] sm:$0x1] %v4564_v47  ;;  %v4991_v55 = vld [vmem:[#allocation2 + $0xb8] sm:$0x1]  ;;  %v5127_v36 = vrot.slane %v4990_v30, 1  ;;  %v10735_v29 = vld [vmem:[#allocation2 + $0xc8] sm:$0xff] }
 0x583   :  { %8878 = vmatmul.msk.f32.gmra.mxu3 %vm75_vm0, %v5119_v5  ;;  %4649 = vst.msk [vmem:[#allocation2 + $0x198] sm:$0x1] %vm406_vm6, %v4565_v11  ;;  %v5130_v51 = vrot.slane %v4991_v55, 1  ;;  %v4992_v11 = vld [vmem:[#allocation2 + $0xc0] sm:$0xfe]  ;;  %v5702_v10 = vld [vmem:[#allocation9 + $0x170] sm:$0xff] }
 0x584   :  { %4644 = vst [vmem:[#allocation2 + $0x170] sm:$0x1] %v4562_v23  ;;  %4834 = vmatmul.f32.gmra.mxu0 %v10696_v4  ;;  %v4449_v52 = vpop.permute.xlu1 %4448  ;;  %v4463_v8 = vpop.permute.xlu0 %4462  ;;  %v5128_v37 = vsel %vm890_vm1, %v5126_v17, %v5127_v36  ;;  %v4994_v0 = vld [vmem:[#allocation2 + $0xd0] sm:$0x1]  ;;  %v4993_v3 = vld [vmem:[#allocation2 + $0xc8] sm:$0xfe] }
 0x585   :  { %4645 = vst.msk [vmem:[#allocation2 + $0x178] sm:$0x1] %vm406_vm6, %v4563_v39  ;;  %8863 = vmatmul.msk.f32.gmra.mxu2 %vm75_vm0, %v10698_v56  ;;  %v4489_v19 = vsel %vm273_vm4, 0.0, %v4449_v52  ;;  %v4505_v21 = vsel %vm273_vm4, %v4449_v52, 0.0  ;;  %v4496_v48 = vsel %vm273_vm4, 0.0, %v4463_v8  ;;  %v5131_v50 = vsel %vm890_vm1, %v5129_v59, %v5130_v51  ;;  %v10746_v54 = vld [vmem:[#allocation2 + $0xe0] sm:$0xff] }
 0x586   :  { %4642 = vst [vmem:[#allocation2 + $0x160] sm:$0xfe] %v4562_v23  ;;  %v4560_v47 = vrot.slane %v4489_v19, 7  ;;  %v4561_v12 = vrot.slane %v4505_v21, 7  ;;  %v4512_v58 = vsel %vm273_vm4, %v4463_v8, 0.0  ;;  %v5703_v23 = vld [vmem:[#allocation9 + $0x178] sm:$0xff] }
 0x587   :  { %4643 = vst.msk [vmem:[#allocation2 + $0x168] sm:$0xfe] %vm403_vm5, %v4563_v39  ;;  %v4995_v49 = vld [vmem:[#allocation2 + $0xd8] sm:$0x1]  ;;  %v10732_v39 = vld [vmem:[#allocation2 + $0xc0] sm:$0xff]  ;;  %5756 = vmatpush.msrb.mxu0 %v5703_v23  ;;  %v4574_v45 = vrot.slane %v4496_v48, 7 }
 0x588   :  { %4672 = vst [vmem:[#allocation2 + $0x250] sm:$0x1] %v4576_v7  ;;  %v5132_v41 = vrot.slane %v4992_v11, 1  ;;  %v5133_v5 = vrot.slane %v4994_v0, 1  ;;  %v4575_v63 = vrot.slane %v4512_v58, 7  ;;  %v5135_v13 = vrot.slane %v4993_v3, 1 }
 0x589   :  { %4673 = vst.msk [vmem:[#allocation2 + $0x258] sm:$0x1] %vm406_vm6, %v4577_v53  ;;  %v5136_v26 = vrot.slane %v4995_v49, 1  ;;  %v4996_v61 = vld [vmem:[#allocation2 + $0xe0] sm:$0xfe]  ;;  %5757 = vmatpush.msrb.mxu0 %v5702_v10  ;;  %v4707_v30 = vld [vmem:[#allocation2 + $0x148] sm:$0xff] }
 0x58a   :  { %5305 = vmatmul.f32.gmra.mxu1 %v5122_v40  ;;  %4670 = vst [vmem:[#allocation2 + $0x240] sm:$0xfe] %v4576_v7  ;;  %v5134_v32 = vsel %vm890_vm1, %v5132_v41, %v5133_v5  ;;  %v4998_v46 = vld [vmem:[#allocation2 + $0xf0] sm:$0x1]  ;;  %v4997_v22 = vld [vmem:[#allocation2 + $0xe8] sm:$0xfe] }
 0x58b   :  { %8879 = vmatmul.msk.f32.gmra.mxu3 %vm75_vm0, %v5125_v42  ;;  %4671 = vst.msk [vmem:[#allocation2 + $0x248] sm:$0xfe] %vm403_vm5, %v4577_v53  ;;  %v5137_v7 = vsel %vm890_vm1, %v5135_v13, %v5136_v26  ;;  %v4999_v16 = vld [vmem:[#allocation2 + $0xf8] sm:$0x1]  ;;  %v10749_v53 = vld [vmem:[#allocation2 + $0xe8] sm:$0xff]  ;;  %v5138_v60 = vrot.slane %v4996_v61, 1 }
 0x58c   :  { %4658 = vst [vmem:[#allocation2 + $0x1e0] sm:$0xfe] %v4570_v25  ;;  %4837 = vmatmul.f32.gmra.mxu0 %v10714_v27  ;;  %v5139_v18 = vrot.slane %v4998_v46, 1  ;;  %v5000_v20 = vld [vmem:[#allocation2 + $0x140] sm:$0xfe]  ;;  %v5701_v55 = vld [vmem:[#allocation9 + $0x168] sm:$0xff] }
 0x58d   :  { %4659 = vst.msk [vmem:[#allocation2 + $0x1e8] sm:$0xfe] %vm403_vm5, %v4571_v6  ;;  %8864 = vmatmul.msk.f32.gmra.mxu2 %vm75_vm0, %v10717_v38  ;;  %v5002_v9 = vld [vmem:[#allocation2 + $0x150] sm:$0x1]  ;;  %v5001_v24 = vld [vmem:[#allocation2 + $0x148] sm:$0xfe]  ;;  %5758 = vmatpush.msrb.mxu0 %v5701_v55 }
 0x58e   :  { %4660 = vst [vmem:[#allocation2 + $0x1f0] sm:$0x1] %v4570_v25  ;;  %v5141_v25 = vrot.slane %v4997_v22, 1  ;;  %v5140_v40 = vsel %vm890_vm1, %v5138_v60, %v5139_v18  ;;  %v5003_v35 = vld [vmem:[#allocation2 + $0x158] sm:$0x1]  ;;  %v5144_v33 = vrot.slane %v5000_v20, 1 }
 0x58f   :  { %4661 = vst.msk [vmem:[#allocation2 + $0x1f8] sm:$0x1] %vm406_vm6, %v4571_v6  ;;  %v5142_v6 = vrot.slane %v4999_v16, 1  ;;  %v5145_v52 = vrot.slane %v5002_v9, 1  ;;  %v5147_v15 = vrot.slane %v5001_v24, 1  ;;  %v5712_v1 = vld [vmem:[#allocation9 + $0x1c0] sm:$0xff] }
 0x590   :  { %4654 = vst [vmem:[#allocation2 + $0x1c0] sm:$0xfe] %v4568_v28  ;;  %5828 = vmatpush.msrb.mxu2 %v5712_v1  ;;  %v5004_v17 = vld [vmem:[#allocation2 + $0x160] sm:$0xfe]  ;;  %v5006_v36 = vld [vmem:[#allocation2 + $0x170] sm:$0x1] }
 0x591   :  { %4655 = vst.msk [vmem:[#allocation2 + $0x1c8] sm:$0xfe] %vm403_vm5, %v4569_v14  ;;  %v5143_v42 = vsel %vm890_vm1, %v5141_v25, %v5142_v6  ;;  %v5005_v19 = vld [vmem:[#allocation2 + $0x168] sm:$0xfe]  ;;  %v5007_v21 = vld [vmem:[#allocation2 + $0x178] sm:$0x1] }
 0x592   :  { %5308 = vmatmul.f32.gmra.mxu1 %v5128_v37  ;;  %4656 = vst [vmem:[#allocation2 + $0x1d0] sm:$0x1] %v4568_v28  ;;  %v5148_v28 = vrot.slane %v5003_v35, 1  ;;  %v5700_v59 = vld [vmem:[#allocation9 + $0x160] sm:$0xff]  ;;  %v5974_v51 = vld [vmem:[#allocation9 + $0x258] sm:$0xff]  ;;  %v5973_v48 = vld [vmem:[#allocation9 + $0x250] sm:$0xff] }
 0x593   :  { %8880 = vmatmul.msk.f32.gmra.mxu3 %vm75_vm0, %v5131_v50  ;;  %4657 = vst.msk [vmem:[#allocation2 + $0x1d8] sm:$0x1] %vm406_vm6, %v4569_v14  ;;  %v5146_v14 = vsel %vm890_vm1, %v5144_v33, %v5145_v52  ;;  %5759 = vmatpush.msrb.mxu0 %v5700_v59  ;;  %v5151_v37 = vrot.slane %v5006_v36, 1  ;;  %v5153_v11 = vrot.slane %v5005_v19, 1  ;;  %v5154_v50 = vrot.slane %v5007_v21, 1  ;;  %v5972_v0 = vld [vmem:[#allocation9 + $0x248] sm:$0xff] }
 0x594   :  { %4640 = vst [vmem:[#allocation2 + $0x110] sm:$0x1] %v4560_v47  ;;  %4840 = vmatmul.f32.gmra.mxu0 %v10732_v39  ;;  %v5149_v8 = vsel %vm890_vm1, %v5147_v15, %v5148_v28  ;;  %6027 = vmatpush.msra.mxu1 %v5974_v51  ;;  %v5971_v3 = vld [vmem:[#allocation9 + $0x240] sm:$0xff]  ;;  %v5009_v41 = vld [vmem:[#allocation2 + $0x188] sm:$0xfe]  ;;  %v5970_v13 = vld [vmem:[#allocation9 + $0x238] sm:$0xff] }
 0x595   :  { %4641 = vst.msk [vmem:[#allocation2 + $0x118] sm:$0x1] %vm406_vm6, %v4561_v12  ;;  %8865 = vmatmul.msk.f32.gmra.mxu2 %vm75_vm0, %v10735_v29  ;;  %v5155_v49 = vsel %vm890_vm1, %v5153_v11, %v5154_v50  ;;  %v5008_v23 = vld [vmem:[#allocation2 + $0x180] sm:$0xfe]  ;;  %v5011_v5 = vld [vmem:[#allocation2 + $0x198] sm:$0x1] }
 0x596   :  { %4638 = vst [vmem:[#allocation2 + $0x100] sm:$0xfe] %v4560_v47  ;;  %v10761_v47 = vld [vmem:[#allocation2 + $0x160] sm:$0xff]  ;;  %6028 = vmatpush.msra.mxu1 %v5973_v48  ;;  %v10774_v61 = vld [vmem:[#allocation2 + $0x188] sm:$0xff]  ;;  %v5159_v22 = vrot.slane %v5009_v41, 1  ;;  %v5160_v16 = vrot.slane %v5011_v5, 1 }
 0x597   :  { %4639 = vst.msk [vmem:[#allocation2 + $0x108] sm:$0xfe] %vm403_vm5, %v4561_v12  ;;  %v5150_v12 = vrot.slane %v5004_v17, 1  ;;  %v10771_v26 = vld [vmem:[#allocation2 + $0x180] sm:$0xff]  ;;  %v5968_v10 = vld [vmem:[#allocation9 + $0x228] sm:$0xff]  ;;  %v5698_v24 = vld [vmem:[#allocation9 + $0x150] sm:$0xff] }
 0x598   :  { %4666 = vst [vmem:[#allocation2 + $0x220] sm:$0xfe] %v4574_v45  ;;  %6029 = vmatpush.msra.mxu1 %v5972_v0  ;;  %v5967_v60 = vld [vmem:[#allocation9 + $0x220] sm:$0xff]  ;;  %v5161_v25 = vsel %vm890_vm1, %v5159_v22, %v5160_v16  ;;  %v5014_v20 = vld [vmem:[#allocation2 + $0x1b0] sm:$0x1]  ;;  %v5966_v35 = vld [vmem:[#allocation9 + $0x218] sm:$0xff] }
 0x599   :  { %4667 = vst.msk [vmem:[#allocation2 + $0x228] sm:$0xfe] %vm403_vm5, %v4575_v63  ;;  %v5152_v58 = vsel %vm890_vm1, %v5150_v12, %v5151_v37  ;;  %v5012_v6 = vld [vmem:[#allocation2 + $0x1a0] sm:$0xfe]  ;;  %v5013_v9 = vld [vmem:[#allocation2 + $0x1a8] sm:$0xfe] }
 0x59a   :  { %5311 = vmatmul.f32.gmra.mxu1 %v5134_v32  ;;  %4668 = vst [vmem:[#allocation2 + $0x230] sm:$0x1] %v4574_v45  ;;  %v5010_v45 = vld [vmem:[#allocation2 + $0x190] sm:$0x1]  ;;  %v10784_v33 = vld [vmem:[#allocation2 + $0x1a8] sm:$0xff]  ;;  %v5162_v52 = vrot.slane %v5012_v6, 1 }
 0x59b   :  { %8881 = vmatmul.msk.f32.gmra.mxu3 %vm75_vm0, %v5137_v7  ;;  %4669 = vst.msk [vmem:[#allocation2 + $0x238] sm:$0x1] %vm406_vm6, %v4575_v63  ;;  %6030 = vmatpush.msra.mxu1 %v5971_v3  ;;  %v5699_v63 = vld [vmem:[#allocation9 + $0x158] sm:$0xff]  ;;  %v5969_v32 = vld [vmem:[#allocation9 + $0x230] sm:$0xff]  ;;  %v5156_v7 = vrot.slane %v5008_v23, 1  ;;  %v5157_v46 = vrot.slane %v5010_v45, 1 }
 0x59c   :  { %4843 = vmatmul.f32.gmra.mxu0 %v10746_v54  ;;  %v5163_v55 = vrot.slane %v5014_v20, 1  ;;  %v5165_v15 = vrot.slane %v5013_v9, 1  ;;  %v5964_v1 = vld [vmem:[#allocation9 + $0x208] sm:$0xff]  ;;  %v5016_v17 = vld [vmem:[#allocation2 + $0x1c0] sm:$0xfe]  ;;  %v5962_v48 = vld [vmem:[#allocation9 + $0x1f8] sm:$0xff] }
 0x59d   :  { %8866 = vmatmul.msk.f32.gmra.mxu2 %vm75_vm0, %v10749_v53  ;;  %5760 = vmatpush.msrb.mxu0 %v5699_v63  ;;  %v5158_v18 = vsel %vm890_vm1, %v5156_v7, %v5157_v46  ;;  %v5018_v19 = vld [vmem:[#allocation2 + $0x1d0] sm:$0x1]  ;;  %v5017_v21 = vld [vmem:[#allocation2 + $0x1c8] sm:$0xfe]  ;;  %v5019_v59 = vld [vmem:[#allocation2 + $0x1d8] sm:$0x1] }
 0x59e   :  { %6031 = vmatpush.msra.mxu1 %v5970_v13  ;;  %v5697_v51 = vld [vmem:[#allocation9 + $0x148] sm:$0xff]  ;;  %v5978_v12 = vld [vmem:[#allocation9 + $0x278] sm:$0xff]  ;;  %v10791_v37 = vld [vmem:[#allocation2 + $0x1c0] sm:$0xff]  ;;  %v5168_v50 = vrot.slane %v5016_v17, 1  ;;  %v5169_v0 = vrot.slane %v5018_v19, 1  ;;  %v5171_v3 = vrot.slane %v5017_v21, 1 }
 0x59f   :  { %5761 = vmatpush.msrb.mxu0 %v5698_v24  ;;  %6104 = vmatpush.msrb.mxu3 %v5978_v12  ;;  %v10794_v11 = vld [vmem:[#allocation2 + $0x1c8] sm:$0xff]  ;;  %v5977_v23 = vld [vmem:[#allocation9 + $0x270] sm:$0xff]  ;;  %v5696_v45 = vld [vmem:[#allocation9 + $0x140] sm:$0xff] }
 0x5a0   :  { %6032 = vmatpush.msra.mxu1 %v5969_v32  ;;  %v5960_v41 = vld [vmem:[#allocation9 + $0x1e8] sm:$0xff]  ;;  %v5170_v5 = vsel %vm890_vm1, %v5168_v50, %v5169_v0  ;;  %v6465_v13 = vld [vmem:[#allocation9 + $0x318] sm:$0xff]  ;;  %v5959_v32 = vld [vmem:[#allocation9 + $0x1e0] sm:$0xff] }
 0x5a1   :  { %5762 = vmatpush.msrb.mxu0 %v5697_v51  ;;  %6105 = vmatpush.msrb.mxu3 %v5977_v23  ;;  %v5976_v63 = vld [vmem:[#allocation9 + $0x268] sm:$0xff]  ;;  %v5020_v46 = vld [vmem:[#allocation2 + $0x1e0] sm:$0xfe]  ;;  %v5022_v22 = vld [vmem:[#allocation2 + $0x1f0] sm:$0x1] }
 0x5a2   :  { %5314 = vmatmul.f32.gmra.mxu1 %v5140_v40  ;;  %v5015_v40 = vld [vmem:[#allocation2 + $0x1b8] sm:$0x1]  ;;  %v5975_v16 = vld [vmem:[#allocation9 + $0x260] sm:$0xff]  ;;  %6575 = vmatpush.msra.mxu2 %v6465_v13  ;;  %v5174_v6 = vrot.slane %v5020_v46, 1  ;;  %v5175_v20 = vrot.slane %v5022_v22, 1 }
 0x5a3   :  { %8882 = vmatmul.msk.f32.gmra.mxu3 %vm75_vm0, %v5143_v42  ;;  %6033 = vmatpush.msra.mxu1 %v5968_v10  ;;  %v10781_v42 = vld [vmem:[#allocation2 + $0x1a0] sm:$0xff]  ;;  %v5166_v28 = vrot.slane %v5015_v40, 1  ;;  %v5021_v10 = vld [vmem:[#allocation2 + $0x1e8] sm:$0xfe]  ;;  %v5031_v50 = vld [vmem:[#allocation2 + $0x238] sm:$0x1] }
 0x5a4   :  { %4846 = vmatmul.f32.gmra.mxu0 %v10616_v31  ;;  %v10764_v31 = vld [vmem:[#allocation2 + $0x168] sm:$0xff]  ;;  %6106 = vmatpush.msrb.mxu3 %v5976_v63  ;;  %v5177_v9 = vrot.slane %v5021_v10, 1  ;;  %v5176_v24 = vsel %vm890_vm1, %v5174_v6, %v5175_v20  ;;  %v5439_v0 = vld [vmem:[#allocation2] sm:$0xfc]  ;;  %v10828_v10 = vpop.f32.mrf.mxu0 }
 0x5a5   :  { %8867 = vmatmul.msk.f32.gmra.mxu2 %vm75_vm0, %v4707_v30  ;;  %6034 = vmatpush.msra.mxu1 %v5967_v60  ;;  %v5965_v30 = vld [vmem:[#allocation9 + $0x210] sm:$0xff]  ;;  %v5167_v36 = vsel %vm890_vm1, %v5165_v15, %v5166_v28  ;;  %v5023_v60 = vld [vmem:[#allocation2 + $0x1f8] sm:$0x1]  ;;  %v5029_v12 = vld [vmem:[#allocation2 + $0x228] sm:$0xfe] }
 0x5a6   :  { %5763 = vmatpush.msrb.mxu0 %v5696_v45  ;;  %6107 = vmatpush.msrb.mxu3 %v5975_v16  ;;  %v5178_v40 = vrot.slane %v5023_v60, 1  ;;  %v5027_v15 = vld [vmem:[#allocation2 + $0x218] sm:$0x1]  ;;  %v5440_v23 = vld [vmem:[#allocation2 + $0x8] sm:$0xfc]  ;;  %v5189_v13 = vrot.slane %v5029_v12, 1 }
 0x5a7   :  { %6035 = vmatpush.msra.mxu1 %v5966_v35  ;;  %v6461_v28 = vld [vmem:[#allocation9 + $0x2f8] sm:$0xff]  ;;  %v5184_v19 = vrot.slane %v5027_v15, 1  ;;  %v5570_v22 = vrot.slane %v5440_v23, 2  ;;  %v10838_v15 = vpop.f32.mrf.mxu2 }
 0x5a8   :  { %v5179_v35 = vsel %vm890_vm1, %v5177_v9, %v5178_v40  ;;  %6498 = vmatpush.msra.mxu0 %v6461_v28  ;;  %v5442_v45 = vld [vmem:[#allocation2 + $0x18] sm:$0x3]  ;;  %v6459_v40 = vld [vmem:[#allocation9 + $0x2e8] sm:$0xff] }
 0x5a9   :  { %6036 = vmatpush.msra.mxu1 %v5965_v30  ;;  %v5024_v30 = vld [vmem:[#allocation2 + $0x200] sm:$0xfe]  ;;  %v5571_v16 = vrot.slane %v5442_v45, 2 }
 0x5aa   :  { %5317 = vmatmul.f32.gmra.mxu1 %v5146_v14  ;;  %v5963_v14 = vld [vmem:[#allocation9 + $0x200] sm:$0xff] }
 0x5ab   :  { %8883 = vmatmul.msk.f32.gmra.mxu3 %vm75_vm0, %v5149_v8  ;;  %v5164_v8 = vsel %vm890_vm1, %v5162_v52, %v5163_v55  ;;  %6037 = vmatpush.msra.mxu1 %v5964_v1  ;;  %v5026_v52 = vld [vmem:[#allocation2 + $0x210] sm:$0x1]  ;;  %v5025_v55 = vld [vmem:[#allocation2 + $0x208] sm:$0xfe]  ;;  %v10811_v1 = vld [vmem:[#allocation2 + $0x200] sm:$0xff]  ;;  %v5572_v9 = vsel %vm1362_vm7, %v5570_v22, %v5571_v16 }
 0x5ac   :  { %4849 = vmatmul.f32.gmra.mxu0 %v10761_v47  ;;  %v5181_v17 = vrot.slane %v5026_v52, 1  ;;  %v5444_v52 = vld [vmem:[#allocation2 + $0x28] sm:$0xfc]  ;;  %v5451_v22 = vld [vmem:[#allocation2 + $0x60] sm:$0xfc] }
 0x5ad   :  { %8868 = vmatmul.msk.f32.gmra.mxu2 %vm75_vm0, %v10764_v31  ;;  %6038 = vmatpush.msra.mxu1 %v5963_v14  ;;  %v10814_v14 = vld [vmem:[#allocation2 + $0x208] sm:$0xff]  ;;  %v5453_v16 = vld [vmem:[#allocation2 + $0x70] sm:$0x3] }
 0x5af   :  { %6039 = vmatpush.msra.mxu1 %v5962_v48  ;;  %v5030_v48 = vld [vmem:[#allocation2 + $0x230] sm:$0x1] }
 0x5b0   :  { %v5187_v63 = vrot.slane %v5030_v48, 1 }
 0x5b2   :  { %5320 = vmatmul.f32.gmra.mxu1 %v5152_v58  ;;  %v5172_v58 = vrot.slane %v5019_v59, 1  ;;  %v5028_v59 = vld [vmem:[#allocation2 + $0x220] sm:$0xfe] }
 0x5b3   :  { %8884 = vmatmul.msk.f32.gmra.mxu3 %vm75_vm0, %v5155_v49  ;;  %v5961_v49 = vld [vmem:[#allocation9 + $0x1f0] sm:$0xff] }
 0x5b4   :  { %4852 = vmatmul.f32.gmra.mxu0 %v10771_v26  ;;  %6040 = vmatpush.msra.mxu1 %v5961_v49  ;;  %v5173_v7 = vsel %vm890_vm1, %v5171_v3, %v5172_v58  ;;  %v5441_v3 = vld [vmem:[#allocation2 + $0x10] sm:$0x3]  ;;  %v10821_v49 = vld [vmem:[#allocation2 + $0x220] sm:$0xff] }
 0x5b5   :  { %8869 = vmatmul.msk.f32.gmra.mxu2 %vm75_vm0, %v10774_v61  ;;  %v6460_v58 = vld [vmem:[#allocation9 + $0x2f0] sm:$0xff]  ;;  %v5568_v46 = vrot.slane %v5441_v3, 2  ;;  %v5448_v3 = vld [vmem:[#allocation2 + $0x48] sm:$0xfc] }
 0x5b6   :  { %6041 = vmatpush.msra.mxu1 %v5960_v41  ;;  %6499 = vmatpush.msra.mxu0 %v6460_v58  ;;  %v10824_v41 = vld [vmem:[#allocation2 + $0x228] sm:$0xff] }
 0x5b8   :  { %6042 = vmatpush.msra.mxu1 %v5959_v32  ;;  %v5190_v32 = vrot.slane %v5031_v50, 1  ;;  %6500 = vmatpush.msra.mxu0 %v6459_v40  ;;  %v5447_v50 = vld [vmem:[#allocation2 + $0x40] sm:$0xfc]  ;;  %v5586_v40 = vrot.slane %v5453_v16, 2 }
 0x5b9   :  { %v5579_v23 = vrot.slane %v5447_v50, 2 }
 0x5ba   :  { %5323 = vmatmul.f32.gmra.mxu1 %v5158_v18  ;;  %v10801_v18 = vld [vmem:[#allocation2 + $0x1e0] sm:$0xff]  ;;  %v5191_v6 = vsel %vm890_vm1, %v5189_v13, %v5190_v32  ;;  %v6457_v32 = vld [vmem:[#allocation9 + $0x2d8] sm:$0xff] }
 0x5bb   :  { %8885 = vmatmul.msk.f32.gmra.mxu3 %vm75_vm0, %v5161_v25  ;;  %v10804_v25 = vld [vmem:[#allocation2 + $0x1e8] sm:$0xff] }
 0x5bc   :  { %4855 = vmatmul.f32.gmra.mxu0 %v10781_v42 }
 0x5bd   :  { %8870 = vmatmul.msk.f32.gmra.mxu2 %vm75_vm0, %v10784_v33 }
 0x5c2   :  { %5326 = vmatmul.f32.gmra.mxu1 %v5164_v8  ;;  %v5180_v8 = vrot.slane %v5024_v30, 1  ;;  %v5445_v30 = vld [vmem:[#allocation2 + $0x30] sm:$0x3] }
 0x5c3   :  { %8886 = vmatmul.msk.f32.gmra.mxu3 %vm75_vm0, %v5167_v36  ;;  %v5183_v36 = vrot.slane %v5025_v55, 1  ;;  %v5446_v55 = vld [vmem:[#allocation2 + $0x38] sm:$0x3] }
 0x5c4   :  { %4858 = vmatmul.f32.gmra.mxu0 %v10791_v37  ;;  %v5182_v21 = vsel %vm890_vm1, %v5180_v8, %v5181_v17  ;;  %v5574_v8 = vrot.slane %v5445_v30, 2  ;;  %v5576_v17 = vrot.slane %v5444_v52, 2 }
 0x5c5   :  { %8871 = vmatmul.msk.f32.gmra.mxu2 %vm75_vm0, %v10794_v11  ;;  %v5185_v51 = vsel %vm890_vm1, %v5183_v36, %v5184_v19  ;;  %v5577_v36 = vrot.slane %v5446_v55, 2 }
 0x5c7   :  { %v5578_v12 = vsel %vm1362_vm7, %v5576_v17, %v5577_v36  ;;  %v5455_v36 = vld [vmem:[#allocation2 + $0x80] sm:$0xfc] }
 0x5ca   :  { %5329 = vmatmul.f32.gmra.mxu1 %v5170_v5  ;;  %v5186_v5 = vrot.slane %v5028_v59, 1  ;;  %v6458_v59 = vld [vmem:[#allocation9 + $0x2e0] sm:$0xff] }
 0x5cb   :  { %8887 = vmatmul.msk.f32.gmra.mxu3 %vm75_vm0, %v5173_v7  ;;  %v5567_v7 = vrot.slane %v5439_v0, 2  ;;  %6501 = vmatpush.msra.mxu0 %v6458_v59  ;;  %v5449_v0 = vld [vmem:[#allocation2 + $0x50] sm:$0x3] }
 0x5cc   :  { %4861 = vmatmul.f32.gmra.mxu0 %v10801_v18  ;;  %v5188_v60 = vsel %vm890_vm1, %v5186_v5, %v5187_v63  ;;  %v5582_v5 = vrot.slane %v5448_v3, 2 }
 0x5cd   :  { %8872 = vmatmul.msk.f32.gmra.mxu2 %vm75_vm0, %v10804_v25  ;;  %v5569_v20 = vsel %vm1362_vm7, %v5567_v7, %v5568_v46  ;;  %6502 = vmatpush.msra.mxu0 %v6457_v32 }
 0x5d2   :  { %5332 = vmatmul.f32.gmra.mxu1 %v5176_v24  ;;  %v10835_v24 = vpop.f32.mrf.mxu1 }
 0x5d3   :  { %8888 = vmatmul.msk.f32.gmra.mxu3 %vm75_vm0, %v5179_v35  ;;  %v5443_v35 = vld [vmem:[#allocation2 + $0x20] sm:$0xfc] }
 0x5d4   :  { %4864 = vmatmul.f32.gmra.mxu0 %v10811_v1  ;;  %v5573_v28 = vrot.slane %v5443_v35, 2 }
 0x5d5   :  { %8873 = vmatmul.msk.f32.gmra.mxu2 %vm75_vm0, %v10814_v14 }
 0x5d6   :  { %v5575_v48 = vsel %vm1362_vm7, %v5573_v28, %v5574_v8  ;;  %v6456_v28 = vld [vmem:[#allocation9 + $0x2d0] sm:$0xff] }
 0x5d7   :  { %6503 = vmatpush.msra.mxu0 %v6456_v28  ;;  %v6463_v28 = vld [vmem:[#allocation9 + $0x308] sm:$0xff] }
 0x5d8   :  { %v10840_v19 = vpop.f32.mrf.mxu0 }
 0x5da   :  { %5335 = vmatmul.f32.gmra.mxu1 %v5182_v21  ;;  %v6464_v21 = vld [vmem:[#allocation9 + $0x310] sm:$0xff] }
 0x5db   :  { %8889 = vmatmul.msk.f32.gmra.mxu3 %vm75_vm0, %v5185_v51  ;;  %6576 = vmatpush.msra.mxu2 %v6464_v21  ;;  %v10845_v51 = vpop.f32.mrf.mxu3  ;;  %v5457_v21 = vld [vmem:[#allocation2 + $0x90] sm:$0x3] }
 0x5dc   :  { %4867 = vmatmul.f32.gmra.mxu0 %v10821_v49  ;;  %v10850_v58 = vpop.f32.mrf.mxu1  ;;  %v5592_v3 = vrot.slane %v5457_v21, 2  ;;  %v5463_v21 = vld [vmem:[#allocation2 + $0xc0] sm:$0xfc] }
 0x5dd   :  { %8874 = vmatmul.msk.f32.gmra.mxu2 %vm75_vm0, %v10824_v41 }
 0x5de   :  { %6577 = vmatpush.msra.mxu2 %v6463_v28  ;;  %v5473_v28 = vld [vmem:[#allocation2 + $0x150] sm:$0x3] }
 0x5df   :  { %v10852_v45 = vpop.f32.mrf.mxu2 }
 0x5e2   :  { %5338 = vmatmul.f32.gmra.mxu1 %v5188_v60 }
 0x5e3   :  { %8890 = vmatmul.msk.f32.gmra.mxu3 %vm75_vm0, %v5191_v6  ;;  %v10859_v60 = vpop.f32.mrf.mxu3  ;;  %v5452_v6 = vld [vmem:[#allocation2 + $0x68] sm:$0xfc] }
 0x5e4   :  { %5764 = vmatmul.f32.vlgmr.msrb.gmra.mxu0 %v5569_v20  ;;  %v5454_v20 = vld [vmem:[#allocation2 + $0x78] sm:$0x3] }
 0x5e5   :  { %8891 = vmatmul.msk.f32.vlgmr.msrb.gmra.mxu2 %vm75_vm0, %v5572_v9  ;;  %v5585_v9 = vrot.slane %v5451_v22, 2  ;;  %v5589_v30 = vrot.slane %v5454_v20, 2  ;;  %v5461_v22 = vld [vmem:[#allocation2 + $0xb0] sm:$0x3]  ;;  %v5462_v20 = vld [vmem:[#allocation2 + $0xb8] sm:$0x3] }
 0x5e7   :  { %v5587_v8 = vsel %vm1362_vm7, %v5585_v9, %v5586_v40  ;;  %v5598_v40 = vrot.slane %v5461_v22, 2  ;;  %v5469_v22 = vld [vmem:[#allocation2 + $0xf0] sm:$0x3] }
 0x5ea   :  { %6043 = vmatmul.f32.vlgmr.msra.gmra.mxu1 %v10629_v62  ;;  %v5450_v62 = vld [vmem:[#allocation2 + $0x58] sm:$0x3] }
 0x5eb   :  { %8907 = vmatmul.msk.f32.vlgmr.msrb.gmra.mxu3 %vm75_vm0, %v10632_v44  ;;  %v5580_v44 = vrot.slane %v5449_v0, 2  ;;  %v5583_v63 = vrot.slane %v5450_v62, 2  ;;  %v5591_v0 = vrot.slane %v5455_v36, 2 }
 0x5ec   :  { %5767 = vmatmul.f32.gmra.mxu0 %v5575_v48  ;;  %v5456_v48 = vld [vmem:[#allocation2 + $0x88] sm:$0xfc] }
 0x5ed   :  { %8892 = vmatmul.msk.f32.gmra.mxu2 %vm75_vm0, %v5578_v12  ;;  %v5581_v7 = vsel %vm1362_vm7, %v5579_v23, %v5580_v44  ;;  %v5584_v46 = vsel %vm1362_vm7, %v5582_v5, %v5583_v63  ;;  %v5458_v12 = vld [vmem:[#allocation2 + $0x98] sm:$0x3]  ;;  %v5594_v23 = vrot.slane %v5456_v48, 2  ;;  %v5593_v32 = vsel %vm1362_vm7, %v5591_v0, %v5592_v3 }
 0x5ee   :  { %v5595_v44 = vrot.slane %v5458_v12, 2  ;;  %v5464_v12 = vld [vmem:[#allocation2 + $0xc8] sm:$0xfc]  ;;  %v5603_v0 = vrot.slane %v5463_v21, 2  ;;  %v5474_v21 = vld [vmem:[#allocation2 + $0x158] sm:$0x3] }
 0x5f1   :  { %v4829_v13 = vpop.f32.mrf.mxu0 }
 0x5f2   :  { %6046 = vmatmul.f32.gmra.mxu1 %v10661_v57 }
 0x5f3   :  { %8908 = vmatmul.msk.f32.gmra.mxu3 %vm75_vm0, %v10664_v43  ;;  %v5588_v43 = vrot.slane %v5452_v6, 2  ;;  %v5460_v6 = vld [vmem:[#allocation2 + $0xa8] sm:$0xfc] }
 0x5f4   :  { %5770 = vmatmul.f32.gmra.mxu0 %v5581_v7  ;;  %v5596_v7 = vsel %vm1362_vm7, %v5594_v23, %v5595_v44  ;;  %v5606_v23 = vrot.slane %v5464_v12, 2 }
 0x5f5   :  { %8893 = vmatmul.msk.f32.gmra.mxu2 %vm75_vm0, %v5584_v46  ;;  %v5590_v17 = vsel %vm1362_vm7, %v5588_v43, %v5589_v30  ;;  %v5459_v46 = vld [vmem:[#allocation2 + $0xa0] sm:$0xfc]  ;;  %v5600_v43 = vrot.slane %v5460_v6, 2  ;;  %v5601_v30 = vrot.slane %v5462_v20, 2  ;;  %v5468_v6 = vld [vmem:[#allocation2 + $0xe8] sm:$0xfc] }
 0x5f6   :  { %v5597_v9 = vrot.slane %v5459_v46, 2  ;;  %v5467_v46 = vld [vmem:[#allocation2 + $0xe0] sm:$0xfc]  ;;  %v5470_v20 = vld [vmem:[#allocation2 + $0xf8] sm:$0x3] }
 0x5f7   :  { %v5300_v57 = vpop.f32.mrf.mxu1  ;;  %v5602_v36 = vsel %vm1362_vm7, %v5600_v43, %v5601_v30  ;;  %v5613_v43 = vrot.slane %v5470_v20, 2 }
 0x5f8   :  { %v4894_v35 = vpop.f32.mrf.mxu2 }
 0x5f9   :  { %v4895_v52 = vadd.f32 %v4894_v35, %v4829_v13  ;;  %v4832_v55 = vpop.f32.mrf.mxu0  ;;  %v6455_v13 = vld [vmem:[#allocation9 + $0x2c8] sm:$0xff] }
 0x5fa   :  { %6049 = vmatmul.f32.gmra.mxu1 %v10678_v2  ;;  %6504 = vmatpush.msra.mxu0 %v6455_v13  ;;  %v6453_v13 = vld [vmem:[#allocation9 + $0x2b8] sm:$0xff] }
 0x5fb   :  { %8909 = vmatmul.msk.f32.gmra.mxu3 %vm75_vm0, %v10681_v34 }
 0x5fc   :  { %5773 = vmatmul.f32.gmra.mxu0 %v5587_v8  ;;  %v6454_v8 = vld [vmem:[#allocation9 + $0x2c0] sm:$0xff] }
 0x5fd   :  { %8894 = vmatmul.msk.f32.gmra.mxu2 %vm75_vm0, %v5590_v17  ;;  %v5599_v17 = vsel %vm1362_vm7, %v5597_v9, %v5598_v40  ;;  %6505 = vmatpush.msra.mxu0 %v6454_v8  ;;  %v5610_v9 = vrot.slane %v5469_v22, 2  ;;  %v6452_v8 = vld [vmem:[#allocation9 + $0x2b0] sm:$0xff] }
 0x5fe   :  { %v5365_v59 = vpop.f32.mrf.mxu3 }
 0x5ff   :  { %v5366_v50 = vadd.f32 %v5365_v59, %v5300_v57  ;;  %v5303_v2 = vpop.f32.mrf.mxu1  ;;  %v5465_v59 = vld [vmem:[#allocation2 + $0xd0] sm:$0x3]  ;;  %6506 = vmatpush.msra.mxu0 %v6453_v13 }
 0x600   :  { %v4897_v34 = vpop.f32.mrf.mxu2  ;;  %v5604_v3 = vrot.slane %v5465_v59, 2 }
 0x601   :  { %v10868_v62 = vadd.f32 %v5366_v50, %v4895_v52  ;;  %v4898_v5 = vadd.f32 %v4897_v34, %v4832_v55  ;;  %v4835_v63 = vpop.f32.mrf.mxu0  ;;  %6507 = vmatpush.msra.mxu0 %v6452_v8  ;;  %v6932_v8 = vld [vmem:[#allocation9 + $0x398] sm:$0xff] }
 0x602   :  { %6052 = vmatmul.f32.gmra.mxu1 %v10696_v4 }
 0x603   :  { %8910 = vmatmul.msk.f32.gmra.mxu3 %vm75_vm0, %v10698_v56  ;;  %6969 = vmatpush.msrb.mxu1 %v6932_v8 }
 0x604   :  { %5776 = vmatmul.f32.gmra.mxu0 %v5593_v32  ;;  %v5605_v32 = vsel %vm1362_vm7, %v5603_v0, %v5604_v3 }
 0x605   :  { %8895 = vmatmul.msk.f32.gmra.mxu2 %vm75_vm0, %v5596_v7 }
 0x606   :  { %v5368_v16 = vpop.f32.mrf.mxu3 }
 0x607   :  { %v5369_v57 = vadd.f32 %v5368_v16, %v5303_v2  ;;  %v5306_v4 = vpop.f32.mrf.mxu1 }
 0x608   :  { %v4900_v56 = vpop.f32.mrf.mxu2 }
 0x609   :  { %v10876_v35 = vadd.f32 %v5369_v57, %v4898_v5  ;;  %v4901_v52 = vadd.f32 %v4900_v56, %v4835_v63  ;;  %v4838_v55 = vpop.f32.mrf.mxu0  ;;  %v5612_v56 = vrot.slane %v5468_v6, 2  ;;  %v5478_v6 = vld [vmem:[#allocation2 + $0x178] sm:$0x3] }
 0x60a   :  { %6055 = vmatmul.f32.gmra.mxu1 %v10714_v27  ;;  %v5466_v27 = vld [vmem:[#allocation2 + $0xd8] sm:$0x3] }
 0x60b   :  { %8911 = vmatmul.msk.f32.gmra.mxu3 %vm75_vm0, %v10717_v38  ;;  %v5607_v44 = vrot.slane %v5466_v27, 2  ;;  %v5614_v59 = vsel %vm1362_vm7, %v5612_v56, %v5613_v43  ;;  %v5625_v43 = vrot.slane %v5478_v6, 2 }
 0x60c   :  { %5779 = vmatmul.f32.gmra.mxu0 %v5599_v17 }
 0x60d   :  { %8896 = vmatmul.msk.f32.gmra.mxu2 %vm75_vm0, %v5602_v36  ;;  %v5608_v7 = vsel %vm1362_vm7, %v5606_v23, %v5607_v44  ;;  %v5472_v36 = vld [vmem:[#allocation2 + $0x148] sm:$0xfc] }
 0x60e   :  { %v5371_v48 = vpop.f32.mrf.mxu3  ;;  %v5925_v44 = vld [vmem:[#allocation2 + $0x108] sm:$0xff] }
 0x60f   :  { %v5372_v50 = vadd.f32 %v5371_v48, %v5306_v4  ;;  %v5309_v2 = vpop.f32.mrf.mxu1  ;;  %v5609_v4 = vrot.slane %v5467_v46, 2  ;;  %v5477_v46 = vld [vmem:[#allocation2 + $0x170] sm:$0x3] }
 0x610   :  { %v4903_v34 = vpop.f32.mrf.mxu2 }
 0x611   :  { %v10884_v38 = vadd.f32 %v5372_v50, %v4901_v52  ;;  %v4904_v5 = vadd.f32 %v4903_v34, %v4838_v55  ;;  %v4841_v63 = vpop.f32.mrf.mxu0  ;;  %v5471_v55 = vld [vmem:[#allocation2 + $0x140] sm:$0xfc]  ;;  %v5611_v17 = vsel %vm1362_vm7, %v5609_v4, %v5610_v9  ;;  %v5622_v4 = vrot.slane %v5477_v46, 2 }
 0x612   :  { %6058 = vmatmul.f32.gmra.mxu1 %v10732_v39  ;;  %v5615_v12 = vrot.slane %v5471_v55, 2  ;;  %v5924_v34 = vld [vmem:[#allocation2 + $0x100] sm:$0xff] }
 0x613   :  { %8912 = vmatmul.msk.f32.gmra.mxu3 %vm75_vm0, %v10735_v29 }
 0x614   :  { %5782 = vmatmul.f32.gmra.mxu0 %v5605_v32  ;;  %v6451_v32 = vld [vmem:[#allocation9 + $0x2a8] sm:$0xff] }
 0x615   :  { %8897 = vmatmul.msk.f32.gmra.mxu2 %vm75_vm0, %v5608_v7  ;;  %6508 = vmatpush.msra.mxu0 %v6451_v32  ;;  %v5475_v7 = vld [vmem:[#allocation2 + $0x160] sm:$0xfc] }
 0x616   :  { %v5374_v16 = vpop.f32.mrf.mxu3 }
 0x617   :  { %v5375_v57 = vadd.f32 %v5374_v16, %v5309_v2  ;;  %v5312_v39 = vpop.f32.mrf.mxu1  ;;  %v5618_v2 = vrot.slane %v5472_v36, 2  ;;  %v5476_v16 = vld [vmem:[#allocation2 + $0x168] sm:$0xfc] }
 0x618   :  { %v4906_v29 = vpop.f32.mrf.mxu2  ;;  %v5624_v56 = vrot.slane %v5476_v16, 2  ;;  %v5485_v16 = vld [vmem:[#allocation2 + $0x1b0] sm:$0x3] }
 0x619   :  { %v10892_v40 = vadd.f32 %v5375_v57, %v4904_v5  ;;  %v4907_v30 = vadd.f32 %v4906_v29, %v4841_v63  ;;  %v4844_v52 = vpop.f32.mrf.mxu0 }
 0x61a   :  { %6061 = vmatmul.f32.gmra.mxu1 %v10746_v54  ;;  %v5616_v54 = vrot.slane %v5473_v28, 2  ;;  %v6450_v28 = vld [vmem:[#allocation9 + $0x2a0] sm:$0xff]  ;;  %v5626_v36 = vsel %vm1362_vm7, %v5624_v56, %v5625_v43 }
 0x61b   :  { %8913 = vmatmul.msk.f32.gmra.mxu3 %vm75_vm0, %v10749_v53  ;;  %v5619_v53 = vrot.slane %v5474_v21, 2  ;;  %6509 = vmatpush.msra.mxu0 %v6450_v28  ;;  %v5479_v21 = vld [vmem:[#allocation2 + $0x180] sm:$0xfc] }
 0x61c   :  { %5785 = vmatmul.f32.gmra.mxu0 %v5611_v17  ;;  %v5617_v63 = vsel %vm1362_vm7, %v5615_v12, %v5616_v54  ;;  %v5482_v12 = vld [vmem:[#allocation2 + $0x198] sm:$0x3] }
 0x61d   :  { %8898 = vmatmul.msk.f32.gmra.mxu2 %vm75_vm0, %v5614_v59  ;;  %v5620_v13 = vsel %vm1362_vm7, %v5618_v2, %v5619_v53  ;;  %v5481_v59 = vld [vmem:[#allocation2 + $0x190] sm:$0x3] }
 0x61e   :  { %v5377_v48 = vpop.f32.mrf.mxu3 }
 0x61f   :  { %v5378_v27 = vadd.f32 %v5377_v48, %v5312_v39  ;;  %v5315_v50 = vpop.f32.mrf.mxu1  ;;  %v5621_v39 = vrot.slane %v5475_v7, 2  ;;  %v6929_v7 = vld [vmem:[#allocation9 + $0x380] sm:$0xff] }
 0x620   :  { %v4909_v3 = vpop.f32.mrf.mxu2 }
 0x621   :  { %v10900_v0 = vadd.f32 %v5378_v27, %v4907_v30  ;;  %v4910_v23 = vadd.f32 %v4909_v3, %v4844_v52  ;;  %v4847_v5 = vpop.f32.mrf.mxu0  ;;  %v6462_v30 = vld [vmem:[#allocation9 + $0x300] sm:$0xff]  ;;  %v5623_v17 = vsel %vm1362_vm7, %v5621_v39, %v5622_v4 }
 0x622   :  { %6064 = vmatmul.f32.gmra.mxu1 %v5924_v34  ;;  %6578 = vmatpush.msra.mxu2 %v6462_v30  ;;  %v5631_v34 = vrot.slane %v5482_v12, 2  ;;  %v5489_v12 = vld [vmem:[#allocation2 + $0x1d0] sm:$0x3] }
 0x623   :  { %8914 = vmatmul.msk.f32.gmra.mxu3 %vm75_vm0, %v5925_v44 }
 0x624   :  { %5788 = vmatmul.f32.gmra.mxu0 %v5617_v63  ;;  %v6930_v63 = vld [vmem:[#allocation9 + $0x388] sm:$0xff] }
 0x625   :  { %8899 = vmatmul.msk.f32.gmra.mxu2 %vm75_vm0, %v5620_v13  ;;  %v6449_v13 = vld [vmem:[#allocation9 + $0x298] sm:$0xff] }
 0x626   :  { %v5380_v22 = vpop.f32.mrf.mxu3  ;;  %6510 = vmatpush.msra.mxu0 %v6449_v13 }
 0x627   :  { %v5381_v20 = vadd.f32 %v5380_v22, %v5315_v50  ;;  %v5318_v57 = vpop.f32.mrf.mxu1  ;;  %v5627_v50 = vrot.slane %v5479_v21, 2  ;;  %v5483_v22 = vld [vmem:[#allocation2 + $0x1a0] sm:$0xfc] }
 0x628   :  { %v4912_v29 = vpop.f32.mrf.mxu2  ;;  %v5633_v4 = vrot.slane %v5483_v22, 2  ;;  %v6936_v22 = vld [vmem:[#allocation9 + $0x3b8] sm:$0xff] }
 0x629   :  { %v10906_v9 = vadd.f32 %v5381_v20, %v4910_v23  ;;  %v4913_v52 = vadd.f32 %v4912_v29, %v4847_v5  ;;  %v4850_v55 = vpop.f32.mrf.mxu0  ;;  %v6931_v23 = vld [vmem:[#allocation9 + $0x390] sm:$0xff]  ;;  %v5486_v20 = vld [vmem:[#allocation2 + $0x1b8] sm:$0x3]  ;;  %v5634_v29 = vrot.slane %v5485_v16, 2  ;;  %7046 = vmatpush.msra.mxu3 %v6936_v22 }
 0x62a   :  { %6067 = vmatmul.f32.gmra.mxu1 %v10761_v47  ;;  %v5480_v47 = vld [vmem:[#allocation2 + $0x188] sm:$0xfc] }
 0x62b   :  { %8915 = vmatmul.msk.f32.gmra.mxu3 %vm75_vm0, %v10764_v31  ;;  %v5628_v31 = vrot.slane %v5481_v59, 2  ;;  %v5630_v3 = vrot.slane %v5480_v47, 2  ;;  %6970 = vmatpush.msrb.mxu1 %v6931_v23  ;;  %v5635_v21 = vsel %vm1362_vm7, %v5633_v4, %v5634_v29  ;;  %v6925_v59 = vld [vmem:[#allocation9 + $0x360] sm:$0xff] }
 0x62c   :  { %5791 = vmatmul.f32.gmra.mxu0 %v5623_v17  ;;  %v6926_v17 = vld [vmem:[#allocation9 + $0x368] sm:$0xff]  ;;  %v5487_v47 = vld [vmem:[#allocation2 + $0x1c0] sm:$0xfc] }
 0x62d   :  { %8900 = vmatmul.msk.f32.gmra.mxu2 %vm75_vm0, %v5626_v36  ;;  %v5629_v32 = vsel %vm1362_vm7, %v5627_v50, %v5628_v31  ;;  %v5632_v46 = vsel %vm1362_vm7, %v5630_v3, %v5631_v34  ;;  %6971 = vmatpush.msrb.mxu1 %v6930_v63  ;;  %v6448_v36 = vld [vmem:[#allocation9 + $0x290] sm:$0xff]  ;;  %v6924_v50 = vld [vmem:[#allocation9 + $0x358] sm:$0xff]  ;;  %v5640_v3 = vrot.slane %v5489_v12, 2  ;;  %v6934_v12 = vld [vmem:[#allocation9 + $0x3a8] sm:$0xff] }
 0x62e   :  { %v5383_v48 = vpop.f32.mrf.mxu3  ;;  %6511 = vmatpush.msra.mxu0 %v6448_v36  ;;  %v6923_v63 = vld [vmem:[#allocation9 + $0x350] sm:$0xff] }
 0x62f   :  { %v5384_v54 = vadd.f32 %v5383_v48, %v5318_v57  ;;  %v5321_v27 = vpop.f32.mrf.mxu1  ;;  %v6928_v57 = vld [vmem:[#allocation9 + $0x378] sm:$0xff]  ;;  %6972 = vmatpush.msrb.mxu1 %v6929_v7  ;;  %v6922_v7 = vld [vmem:[#allocation9 + $0x348] sm:$0xff]  ;;  %v6935_v36 = vld [vmem:[#allocation9 + $0x3b0] sm:$0xff] }
 0x630   :  { %v4915_v53 = vpop.f32.mrf.mxu2  ;;  %7047 = vmatpush.msra.mxu3 %v6935_v36 }
 0x631   :  { %v10914_v2 = vadd.f32 %v5384_v54, %v4913_v52  ;;  %v4916_v44 = vadd.f32 %v4915_v53, %v4850_v55  ;;  %v4853_v5 = vpop.f32.mrf.mxu0  ;;  %v5637_v52 = vrot.slane %v5486_v20, 2  ;;  %6973 = vmatpush.msrb.mxu1 %v6928_v57  ;;  %v6927_v55 = vld [vmem:[#allocation9 + $0x370] sm:$0xff]  ;;  %v5639_v53 = vrot.slane %v5487_v47, 2  ;;  %v5491_v20 = vld [vmem:[#allocation2 + $0x1e0] sm:$0xfc]  ;;  %v6918_v47 = vld [vmem:[#allocation9 + $0x328] sm:$0xff] }
 0x632   :  { %6070 = vmatmul.f32.gmra.mxu1 %v10771_v26  ;;  %v5484_v26 = vld [vmem:[#allocation2 + $0x1a8] sm:$0xfc]  ;;  %v5493_v57 = vld [vmem:[#allocation2 + $0x1f0] sm:$0x3]  ;;  %7048 = vmatpush.msra.mxu3 %v6934_v12 }
 0x633   :  { %8916 = vmatmul.msk.f32.gmra.mxu3 %vm75_vm0, %v10774_v61  ;;  %v5636_v30 = vrot.slane %v5484_v26, 2  ;;  %6974 = vmatpush.msrb.mxu1 %v6927_v55  ;;  %v5641_v16 = vsel %vm1362_vm7, %v5639_v53, %v5640_v3  ;;  %v5496_v3 = vld [vmem:[#allocation2 + $0x208] sm:$0xfc] }
 0x634   :  { %5794 = vmatmul.f32.gmra.mxu0 %v5629_v32 }
 0x635   :  { %8901 = vmatmul.msk.f32.gmra.mxu2 %vm75_vm0, %v5632_v46  ;;  %v5638_v48 = vsel %vm1362_vm7, %v5636_v30, %v5637_v52  ;;  %6975 = vmatpush.msrb.mxu1 %v6926_v17  ;;  %v6447_v46 = vld [vmem:[#allocation9 + $0x288] sm:$0xff]  ;;  %v5646_v30 = vrot.slane %v5493_v57, 2  ;;  %v6919_v17 = vld [vmem:[#allocation9 + $0x330] sm:$0xff]  ;;  %v5499_v57 = vld [vmem:[#allocation2 + $0x220] sm:$0xfc] }
 0x636   :  { %v5386_v6 = vpop.f32.mrf.mxu3  ;;  %6512 = vmatpush.msra.mxu0 %v6447_v46 }
 0x637   :  { %v5387_v39 = vadd.f32 %v5386_v6, %v5321_v27  ;;  %v5324_v61 = vpop.f32.mrf.mxu1  ;;  %v5490_v27 = vld [vmem:[#allocation2 + $0x1d8] sm:$0x3]  ;;  %6976 = vmatpush.msrb.mxu1 %v6925_v59  ;;  %v6921_v6 = vld [vmem:[#allocation9 + $0x340] sm:$0xff] }
 0x638   :  { %v4918_v43 = vpop.f32.mrf.mxu2 }
 0x639   :  { %v10922_v56 = vadd.f32 %v5387_v39, %v4916_v44  ;;  %v4919_v28 = vadd.f32 %v4918_v43, %v4853_v5  ;;  %v4856_v8 = vpop.f32.mrf.mxu0  ;;  %v5643_v5 = vrot.slane %v5490_v27, 2  ;;  %6977 = vmatpush.msrb.mxu1 %v6924_v50  ;;  %v5492_v39 = vld [vmem:[#allocation2 + $0x1e8] sm:$0xfc]  ;;  %v5645_v43 = vrot.slane %v5491_v20, 2  ;;  %v7199_v27 = vld [vmem:[#allocation9 + $0x458] sm:$0xff]  ;;  %v6917_v50 = vld [vmem:[#allocation9 + $0x320] sm:$0xff] }
 0x63a   :  { %6073 = vmatmul.f32.gmra.mxu1 %v10781_v42  ;;  %v5488_v42 = vld [vmem:[#allocation2 + $0x1c8] sm:$0xfc]  ;;  %7325 = vmatpush.msrb.mxu2 %v7199_v27 }
 0x63b   :  { %8917 = vmatmul.msk.f32.gmra.mxu3 %vm75_vm0, %v10784_v33  ;;  %v5642_v44 = vrot.slane %v5488_v42, 2  ;;  %6978 = vmatpush.msrb.mxu1 %v6923_v63  ;;  %v5647_v42 = vsel %vm1362_vm7, %v5645_v43, %v5646_v30 }
 0x63c   :  { %5797 = vmatmul.f32.gmra.mxu0 %v5635_v21  ;;  %v6446_v21 = vld [vmem:[#allocation9 + $0x280] sm:$0xff] }
 0x63d   :  { %8902 = vmatmul.msk.f32.gmra.mxu2 %vm75_vm0, %v5638_v48  ;;  %v5644_v26 = vsel %vm1362_vm7, %v5642_v44, %v5643_v5  ;;  %6979 = vmatpush.msrb.mxu1 %v6922_v7  ;;  %v5654_v7 = vrot.slane %v5496_v3, 2 }
 0x63e   :  { %v5389_v54 = vpop.f32.mrf.mxu3  ;;  %6513 = vmatpush.msra.mxu0 %v6446_v21  ;;  %v7194_v21 = vld [vmem:[#allocation9 + $0x430] sm:$0xff] }
 0x63f   :  { %v5390_v31 = vadd.f32 %v5389_v54, %v5324_v61  ;;  %v5327_v33 = vpop.f32.mrf.mxu1  ;;  %v5494_v61 = vld [vmem:[#allocation2 + $0x1f8] sm:$0x3]  ;;  %6980 = vmatpush.msrb.mxu1 %v6921_v6  ;;  %v6933_v54 = vld [vmem:[#allocation9 + $0x3a0] sm:$0xff] }
 0x640   :  { %v4921_v23 = vpop.f32.mrf.mxu2  ;;  %7049 = vmatpush.msra.mxu3 %v6933_v54  ;;  %v6190_v54 = vld [vmem:[#allocation2 + $0x28] sm:$0xfe] }
 0x641   :  { %v10930_v34 = vadd.f32 %v5390_v31, %v4919_v28  ;;  %v4922_v13 = vadd.f32 %v4921_v23, %v4856_v8  ;;  %v4859_v32 = vpop.f32.mrf.mxu0  ;;  %v5648_v28 = vrot.slane %v5492_v39, 2  ;;  %v5649_v8 = vrot.slane %v5494_v61, 2  ;;  %v5498_v23 = vld [vmem:[#allocation2 + $0x218] sm:$0x3]  ;;  %v5500_v61 = vld [vmem:[#allocation2 + $0x228] sm:$0xfc] }
 0x642   :  { %6076 = vmatmul.f32.gmra.mxu1 %v10791_v37  ;;  %v5655_v46 = vrot.slane %v5498_v23, 2 }
 0x643   :  { %8918 = vmatmul.msk.f32.gmra.mxu3 %vm75_vm0, %v10794_v11  ;;  %v6920_v11 = vld [vmem:[#allocation9 + $0x338] sm:$0xff]  ;;  %v5650_v31 = vsel %vm1362_vm7, %v5648_v28, %v5649_v8 }
 0x644   :  { %5800 = vmatmul.f32.gmra.mxu0 %v5641_v16  ;;  %6981 = vmatpush.msrb.mxu1 %v6920_v11  ;;  %v5656_v20 = vsel %vm1362_vm7, %v5654_v7, %v5655_v46  ;;  %v5502_v11 = vld [vmem:[#allocation2 + $0x238] sm:$0x3] }
 0x645   :  { %8903 = vmatmul.msk.f32.gmra.mxu2 %vm75_vm0, %v5644_v26  ;;  %v7195_v26 = vld [vmem:[#allocation9 + $0x438] sm:$0xff]  ;;  %v5661_v28 = vrot.slane %v5502_v11, 2  ;;  %v6194_v11 = vld [vmem:[#allocation2 + $0x48] sm:$0xfe] }
 0x646   :  { %v5392_v37 = vpop.f32.mrf.mxu3  ;;  %6982 = vmatpush.msrb.mxu1 %v6919_v17  ;;  %7248 = vmatpush.msrb.mxu0 %v7195_v26  ;;  %v6663_v7 = vld [vmem:[#allocation2 + $0x38] sm:$0x3] }
 0x647   :  { %v5393_v4 = vadd.f32 %v5392_v37, %v5327_v33  ;;  %v5330_v29 = vpop.f32.mrf.mxu1  ;;  %v5495_v33 = vld [vmem:[#allocation2 + $0x200] sm:$0xfc]  ;;  %v5501_v37 = vld [vmem:[#allocation2 + $0x230] sm:$0x3] }
 0x648   :  { %v4924_v55 = vpop.f32.mrf.mxu2  ;;  %6983 = vmatpush.msrb.mxu1 %v6918_v47  ;;  %v5651_v5 = vrot.slane %v5495_v33, 2  ;;  %v5658_v43 = vrot.slane %v5501_v37, 2  ;;  %v6191_v47 = vld [vmem:[#allocation2 + $0x30] sm:$0x1]  ;;  %7249 = vmatpush.msrb.mxu0 %v7194_v21  ;;  %v6326_v21 = vrot.slane %v6194_v11, 1 }
 0x649   :  { %v10938_v52 = vadd.f32 %v5393_v4, %v4922_v13  ;;  %v4925_v59 = vadd.f32 %v4924_v55, %v4859_v32  ;;  %v4862_v48 = vpop.f32.mrf.mxu0  ;;  %v5660_v55 = vrot.slane %v5500_v61, 2  ;;  %v6792_v61 = vrot.slane %v6663_v7, 2 }
 0x64a   :  { %6079 = vmatmul.f32.gmra.mxu1 %v10801_v18  ;;  %v5497_v18 = vld [vmem:[#allocation2 + $0x210] sm:$0x3] }
 0x64b   :  { %8919 = vmatmul.msk.f32.gmra.mxu3 %vm75_vm0, %v10804_v25  ;;  %6984 = vmatpush.msrb.mxu1 %v6917_v50  ;;  %v5652_v63 = vrot.slane %v5497_v18, 2  ;;  %v5940_v18 = vld [vmem:[#allocation2 + $0x240] sm:$0xff] }
 0x64c   :  { %5803 = vmatmul.f32.gmra.mxu0 %v5647_v42  ;;  %v6192_v42 = vld [vmem:[#allocation2 + $0x38] sm:$0x1] }
 0x64d   :  { %8904 = vmatmul.msk.f32.gmra.mxu2 %vm75_vm0, %v5650_v31  ;;  %v5653_v6 = vsel %vm1362_vm7, %v5651_v5, %v5652_v63  ;;  %v6318_v31 = vrot.slane %v6191_v47, 1  ;;  %v6321_v3 = vrot.slane %v6192_v42, 1  ;;  %v6660_v5 = vld [vmem:[#allocation2 + $0x20] sm:$0xfc]  ;;  %v6662_v63 = vld [vmem:[#allocation2 + $0x30] sm:$0x3] }
 0x64e   :  { %v5395_v53 = vpop.f32.mrf.mxu3  ;;  %v6789_v26 = vrot.slane %v6662_v63, 2  ;;  %v6667_v42 = vld [vmem:[#allocation2 + $0x58] sm:$0x3] }
 0x64f   :  { %v5396_v25 = vadd.f32 %v5395_v53, %v5330_v29  ;;  %v5333_v44 = vpop.f32.mrf.mxu1  ;;  %v5657_v29 = vrot.slane %v5499_v57, 2  ;;  %v6320_v53 = vrot.slane %v6190_v54, 1  ;;  %v6195_v57 = vld [vmem:[#allocation2 + $0x50] sm:$0x1]  ;;  %v6200_v63 = vld [vmem:[#allocation2 + $0x78] sm:$0x1] }
 0x650   :  { %v4927_v32 = vpop.f32.mrf.mxu2  ;;  %v6666_v54 = vld [vmem:[#allocation2 + $0x50] sm:$0x3] }
 0x651   :  { %v10946_v13 = vadd.f32 %v5396_v25, %v4925_v59  ;;  %v4928_v22 = vadd.f32 %v4927_v32, %v4862_v48  ;;  %v4865_v16 = vpop.f32.mrf.mxu0  ;;  %v5659_v36 = vsel %vm1362_vm7, %v5657_v29, %v5658_v43  ;;  %v5662_v59 = vsel %vm1362_vm7, %v5660_v55, %v5661_v28  ;;  %v6189_v48 = vld [vmem:[#allocation2 + $0x20] sm:$0xfe]  ;;  %v5941_v25 = vld [vmem:[#allocation2 + $0x248] sm:$0xff] }
 0x652   :  { %6082 = vmatmul.f32.gmra.mxu1 %v10811_v1  ;;  %v6317_v50 = vrot.slane %v6189_v48, 1  ;;  %v6661_v32 = vld [vmem:[#allocation2 + $0x28] sm:$0xfc]  ;;  %v5360_v29 = vadd.f32 %v10845_v51, %v10835_v24  ;;  %v6324_v28 = vrot.slane %v6195_v57, 1  ;;  %v7198_v48 = vld [vmem:[#allocation9 + $0x450] sm:$0xff] }
 0x653   :  { %8920 = vmatmul.msk.f32.gmra.mxu3 %vm75_vm0, %v10814_v14  ;;  %7326 = vmatpush.msrb.mxu2 %v7198_v48  ;;  %v6665_v51 = vld [vmem:[#allocation2 + $0x48] sm:$0xfc] }
 0x654   :  { %5806 = vmatmul.f32.gmra.mxu0 %v5653_v6  ;;  %v6319_v46 = vsel %vm890_vm1, %v6317_v50, %v6318_v31  ;;  %v6788_v6 = vrot.slane %v6660_v5, 2  ;;  %v6198_v5 = vld [vmem:[#allocation2 + $0x68] sm:$0xfe] }
 0x655   :  { %8905 = vmatmul.msk.f32.gmra.mxu2 %vm75_vm0, %v5656_v20  ;;  %v6193_v20 = vld [vmem:[#allocation2 + $0x40] sm:$0xfe] }
 0x656   :  { %v5398_v39 = vpop.f32.mrf.mxu3  ;;  %v6323_v55 = vrot.slane %v6193_v20, 1 }
 0x657   :  { %v5399_v4 = vadd.f32 %v5398_v39, %v5333_v44  ;;  %v5336_v1 = vpop.f32.mrf.mxu1  ;;  %v6791_v39 = vrot.slane %v6661_v32, 2  ;;  %v5363_v32 = vadd.f32 %v10859_v60, %v10850_v58  ;;  %v6668_v58 = vld [vmem:[#allocation2 + $0x60] sm:$0xfc]  ;;  %v6670_v60 = vld [vmem:[#allocation2 + $0x70] sm:$0x3] }
 0x658   :  { %v4930_v14 = vpop.f32.mrf.mxu2 }
 0x659   :  { %v10954_v30 = vadd.f32 %v5399_v4, %v4928_v22  ;;  %v4931_v8 = vadd.f32 %v4930_v14, %v4865_v16  ;;  %v4868_v17 = vpop.f32.mrf.mxu0  ;;  %v7193_v22 = vld [vmem:[#allocation9 + $0x428] sm:$0xff]  ;;  %v6322_v16 = vsel %vm890_vm1, %v6320_v53, %v6321_v3  ;;  %v6196_v4 = vld [vmem:[#allocation2 + $0x58] sm:$0x1]  ;;  %v6197_v53 = vld [vmem:[#allocation2 + $0x60] sm:$0xfe] }
 0x65a   :  { %6085 = vmatmul.f32.gmra.mxu1 %v10821_v49  ;;  %7250 = vmatpush.msrb.mxu0 %v7193_v22  ;;  %v6199_v3 = vld [vmem:[#allocation2 + $0x70] sm:$0x1]  ;;  %v4892_v22 = vadd.f32 %v10852_v45, %v10840_v19  ;;  %v6669_v19 = vld [vmem:[#allocation2 + $0x68] sm:$0xfc]  ;;  %v6671_v45 = vld [vmem:[#allocation2 + $0x78] sm:$0x3] }
 0x65b   :  { %8921 = vmatmul.msk.f32.gmra.mxu3 %vm75_vm0, %v10824_v41  ;;  %v6803_v48 = vrot.slane %v6669_v19, 2 }
 0x65c   :  { %5809 = vmatmul.f32.gmra.mxu0 %v5659_v36  ;;  %v6790_v36 = vsel %vm1362_vm7, %v6788_v6, %v6789_v26  ;;  %v6330_v6 = vrot.slane %v6199_v3, 1  ;;  %v6672_v3 = vld [vmem:[#allocation2 + $0x80] sm:$0xfc] }
 0x65d   :  { %8906 = vmatmul.msk.f32.gmra.mxu2 %vm75_vm0, %v5662_v59  ;;  %v6327_v59 = vrot.slane %v6196_v4, 1 }
 0x65e   :  { %v5401_v12 = vpop.f32.mrf.mxu3 }
 0x65f   :  { %v5402_v27 = vadd.f32 %v5401_v12, %v5336_v1  ;;  %v5339_v49 = vpop.f32.mrf.mxu1  ;;  %v4889_v1 = vadd.f32 %v10838_v15, %v10828_v10  ;;  %v6793_v12 = vsel %vm1362_vm7, %v6791_v39, %v6792_v61  ;;  %v6664_v15 = vld [vmem:[#allocation2 + $0x40] sm:$0xfc]  ;;  %v6328_v31 = vsel %vm890_vm1, %v6326_v21, %v6327_v59  ;;  %v6203_v21 = vld [vmem:[#allocation2 + $0x90] sm:$0x1] }
 0x660   :  { %v4933_v41 = vpop.f32.mrf.mxu2  ;;  %v6333_v39 = vrot.slane %v6200_v63, 1 }
 0x661   :  { %v10962_v33 = vadd.f32 %v5402_v27, %v4931_v8  ;;  %v4934_v23 = vadd.f32 %v4933_v41, %v4868_v17  ;;  %v5765_v44 = vpop.f32.mrf.mxu0  ;;  %v5407_v24 = vadd.f32 %v5360_v29, %v4889_v1  ;;  %v6325_v27 = vsel %vm890_vm1, %v6323_v55, %v6324_v28 }
 0x662   :  { %6088 = vmatmul.f32.gmra.mxu1 %v5940_v18  ;;  %v6794_v41 = vrot.slane %v6664_v15, 2  ;;  %v6795_v18 = vrot.slane %v6666_v54, 2  ;;  %v5408_v1 = vadd.f32 %v5363_v32, %v4892_v22  ;;  %v6800_v28 = vrot.slane %v6668_v58, 2  ;;  %v7190_v32 = vld [vmem:[#allocation9 + $0x410] sm:$0xff] }
 0x663   :  { %8922 = vmatmul.msk.f32.gmra.mxu3 %vm75_vm0, %v5941_v25  ;;  %v6797_v25 = vrot.slane %v6665_v51, 2  ;;  %v6336_v51 = vrot.slane %v6203_v21, 1  ;;  %v6679_v21 = vld [vmem:[#allocation2 + $0xb8] sm:$0x3] }
 0x664   :  { %6514 = vmatmul.f32.vlgmr.msra.gmra.mxu0 %v6319_v46  ;;  %v6796_v57 = vsel %vm1362_vm7, %v6794_v41, %v6795_v18 }
 0x665   :  { %8923 = vmatmul.msk.f32.vlgmr.msra.gmra.mxu2 %vm75_vm0, %v6322_v16  ;;  %v6329_v16 = vrot.slane %v6197_v53, 1 }
 0x666   :  { %v5404_v37 = vpop.f32.mrf.mxu3 }
 0x667   :  { %v5405_v43 = vadd.f32 %v5404_v37, %v5339_v49  ;;  %v6044_v14 = vpop.f32.mrf.mxu1  ;;  %v7192_v49 = vld [vmem:[#allocation9 + $0x420] sm:$0xff]  ;;  %v6332_v37 = vrot.slane %v6198_v5, 1  ;;  %v6331_v29 = vsel %vm890_vm1, %v6329_v16, %v6330_v6  ;;  %v6207_v6 = vld [vmem:[#allocation2 + $0xb0] sm:$0x1] }
 0x668   :  { %v5830_v17 = vpop.f32.mrf.mxu2  ;;  %7251 = vmatpush.msrb.mxu0 %v7192_v49  ;;  %v6205_v16 = vld [vmem:[#allocation2 + $0xa0] sm:$0xfe]  ;;  %v6342_v58 = vrot.slane %v6207_v6, 1  ;;  %v6681_v6 = vld [vmem:[#allocation2 + $0xc8] sm:$0xfc] }
 0x669   :  { %v10972_v8 = vadd.f32 %v5405_v43, %v4934_v23  ;;  %v5831_v47 = vadd.f32 %v5830_v17, %v5765_v44  ;;  %v5768_v10 = vpop.f32.mrf.mxu0  ;;  %v6798_v44 = vrot.slane %v6667_v42, 2  ;;  %v7191_v43 = vld [vmem:[#allocation9 + $0x418] sm:$0xff]  ;;  %v6334_v55 = vsel %vm890_vm1, %v6332_v37, %v6333_v39  ;;  %v6206_v39 = vld [vmem:[#allocation2 + $0xa8] sm:$0xfe] }
 0x66a   :  { %6985 = vmatmul.f32.vlgmr.msrb.gmra.mxu1 %v6790_v36  ;;  %v6801_v17 = vrot.slane %v6670_v60, 2  ;;  %v6201_v36 = vld [vmem:[#allocation2 + $0x80] sm:$0xfe]  ;;  %7252 = vmatpush.msrb.mxu0 %v7191_v43 }
 0x66b   :  { %8939 = vmatmul.msk.f32.vlgmr.msra.gmra.mxu3 %vm75_vm0, %v6793_v12  ;;  %v5878_v50 = vadd.f32 %v5831_v47, %v5407_v24  ;;  %v6799_v11 = vsel %vm1362_vm7, %v6797_v25, %v6798_v44  ;;  %v6804_v47 = vrot.slane %v6671_v45, 2  ;;  %v6202_v12 = vld [vmem:[#allocation2 + $0x88] sm:$0xfe]  ;;  %v6335_v24 = vrot.slane %v6201_v36, 1  ;;  %v6675_v44 = vld [vmem:[#allocation2 + $0x98] sm:$0x3] }
 0x66c   :  { %6517 = vmatmul.f32.gmra.mxu0 %v6325_v27  ;;  %v6802_v49 = vsel %vm1362_vm7, %v6800_v28, %v6801_v17  ;;  %v6673_v25 = vld [vmem:[#allocation2 + $0x88] sm:$0xfc]  ;;  %v6810_v37 = vrot.slane %v6675_v44, 2  ;;  %v6344_v45 = vrot.slane %v6206_v39, 1  ;;  %v6676_v28 = vld [vmem:[#allocation2 + $0xa0] sm:$0xfc] }
 0x66d   :  { %8924 = vmatmul.msk.f32.gmra.mxu2 %vm75_vm0, %v6328_v31  ;;  %v6805_v18 = vsel %vm1362_vm7, %v6803_v48, %v6804_v47  ;;  %v6337_v63 = vsel %vm890_vm1, %v6335_v24, %v6336_v51  ;;  %7253 = vmatpush.msrb.mxu0 %v7190_v32  ;;  %v6678_v17 = vld [vmem:[#allocation2 + $0xb0] sm:$0x3]  ;;  %v6677_v36 = vld [vmem:[#allocation2 + $0xa8] sm:$0xfc]  ;;  %v7188_v39 = vld [vmem:[#allocation9 + $0x400] sm:$0xff] }
 0x66e   :  { %v6109_v23 = vpop.f32.mrf.mxu3  ;;  %v7189_v47 = vld [vmem:[#allocation9 + $0x408] sm:$0xff]  ;;  %v6211_v24 = vld [vmem:[#allocation2 + $0xd0] sm:$0x1] }
 0x66f   :  { %v6110_v7 = vadd.f32 %v6109_v23, %v6044_v14  ;;  %v6047_v46 = vpop.f32.mrf.mxu1  ;;  %v6674_v23 = vld [vmem:[#allocation2 + $0x90] sm:$0x3]  ;;  %7254 = vmatpush.msrb.mxu0 %v7189_v47 }
 0x670   :  { %v5833_v20 = vpop.f32.mrf.mxu2  ;;  %v6807_v22 = vrot.slane %v6674_v23, 2 }
 0x671   :  { %v10984_v26 = vadd.f32 %v6110_v7, %v5878_v50  ;;  %v5834_v61 = vadd.f32 %v5833_v20, %v5768_v10  ;;  %v5771_v4 = vpop.f32.mrf.mxu0  ;;  %v6204_v10 = vld [vmem:[#allocation2 + $0x98] sm:$0x1]  ;;  %v6338_v50 = vrot.slane %v6202_v12, 1  ;;  %7255 = vmatpush.msrb.mxu0 %v7188_v39 }
 0x672   :  { %6988 = vmatmul.f32.gmra.mxu1 %v6796_v57  ;;  %v6339_v31 = vrot.slane %v6204_v10, 1  ;;  %v6809_v57 = vrot.slane %v6673_v25, 2  ;;  %v6812_v10 = vrot.slane %v6676_v28, 2 }
 0x673   :  { %8940 = vmatmul.msk.f32.gmra.mxu3 %vm75_vm0, %v6799_v11  ;;  %v5879_v14 = vadd.f32 %v5834_v61, %v5408_v1  ;;  %v6208_v61 = vld [vmem:[#allocation2 + $0xb8] sm:$0x1] }
 0x674   :  { %6520 = vmatmul.f32.gmra.mxu0 %v6331_v29  ;;  %v6340_v7 = vsel %vm890_vm1, %v6338_v50, %v6339_v31  ;;  %v6345_v29 = vrot.slane %v6208_v61, 1  ;;  %v6210_v50 = vld [vmem:[#allocation2 + $0xc8] sm:$0xfe]  ;;  %v6212_v31 = vld [vmem:[#allocation2 + $0xd8] sm:$0x1] }
 0x675   :  { %8925 = vmatmul.msk.f32.gmra.mxu2 %vm75_vm0, %v6334_v55  ;;  %v6350_v44 = vrot.slane %v6210_v50, 1  ;;  %v7187_v50 = vld [vmem:[#allocation9 + $0x3f8] sm:$0xff] }
 0x676   :  { %v6112_v59 = vpop.f32.mrf.mxu3  ;;  %v6346_v12 = vsel %vm890_vm1, %v6344_v45, %v6345_v29  ;;  %v6214_v29 = vld [vmem:[#allocation2 + $0xe8] sm:$0xfe]  ;;  %7256 = vmatpush.msrb.mxu0 %v7187_v50 }
 0x677   :  { %v6113_v15 = vadd.f32 %v6112_v59, %v6047_v46  ;;  %v6050_v54 = vpop.f32.mrf.mxu1  ;;  %v6806_v46 = vrot.slane %v6672_v3, 2 }
 0x678   :  { %v5836_v27 = vpop.f32.mrf.mxu2 }
 0x679   :  { %v10992_v42 = vadd.f32 %v6113_v15, %v5879_v14  ;;  %v5837_v41 = vadd.f32 %v5836_v27, %v5771_v4  ;;  %v5774_v53 = vpop.f32.mrf.mxu0  ;;  %v6341_v4 = vrot.slane %v6205_v16, 1  ;;  %v6808_v19 = vsel %vm1362_vm7, %v6806_v46, %v6807_v22  ;;  %v6680_v22 = vld [vmem:[#allocation2 + $0xc0] sm:$0xfc]  ;;  %v6682_v16 = vld [vmem:[#allocation2 + $0xd0] sm:$0x3] }
 0x67a   :  { %6991 = vmatmul.f32.gmra.mxu1 %v6802_v49  ;;  %v6811_v14 = vsel %vm1362_vm7, %v6809_v57, %v6810_v37  ;;  %v6813_v15 = vrot.slane %v6678_v17, 2  ;;  %v6815_v27 = vrot.slane %v6677_v36, 2  ;;  %v6816_v49 = vrot.slane %v6679_v21, 2 }
 0x67b   :  { %8941 = vmatmul.msk.f32.gmra.mxu3 %vm75_vm0, %v6805_v18  ;;  %v5880_v5 = vadd.f32 %v5837_v41, %v10868_v62  ;;  %v6343_v48 = vsel %vm890_vm1, %v6341_v4, %v6342_v58  ;;  %v6213_v4 = vld [vmem:[#allocation2 + $0xe0] sm:$0xfe]  ;;  %v6215_v58 = vld [vmem:[#allocation2 + $0xf0] sm:$0x1] }
 0x67c   :  { %6523 = vmatmul.f32.gmra.mxu0 %v6337_v63  ;;  %v6814_v25 = vsel %vm1362_vm7, %v6812_v10, %v6813_v15  ;;  %v7197_v63 = vld [vmem:[#allocation9 + $0x448] sm:$0xff]  ;;  %v6354_v28 = vrot.slane %v6215_v58, 1  ;;  %v6684_v15 = vld [vmem:[#allocation2 + $0xe0] sm:$0xfc]  ;;  %v6691_v58 = vld [vmem:[#allocation2 + $0x118] sm:$0x3] }
 0x67d   :  { %8926 = vmatmul.msk.f32.gmra.mxu2 %vm75_vm0, %v6340_v7  ;;  %v6817_v7 = vsel %vm1362_vm7, %v6815_v27, %v6816_v49 }
 0x67e   :  { %v6115_v20 = vpop.f32.mrf.mxu3  ;;  %7327 = vmatpush.msrb.mxu2 %v7197_v63  ;;  %v6220_v63 = vld [vmem:[#allocation2 + $0x118] sm:$0x1] }
 0x67f   :  { %v6116_v11 = vadd.f32 %v6115_v20, %v6050_v54  ;;  %v6053_v62 = vpop.f32.mrf.mxu1  ;;  %v6209_v54 = vld [vmem:[#allocation2 + $0xc0] sm:$0xfe]  ;;  %v6683_v20 = vld [vmem:[#allocation2 + $0xd8] sm:$0x3] }
 0x680   :  { %v5839_v1 = vpop.f32.mrf.mxu2  ;;  %v6347_v18 = vrot.slane %v6209_v54, 1  ;;  %v6822_v45 = vrot.slane %v6683_v20, 2  ;;  %v6686_v54 = vld [vmem:[#allocation2 + $0xf0] sm:$0x3] }
 0x681   :  { %v11001_v60 = vadd.f32 %v6116_v11, %v5880_v5  ;;  %v5840_v43 = vadd.f32 %v5839_v1, %v5774_v53  ;;  %v5777_v55 = vpop.f32.mrf.mxu0  ;;  %v6348_v53 = vrot.slane %v6211_v24, 1  ;;  %v6351_v5 = vrot.slane %v6212_v31, 1  ;;  %v6685_v24 = vld [vmem:[#allocation2 + $0xe8] sm:$0xfc] }
 0x682   :  { %6994 = vmatmul.f32.gmra.mxu1 %v6808_v19  ;;  %v6818_v11 = vrot.slane %v6680_v22, 2  ;;  %v6821_v19 = vrot.slane %v6681_v6, 2 }
 0x683   :  { %8942 = vmatmul.msk.f32.gmra.mxu3 %vm75_vm0, %v6811_v14  ;;  %v5881_v59 = vadd.f32 %v5840_v43, %v10876_v35  ;;  %v6349_v37 = vsel %vm890_vm1, %v6347_v18, %v6348_v53  ;;  %v6352_v61 = vsel %vm890_vm1, %v6350_v44, %v6351_v5  ;;  %v6216_v43 = vld [vmem:[#allocation2 + $0xf8] sm:$0x1]  ;;  %v6217_v18 = vld [vmem:[#allocation2 + $0x100] sm:$0xfe]  ;;  %v6219_v53 = vld [vmem:[#allocation2 + $0x110] sm:$0x1] }
 0x684   :  { %6526 = vmatmul.f32.gmra.mxu0 %v6343_v48  ;;  %v6357_v48 = vrot.slane %v6216_v43, 1  ;;  %v6218_v5 = vld [vmem:[#allocation2 + $0x108] sm:$0xfe] }
 0x685   :  { %8927 = vmatmul.msk.f32.gmra.mxu2 %vm75_vm0, %v6346_v12  ;;  %v6823_v12 = vsel %vm1362_vm7, %v6821_v19, %v6822_v45  ;;  %v6362_v20 = vrot.slane %v6218_v5, 1  ;;  %v7186_v45 = vld [vmem:[#allocation9 + $0x3f0] sm:$0xff] }
 0x686   :  { %v6118_v51 = vpop.f32.mrf.mxu3  ;;  %7257 = vmatpush.msrb.mxu0 %v7186_v45 }
 0x687   :  { %v6119_v41 = vadd.f32 %v6118_v51, %v6053_v62  ;;  %v6056_v35 = vpop.f32.mrf.mxu1  ;;  %v6819_v62 = vrot.slane %v6682_v16, 2  ;;  %v6687_v51 = vld [vmem:[#allocation2 + $0xf8] sm:$0x3] }
 0x688   :  { %v5842_v23 = vpop.f32.mrf.mxu2  ;;  %v6828_v44 = vrot.slane %v6687_v51, 2 }
 0x689   :  { %v11010_v3 = vadd.f32 %v6119_v41, %v5881_v59  ;;  %v5843_v32 = vadd.f32 %v5842_v23, %v5777_v55  ;;  %v5780_v46 = vpop.f32.mrf.mxu0  ;;  %v6353_v55 = vrot.slane %v6213_v4, 1  ;;  %v6820_v21 = vsel %vm1362_vm7, %v6818_v11, %v6819_v62  ;;  %v6688_v11 = vld [vmem:[#allocation2 + $0x100] sm:$0xfc]  ;;  %v6690_v62 = vld [vmem:[#allocation2 + $0x110] sm:$0x3] }
 0x68a   :  { %6997 = vmatmul.f32.gmra.mxu1 %v6814_v25  ;;  %v6356_v59 = vrot.slane %v6214_v29, 1  ;;  %v6824_v41 = vrot.slane %v6684_v15, 2  ;;  %v6827_v25 = vrot.slane %v6685_v24, 2  ;;  %v6689_v4 = vld [vmem:[#allocation2 + $0x108] sm:$0xfc]  ;;  %v6830_v43 = vrot.slane %v6688_v11, 2 }
 0x68b   :  { %8943 = vmatmul.msk.f32.gmra.mxu3 %vm75_vm0, %v6817_v7  ;;  %v5882_v57 = vadd.f32 %v5843_v32, %v10884_v38  ;;  %v6355_v49 = vsel %vm890_vm1, %v6353_v55, %v6354_v28  ;;  %v6359_v7 = vrot.slane %v6217_v18, 1  ;;  %v6223_v55 = vld [vmem:[#allocation2 + $0x170] sm:$0x1]  ;;  %v6693_v18 = vld [vmem:[#allocation2 + $0x168] sm:$0xfc] }
 0x68c   :  { %6529 = vmatmul.f32.gmra.mxu0 %v6349_v37  ;;  %v6358_v31 = vsel %vm890_vm1, %v6356_v59, %v6357_v48  ;;  %v6829_v39 = vsel %vm1362_vm7, %v6827_v25, %v6828_v44  ;;  %v6222_v59 = vld [vmem:[#allocation2 + $0x168] sm:$0xfe]  ;;  %v6224_v48 = vld [vmem:[#allocation2 + $0x178] sm:$0x1] }
 0x68d   :  { %8928 = vmatmul.msk.f32.gmra.mxu2 %vm75_vm0, %v6352_v61  ;;  %v6368_v51 = vrot.slane %v6222_v59, 1  ;;  %v7185_v44 = vld [vmem:[#allocation9 + $0x3e8] sm:$0xff]  ;;  %v7184_v59 = vld [vmem:[#allocation9 + $0x3e0] sm:$0xff] }
 0x68e   :  { %v6121_v1 = vpop.f32.mrf.mxu3  ;;  %7258 = vmatpush.msrb.mxu0 %v7185_v44 }
 0x68f   :  { %v6122_v14 = vadd.f32 %v6121_v1, %v6056_v35  ;;  %v6059_v38 = vpop.f32.mrf.mxu1  ;;  %v6825_v35 = vrot.slane %v6686_v54, 2 }
 0x690   :  { %v5845_v36 = vpop.f32.mrf.mxu2  ;;  %7259 = vmatpush.msrb.mxu0 %v7184_v59 }
 0x691   :  { %v11019_v17 = vadd.f32 %v6122_v14, %v5882_v57  ;;  %v5846_v47 = vadd.f32 %v5845_v36, %v5780_v46  ;;  %v5783_v10 = vpop.f32.mrf.mxu0  ;;  %v6360_v46 = vrot.slane %v6219_v53, 1  ;;  %v6826_v6 = vsel %vm1362_vm7, %v6824_v41, %v6825_v35  ;;  %v6692_v41 = vld [vmem:[#allocation2 + $0x160] sm:$0xfc]  ;;  %v6694_v35 = vld [vmem:[#allocation2 + $0x170] sm:$0x3] }
 0x692   :  { %7000 = vmatmul.f32.gmra.mxu1 %v6820_v21  ;;  %v6363_v57 = vrot.slane %v6220_v63, 1  ;;  %v6831_v14 = vrot.slane %v6690_v62, 2  ;;  %v6833_v36 = vrot.slane %v6689_v4, 2  ;;  %v6834_v21 = vrot.slane %v6691_v58, 2  ;;  %v6695_v53 = vld [vmem:[#allocation2 + $0x178] sm:$0x3] }
 0x693   :  { %8944 = vmatmul.msk.f32.gmra.mxu3 %vm75_vm0, %v6823_v12  ;;  %v5883_v27 = vadd.f32 %v5846_v47, %v10892_v40  ;;  %v6361_v19 = vsel %vm890_vm1, %v6359_v7, %v6360_v46  ;;  %v6836_v63 = vrot.slane %v6692_v41, 2  ;;  %v6227_v7 = vld [vmem:[#allocation2 + $0x190] sm:$0x1] }
 0x694   :  { %6532 = vmatmul.f32.gmra.mxu0 %v6355_v49  ;;  %v6364_v29 = vsel %vm890_vm1, %v6362_v20, %v6363_v57  ;;  %v6832_v24 = vsel %vm1362_vm7, %v6830_v43, %v6831_v14  ;;  %v6835_v50 = vsel %vm1362_vm7, %v6833_v36, %v6834_v21  ;;  %v6226_v20 = vld [vmem:[#allocation2 + $0x188] sm:$0xfe]  ;;  %v6228_v57 = vld [vmem:[#allocation2 + $0x198] sm:$0x1]  ;;  %v6696_v14 = vld [vmem:[#allocation2 + $0x180] sm:$0xfc] }
 0x695   :  { %8929 = vmatmul.msk.f32.gmra.mxu2 %vm75_vm0, %v6358_v31  ;;  %v6374_v58 = vrot.slane %v6226_v20, 1  ;;  %v6703_v20 = vld [vmem:[#allocation2 + $0x1b8] sm:$0x3] }
 0x696   :  { %v6124_v23 = vpop.f32.mrf.mxu3 }
 0x697   :  { %v6125_v32 = vadd.f32 %v6124_v23, %v6059_v38  ;;  %v6062_v40 = vpop.f32.mrf.mxu1  ;;  %v6221_v38 = vld [vmem:[#allocation2 + $0x160] sm:$0xfe] }
 0x698   :  { %v5848_v16 = vpop.f32.mrf.mxu2  ;;  %v6365_v12 = vrot.slane %v6221_v38, 1  ;;  %v6698_v38 = vld [vmem:[#allocation2 + $0x190] sm:$0x3] }
 0x699   :  { %v11028_v22 = vadd.f32 %v6125_v32, %v5883_v27  ;;  %v5849_v37 = vadd.f32 %v5848_v16, %v5783_v10  ;;  %v5786_v61 = vpop.f32.mrf.mxu0  ;;  %v6366_v10 = vrot.slane %v6223_v55, 1  ;;  %v6369_v27 = vrot.slane %v6224_v48, 1  ;;  %v6697_v55 = vld [vmem:[#allocation2 + $0x188] sm:$0xfc]  ;;  %v7682_v48 = vld [vmem:[#allocation9 + $0x4d8] sm:$0xff] }
 0x69a   :  { %7003 = vmatmul.f32.gmra.mxu1 %v6826_v6  ;;  %v6837_v32 = vrot.slane %v6694_v35, 2  ;;  %v6839_v16 = vrot.slane %v6693_v18, 2  ;;  %v6840_v6 = vrot.slane %v6695_v53, 2 }
 0x69b   :  { %8945 = vmatmul.msk.f32.gmra.mxu3 %vm75_vm0, %v6829_v39  ;;  %v5884_v1 = vadd.f32 %v5849_v37, %v10900_v0  ;;  %v6367_v25 = vsel %vm890_vm1, %v6365_v12, %v6366_v10  ;;  %v6370_v5 = vsel %vm890_vm1, %v6368_v51, %v6369_v27  ;;  %v6843_v12 = vrot.slane %v6698_v38, 2  ;;  %v6229_v10 = vld [vmem:[#allocation2 + $0x1a0] sm:$0xfe]  ;;  %7719 = vmatpush.msra.mxu1 %v7682_v48 }
 0x69c   :  { %6535 = vmatmul.f32.gmra.mxu0 %v6361_v19  ;;  %v6838_v4 = vsel %vm1362_vm7, %v6836_v63, %v6837_v32  ;;  %v7196_v19 = vld [vmem:[#allocation9 + $0x440] sm:$0xff]  ;;  %v6845_v51 = vrot.slane %v6697_v55, 2  ;;  %v6377_v41 = vrot.slane %v6229_v10, 1  ;;  %v7681_v63 = vld [vmem:[#allocation9 + $0x4d0] sm:$0xff] }
 0x69d   :  { %8930 = vmatmul.msk.f32.gmra.mxu2 %vm75_vm0, %v6364_v29  ;;  %v6841_v29 = vsel %vm1362_vm7, %v6839_v16, %v6840_v6  ;;  %v6701_v16 = vld [vmem:[#allocation2 + $0x1a8] sm:$0xfc]  ;;  %7720 = vmatpush.msra.mxu1 %v7681_v63  ;;  %v7677_v10 = vld [vmem:[#allocation9 + $0x4b0] sm:$0xff]  ;;  %v6237_v63 = vld [vmem:[#allocation2 + $0x1e0] sm:$0xfe] }
 0x69e   :  { %v6127_v28 = vpop.f32.mrf.mxu3  ;;  %7328 = vmatpush.msrb.mxu2 %v7196_v19  ;;  %v7680_v6 = vld [vmem:[#allocation9 + $0x4c8] sm:$0xff]  ;;  %v6235_v19 = vld [vmem:[#allocation2 + $0x1d0] sm:$0x1] }
 0x69f   :  { %v6128_v47 = vadd.f32 %v6127_v28, %v6062_v40  ;;  %v6065_v0 = vpop.f32.mrf.mxu1  ;;  %v6225_v40 = vld [vmem:[#allocation2 + $0x180] sm:$0xfe]  ;;  %v6699_v28 = vld [vmem:[#allocation2 + $0x198] sm:$0x3]  ;;  %7721 = vmatpush.msra.mxu1 %v7680_v6 }
 0x6a0   :  { %v5851_v54 = vpop.f32.mrf.mxu2  ;;  %v6371_v39 = vrot.slane %v6225_v40, 1  ;;  %v6846_v27 = vrot.slane %v6699_v28, 2 }
 0x6a1   :  { %v11037_v15 = vadd.f32 %v6128_v47, %v5884_v1  ;;  %v5852_v49 = vadd.f32 %v5851_v54, %v5786_v61  ;;  %v5789_v31 = vpop.f32.mrf.mxu0  ;;  %v6372_v61 = vrot.slane %v6227_v7, 1  ;;  %v6375_v1 = vrot.slane %v6228_v57, 1  ;;  %v6231_v54 = vld [vmem:[#allocation2 + $0x1b0] sm:$0x1] }
 0x6a2   :  { %7006 = vmatmul.f32.gmra.mxu1 %v6832_v24  ;;  %v6378_v35 = vrot.slane %v6231_v54, 1  ;;  %v6847_v40 = vsel %vm1362_vm7, %v6845_v51, %v6846_v27  ;;  %v6706_v27 = vld [vmem:[#allocation2 + $0x1d0] sm:$0x3] }
 0x6a3   :  { %8946 = vmatmul.msk.f32.gmra.mxu3 %vm75_vm0, %v6835_v50  ;;  %v5885_v23 = vadd.f32 %v5852_v49, %v10906_v9  ;;  %v6373_v21 = vsel %vm890_vm1, %v6371_v39, %v6372_v61  ;;  %v6376_v47 = vsel %vm890_vm1, %v6374_v58, %v6375_v1  ;;  %v6230_v49 = vld [vmem:[#allocation2 + $0x1a8] sm:$0xfe]  ;;  %v6232_v50 = vld [vmem:[#allocation2 + $0x1b8] sm:$0x1]  ;;  %v7679_v39 = vld [vmem:[#allocation9 + $0x4c0] sm:$0xff]  ;;  %v6851_v58 = vrot.slane %v6701_v16, 2 }
 0x6a4   :  { %6538 = vmatmul.f32.gmra.mxu0 %v6367_v25  ;;  %v6380_v25 = vrot.slane %v6230_v49, 1  ;;  %v6381_v44 = vrot.slane %v6232_v50, 1  ;;  %v7183_v61 = vld [vmem:[#allocation9 + $0x3d8] sm:$0xff]  ;;  %v6233_v1 = vld [vmem:[#allocation2 + $0x1c0] sm:$0xfe]  ;;  %7722 = vmatpush.msra.mxu1 %v7679_v39  ;;  %v7676_v50 = vld [vmem:[#allocation9 + $0x4a8] sm:$0xff] }
 0x6a5   :  { %8931 = vmatmul.msk.f32.gmra.mxu2 %vm75_vm0, %v6370_v5  ;;  %v6700_v5 = vld [vmem:[#allocation2 + $0x1a0] sm:$0xfc]  ;;  %7260 = vmatpush.msrb.mxu0 %v7183_v61  ;;  %v6383_v28 = vrot.slane %v6233_v1, 1  ;;  %v6705_v49 = vld [vmem:[#allocation2 + $0x1c8] sm:$0xfc]  ;;  %v7673_v1 = vld [vmem:[#allocation9 + $0x490] sm:$0xff] }
 0x6a6   :  { %v6130_v46 = vpop.f32.mrf.mxu3  ;;  %v6240_v16 = vld [vmem:[#allocation2 + $0x1f8] sm:$0x1] }
 0x6a7   :  { %v6131_v37 = vadd.f32 %v6130_v46, %v6065_v0  ;;  %v6068_v9 = vpop.f32.mrf.mxu1  ;;  %v6842_v0 = vrot.slane %v6696_v14, 2  ;;  %v6702_v46 = vld [vmem:[#allocation2 + $0x1b0] sm:$0x3]  ;;  %v6236_v14 = vld [vmem:[#allocation2 + $0x1d8] sm:$0x1] }
 0x6a8   :  { %v5854_v62 = vpop.f32.mrf.mxu2 }
 0x6a9   :  { %v11046_v11 = vadd.f32 %v6131_v37, %v5885_v23  ;;  %v5855_v45 = vadd.f32 %v5854_v62, %v5789_v31  ;;  %v5792_v43 = vpop.f32.mrf.mxu0  ;;  %v6844_v23 = vsel %vm1362_vm7, %v6842_v0, %v6843_v12  ;;  %v6379_v37 = vsel %vm890_vm1, %v6377_v41, %v6378_v35  ;;  %v6704_v12 = vld [vmem:[#allocation2 + $0x1c0] sm:$0xfc] }
 0x6aa   :  { %7009 = vmatmul.f32.gmra.mxu1 %v6838_v4  ;;  %v6382_v62 = vsel %vm890_vm1, %v6380_v25, %v6381_v44  ;;  %v6849_v4 = vrot.slane %v6702_v46, 2  ;;  %v6387_v0 = vrot.slane %v6236_v14, 1  ;;  %v6854_v35 = vrot.slane %v6704_v12, 2  ;;  %v6238_v46 = vld [vmem:[#allocation2 + $0x1e8] sm:$0xfe] }
 0x6ab   :  { %8947 = vmatmul.msk.f32.gmra.mxu3 %vm75_vm0, %v6841_v29  ;;  %v5886_v36 = vadd.f32 %v5855_v45, %v10914_v2  ;;  %v6852_v29 = vrot.slane %v6703_v20, 2  ;;  %v6855_v44 = vrot.slane %v6706_v27, 2  ;;  %v6709_v14 = vld [vmem:[#allocation2 + $0x1e8] sm:$0xfc] }
 0x6ac   :  { %6541 = vmatmul.f32.gmra.mxu0 %v6373_v21 }
 0x6ad   :  { %8932 = vmatmul.msk.f32.gmra.mxu2 %vm75_vm0, %v6376_v47  ;;  %v6856_v61 = vsel %vm1362_vm7, %v6854_v35, %v6855_v44 }
 0x6ae   :  { %v6133_v24 = vpop.f32.mrf.mxu3 }
 0x6af   :  { %v6134_v2 = vadd.f32 %v6133_v24, %v6068_v9  ;;  %v6071_v31 = vpop.f32.mrf.mxu1  ;;  %v6848_v9 = vrot.slane %v6700_v5, 2  ;;  %v6853_v24 = vsel %vm1362_vm7, %v6851_v58, %v6852_v29  ;;  %v6857_v5 = vrot.slane %v6705_v49, 2  ;;  %v6708_v58 = vld [vmem:[#allocation2 + $0x1e0] sm:$0xfc]  ;;  %v6242_v49 = vld [vmem:[#allocation2 + $0x208] sm:$0xfe] }
 0x6b0   :  { %v5857_v53 = vpop.f32.mrf.mxu2 }
 0x6b1   :  { %v11055_v18 = vadd.f32 %v6134_v2, %v5886_v36  ;;  %v5858_v32 = vadd.f32 %v5857_v53, %v5792_v43  ;;  %v5795_v7 = vpop.f32.mrf.mxu0  ;;  %v6234_v43 = vld [vmem:[#allocation2 + $0x1c8] sm:$0xfe]  ;;  %v6384_v36 = vrot.slane %v6235_v19, 1  ;;  %v6850_v48 = vsel %vm1362_vm7, %v6848_v9, %v6849_v4  ;;  %v6707_v2 = vld [vmem:[#allocation2 + $0x1d8] sm:$0x3]  ;;  %v7675_v53 = vld [vmem:[#allocation9 + $0x4a0] sm:$0xff] }
 0x6b2   :  { %7012 = vmatmul.f32.gmra.mxu1 %v6844_v23  ;;  %v6386_v47 = vrot.slane %v6234_v43, 1  ;;  %v7182_v23 = vld [vmem:[#allocation9 + $0x3d0] sm:$0xff]  ;;  %v6393_v4 = vrot.slane %v6240_v16, 1 }
 0x6b3   :  { %8948 = vmatmul.msk.f32.gmra.mxu3 %vm75_vm0, %v6847_v40  ;;  %v5887_v57 = vadd.f32 %v5858_v32, %v10922_v56  ;;  %v7678_v56 = vld [vmem:[#allocation9 + $0x4b8] sm:$0xff]  ;;  %v6385_v41 = vsel %vm890_vm1, %v6383_v28, %v6384_v36  ;;  %v6239_v32 = vld [vmem:[#allocation2 + $0x1f0] sm:$0x1]  ;;  %7261 = vmatpush.msrb.mxu0 %v7182_v23  ;;  %v6860_v36 = vrot.slane %v6708_v58, 2 }
 0x6b4   :  { %6544 = vmatmul.f32.gmra.mxu0 %v6379_v37  ;;  %7723 = vmatpush.msra.mxu1 %v7678_v56  ;;  %v6388_v25 = vsel %vm890_vm1, %v6386_v47, %v6387_v0  ;;  %v6390_v37 = vrot.slane %v6239_v32, 1  ;;  %v6710_v43 = vld [vmem:[#allocation2 + $0x1f0] sm:$0x3]  ;;  %v7672_v56 = vld [vmem:[#allocation9 + $0x488] sm:$0xff]  ;;  %v7686_v47 = vld [vmem:[#allocation9 + $0x4f8] sm:$0xff] }
 0x6b5   :  { %8933 = vmatmul.msk.f32.gmra.mxu2 %vm75_vm0, %v6382_v62  ;;  %v6392_v62 = vrot.slane %v6238_v46, 1  ;;  %v6861_v12 = vrot.slane %v6710_v43, 2  ;;  %7796 = vmatpush.msrb.mxu3 %v7686_v47  ;;  %v7669_v32 = vld [vmem:[#allocation9 + $0x470] sm:$0xff]  ;;  %v8157_v58 = vld [vmem:[#allocation9 + $0x598] sm:$0xff]  ;;  %v6245_v43 = vld [vmem:[#allocation2 + $0x220] sm:$0xfe] }
 0x6b6   :  { %v6136_v45 = vpop.f32.mrf.mxu3  ;;  %7724 = vmatpush.msra.mxu1 %v7677_v10  ;;  %v6863_v10 = vrot.slane %v6709_v14, 2  ;;  %v6247_v14 = vld [vmem:[#allocation2 + $0x230] sm:$0x1]  ;;  %8267 = vmatpush.msra.mxu2 %v8157_v58 }
 0x6b7   :  { %v6137_v38 = vadd.f32 %v6136_v45, %v6071_v31  ;;  %v6074_v55 = vpop.f32.mrf.mxu1  ;;  %v6394_v0 = vsel %vm890_vm1, %v6392_v62, %v6393_v4  ;;  %v6862_v44 = vsel %vm1362_vm7, %v6860_v36, %v6861_v12  ;;  %v6402_v47 = vrot.slane %v6247_v14, 1  ;;  %v6723_v14 = vld [vmem:[#allocation2 + $0x258] sm:$0x3] }
 0x6b8   :  { %v5860_v59 = vpop.f32.mrf.mxu2  ;;  %7725 = vmatpush.msra.mxu1 %v7676_v50  ;;  %v7670_v50 = vld [vmem:[#allocation9 + $0x478] sm:$0xff] }
 0x6b9   :  { %v11064_v21 = vadd.f32 %v6137_v38, %v5887_v57  ;;  %v5861_v54 = vadd.f32 %v5860_v59, %v5795_v7  ;;  %v5798_v51 = vpop.f32.mrf.mxu0  ;;  %v6858_v7 = vrot.slane %v6707_v2, 2  ;;  %v6389_v57 = vrot.slane %v6237_v63, 1  ;;  %v6711_v38 = vld [vmem:[#allocation2 + $0x1f8] sm:$0x3]  ;;  %v7671_v59 = vld [vmem:[#allocation9 + $0x480] sm:$0xff] }
 0x6ba   :  { %7015 = vmatmul.f32.gmra.mxu1 %v6850_v48  ;;  %v7181_v48 = vld [vmem:[#allocation9 + $0x3c8] sm:$0xff]  ;;  %v6864_v27 = vrot.slane %v6711_v38, 2 }
 0x6bb   :  { %8949 = vmatmul.msk.f32.gmra.mxu3 %vm75_vm0, %v6853_v24  ;;  %v5888_v31 = vadd.f32 %v5861_v54, %v10930_v34  ;;  %v7674_v34 = vld [vmem:[#allocation9 + $0x498] sm:$0xff]  ;;  %7726 = vmatpush.msra.mxu1 %v7675_v53  ;;  %v6859_v45 = vsel %vm1362_vm7, %v6857_v5, %v6858_v7  ;;  %v6391_v28 = vsel %vm890_vm1, %v6389_v57, %v6390_v37  ;;  %v6241_v54 = vld [vmem:[#allocation2 + $0x200] sm:$0xfe]  ;;  %v6243_v24 = vld [vmem:[#allocation2 + $0x210] sm:$0x1]  ;;  %v6398_v5 = vrot.slane %v6242_v49, 1 }
 0x6bc   :  { %6547 = vmatmul.f32.gmra.mxu0 %v6385_v41  ;;  %v6395_v41 = vrot.slane %v6241_v54, 1  ;;  %v6396_v35 = vrot.slane %v6243_v24, 1  ;;  %v6712_v53 = vld [vmem:[#allocation2 + $0x200] sm:$0xfc]  ;;  %v6865_v16 = vsel %vm1362_vm7, %v6863_v10, %v6864_v27  ;;  %v7684_v57 = vld [vmem:[#allocation9 + $0x4e8] sm:$0xff] }
 0x6bd   :  { %8934 = vmatmul.msk.f32.gmra.mxu2 %vm75_vm0, %v6388_v25  ;;  %7727 = vmatpush.msra.mxu1 %v7674_v34  ;;  %v7180_v7 = vld [vmem:[#allocation9 + $0x3c0] sm:$0xff]  ;;  %v6713_v37 = vld [vmem:[#allocation2 + $0x208] sm:$0xfc] }
 0x6be   :  { %v6139_v40 = vpop.f32.mrf.mxu3  ;;  %7262 = vmatpush.msrb.mxu0 %v7181_v48  ;;  %v6397_v4 = vsel %vm890_vm1, %v6395_v41, %v6396_v35  ;;  %v6869_v38 = vrot.slane %v6713_v37, 2  ;;  %v6401_v48 = vrot.slane %v6245_v43, 1  ;;  %v6721_v43 = vld [vmem:[#allocation2 + $0x248] sm:$0xfc] }
 0x6bf   :  { %v6140_v6 = vadd.f32 %v6139_v40, %v6074_v55  ;;  %v6077_v20 = vpop.f32.mrf.mxu1  ;;  %7728 = vmatpush.msra.mxu1 %v7673_v1  ;;  %v7685_v40 = vld [vmem:[#allocation9 + $0x4f0] sm:$0xff]  ;;  %v7667_v1 = vld [vmem:[#allocation9 + $0x460] sm:$0xff] }
 0x6c0   :  { %v5863_v39 = vpop.f32.mrf.mxu2  ;;  %7797 = vmatpush.msrb.mxu3 %v7685_v40  ;;  %7263 = vmatpush.msrb.mxu0 %v7180_v7  ;;  %v6403_v35 = vsel %vm890_vm1, %v6401_v48, %v6402_v47  ;;  %v6881_v48 = vrot.slane %v6721_v43, 2  ;;  %v6882_v47 = vrot.slane %v6723_v14, 2 }
 0x6c1   :  { %v11073_v9 = vadd.f32 %v6140_v6, %v5888_v31  ;;  %v5864_v19 = vadd.f32 %v5863_v39, %v5798_v51  ;;  %v5801_v29 = vpop.f32.mrf.mxu0  ;;  %7729 = vmatpush.msra.mxu1 %v7672_v56  ;;  %v6714_v6 = vld [vmem:[#allocation2 + $0x210] sm:$0x3]  ;;  %v6715_v39 = vld [vmem:[#allocation2 + $0x218] sm:$0x3] }
 0x6c2   :  { %7018 = vmatmul.f32.gmra.mxu1 %v6856_v61  ;;  %v7683_v61 = vld [vmem:[#allocation9 + $0x4e0] sm:$0xff]  ;;  %7798 = vmatpush.msrb.mxu3 %v7684_v57 }
 0x6c3   :  { %8950 = vmatmul.msk.f32.gmra.mxu3 %vm75_vm0, %v6859_v45  ;;  %v5889_v55 = vadd.f32 %v5864_v19, %v10938_v52  ;;  %v6244_v52 = vld [vmem:[#allocation2 + $0x218] sm:$0x1]  ;;  %7730 = vmatpush.msra.mxu1 %v7671_v59  ;;  %v6866_v45 = vrot.slane %v6712_v53, 2 }
 0x6c4   :  { %6550 = vmatmul.f32.gmra.mxu0 %v6391_v28  ;;  %v6399_v63 = vrot.slane %v6244_v52, 1  ;;  %v6248_v28 = vld [vmem:[#allocation2 + $0x238] sm:$0x1]  ;;  %7799 = vmatpush.msrb.mxu3 %v7683_v61  ;;  %v6716_v52 = vld [vmem:[#allocation2 + $0x220] sm:$0xfc] }
 0x6c5   :  { %8935 = vmatmul.msk.f32.gmra.mxu2 %vm75_vm0, %v6394_v0  ;;  %7731 = vmatpush.msra.mxu1 %v7670_v50  ;;  %v6405_v24 = vrot.slane %v6248_v28, 1  ;;  %v6718_v50 = vld [vmem:[#allocation2 + $0x230] sm:$0x3]  ;;  %v8153_v53 = vld [vmem:[#allocation9 + $0x578] sm:$0xff] }
 0x6c6   :  { %v6142_v51 = vpop.f32.mrf.mxu3  ;;  %v6400_v19 = vsel %vm890_vm1, %v6398_v5, %v6399_v63  ;;  %v6873_v5 = vrot.slane %v6718_v50, 2  ;;  %v6249_v63 = vld [vmem:[#allocation2 + $0x240] sm:$0xfe]  ;;  %8190 = vmatpush.msra.mxu0 %v8153_v53  ;;  %v7412_v50 = vld [vmem:[#allocation2 + $0x50] sm:$0x1] }
 0x6c7   :  { %v6143_v2 = vadd.f32 %v6142_v51, %v6077_v20  ;;  %v6080_v31 = vpop.f32.mrf.mxu1  ;;  %v7668_v20 = vld [vmem:[#allocation9 + $0x468] sm:$0xff]  ;;  %7732 = vmatpush.msra.mxu1 %v7669_v32  ;;  %v6251_v32 = vld [vmem:[#allocation2 + $0x250] sm:$0x1] }
 0x6c8   :  { %v5866_v25 = vpop.f32.mrf.mxu2  ;;  %v6408_v57 = vrot.slane %v6251_v32, 1 }
 0x6c9   :  { %v11082_v23 = vadd.f32 %v6143_v2, %v5889_v55  ;;  %v5867_v46 = vadd.f32 %v5866_v25, %v5801_v29  ;;  %v5804_v34 = vpop.f32.mrf.mxu0  ;;  %v6867_v29 = vrot.slane %v6714_v6, 2  ;;  %7733 = vmatpush.msra.mxu1 %v7668_v20  ;;  %v6870_v55 = vrot.slane %v6715_v39, 2  ;;  %v6717_v2 = vld [vmem:[#allocation2 + $0x228] sm:$0xfc] }
 0x6ca   :  { %7021 = vmatmul.f32.gmra.mxu1 %v6862_v44  ;;  %v6872_v44 = vrot.slane %v6716_v52, 2  ;;  %v6875_v7 = vrot.slane %v6717_v2, 2  ;;  %v6407_v20 = vrot.slane %v6249_v63, 1  ;;  %v7410_v52 = vld [vmem:[#allocation2 + $0x40] sm:$0xfe] }
 0x6cb   :  { %8951 = vmatmul.msk.f32.gmra.mxu3 %vm75_vm0, %v6865_v16  ;;  %v5890_v62 = vadd.f32 %v5867_v46, %v10946_v13  ;;  %v6246_v13 = vld [vmem:[#allocation2 + $0x228] sm:$0xfe]  ;;  %7734 = vmatpush.msra.mxu1 %v7667_v1  ;;  %v6868_v10 = vsel %vm1362_vm7, %v6866_v45, %v6867_v29  ;;  %v6871_v27 = vsel %vm1362_vm7, %v6869_v38, %v6870_v55  ;;  %v6720_v45 = vld [vmem:[#allocation2 + $0x240] sm:$0xfc]  ;;  %v6722_v29 = vld [vmem:[#allocation2 + $0x250] sm:$0x3] }
 0x6cc   :  { %6553 = vmatmul.f32.gmra.mxu0 %v6397_v4  ;;  %v6404_v54 = vrot.slane %v6246_v13, 1  ;;  %v6250_v16 = vld [vmem:[#allocation2 + $0x248] sm:$0xfe]  ;;  %v6874_v61 = vsel %vm1362_vm7, %v6872_v44, %v6873_v5  ;;  %v6409_v38 = vsel %vm890_vm1, %v6407_v20, %v6408_v57  ;;  %v8152_v55 = vld [vmem:[#allocation9 + $0x570] sm:$0xff]  ;;  %v6878_v28 = vrot.slane %v6720_v45, 2 }
 0x6cd   :  { %8936 = vmatmul.msk.f32.gmra.mxu2 %vm75_vm0, %v6400_v19  ;;  %9007 = vmatpush.msrb.mxu1 %v8153_v53  ;;  %v7411_v2 = vld [vmem:[#allocation2 + $0x48] sm:$0xfe]  ;;  %v7538_v44 = vrot.slane %v7410_v52, 1  ;;  %v7539_v5 = vrot.slane %v7412_v50, 1 }
 0x6ce   :  { %v6145_v56 = vpop.f32.mrf.mxu3  ;;  %v6406_v25 = vsel %vm890_vm1, %v6404_v54, %v6405_v24  ;;  %8191 = vmatpush.msra.mxu0 %v8152_v55  ;;  %v8151_v53 = vld [vmem:[#allocation9 + $0x568] sm:$0xff]  ;;  %v7541_v32 = vrot.slane %v7411_v2, 1 }
 0x6cf   :  { %v6146_v36 = vadd.f32 %v6145_v56, %v6080_v31  ;;  %v6083_v59 = vpop.f32.mrf.mxu1  ;;  %v6719_v31 = vld [vmem:[#allocation2 + $0x238] sm:$0x3]  ;;  %9008 = vmatpush.msrb.mxu1 %v8152_v55  ;;  %v7134_v45 = vld [vmem:[#allocation2 + $0x68] sm:$0xff] }
 0x6d0   :  { %v5869_v12 = vpop.f32.mrf.mxu2  ;;  %v6876_v46 = vrot.slane %v6719_v31, 2  ;;  %v7413_v31 = vld [vmem:[#allocation2 + $0x58] sm:$0x1]  ;;  %8192 = vmatpush.msra.mxu0 %v8151_v53  ;;  %v7136_v52 = vld [vmem:[#allocation2 + $0x88] sm:$0xff] }
 0x6d1   :  { %v11091_v0 = vadd.f32 %v6146_v36, %v5890_v62  ;;  %v5870_v51 = vadd.f32 %v5869_v12, %v5804_v34  ;;  %v5807_v49 = vpop.f32.mrf.mxu0  ;;  %v6252_v34 = vld [vmem:[#allocation2 + $0x258] sm:$0x1]  ;;  %v6410_v62 = vrot.slane %v6250_v16, 1  ;;  %v6879_v36 = vrot.slane %v6722_v29, 2  ;;  %9009 = vmatpush.msrb.mxu1 %v8151_v53 }
 0x6d2   :  { %7024 = vmatmul.f32.gmra.mxu1 %v6868_v10  ;;  %v6411_v4 = vrot.slane %v6252_v34, 1  ;;  %v6877_v1 = vsel %vm1362_vm7, %v6875_v7, %v6876_v46 }
 0x6d3   :  { %8952 = vmatmul.msk.f32.gmra.mxu3 %vm75_vm0, %v6871_v27  ;;  %v5891_v41 = vadd.f32 %v5870_v51, %v10954_v30  ;;  %v6880_v24 = vsel %vm1362_vm7, %v6878_v28, %v6879_v36  ;;  %v6883_v27 = vsel %vm1362_vm7, %v6881_v48, %v6882_v47 }
 0x6d4   :  { %6556 = vmatmul.f32.gmra.mxu0 %v6403_v35  ;;  %v6412_v13 = vsel %vm890_vm1, %v6410_v62, %v6411_v4  ;;  %v7131_v35 = vld [vmem:[#allocation2 + $0x40] sm:$0xff]  ;;  %v7415_v62 = vld [vmem:[#allocation2 + $0x68] sm:$0xfe]  ;;  %v7417_v4 = vld [vmem:[#allocation2 + $0x78] sm:$0x1] }
 0x6d5   :  { %8937 = vmatmul.msk.f32.gmra.mxu2 %vm75_vm0, %v6406_v25  ;;  %v7132_v25 = vld [vmem:[#allocation2 + $0x48] sm:$0xff] }
 0x6d6   :  { %v6148_v40 = vpop.f32.mrf.mxu3 }
 0x6d7   :  { %v6149_v30 = vadd.f32 %v6148_v40, %v6083_v59  ;;  %v6086_v6 = vpop.f32.mrf.mxu1  ;;  %v7542_v40 = vrot.slane %v7413_v31, 1 }
 0x6d8   :  { %v5872_v39 = vpop.f32.mrf.mxu2 }
 0x6d9   :  { %v11100_v37 = vadd.f32 %v6149_v30, %v5891_v41  ;;  %v5873_v58 = vadd.f32 %v5872_v39, %v5807_v49  ;;  %v5810_v19 = vpop.f32.mrf.mxu0  ;;  %v8156_v30 = vld [vmem:[#allocation9 + $0x590] sm:$0xff]  ;;  %v7543_v20 = vsel %vm890_vm1, %v7541_v32, %v7542_v40  ;;  %v7414_v39 = vld [vmem:[#allocation2 + $0x60] sm:$0xfe] }
 0x6da   :  { %7027 = vmatmul.f32.gmra.mxu1 %v6874_v61  ;;  %v7416_v61 = vld [vmem:[#allocation2 + $0x70] sm:$0x1]  ;;  %8268 = vmatpush.msra.mxu2 %v8156_v30  ;;  %v7544_v29 = vrot.slane %v7414_v39, 1 }
 0x6db   :  { %8953 = vmatmul.msk.f32.gmra.mxu3 %vm75_vm0, %v6877_v1  ;;  %v5892_v56 = vadd.f32 %v5873_v58, %v10962_v33  ;;  %v7133_v1 = vld [vmem:[#allocation2 + $0x60] sm:$0xff]  ;;  %v7545_v43 = vrot.slane %v7416_v61, 1 }
 0x6dc   :  { %6559 = vmatmul.f32.gmra.mxu0 %v6409_v38  ;;  %v7548_v38 = vrot.slane %v7417_v4, 1 }
 0x6dd   :  { %8938 = vmatmul.msk.f32.gmra.mxu2 %vm75_vm0, %v6412_v13 }
 0x6de   :  { %v6151_v59 = vpop.f32.mrf.mxu3 }
 0x6df   :  { %v6152_v12 = vadd.f32 %v6151_v59, %v6086_v6  ;;  %v6089_v10 = vpop.f32.mrf.mxu1 }
 0x6e0   :  { %v5875_v33 = vpop.f32.mrf.mxu2 }
 0x6e1   :  { %v11109_v54 = vadd.f32 %v6152_v12, %v5892_v56  ;;  %v5876_v51 = vadd.f32 %v5875_v33, %v5810_v19  ;;  %v6515_v49 = vpop.f32.mrf.mxu0  ;;  %v8150_v19 = vld [vmem:[#allocation9 + $0x560] sm:$0xff]  ;;  %v7547_v56 = vrot.slane %v7415_v62, 1  ;;  %v7419_v33 = vld [vmem:[#allocation2 + $0x88] sm:$0xfe] }
 0x6e2   :  { %7030 = vmatmul.f32.gmra.mxu1 %v6880_v24  ;;  %8193 = vmatpush.msra.mxu0 %v8150_v19  ;;  %v7418_v12 = vld [vmem:[#allocation2 + $0x80] sm:$0xfe]  ;;  %v7421_v24 = vld [vmem:[#allocation2 + $0x98] sm:$0x1] }
 0x6e3   :  { %8954 = vmatmul.msk.f32.gmra.mxu3 %vm75_vm0, %v6883_v27  ;;  %v5893_v41 = vadd.f32 %v5876_v51, %v10972_v8  ;;  %v7540_v8 = vsel %vm890_vm1, %v7538_v44, %v7539_v5  ;;  %9010 = vmatpush.msrb.mxu1 %v8150_v19  ;;  %v7549_v48 = vsel %vm890_vm1, %v7547_v56, %v7548_v38  ;;  %v7135_v27 = vld [vmem:[#allocation2 + $0x80] sm:$0xff]  ;;  %v7550_v50 = vrot.slane %v7418_v12, 1 }
 0x6e4   :  { %7264 = vmatmul.f32.vlgmr.msrb.gmra.mxu0 %v7131_v35  ;;  %v7554_v35 = vrot.slane %v7421_v24, 1  ;;  %v7426_v38 = vld [vmem:[#allocation2 + $0xc0] sm:$0xfe] }
 0x6e5   :  { %8955 = vmatmul.msk.f32.vlgmr.msrb.gmra.mxu2 %vm75_vm0, %v7132_v25 }
 0x6e6   :  { %v6154_v63 = vpop.f32.mrf.mxu3 }
 0x6e7   :  { %v6155_v7 = vadd.f32 %v6154_v63, %v6089_v10  ;;  %v6986_v46 = vpop.f32.mrf.mxu1  ;;  %v7420_v10 = vld [vmem:[#allocation2 + $0x90] sm:$0x1] }
 0x6e8   :  { %v6580_v34 = vpop.f32.mrf.mxu2  ;;  %v7551_v2 = vrot.slane %v7420_v10, 1  ;;  %v8147_v10 = vld [vmem:[#allocation9 + $0x548] sm:$0xff] }
 0x6e9   :  { %v11116_v16 = vadd.f32 %v6155_v7, %v5893_v41  ;;  %v6581_v6 = vadd.f32 %v6580_v34, %v6515_v49  ;;  %v6518_v57 = vpop.f32.mrf.mxu0  ;;  %v8149_v49 = vld [vmem:[#allocation9 + $0x558] sm:$0xff]  ;;  %v7553_v41 = vrot.slane %v7419_v33, 1  ;;  %v7422_v7 = vld [vmem:[#allocation2 + $0xa0] sm:$0xfe]  ;;  %v7423_v34 = vld [vmem:[#allocation2 + $0xa8] sm:$0xfe] }
 0x6ea   :  { %7735 = vmatmul.f32.vlgmr.msra.gmra.mxu1 %v7540_v8  ;;  %8194 = vmatpush.msra.mxu0 %v8149_v49  ;;  %v7425_v8 = vld [vmem:[#allocation2 + $0xb8] sm:$0x1]  ;;  %v7556_v39 = vrot.slane %v7422_v7, 1  ;;  %v7559_v4 = vrot.slane %v7423_v34, 1  ;;  %v7142_v7 = vld [vmem:[#allocation2 + $0xe8] sm:$0xff] }
 0x6eb   :  { %8971 = vmatmul.msk.f32.vlgmr.msrb.gmra.mxu3 %vm75_vm0, %v7543_v20  ;;  %v6628_v58 = vadd.f32 %v6581_v6, %v10984_v26  ;;  %v7546_v26 = vsel %vm890_vm1, %v7544_v29, %v7545_v43  ;;  %9011 = vmatpush.msrb.mxu1 %v8149_v49  ;;  %v7555_v32 = vsel %vm890_vm1, %v7553_v41, %v7554_v35  ;;  %v7137_v6 = vld [vmem:[#allocation2 + $0xa0] sm:$0xff]  ;;  %v8148_v20 = vld [vmem:[#allocation9 + $0x550] sm:$0xff] }
 0x6ec   :  { %7267 = vmatmul.f32.gmra.mxu0 %v7133_v1 }
 0x6ed   :  { %8956 = vmatmul.msk.f32.gmra.mxu2 %vm75_vm0, %v7134_v45  ;;  %9012 = vmatpush.msrb.mxu1 %v8148_v20 }
 0x6ee   :  { %v7051_v14 = vpop.f32.mrf.mxu3  ;;  %8195 = vmatpush.msra.mxu0 %v8148_v20 }
 0x6ef   :  { %v7052_v55 = vadd.f32 %v7051_v14, %v6986_v46  ;;  %v6989_v13 = vpop.f32.mrf.mxu1  ;;  %v7424_v46 = vld [vmem:[#allocation2 + $0xb0] sm:$0x1]  ;;  %9013 = vmatpush.msrb.mxu1 %v8147_v10 }
 0x6f0   :  { %v6583_v36 = vpop.f32.mrf.mxu2  ;;  %v7557_v61 = vrot.slane %v7424_v46, 1  ;;  %8196 = vmatpush.msra.mxu0 %v8147_v10  ;;  %v7440_v10 = vld [vmem:[#allocation2 + $0x130] sm:$0x1] }
 0x6f1   :  { %v11123_v28 = vadd.f32 %v7052_v55, %v6628_v58  ;;  %v6584_v59 = vadd.f32 %v6583_v36, %v6518_v57  ;;  %v6521_v47 = vpop.f32.mrf.mxu0  ;;  %v7138_v57 = vld [vmem:[#allocation2 + $0xa8] sm:$0xff]  ;;  %v7560_v58 = vrot.slane %v7425_v8, 1  ;;  %v7428_v55 = vld [vmem:[#allocation2 + $0xd0] sm:$0x1]  ;;  %v7429_v36 = vld [vmem:[#allocation2 + $0xd8] sm:$0x1] }
 0x6f2   :  { %7738 = vmatmul.f32.gmra.mxu1 %v7546_v26  ;;  %v7563_v12 = vrot.slane %v7428_v55, 1 }
 0x6f3   :  { %8972 = vmatmul.msk.f32.gmra.mxu3 %vm75_vm0, %v7549_v48  ;;  %v6629_v51 = vadd.f32 %v6584_v59, %v10992_v42  ;;  %v7552_v42 = vsel %vm890_vm1, %v7550_v50, %v7551_v2  ;;  %v7561_v14 = vsel %vm890_vm1, %v7559_v4, %v7560_v58  ;;  %v7139_v59 = vld [vmem:[#allocation2 + $0xc0] sm:$0xff]  ;;  %v7140_v48 = vld [vmem:[#allocation2 + $0xc8] sm:$0xff] }
 0x6f4   :  { %7270 = vmatmul.f32.gmra.mxu0 %v7135_v27  ;;  %v8155_v2 = vld [vmem:[#allocation9 + $0x588] sm:$0xff] }
 0x6f5   :  { %8957 = vmatmul.msk.f32.gmra.mxu2 %vm75_vm0, %v7136_v52 }
 0x6f6   :  { %v7054_v31 = vpop.f32.mrf.mxu3  ;;  %8269 = vmatpush.msra.mxu2 %v8155_v2  ;;  %v7146_v2 = vld [vmem:[#allocation2 + $0x128] sm:$0xff] }
 0x6f7   :  { %v7055_v53 = vadd.f32 %v7054_v31, %v6989_v13  ;;  %v6992_v25 = vpop.f32.mrf.mxu1  ;;  %v7427_v13 = vld [vmem:[#allocation2 + $0xc8] sm:$0xfe] }
 0x6f8   :  { %v6586_v5 = vpop.f32.mrf.mxu2  ;;  %v7565_v24 = vrot.slane %v7427_v13, 1 }
 0x6f9   :  { %v11130_v44 = vadd.f32 %v7055_v53, %v6629_v51  ;;  %v6587_v63 = vadd.f32 %v6586_v5, %v6521_v47  ;;  %v6524_v40 = vpop.f32.mrf.mxu0  ;;  %v7562_v47 = vrot.slane %v7426_v38, 1  ;;  %v7566_v51 = vrot.slane %v7429_v36, 1  ;;  %v7430_v53 = vld [vmem:[#allocation2 + $0xe0] sm:$0xfe]  ;;  %v7431_v5 = vld [vmem:[#allocation2 + $0xe8] sm:$0xfe] }
 0x6fa   :  { %7741 = vmatmul.f32.gmra.mxu1 %v7552_v42  ;;  %v7433_v42 = vld [vmem:[#allocation2 + $0xf8] sm:$0x1]  ;;  %v7568_v46 = vrot.slane %v7430_v53, 1  ;;  %v7144_v38 = vld [vmem:[#allocation2 + $0x108] sm:$0xff] }
 0x6fb   :  { %8973 = vmatmul.msk.f32.gmra.mxu3 %vm75_vm0, %v7555_v32  ;;  %v6630_v30 = vadd.f32 %v6587_v63, %v11001_v60  ;;  %v7558_v60 = vsel %vm890_vm1, %v7556_v39, %v7557_v61  ;;  %v7567_v41 = vsel %vm890_vm1, %v7565_v24, %v7566_v51  ;;  %v7141_v32 = vld [vmem:[#allocation2 + $0xe0] sm:$0xff]  ;;  %v7439_v51 = vld [vmem:[#allocation2 + $0x128] sm:$0xfe] }
 0x6fc   :  { %7273 = vmatmul.f32.gmra.mxu0 %v7137_v6  ;;  %v7572_v6 = vrot.slane %v7433_v42, 1  ;;  %v7583_v53 = vrot.slane %v7439_v51, 1  ;;  %v11164_v42 = vld [vmem:[#allocation2] sm:$0xff] }
 0x6fd   :  { %8958 = vmatmul.msk.f32.gmra.mxu2 %vm75_vm0, %v7138_v57  ;;  %v8142_v51 = vld [vmem:[#allocation9 + $0x520] sm:$0xff] }
 0x6fe   :  { %v7057_v62 = vpop.f32.mrf.mxu3 }
 0x6ff   :  { %v7058_v1 = vadd.f32 %v7057_v62, %v6992_v25  ;;  %v6995_v19 = vpop.f32.mrf.mxu1  ;;  %v7432_v25 = vld [vmem:[#allocation2 + $0xf0] sm:$0x1] }
 0x700   :  { %v6589_v29 = vpop.f32.mrf.mxu2  ;;  %v7569_v34 = vrot.slane %v7432_v25, 1 }
 0x701   :  { %v11137_v45 = vadd.f32 %v7058_v1, %v6630_v30  ;;  %v6590_v43 = vadd.f32 %v6589_v29, %v6524_v40  ;;  %v6527_v56 = vpop.f32.mrf.mxu0  ;;  %v8146_v40 = vld [vmem:[#allocation9 + $0x540] sm:$0xff]  ;;  %v7571_v30 = vrot.slane %v7431_v5, 1  ;;  %v7435_v29 = vld [vmem:[#allocation2 + $0x108] sm:$0xfe]  ;;  %v8144_v5 = vld [vmem:[#allocation9 + $0x530] sm:$0xff] }
 0x702   :  { %7744 = vmatmul.f32.gmra.mxu1 %v7558_v60  ;;  %8197 = vmatpush.msra.mxu0 %v8146_v40  ;;  %v7434_v1 = vld [vmem:[#allocation2 + $0x100] sm:$0xfe]  ;;  %v7437_v60 = vld [vmem:[#allocation2 + $0x118] sm:$0x1] }
 0x703   :  { %8974 = vmatmul.msk.f32.gmra.mxu3 %vm75_vm0, %v7561_v14  ;;  %v6631_v26 = vadd.f32 %v6590_v43, %v11010_v3  ;;  %v7564_v3 = vsel %vm890_vm1, %v7562_v47, %v7563_v12  ;;  %9014 = vmatpush.msrb.mxu1 %v8146_v40  ;;  %v7573_v4 = vsel %vm890_vm1, %v7571_v30, %v7572_v6  ;;  %v7143_v14 = vld [vmem:[#allocation2 + $0x100] sm:$0xff]  ;;  %v7574_v55 = vrot.slane %v7434_v1, 1 }
 0x704   :  { %7276 = vmatmul.f32.gmra.mxu0 %v7139_v59  ;;  %v7578_v59 = vrot.slane %v7437_v60, 1  ;;  %v7438_v12 = vld [vmem:[#allocation2 + $0x120] sm:$0xfe] }
 0x705   :  { %8959 = vmatmul.msk.f32.gmra.mxu2 %vm75_vm0, %v7140_v48  ;;  %v7442_v6 = vld [vmem:[#allocation2 + $0x180] sm:$0xfe] }
 0x706   :  { %v7060_v33 = vpop.f32.mrf.mxu3  ;;  %v7586_v1 = vrot.slane %v7442_v6, 1  ;;  %v8141_v6 = vld [vmem:[#allocation9 + $0x518] sm:$0xff] }
 0x707   :  { %v7061_v27 = vadd.f32 %v7060_v33, %v6995_v19  ;;  %v6998_v49 = vpop.f32.mrf.mxu1  ;;  %v7436_v19 = vld [vmem:[#allocation2 + $0x110] sm:$0x1] }
 0x708   :  { %v6592_v50 = vpop.f32.mrf.mxu2  ;;  %v7575_v13 = vrot.slane %v7436_v19, 1 }
 0x709   :  { %v11144_v52 = vadd.f32 %v7061_v27, %v6631_v26  ;;  %v6593_v31 = vadd.f32 %v6592_v50, %v6527_v56  ;;  %v6530_v35 = vpop.f32.mrf.mxu0  ;;  %v8145_v56 = vld [vmem:[#allocation9 + $0x538] sm:$0xff]  ;;  %v7577_v26 = vrot.slane %v7435_v29, 1 }
 0x70a   :  { %7747 = vmatmul.f32.gmra.mxu1 %v7564_v3  ;;  %8198 = vmatpush.msra.mxu0 %v8145_v56  ;;  %v7576_v24 = vsel %vm890_vm1, %v7574_v55, %v7575_v13  ;;  %v7441_v27 = vld [vmem:[#allocation2 + $0x138] sm:$0x1]  ;;  %v8154_v13 = vld [vmem:[#allocation9 + $0x580] sm:$0xff] }
 0x70b   :  { %8975 = vmatmul.msk.f32.gmra.mxu3 %vm75_vm0, %v7567_v41  ;;  %v6632_v63 = vadd.f32 %v6593_v31, %v11019_v17  ;;  %v7570_v17 = vsel %vm890_vm1, %v7568_v46, %v7569_v34  ;;  %9015 = vmatpush.msrb.mxu1 %v8145_v56  ;;  %v7579_v50 = vsel %vm890_vm1, %v7577_v26, %v7578_v59  ;;  %v7580_v31 = vrot.slane %v7438_v12, 1  ;;  %v7447_v12 = vld [vmem:[#allocation2 + $0x1a8] sm:$0xfe] }
 0x70c   :  { %7279 = vmatmul.f32.gmra.mxu0 %v7141_v32  ;;  %v7581_v41 = vrot.slane %v7440_v10, 1  ;;  %v7584_v25 = vrot.slane %v7441_v27, 1  ;;  %8270 = vmatpush.msra.mxu2 %v8154_v13  ;;  %v7449_v10 = vld [vmem:[#allocation2 + $0x1b8] sm:$0x1]  ;;  %v7150_v27 = vld [vmem:[#allocation2 + $0x1a8] sm:$0xff] }
 0x70d   :  { %8960 = vmatmul.msk.f32.gmra.mxu2 %vm75_vm0, %v7142_v7  ;;  %9016 = vmatpush.msrb.mxu1 %v8144_v5  ;;  %v7457_v13 = vld [vmem:[#allocation2 + $0x1f8] sm:$0x1] }
 0x70e   :  { %v7063_v8 = vpop.f32.mrf.mxu3  ;;  %8199 = vmatpush.msra.mxu0 %v8144_v5  ;;  %v7582_v7 = vsel %vm890_vm1, %v7580_v31, %v7581_v41  ;;  %v7585_v46 = vsel %vm890_vm1, %v7583_v53, %v7584_v25  ;;  %v7596_v31 = vrot.slane %v7449_v10, 1 }
 0x70f   :  { %v7064_v20 = vadd.f32 %v7063_v8, %v6998_v49  ;;  %v7001_v57 = vpop.f32.mrf.mxu1 }
 0x710   :  { %v6595_v61 = vpop.f32.mrf.mxu2 }
 0x711   :  { %v11151_v39 = vadd.f32 %v7064_v20, %v6632_v63  ;;  %v6596_v62 = vadd.f32 %v6595_v61, %v6530_v35  ;;  %v6533_v58 = vpop.f32.mrf.mxu0  ;;  %v7444_v20 = vld [vmem:[#allocation2 + $0x190] sm:$0x1]  ;;  %v7445_v61 = vld [vmem:[#allocation2 + $0x198] sm:$0x1] }
 0x712   :  { %7750 = vmatmul.f32.gmra.mxu1 %v7570_v17  ;;  %v7587_v19 = vrot.slane %v7444_v20, 1  ;;  %v7152_v20 = vld [vmem:[#allocation2 + $0x1c8] sm:$0xff] }
 0x713   :  { %8976 = vmatmul.msk.f32.gmra.mxu3 %vm75_vm0, %v7573_v4  ;;  %v6633_v43 = vadd.f32 %v6596_v62, %v11028_v22  ;;  %v7147_v62 = vld [vmem:[#allocation2 + $0x180] sm:$0xff]  ;;  %v8143_v4 = vld [vmem:[#allocation9 + $0x528] sm:$0xff] }
 0x714   :  { %7282 = vmatmul.f32.gmra.mxu0 %v7143_v14  ;;  %9017 = vmatpush.msrb.mxu1 %v8143_v4 }
 0x715   :  { %8961 = vmatmul.msk.f32.gmra.mxu2 %vm75_vm0, %v7144_v38  ;;  %8200 = vmatpush.msra.mxu0 %v8143_v4 }
 0x716   :  { %v7066_v36 = vpop.f32.mrf.mxu3  ;;  %9018 = vmatpush.msrb.mxu1 %v8142_v51 }
 0x717   :  { %v7067_v48 = vadd.f32 %v7066_v36, %v7001_v57  ;;  %v7004_v47 = vpop.f32.mrf.mxu1  ;;  %v7443_v57 = vld [vmem:[#allocation2 + $0x188] sm:$0xfe]  ;;  %8201 = vmatpush.msra.mxu0 %v8142_v51 }
 0x718   :  { %v6598_v22 = vpop.f32.mrf.mxu2  ;;  %v7589_v60 = vrot.slane %v7443_v57, 1  ;;  %9019 = vmatpush.msrb.mxu1 %v8141_v6 }
 0x719   :  { %v11158_v33 = vadd.f32 %v7067_v48, %v6633_v43  ;;  %v6599_v49 = vadd.f32 %v6598_v22, %v6533_v58  ;;  %v6536_v3 = vpop.f32.mrf.mxu0  ;;  %v7148_v58 = vld [vmem:[#allocation2 + $0x188] sm:$0xff]  ;;  %v7590_v43 = vrot.slane %v7445_v61, 1  ;;  %v7446_v48 = vld [vmem:[#allocation2 + $0x1a0] sm:$0xfe]  ;;  %8202 = vmatpush.msra.mxu0 %v8141_v6 }
 0x71a   :  { %7753 = vmatmul.f32.gmra.mxu1 %v7576_v24  ;;  %v7149_v24 = vld [vmem:[#allocation2 + $0x1a0] sm:$0xff] }
 0x71b   :  { %8977 = vmatmul.msk.f32.gmra.mxu3 %vm75_vm0, %v7579_v50  ;;  %v6634_v35 = vadd.f32 %v6599_v49, %v11037_v15  ;;  %v7591_v26 = vsel %vm890_vm1, %v7589_v60, %v7590_v43  ;;  %v7592_v49 = vrot.slane %v7446_v48, 1  ;;  %v7154_v48 = vld [vmem:[#allocation2 + $0x1e8] sm:$0xff] }
 0x71c   :  { %7285 = vmatmul.f32.gmra.mxu0 %v11164_v42 }
 0x71d   :  { %8962 = vmatmul.msk.f32.gmra.mxu2 %vm75_vm0, %v7146_v2  ;;  %v7595_v2 = vrot.slane %v7447_v12, 1 }
 0x71e   :  { %v7069_v63 = vpop.f32.mrf.mxu3 }
 0x71f   :  { %v7070_v32 = vadd.f32 %v7069_v63, %v7004_v47  ;;  %v7007_v40 = vpop.f32.mrf.mxu1  ;;  %v7448_v47 = vld [vmem:[#allocation2 + $0x1b0] sm:$0x1]  ;;  %v7597_v63 = vsel %vm890_vm1, %v7595_v2, %v7596_v31 }
 0x720   :  { %v6601_v15 = vpop.f32.mrf.mxu2  ;;  %v7593_v50 = vrot.slane %v7448_v47, 1 }
 0x721   :  { %v11170_v34 = vadd.f32 %v7070_v32, %v6634_v35  ;;  %v6602_v8 = vadd.f32 %v6601_v15, %v6536_v3  ;;  %v6539_v30 = vpop.f32.mrf.mxu0  ;;  %v7453_v15 = vld [vmem:[#allocation2 + $0x1d8] sm:$0x1] }
 0x722   :  { %7756 = vmatmul.f32.gmra.mxu1 %v7582_v7  ;;  %v7452_v7 = vld [vmem:[#allocation2 + $0x1d0] sm:$0x1]  ;;  %v7602_v4 = vrot.slane %v7453_v15, 1 }
 0x723   :  { %8978 = vmatmul.msk.f32.gmra.mxu3 %vm75_vm0, %v7585_v46  ;;  %v6635_v17 = vadd.f32 %v6602_v8, %v11046_v11  ;;  %v7588_v11 = vsel %vm890_vm1, %v7586_v1, %v7587_v19  ;;  %v7451_v46 = vld [vmem:[#allocation2 + $0x1c8] sm:$0xfe]  ;;  %v7599_v61 = vrot.slane %v7452_v7, 1 }
 0x724   :  { %7288 = vmatmul.f32.gmra.mxu0 %v7147_v62  ;;  %v7601_v62 = vrot.slane %v7451_v46, 1 }
 0x725   :  { %8963 = vmatmul.msk.f32.gmra.mxu2 %vm75_vm0, %v7148_v58 }
 0x726   :  { %v7072_v29 = vpop.f32.mrf.mxu3  ;;  %v7603_v43 = vsel %vm890_vm1, %v7601_v62, %v7602_v4 }
 0x727   :  { %v7073_v14 = vadd.f32 %v7072_v29, %v7007_v40  ;;  %v7010_v56 = vpop.f32.mrf.mxu1  ;;  %v7450_v40 = vld [vmem:[#allocation2 + $0x1c0] sm:$0xfe] }
 0x728   :  { %v6604_v55 = vpop.f32.mrf.mxu2  ;;  %v7598_v57 = vrot.slane %v7450_v40, 1  ;;  %v7156_v40 = vld [vmem:[#allocation2 + $0x208] sm:$0xff] }
 0x729   :  { %v11175_v38 = vadd.f32 %v7073_v14, %v6635_v17  ;;  %v6605_v36 = vadd.f32 %v6604_v55, %v6539_v30  ;;  %v6542_v59 = vpop.f32.mrf.mxu0  ;;  %v7151_v30 = vld [vmem:[#allocation2 + $0x1c0] sm:$0xff]  ;;  %v7456_v55 = vld [vmem:[#allocation2 + $0x1f0] sm:$0x1] }
 0x72a   :  { %7759 = vmatmul.f32.gmra.mxu1 %v7588_v11  ;;  %v7455_v11 = vld [vmem:[#allocation2 + $0x1e8] sm:$0xfe]  ;;  %v7605_v12 = vrot.slane %v7456_v55, 1 }
 0x72b   :  { %8979 = vmatmul.msk.f32.gmra.mxu3 %vm75_vm0, %v7591_v26  ;;  %v6636_v22 = vadd.f32 %v6605_v36, %v11055_v18  ;;  %v7594_v18 = vsel %vm890_vm1, %v7592_v49, %v7593_v50  ;;  %v7153_v26 = vld [vmem:[#allocation2 + $0x1e0] sm:$0xff] }
 0x72c   :  { %7291 = vmatmul.f32.gmra.mxu0 %v7149_v24  ;;  %v7608_v24 = vrot.slane %v7457_v13, 1 }
 0x72d   :  { %8964 = vmatmul.msk.f32.gmra.mxu2 %vm75_vm0, %v7150_v27 }
 0x72e   :  { %v7075_v3 = vpop.f32.mrf.mxu3 }
 0x72f   :  { %v7076_v41 = vadd.f32 %v7075_v3, %v7010_v56  ;;  %v7013_v35 = vpop.f32.mrf.mxu1  ;;  %v7454_v56 = vld [vmem:[#allocation2 + $0x1e0] sm:$0xfe] }
 0x730   :  { %v6607_v25 = vpop.f32.mrf.mxu2  ;;  %v7604_v47 = vrot.slane %v7454_v56, 1  ;;  %v7158_v56 = vld [vmem:[#allocation2 + $0x228] sm:$0xff] }
 0x731   :  { %v11182_v53 = vadd.f32 %v7076_v41, %v6636_v22  ;;  %v6608_v5 = vadd.f32 %v6607_v25, %v6542_v59  ;;  %v6545_v32 = vpop.f32.mrf.mxu0  ;;  %v8140_v59 = vld [vmem:[#allocation9 + $0x510] sm:$0xff]  ;;  %v7607_v22 = vrot.slane %v7455_v11, 1  ;;  %v7458_v41 = vld [vmem:[#allocation2 + $0x200] sm:$0xfe]  ;;  %v7459_v25 = vld [vmem:[#allocation2 + $0x208] sm:$0xfe] }
 0x732   :  { %7762 = vmatmul.f32.gmra.mxu1 %v7594_v18  ;;  %8203 = vmatpush.msra.mxu0 %v8140_v59  ;;  %v7461_v18 = vld [vmem:[#allocation2 + $0x218] sm:$0x1]  ;;  %v7610_v7 = vrot.slane %v7458_v41, 1 }
 0x733   :  { %8980 = vmatmul.msk.f32.gmra.mxu3 %vm75_vm0, %v7597_v63  ;;  %v6637_v8 = vadd.f32 %v6608_v5, %v11064_v21  ;;  %v7600_v21 = vsel %vm890_vm1, %v7598_v57, %v7599_v61  ;;  %9020 = vmatpush.msrb.mxu1 %v8140_v59  ;;  %v7609_v2 = vsel %vm890_vm1, %v7607_v22, %v7608_v24  ;;  %v7155_v63 = vld [vmem:[#allocation2 + $0x200] sm:$0xff] }
 0x734   :  { %7294 = vmatmul.f32.gmra.mxu0 %v7151_v30  ;;  %v7614_v30 = vrot.slane %v7461_v18, 1 }
 0x735   :  { %8965 = vmatmul.msk.f32.gmra.mxu2 %vm75_vm0, %v7152_v20 }
 0x736   :  { %v7078_v17 = vpop.f32.mrf.mxu3 }
 0x737   :  { %v7079_v58 = vadd.f32 %v7078_v17, %v7013_v35  ;;  %v7016_v1 = vpop.f32.mrf.mxu1  ;;  %v7460_v35 = vld [vmem:[#allocation2 + $0x210] sm:$0x1]  ;;  %v8138_v17 = vld [vmem:[#allocation9 + $0x500] sm:$0xff] }
 0x738   :  { %v6610_v29 = vpop.f32.mrf.mxu2  ;;  %v7611_v46 = vrot.slane %v7460_v35, 1 }
 0x739   :  { %v11189_v19 = vadd.f32 %v7079_v58, %v6637_v8  ;;  %v6611_v60 = vadd.f32 %v6610_v29, %v6545_v32  ;;  %v6548_v14 = vpop.f32.mrf.mxu0  ;;  %v8139_v32 = vld [vmem:[#allocation9 + $0x508] sm:$0xff]  ;;  %v7613_v8 = vrot.slane %v7459_v25, 1  ;;  %v7464_v29 = vld [vmem:[#allocation2 + $0x230] sm:$0x1] }
 0x73a   :  { %7765 = vmatmul.f32.gmra.mxu1 %v7600_v21  ;;  %8204 = vmatpush.msra.mxu0 %v8139_v32  ;;  %v7463_v21 = vld [vmem:[#allocation2 + $0x228] sm:$0xfe]  ;;  %v7617_v11 = vrot.slane %v7464_v29, 1  ;;  %v7881_v29 = vld [vmem:[#allocation2 + $0x40] sm:$0xfc] }
 0x73b   :  { %8981 = vmatmul.msk.f32.gmra.mxu3 %vm75_vm0, %v7603_v43  ;;  %v6638_v36 = vadd.f32 %v6611_v60, %v11073_v9  ;;  %v7606_v9 = vsel %vm890_vm1, %v7604_v47, %v7605_v12  ;;  %9021 = vmatpush.msrb.mxu1 %v8139_v32  ;;  %v7615_v4 = vsel %vm890_vm1, %v7613_v8, %v7614_v30  ;;  %v7465_v60 = vld [vmem:[#allocation2 + $0x238] sm:$0x1] }
 0x73c   :  { %7297 = vmatmul.f32.gmra.mxu0 %v7153_v26  ;;  %v7620_v26 = vrot.slane %v7465_v60, 1  ;;  %v7473_v30 = vld [vmem:[#allocation2 + $0x278] sm:$0x1] }
 0x73d   :  { %8966 = vmatmul.msk.f32.gmra.mxu2 %vm75_vm0, %v7154_v48  ;;  %8205 = vmatpush.msra.mxu0 %v8138_v17 }
 0x73e   :  { %v7081_v10 = vpop.f32.mrf.mxu3  ;;  %9022 = vmatpush.msrb.mxu1 %v8138_v17 }
 0x73f   :  { %v7082_v51 = vadd.f32 %v7081_v10, %v7016_v1  ;;  %v7019_v27 = vpop.f32.mrf.mxu1  ;;  %v7462_v1 = vld [vmem:[#allocation2 + $0x220] sm:$0xfe] }
 0x740   :  { %v6613_v50 = vpop.f32.mrf.mxu2  ;;  %v7616_v55 = vrot.slane %v7462_v1, 1  ;;  %v7632_v1 = vrot.slane %v7473_v30, 1 }
 0x741   :  { %v11196_v49 = vadd.f32 %v7082_v51, %v6638_v36  ;;  %v6614_v3 = vadd.f32 %v6613_v50, %v6548_v14  ;;  %v6551_v31 = vpop.f32.mrf.mxu0  ;;  %v7157_v14 = vld [vmem:[#allocation2 + $0x220] sm:$0xff]  ;;  %v7619_v36 = vrot.slane %v7463_v21, 1  ;;  %v7467_v50 = vld [vmem:[#allocation2 + $0x248] sm:$0xfe]  ;;  %v7883_v21 = vld [vmem:[#allocation2 + $0x50] sm:$0x3] }
 0x742   :  { %7768 = vmatmul.f32.gmra.mxu1 %v7606_v9  ;;  %v7618_v10 = vsel %vm890_vm1, %v7616_v55, %v7617_v11  ;;  %v7466_v51 = vld [vmem:[#allocation2 + $0x240] sm:$0xfe]  ;;  %v7469_v9 = vld [vmem:[#allocation2 + $0x258] sm:$0x1]  ;;  %v7625_v18 = vrot.slane %v7467_v50, 1 }
 0x743   :  { %8982 = vmatmul.msk.f32.gmra.mxu3 %vm75_vm0, %v7609_v2  ;;  %v6639_v5 = vadd.f32 %v6614_v3, %v11082_v23  ;;  %v7612_v23 = vsel %vm890_vm1, %v7610_v7, %v7611_v46  ;;  %v7159_v2 = vld [vmem:[#allocation2 + $0x240] sm:$0xff]  ;;  %v7622_v41 = vrot.slane %v7466_v51, 1  ;;  %v7472_v7 = vld [vmem:[#allocation2 + $0x270] sm:$0x1] }
 0x744   :  { %7300 = vmatmul.f32.gmra.mxu0 %v7155_v63  ;;  %v7885_v51 = vld [vmem:[#allocation2 + $0x60] sm:$0xfc] }
 0x745   :  { %8967 = vmatmul.msk.f32.gmra.mxu2 %vm75_vm0, %v7156_v40  ;;  %v7470_v40 = vld [vmem:[#allocation2 + $0x260] sm:$0xfe] }
 0x746   :  { %v7084_v15 = vpop.f32.mrf.mxu3  ;;  %v7628_v17 = vrot.slane %v7470_v40, 1 }
 0x747   :  { %v7085_v6 = vadd.f32 %v7084_v15, %v7019_v27  ;;  %v7022_v20 = vpop.f32.mrf.mxu1  ;;  %v7468_v27 = vld [vmem:[#allocation2 + $0x250] sm:$0x1] }
 0x748   :  { %v6616_v61 = vpop.f32.mrf.mxu2  ;;  %v7623_v35 = vrot.slane %v7468_v27, 1  ;;  %v7887_v27 = vld [vmem:[#allocation2 + $0x70] sm:$0x3] }
 0x749   :  { %v11203_v57 = vadd.f32 %v7085_v6, %v6639_v5  ;;  %v6617_v62 = vadd.f32 %v6616_v61, %v6551_v31  ;;  %v6554_v58 = vpop.f32.mrf.mxu0  ;;  %v7160_v31 = vld [vmem:[#allocation2 + $0x248] sm:$0xff]  ;;  %v7626_v5 = vrot.slane %v7469_v9, 1 }
 0x74a   :  { %7771 = vmatmul.f32.gmra.mxu1 %v7612_v23  ;;  %v7624_v8 = vsel %vm890_vm1, %v7622_v41, %v7623_v35  ;;  %v7162_v23 = vld [vmem:[#allocation2 + $0x268] sm:$0xff]  ;;  %v8015_v41 = vrot.slane %v7885_v51, 2  ;;  %v8016_v35 = vrot.slane %v7887_v27, 2 }
 0x74b   :  { %8983 = vmatmul.msk.f32.gmra.mxu3 %vm75_vm0, %v7615_v4  ;;  %v6640_v43 = vadd.f32 %v6617_v62, %v11091_v0  ;;  %v7621_v0 = vsel %vm890_vm1, %v7619_v36, %v7620_v26  ;;  %v7629_v62 = vrot.slane %v7472_v7, 1  ;;  %v8009_v36 = vrot.slane %v7881_v29, 2  ;;  %v7886_v9 = vld [vmem:[#allocation2 + $0x68] sm:$0xfc] }
 0x74c   :  { %7303 = vmatmul.f32.gmra.mxu0 %v7157_v14  ;;  %v7884_v14 = vld [vmem:[#allocation2 + $0x58] sm:$0x3]  ;;  %v8010_v26 = vrot.slane %v7883_v21, 2  ;;  %v8017_v7 = vsel %vm1362_vm7, %v8015_v41, %v8016_v35 }
 0x74d   :  { %8968 = vmatmul.msk.f32.gmra.mxu2 %vm75_vm0, %v7158_v56  ;;  %v7630_v11 = vsel %vm890_vm1, %v7628_v17, %v7629_v62  ;;  %v7900_v41 = vld [vmem:[#allocation2 + $0xd8] sm:$0x3] }
 0x74e   :  { %v7087_v13 = vpop.f32.mrf.mxu3 }
 0x74f   :  { %v7088_v59 = vadd.f32 %v7087_v13, %v7022_v20  ;;  %v7025_v48 = vpop.f32.mrf.mxu1  ;;  %v7627_v20 = vsel %vm890_vm1, %v7625_v18, %v7626_v5 }
 0x750   :  { %v6619_v12 = vpop.f32.mrf.mxu2 }
 0x751   :  { %v11210_v47 = vadd.f32 %v7088_v59, %v6640_v43  ;;  %v6620_v22 = vadd.f32 %v6619_v12, %v6554_v58  ;;  %v6557_v24 = vpop.f32.mrf.mxu0  ;;  %v7882_v43 = vld [vmem:[#allocation2 + $0x48] sm:$0xfc] }
 0x752   :  { %7774 = vmatmul.f32.gmra.mxu1 %v7618_v10 }
 0x753   :  { %8984 = vmatmul.msk.f32.gmra.mxu3 %vm75_vm0, %v7621_v0  ;;  %v6641_v3 = vadd.f32 %v6620_v22, %v11100_v37  ;;  %v7471_v37 = vld [vmem:[#allocation2 + $0x268] sm:$0xfe]  ;;  %v8011_v0 = vsel %vm1362_vm7, %v8009_v36, %v8010_v26  ;;  %v7896_v36 = vld [vmem:[#allocation2 + $0xb8] sm:$0x3] }
 0x754   :  { %7306 = vmatmul.f32.gmra.mxu0 %v7159_v2  ;;  %v7631_v58 = vrot.slane %v7471_v37, 1  ;;  %v7891_v37 = vld [vmem:[#allocation2 + $0x90] sm:$0x3] }
 0x755   :  { %8969 = vmatmul.msk.f32.gmra.mxu2 %vm75_vm0, %v7160_v31  ;;  %v8022_v62 = vrot.slane %v7891_v37, 2 }
 0x756   :  { %v7090_v25 = vpop.f32.mrf.mxu3  ;;  %v7633_v13 = vsel %vm890_vm1, %v7631_v58, %v7632_v1 }
 0x757   :  { %v7091_v63 = vadd.f32 %v7090_v25, %v7025_v48  ;;  %v7028_v32 = vpop.f32.mrf.mxu1  ;;  %v8012_v48 = vrot.slane %v7882_v43, 2 }
 0x758   :  { %v6622_v15 = vpop.f32.mrf.mxu2 }
 0x759   :  { %v11217_v46 = vadd.f32 %v7091_v63, %v6641_v3  ;;  %v6623_v6 = vadd.f32 %v6622_v15, %v6557_v24  ;;  %v6560_v61 = vpop.f32.mrf.mxu0  ;;  %v7888_v3 = vld [vmem:[#allocation2 + $0x78] sm:$0x3] }
 0x75a   :  { %7777 = vmatmul.f32.gmra.mxu1 %v7624_v8  ;;  %v8019_v5 = vrot.slane %v7888_v3, 2  ;;  %v7889_v8 = vld [vmem:[#allocation2 + $0x80] sm:$0xfc]  ;;  %v7899_v3 = vld [vmem:[#allocation2 + $0xd0] sm:$0x3] }
 0x75b   :  { %8985 = vmatmul.msk.f32.gmra.mxu3 %vm75_vm0, %v7627_v20  ;;  %v6642_v4 = vadd.f32 %v6623_v6, %v11109_v54  ;;  %v7890_v6 = vld [vmem:[#allocation2 + $0x88] sm:$0xfc]  ;;  %v7892_v20 = vld [vmem:[#allocation2 + $0x98] sm:$0x3]  ;;  %v8021_v17 = vrot.slane %v7889_v8, 2 }
 0x75c   :  { %7309 = vmatmul.f32.gmra.mxu0 %v11164_v42  ;;  %v8013_v42 = vrot.slane %v7884_v14, 2  ;;  %v8025_v1 = vrot.slane %v7892_v20, 2  ;;  %v7903_v20 = vld [vmem:[#allocation2 + $0xf0] sm:$0x3] }
 0x75d   :  { %8970 = vmatmul.msk.f32.gmra.mxu2 %vm75_vm0, %v7162_v23  ;;  %v8023_v43 = vsel %vm1362_vm7, %v8021_v17, %v8022_v62  ;;  %v7904_v17 = vld [vmem:[#allocation2 + $0xf8] sm:$0x3] }
 0x75e   :  { %v7093_v60 = vpop.f32.mrf.mxu3  ;;  %v8014_v24 = vsel %vm1362_vm7, %v8012_v48, %v8013_v42 }
 0x75f   :  { %v7094_v56 = vadd.f32 %v7093_v60, %v7028_v32  ;;  %v7031_v55 = vpop.f32.mrf.mxu1 }
 0x760   :  { %v6625_v59 = vpop.f32.mrf.mxu2 }
 0x761   :  { %v11227_v54 = vadd.f32 %v7094_v56, %v6642_v4  ;;  %v6626_v12 = vadd.f32 %v6625_v59, %v6560_v61  ;;  %v7265_v10 = vpop.f32.mrf.mxu0  ;;  %v7893_v56 = vld [vmem:[#allocation2 + $0xa0] sm:$0xfc] }
 0x762   :  { %7780 = vmatmul.f32.gmra.mxu1 %v7630_v11  ;;  %v8027_v48 = vrot.slane %v7893_v56, 2 }
 0x763   :  { %8986 = vmatmul.msk.f32.gmra.mxu3 %vm75_vm0, %v7633_v13  ;;  %v6643_v22 = vadd.f32 %v6626_v12, %v11116_v16  ;;  %v8018_v16 = vrot.slane %v7886_v9, 2  ;;  %v7894_v13 = vld [vmem:[#allocation2 + $0xa8] sm:$0xfc]  ;;  %v7897_v9 = vld [vmem:[#allocation2 + $0xc0] sm:$0xfc] }
 0x764   :  { %8206 = vmatmul.f32.vlgmr.msra.gmra.mxu0 %v8011_v0 }
 0x765   :  { %8987 = vmatmul.msk.f32.vlgmr.msra.gmra.mxu2 %vm75_vm0, %v8014_v24  ;;  %v8020_v15 = vsel %vm1362_vm7, %v8018_v16, %v8019_v5  ;;  %v8034_v16 = vrot.slane %v7899_v3, 2 }
 0x766   :  { %v7096_v50 = vpop.f32.mrf.mxu3 }
 0x767   :  { %v7097_v2 = vadd.f32 %v7096_v50, %v7031_v55  ;;  %v7736_v31 = vpop.f32.mrf.mxu1  ;;  %v7895_v55 = vld [vmem:[#allocation2 + $0xb0] sm:$0x3] }
 0x768   :  { %v7330_v18 = vpop.f32.mrf.mxu2  ;;  %v8028_v42 = vrot.slane %v7895_v55, 2 }
 0x769   :  { %v11234_v25 = vadd.f32 %v7097_v2, %v6643_v22  ;;  %v7331_v63 = vadd.f32 %v7330_v18, %v7265_v10  ;;  %v7268_v32 = vpop.f32.mrf.mxu0  ;;  %v8031_v22 = vrot.slane %v7896_v36, 2  ;;  %v8033_v18 = vrot.slane %v7897_v9, 2  ;;  %v7907_v36 = vld [vmem:[#allocation2 + $0x110] sm:$0x3] }
 0x76a   :  { %v8029_v27 = vsel %vm1362_vm7, %v8027_v48, %v8028_v42  ;;  %v7908_v48 = vld [vmem:[#allocation2 + $0x118] sm:$0x3]  ;;  %v7911_v9 = vld [vmem:[#allocation2 + $0x130] sm:$0x3] }
 0x76b   :  { %v7378_v40 = vadd.f32 %v7331_v63, %v11123_v28  ;;  %v8024_v28 = vrot.slane %v7890_v6, 2  ;;  %v8035_v37 = vsel %vm1362_vm7, %v8033_v18, %v8034_v16  ;;  %v7901_v6 = vld [vmem:[#allocation2 + $0xe0] sm:$0xfc] }
 0x76c   :  { %8209 = vmatmul.f32.gmra.mxu0 %v8017_v7 }
 0x76d   :  { %8988 = vmatmul.msk.f32.gmra.mxu2 %vm75_vm0, %v8020_v15  ;;  %v8026_v14 = vsel %vm1362_vm7, %v8024_v28, %v8025_v1  ;;  %v8040_v28 = vrot.slane %v7903_v20, 2 }
 0x76e   :  { %v7801_v30 = vpop.f32.mrf.mxu3 }
 0x76f   :  { %v7802_v61 = vadd.f32 %v7801_v30, %v7736_v31  ;;  %v7739_v23 = vpop.f32.mrf.mxu1  ;;  %v7898_v31 = vld [vmem:[#allocation2 + $0xc8] sm:$0xfc] }
 0x770   :  { %v7333_v58 = vpop.f32.mrf.mxu2 }
 0x771   :  { %v11240_v4 = vadd.f32 %v7802_v61, %v7378_v40  ;;  %v7334_v29 = vadd.f32 %v7333_v58, %v7268_v32  ;;  %v7271_v21 = vpop.f32.mrf.mxu0  ;;  %v8036_v32 = vrot.slane %v7898_v31, 2  ;;  %v8039_v58 = vrot.slane %v7901_v6, 2  ;;  %v7910_v31 = vld [vmem:[#allocation2 + $0x128] sm:$0xfc] }
 0x773   :  { %v7379_v60 = vadd.f32 %v7334_v29, %v11130_v44  ;;  %v8030_v44 = vrot.slane %v7894_v13, 2  ;;  %v8041_v55 = vsel %vm1362_vm7, %v8039_v58, %v8040_v28  ;;  %v7905_v13 = vld [vmem:[#allocation2 + $0x100] sm:$0xfc] }
 0x774   :  { %8212 = vmatmul.f32.gmra.mxu0 %v8023_v43 }
 0x775   :  { %8989 = vmatmul.msk.f32.gmra.mxu2 %vm75_vm0, %v8026_v14  ;;  %v8032_v50 = vsel %vm1362_vm7, %v8030_v44, %v8031_v22  ;;  %v8046_v44 = vrot.slane %v7907_v36, 2  ;;  %v7920_v36 = vld [vmem:[#allocation2 + $0x1b8] sm:$0x3] }
 0x776   :  { %v7804_v11 = vpop.f32.mrf.mxu3 }
 0x777   :  { %v7805_v26 = vadd.f32 %v7804_v11, %v7739_v23  ;;  %v7742_v59 = vpop.f32.mrf.mxu1  ;;  %v7902_v23 = vld [vmem:[#allocation2 + $0xe8] sm:$0xfc] }
 0x778   :  { %v7336_v10 = vpop.f32.mrf.mxu2 }
 0x779   :  { %v11246_v12 = vadd.f32 %v7805_v26, %v7379_v60  ;;  %v7337_v0 = vadd.f32 %v7336_v10, %v7271_v21  ;;  %v7274_v24 = vpop.f32.mrf.mxu0  ;;  %v8042_v21 = vrot.slane %v7902_v23, 2  ;;  %v8045_v10 = vrot.slane %v7905_v13, 2  ;;  %v7915_v23 = vld [vmem:[#allocation2 + $0x190] sm:$0x3]  ;;  %v7918_v13 = vld [vmem:[#allocation2 + $0x1a8] sm:$0xfc] }
 0x77a   :  { %v8058_v28 = vrot.slane %v7915_v23, 2 }
 0x77b   :  { %v7380_v51 = vadd.f32 %v7337_v0, %v11137_v45  ;;  %v8037_v45 = vrot.slane %v7900_v41, 2  ;;  %v7912_v41 = vld [vmem:[#allocation2 + $0x138] sm:$0x3] }
 0x77c   :  { %8215 = vmatmul.f32.gmra.mxu0 %v8029_v27 }
 0x77d   :  { %8990 = vmatmul.msk.f32.gmra.mxu2 %vm75_vm0, %v8032_v50  ;;  %v8038_v30 = vsel %vm1362_vm7, %v8036_v32, %v8037_v45  ;;  %v7909_v50 = vld [vmem:[#allocation2 + $0x120] sm:$0xfc]  ;;  %v8052_v32 = vrot.slane %v7911_v9, 2  ;;  %v7924_v9 = vld [vmem:[#allocation2 + $0x1d8] sm:$0x3] }
 0x77e   :  { %v7807_v2 = vpop.f32.mrf.mxu3 }
 0x77f   :  { %v7808_v35 = vadd.f32 %v7807_v2, %v7742_v59  ;;  %v7745_v40 = vpop.f32.mrf.mxu1  ;;  %v7906_v59 = vld [vmem:[#allocation2 + $0x108] sm:$0xfc]  ;;  %v8047_v2 = vsel %vm1362_vm7, %v8045_v10, %v8046_v44  ;;  %v8067_v10 = vrot.slane %v7920_v36, 2 }
 0x780   :  { %v7339_v63 = vpop.f32.mrf.mxu2 }
 0x781   :  { %v11252_v5 = vadd.f32 %v7808_v35, %v7380_v51  ;;  %v7340_v7 = vadd.f32 %v7339_v63, %v7274_v24  ;;  %v7277_v15 = vpop.f32.mrf.mxu0  ;;  %v8048_v24 = vrot.slane %v7906_v59, 2  ;;  %v8051_v63 = vrot.slane %v7909_v50, 2  ;;  %v7922_v50 = vld [vmem:[#allocation2 + $0x1c8] sm:$0xfc] }
 0x783   :  { %v7381_v8 = vadd.f32 %v7340_v7, %v11144_v52  ;;  %v8043_v52 = vrot.slane %v7904_v17, 2  ;;  %v8055_v7 = vrot.slane %v7912_v41, 2  ;;  %v7914_v17 = vld [vmem:[#allocation2 + $0x188] sm:$0xfc]  ;;  %v8072_v41 = vrot.slane %v7922_v50, 2 }
 0x784   :  { %8218 = vmatmul.f32.gmra.mxu0 %v8035_v37  ;;  %v7943_v50 = vld [vmem:[#allocation2 + $0x270] sm:$0x3] }
 0x785   :  { %8991 = vmatmul.msk.f32.gmra.mxu2 %vm75_vm0, %v8038_v30  ;;  %v8044_v11 = vsel %vm1362_vm7, %v8042_v21, %v8043_v52  ;;  %v8053_v30 = vsel %vm1362_vm7, %v8051_v63, %v8052_v32  ;;  %v8060_v21 = vrot.slane %v7914_v17, 2 }
 0x786   :  { %v7810_v61 = vpop.f32.mrf.mxu3 }
 0x787   :  { %v7811_v62 = vadd.f32 %v7810_v61, %v7745_v40  ;;  %v7748_v14 = vpop.f32.mrf.mxu1  ;;  %v8054_v40 = vrot.slane %v7910_v31, 2  ;;  %v7913_v61 = vld [vmem:[#allocation2 + $0x180] sm:$0xfc] }
 0x788   :  { %v7342_v29 = vpop.f32.mrf.mxu2  ;;  %v8057_v58 = vrot.slane %v7913_v61, 2 }
 0x789   :  { %v11258_v1 = vadd.f32 %v7811_v62, %v7381_v8  ;;  %v7343_v60 = vadd.f32 %v7342_v29, %v7277_v15  ;;  %v7280_v43 = vpop.f32.mrf.mxu0  ;;  %v8056_v6 = vsel %vm1362_vm7, %v8054_v40, %v8055_v7  ;;  %v7916_v62 = vld [vmem:[#allocation2 + $0x198] sm:$0x3]  ;;  %v7927_v40 = vld [vmem:[#allocation2 + $0x1f0] sm:$0x3]  ;;  %v7926_v7 = vld [vmem:[#allocation2 + $0x1e8] sm:$0xfc] }
 0x78a   :  { %v8061_v52 = vrot.slane %v7916_v62, 2 }
 0x78b   :  { %v7382_v56 = vadd.f32 %v7343_v60, %v11151_v39  ;;  %v8049_v39 = vrot.slane %v7908_v48, 2 }
 0x78c   :  { %8221 = vmatmul.f32.gmra.mxu0 %v8041_v55  ;;  %v7917_v55 = vld [vmem:[#allocation2 + $0x1a0] sm:$0xfc] }
 0x78d   :  { %8992 = vmatmul.msk.f32.gmra.mxu2 %vm75_vm0, %v8044_v11  ;;  %v8050_v35 = vsel %vm1362_vm7, %v8048_v24, %v8049_v39  ;;  %v7919_v11 = vld [vmem:[#allocation2 + $0x1b0] sm:$0x3] }
 0x78e   :  { %v7813_v26 = vpop.f32.mrf.mxu3  ;;  %v8064_v59 = vrot.slane %v7919_v11, 2 }
 0x78f   :  { %v7814_v42 = vadd.f32 %v7813_v26, %v7748_v14  ;;  %v7751_v18 = vpop.f32.mrf.mxu1  ;;  %v8063_v26 = vrot.slane %v7917_v55, 2 }
 0x790   :  { %v7345_v0 = vpop.f32.mrf.mxu2 }
 0x791   :  { %v11264_v22 = vadd.f32 %v7814_v42, %v7382_v56  ;;  %v7346_v51 = vadd.f32 %v7345_v0, %v7280_v43  ;;  %v7283_v27 = vpop.f32.mrf.mxu0  ;;  %v8062_v56 = vsel %vm1362_vm7, %v8060_v21, %v8061_v52  ;;  %v8066_v42 = vrot.slane %v7918_v13, 2  ;;  %v7930_v21 = vld [vmem:[#allocation2 + $0x208] sm:$0xfc]  ;;  %v7932_v52 = vld [vmem:[#allocation2 + $0x218] sm:$0x3] }
 0x792   :  { %v8065_v24 = vsel %vm1362_vm7, %v8063_v26, %v8064_v59  ;;  %v8085_v55 = vrot.slane %v7932_v52, 2  ;;  %v7933_v59 = vld [vmem:[#allocation2 + $0x220] sm:$0xfc] }
 0x793   :  { %v7383_v3 = vadd.f32 %v7346_v51, %v11158_v33  ;;  %v8068_v39 = vsel %vm1362_vm7, %v8066_v42, %v8067_v10  ;;  %v7921_v51 = vld [vmem:[#allocation2 + $0x1c0] sm:$0xfc]  ;;  %v7934_v42 = vld [vmem:[#allocation2 + $0x228] sm:$0xfc]  ;;  %v7936_v10 = vld [vmem:[#allocation2 + $0x238] sm:$0x3] }
 0x794   :  { %8224 = vmatmul.f32.gmra.mxu0 %v8047_v2 }
 0x795   :  { %8993 = vmatmul.msk.f32.gmra.mxu2 %vm75_vm0, %v8050_v35  ;;  %v8073_v35 = vrot.slane %v7924_v9, 2 }
 0x796   :  { %v7816_v16 = vpop.f32.mrf.mxu3 }
 0x797   :  { %v7817_v45 = vadd.f32 %v7816_v16, %v7751_v18  ;;  %v8074_v32 = vsel %vm1362_vm7, %v8072_v41, %v8073_v35 }
 0x798   :  { %v7348_v8 = vpop.f32.mrf.mxu2 }
 0x799   :  { %v11270_v15 = vadd.f32 %v7817_v45, %v7383_v3  ;;  %v7349_v33 = vadd.f32 %v7348_v8, %v7283_v27  ;;  %v7286_v37 = vpop.f32.mrf.mxu0  ;;  %v7923_v27 = vld [vmem:[#allocation2 + $0x1d0] sm:$0x3]  ;;  %v8069_v3 = vrot.slane %v7921_v51, 2  ;;  %v7925_v45 = vld [vmem:[#allocation2 + $0x1e0] sm:$0xfc]  ;;  %v8091_v51 = vrot.slane %v7936_v10, 2 }
 0x79a   :  { %v8070_v2 = vrot.slane %v7923_v27, 2  ;;  %v7928_v8 = vld [vmem:[#allocation2 + $0x1f8] sm:$0x3]  ;;  %v7941_v27 = vld [vmem:[#allocation2 + $0x260] sm:$0xfc] }
 0x79b   :  { %v11275_v20 = vadd.f32 %v7349_v33, %v11170_v34  ;;  %v8059_v34 = vsel %vm1362_vm7, %v8057_v58, %v8058_v28  ;;  %v8075_v33 = vrot.slane %v7925_v45, 2  ;;  %v8079_v61 = vrot.slane %v7928_v8, 2  ;;  %v7929_v28 = vld [vmem:[#allocation2 + $0x200] sm:$0xfc]  ;;  %v7940_v45 = vld [vmem:[#allocation2 + $0x258] sm:$0x3] }
 0x79c   :  { %8227 = vmatmul.f32.gmra.mxu0 %v8053_v30  ;;  %v8071_v63 = vsel %vm1362_vm7, %v8069_v3, %v8070_v2  ;;  %v8099_v3 = vrot.slane %v7941_v27, 2  ;;  %v8100_v2 = vrot.slane %v7943_v50, 2 }
 0x79d   :  { %8994 = vmatmul.msk.f32.gmra.mxu2 %vm75_vm0, %v8056_v6  ;;  %v8078_v6 = vrot.slane %v7926_v7, 2 }
 0x79e   :  { %v8101_v35 = vsel %vm1362_vm7, %v8099_v3, %v8100_v2 }
 0x79f   :  { %v8080_v58 = vsel %vm1362_vm7, %v8078_v6, %v8079_v61  ;;  %8251 = vmatmul.f32.vlgmr.msrb.gmra.mxu1 %v8101_v35 }
 0x7a0   :  { %v7351_v29 = vpop.f32.mrf.mxu2 }
 0x7a1   :  { %v7352_v60 = vadd.f32 %v7351_v29, %v7286_v37  ;;  %v7289_v43 = vpop.f32.mrf.mxu0  ;;  %v8076_v37 = vrot.slane %v7927_v40, 2  ;;  %v7931_v29 = vld [vmem:[#allocation2 + $0x210] sm:$0x3] }
 0x7a3   :  { %v11279_v14 = vadd.f32 %v7352_v60, %v11175_v38  ;;  %v8077_v62 = vsel %vm1362_vm7, %v8075_v33, %v8076_v37  ;;  %v8081_v60 = vrot.slane %v7929_v28, 2 }
 0x7a4   :  { %8230 = vmatmul.f32.gmra.mxu0 %v8059_v34 }
 0x7a5   :  { %8995 = vmatmul.msk.f32.gmra.mxu2 %vm75_vm0, %v8062_v56  ;;  %v8084_v56 = vrot.slane %v7930_v21, 2 }
 0x7a7   :  { %v8086_v26 = vsel %vm1362_vm7, %v8084_v56, %v8085_v55 }
 0x7a8   :  { %v7354_v48 = vpop.f32.mrf.mxu2 }
 0x7a9   :  { %v7355_v44 = vadd.f32 %v7354_v48, %v7289_v43  ;;  %v7292_v0 = vpop.f32.mrf.mxu0  ;;  %v8082_v43 = vrot.slane %v7931_v29, 2  ;;  %v7935_v48 = vld [vmem:[#allocation2 + $0x230] sm:$0x3] }
 0x7ab   :  { %v11285_v38 = vadd.f32 %v7355_v44, %v11182_v53  ;;  %v8083_v36 = vsel %vm1362_vm7, %v8081_v60, %v8082_v43  ;;  %v8087_v44 = vrot.slane %v7933_v59, 2 }
 0x7ac   :  { %8233 = vmatmul.f32.gmra.mxu0 %v8065_v24 }
 0x7ad   :  { %8996 = vmatmul.msk.f32.gmra.mxu2 %vm75_vm0, %v8068_v39  ;;  %v8090_v39 = vrot.slane %v7934_v42, 2 }
 0x7b0   :  { %v7357_v31 = vpop.f32.mrf.mxu2 }
 0x7b1   :  { %v7358_v18 = vadd.f32 %v7357_v31, %v7292_v0  ;;  %v7295_v16 = vpop.f32.mrf.mxu0  ;;  %v8088_v0 = vrot.slane %v7935_v48, 2 }
 0x7b3   :  { %v11291_v53 = vadd.f32 %v7358_v18, %v11189_v19  ;;  %v8089_v41 = vsel %vm1362_vm7, %v8087_v44, %v8088_v0  ;;  %v8092_v18 = vsel %vm1362_vm7, %v8090_v39, %v8091_v51  ;;  %v7819_v39 = vpop.f32.mrf.mxu3 }
 0x7b4   :  { %8236 = vmatmul.f32.gmra.mxu0 %v8071_v63  ;;  %v7939_v63 = vld [vmem:[#allocation2 + $0x250] sm:$0x3] }
 0x7b5   :  { %8997 = vmatmul.msk.f32.gmra.mxu2 %vm75_vm0, %v8074_v32  ;;  %v7938_v32 = vld [vmem:[#allocation2 + $0x248] sm:$0xfc]  ;;  %v8094_v7 = vrot.slane %v7939_v63, 2 }
 0x7b6   :  { %v8096_v33 = vrot.slane %v7938_v32, 2 }
 0x7b8   :  { %v7360_v30 = vpop.f32.mrf.mxu2 }
 0x7b9   :  { %v7361_v23 = vadd.f32 %v7360_v30, %v7295_v16  ;;  %v7298_v17 = vpop.f32.mrf.mxu0  ;;  %v7937_v16 = vld [vmem:[#allocation2 + $0x240] sm:$0xfc] }
 0x7ba   :  { %v8093_v40 = vrot.slane %v7937_v16, 2 }
 0x7bb   :  { %v11297_v19 = vadd.f32 %v7361_v23, %v11196_v49  ;;  %v7942_v23 = vld [vmem:[#allocation2 + $0x268] sm:$0xfc]  ;;  %v7822_v3 = vpop.f32.mrf.mxu3 }
 0x7bc   :  { %8239 = vmatmul.f32.gmra.mxu0 %v8077_v62  ;;  %v8095_v61 = vsel %vm1362_vm7, %v8093_v40, %v8094_v7 }
 0x7bd   :  { %8998 = vmatmul.msk.f32.gmra.mxu2 %vm75_vm0, %v8080_v58  ;;  %v8102_v58 = vrot.slane %v7942_v23, 2 }
 0x7c0   :  { %v7363_v34 = vpop.f32.mrf.mxu2 }
 0x7c1   :  { %v7364_v11 = vadd.f32 %v7363_v34, %v7298_v17  ;;  %v7301_v13 = vpop.f32.mrf.mxu0  ;;  %v7944_v17 = vld [vmem:[#allocation2 + $0x278] sm:$0x3] }
 0x7c2   :  { %v8103_v28 = vrot.slane %v7944_v17, 2 }
 0x7c3   :  { %v11303_v49 = vadd.f32 %v7364_v11, %v11203_v57  ;;  %v7825_v16 = vpop.f32.mrf.mxu3 }
 0x7c4   :  { %8242 = vmatmul.f32.gmra.mxu0 %v8083_v36  ;;  %v8104_v60 = vsel %vm1362_vm7, %v8102_v58, %v8103_v28 }
 0x7c5   :  { %8999 = vmatmul.msk.f32.gmra.mxu2 %vm75_vm0, %v8086_v26 }
 0x7c8   :  { %v7366_v24 = vpop.f32.mrf.mxu2 }
 0x7c9   :  { %v7367_v57 = vadd.f32 %v7366_v24, %v7301_v13  ;;  %v7304_v9 = vpop.f32.mrf.mxu0 }
 0x7cb   :  { %v11309_v31 = vadd.f32 %v7367_v57, %v11210_v47  ;;  %v8097_v47 = vrot.slane %v7940_v45, 2  ;;  %v7828_v40 = vpop.f32.mrf.mxu3 }
 0x7cc   :  { %8245 = vmatmul.f32.gmra.mxu0 %v8089_v41 }
 0x7cd   :  { %9000 = vmatmul.msk.f32.gmra.mxu2 %vm75_vm0, %v8092_v18  ;;  %v8098_v62 = vsel %vm1362_vm7, %v8096_v33, %v8097_v47 }
 0x7d0   :  { %v7369_v8 = vpop.f32.mrf.mxu2 }
 0x7d1   :  { %v7370_v37 = vadd.f32 %v7369_v8, %v7304_v9  ;;  %v7307_v30 = vpop.f32.mrf.mxu0 }
 0x7d3   :  { %v11316_v6 = vadd.f32 %v7370_v37, %v11217_v46  ;;  %v7831_v33 = vpop.f32.mrf.mxu3 }
 0x7d4   :  { %8248 = vmatmul.f32.gmra.mxu0 %v8095_v61 }
 0x7d5   :  { %9001 = vmatmul.msk.f32.gmra.mxu2 %vm75_vm0, %v8098_v62 }
 0x7d8   :  { %v7372_v29 = vpop.f32.mrf.mxu2 }
 0x7d9   :  { %v7373_v21 = vadd.f32 %v7372_v29, %v7307_v30  ;;  %v7310_v52 = vpop.f32.mrf.mxu0 }
 0x7db   :  { %v11323_v43 = vadd.f32 %v7373_v21, %v11227_v54  ;;  %v7834_v23 = vpop.f32.mrf.mxu3 }
 0x7dd   :  { %9002 = vmatmul.msk.f32.gmra.mxu2 %vm75_vm0, %v8104_v60 }
 0x7e0   :  { %v7375_v46 = vpop.f32.mrf.mxu2 }
 0x7e1   :  { %v7376_v34 = vadd.f32 %v7375_v46, %v7310_v52  ;;  %v8207_v56 = vpop.f32.mrf.mxu0 }
 0x7e3   :  { %v11327_v55 = vadd.f32 %v7376_v34, %v11234_v25  ;;  %v7754_v25 = vpop.f32.mrf.mxu1  ;;  %v7837_v58 = vpop.f32.mrf.mxu3 }
 0x7e4   :  { %v7820_v46 = vadd.f32 %v7819_v39, %v7754_v25 }
 0x7e8   :  { %v8272_v11 = vpop.f32.mrf.mxu2 }
 0x7e9   :  { %v8273_v13 = vadd.f32 %v8272_v11, %v8207_v56  ;;  %v8210_v36 = vpop.f32.mrf.mxu0 }
 0x7eb   :  { %v11330_v26 = vadd.f32 %v8273_v13, %v11240_v4  ;;  %v7757_v57 = vpop.f32.mrf.mxu1  ;;  %v7840_v52 = vpop.f32.mrf.mxu3 }
 0x7ec   :  { %v7823_v13 = vadd.f32 %v7822_v3, %v7757_v57 }
 0x7f0   :  { %v8275_v59 = vpop.f32.mrf.mxu2 }
 0x7f1   :  { %v8276_v48 = vadd.f32 %v8275_v59, %v8210_v36  ;;  %v8213_v42 = vpop.f32.mrf.mxu0  ;;  %v8389_v59 = vmul.f32 %v11330_v26, %v11330_v26 }
 0x7f3   :  { %v11333_v54 = vadd.f32 %v8276_v48, %v11246_v12 }
 0x7f5   :  { %v8390_v34 = vmul.f32 %v11333_v54, %v11333_v54  ;;  %v8368_v36 = vadd.f32 %v11333_v54, %v11330_v26 }
 0x7f7   :  { %v8405_v25 = vadd.f32 %v8390_v34, %v8389_v59 }
 0x7f8   :  { %v8278_v10 = vpop.f32.mrf.mxu2 }
 0x7f9   :  { %v8279_v44 = vadd.f32 %v8278_v10, %v8213_v42  ;;  %v8216_v0 = vpop.f32.mrf.mxu0  ;;  %v7855_v10 = vadd.f32 %v7820_v46, %v11275_v20 }
 0x7fb   :  { %v11336_v24 = vadd.f32 %v8279_v44, %v11252_v5  ;;  %v7760_v5 = vpop.f32.mrf.mxu1 }
 0x7fc   :  { %v7826_v44 = vadd.f32 %v7825_v16, %v7760_v5 }
 0x7fd   :  { %v8391_v48 = vmul.f32 %v11336_v24, %v11336_v24 }
 0x7ff   :  { %v8406_v3 = vadd.f32 %v8405_v25, %v8391_v48 }
 0x800   :  { %v8281_v51 = vpop.f32.mrf.mxu2 }
 0x801   :  { %v8282_v27 = vadd.f32 %v8281_v51, %v8216_v0  ;;  %v8219_v50 = vpop.f32.mrf.mxu0  ;;  %v8369_v0 = vadd.f32 %v8368_v36, %v11336_v24 }
 0x803   :  { %v11339_v4 = vadd.f32 %v8282_v27, %v11258_v1  ;;  %v7763_v45 = vpop.f32.mrf.mxu1 }
 0x805   :  { %v8392_v39 = vmul.f32 %v11339_v4, %v11339_v4  ;;  %v8370_v57 = vadd.f32 %v8369_v0, %v11339_v4 }
 0x807   :  { %v8407_v16 = vadd.f32 %v8406_v3, %v8392_v39 }
 0x808   :  { %v8284_v9 = vpop.f32.mrf.mxu2 }
 0x809   :  { %v8285_v2 = vadd.f32 %v8284_v9, %v8219_v50  ;;  %v8222_v12 = vpop.f32.mrf.mxu0  ;;  %v7856_v50 = vadd.f32 %v7823_v13, %v11279_v14 }
 0x80b   :  { %v11342_v41 = vadd.f32 %v8285_v2, %v11264_v22  ;;  %v7766_v1 = vpop.f32.mrf.mxu1 }
 0x80c   :  { %v7832_v46 = vadd.f32 %v7831_v33, %v7766_v1 }
 0x80d   :  { %v8393_v20 = vmul.f32 %v11342_v41, %v11342_v41  ;;  %v8371_v5 = vadd.f32 %v8370_v57, %v11342_v41 }
 0x80e   :  { %v7859_v33 = vadd.f32 %v7832_v46, %v11297_v19 }
 0x80f   :  { %v8408_v13 = vadd.f32 %v8407_v16, %v8393_v20 }
 0x810   :  { %v8287_v35 = vpop.f32.mrf.mxu2 }
 0x811   :  { %v8225_v18 = vpop.f32.mrf.mxu0  ;;  %v8288_v56 = vadd.f32 %v8287_v35, %v8222_v12  ;;  %v7829_v35 = vadd.f32 %v7828_v40, %v7763_v45 }
 0x813   :  { %v7769_v30 = vpop.f32.mrf.mxu1  ;;  %v11357_v51 = vadd.f32 %v8288_v56, %v11270_v15  ;;  %v7857_v15 = vadd.f32 %v7826_v44, %v11285_v38  ;;  %v7858_v38 = vadd.f32 %v7829_v35, %v11291_v53 }
 0x815   :  { %v8394_v14 = vmul.f32 %v11357_v51, %v11357_v51  ;;  %v8372_v34 = vadd.f32 %v8371_v5, %v11357_v51 }
 0x817   :  { %v8409_v48 = vadd.f32 %v8408_v13, %v8394_v14 }
 0x818   :  { %v8290_v63 = vpop.f32.mrf.mxu2 }
 0x819   :  { %v8228_v32 = vpop.f32.mrf.mxu0  ;;  %v8291_v42 = vadd.f32 %v8290_v63, %v8225_v18  ;;  %v7843_v18 = vpop.f32.mrf.mxu3 }
 0x81b   :  { %v7772_v62 = vpop.f32.mrf.mxu1  ;;  %v11363_v2 = vadd.f32 %v8291_v42, %v7855_v10 }
 0x81c   :  { %v7838_v59 = vadd.f32 %v7837_v58, %v7772_v62 }
 0x81d   :  { %v8395_v45 = vmul.f32 %v11363_v2, %v11363_v2 }
 0x81e   :  { %v7861_v19 = vadd.f32 %v7838_v59, %v11309_v31 }
 0x81f   :  { %v8410_v0 = vadd.f32 %v8409_v48, %v8395_v45 }
 0x820   :  { %v8293_v7 = vpop.f32.mrf.mxu2 }
 0x821   :  { %v8231_v8 = vpop.f32.mrf.mxu0  ;;  %v8294_v27 = vadd.f32 %v8293_v7, %v8228_v32  ;;  %v7846_v39 = vpop.f32.mrf.mxu3 }
 0x823   :  { %v7775_v21 = vpop.f32.mrf.mxu1  ;;  %v11369_v63 = vadd.f32 %v8294_v27, %v7856_v50 }
 0x824   :  { %v7841_v10 = vadd.f32 %v7840_v52, %v7775_v21 }
 0x825   :  { %v8396_v1 = vmul.f32 %v11369_v63, %v11369_v63 }
 0x827   :  { %v8411_v58 = vadd.f32 %v8410_v0, %v8396_v1 }
 0x828   :  { %v8296_v47 = vpop.f32.mrf.mxu2 }
 0x829   :  { %v8234_v37 = vpop.f32.mrf.mxu0  ;;  %v8297_v12 = vadd.f32 %v8296_v47, %v8231_v8  ;;  %v7835_v8 = vadd.f32 %v7834_v23, %v7769_v30  ;;  %v8373_v47 = vadd.f32 %v8372_v34, %v11363_v2 }
 0x82b   :  { %v7778_v9 = vpop.f32.mrf.mxu1  ;;  %v11374_v40 = vadd.f32 %v8297_v12, %v7857_v15  ;;  %v7860_v30 = vadd.f32 %v7835_v8, %v11303_v49  ;;  %v7862_v49 = vadd.f32 %v7841_v10, %v11316_v6 }
 0x82c   :  { %v7844_v62 = vadd.f32 %v7843_v18, %v7778_v9 }
 0x82d   :  { %v8397_v53 = vmul.f32 %v11374_v40, %v11374_v40 }
 0x82e   :  { %v7863_v9 = vadd.f32 %v7844_v62, %v11323_v43 }
 0x82f   :  { %v8412_v27 = vadd.f32 %v8411_v58, %v8397_v53 }
 0x830   :  { %v8299_v61 = vpop.f32.mrf.mxu2 }
 0x831   :  { %v8237_v17 = vpop.f32.mrf.mxu0  ;;  %v8300_v56 = vadd.f32 %v8299_v61, %v8234_v37  ;;  %v8374_v37 = vadd.f32 %v8373_v47, %v11369_v63 }
 0x833   :  { %v11382_v61 = vadd.f32 %v8300_v56, %v7858_v38  ;;  %v7781_v44 = vpop.f32.mrf.mxu1  ;;  %v8375_v23 = vadd.f32 %v8374_v37, %v11374_v40 }
 0x834   :  { %v7847_v3 = vadd.f32 %v7846_v39, %v7781_v44 }
 0x836   :  { %v7864_v43 = vadd.f32 %v7847_v3, %v11327_v55 }
 0x838   :  { %v8302_v22 = vpop.f32.mrf.mxu2 }
 0x839   :  { %v8240_v28 = vpop.f32.mrf.mxu0  ;;  %v8303_v36 = vadd.f32 %v8302_v22, %v8237_v17 }
 0x83b   :  { %v11388_v17 = vadd.f32 %v8303_v36, %v7859_v33  ;;  %v8252_v18 = vpop.f32.mrf.mxu1 }
 0x83d   :  { %v8399_v31 = vmul.f32 %v11388_v17, %v11388_v17 }
 0x840   :  { %v8305_v29 = vpop.f32.mrf.mxu2 }
 0x841   :  { %v8243_v60 = vpop.f32.mrf.mxu0  ;;  %v8306_v42 = vadd.f32 %v8305_v29, %v8240_v28  ;;  %v8376_v28 = vadd.f32 %v8375_v23, %v11382_v61  ;;  %v8398_v29 = vmul.f32 %v11382_v61, %v11382_v61 }
 0x843   :  { %v11394_v21 = vadd.f32 %v8306_v42, %v7860_v30  ;;  %v8413_v20 = vadd.f32 %v8412_v27, %v8398_v29 }
 0x845   :  { %v8400_v35 = vmul.f32 %v11394_v21, %v11394_v21  ;;  %v8414_v5 = vadd.f32 %v8413_v20, %v8399_v31 }
 0x848   :  { %v8308_v11 = vpop.f32.mrf.mxu2 }
 0x849   :  { %v8246_v32 = vpop.f32.mrf.mxu0  ;;  %v8309_v22 = vadd.f32 %v8308_v11, %v8243_v60  ;;  %v8377_v60 = vadd.f32 %v8376_v28, %v11388_v17 }
 0x84b   :  { %v11400_v11 = vadd.f32 %v8309_v22, %v7861_v19  ;;  %v8378_v12 = vadd.f32 %v8377_v60, %v11394_v21 }
 0x84d   :  { %v8379_v15 = vadd.f32 %v8378_v12, %v11400_v11  ;;  %v8401_v16 = vmul.f32 %v11400_v11, %v11400_v11 }
 0x850   :  { %v8311_v7 = vpop.f32.mrf.mxu2 }
 0x851   :  { %v8312_v52 = vadd.f32 %v8311_v7, %v8246_v32  ;;  %v8249_v50 = vpop.f32.mrf.mxu0  ;;  %v8415_v7 = vadd.f32 %v8414_v5, %v8400_v35 }
 0x853   :  { %v11406_v6 = vadd.f32 %v8312_v52, %v7862_v49  ;;  %v8416_v13 = vadd.f32 %v8415_v7, %v8401_v16 }
 0x855   :  { %v8380_v46 = vadd.f32 %v8379_v15, %v11406_v6  ;;  %v8402_v34 = vmul.f32 %v11406_v6, %v11406_v6 }
 0x857   :  { %v8417_v47 = vadd.f32 %v8416_v13, %v8402_v34 }
 0x858   :  { %v8314_v25 = vpop.f32.mrf.mxu2 }
 0x859   :  { %v8315_v57 = vadd.f32 %v8314_v25, %v8249_v50 }
 0x85b   :  { %v11411_v14 = vadd.f32 %v8315_v57, %v7863_v9 }
 0x85d   :  { %v8381_v45 = vadd.f32 %v8380_v46, %v11411_v14  ;;  %v8403_v38 = vmul.f32 %v11411_v14, %v11411_v14 }
 0x85f   :  { %v8418_v59 = vadd.f32 %v8417_v47, %v8403_v38 }
 0x860   :  { %v8317_v32 = vpop.f32.mrf.mxu2 }
 0x861   :  { %v8318_v56 = vadd.f32 %v8317_v32, %v8252_v18 }
 0x863   :  { %v11420_v8 = vadd.f32 %v8318_v56, %v7864_v43 }
 0x865   :  { %v8382_v36 = vadd.f32 %v8381_v45, %v11420_v8  ;;  %v8404_v55 = vmul.f32 %v11420_v8, %v11420_v8 }
 0x867   :  { %v8383_v48 = vrot.slane %v8382_v36, 4  ;;  %v8419_v33 = vadd.f32 %v8418_v59, %v8404_v55 }
 0x869   :  { %v8384_v1 = vadd.f32 %v8383_v48, %v8382_v36  ;;  %v8420_v10 = vrot.slane %v8419_v33, 4 }
 0x86b   :  { %v8385_v37 = vrot.slane %v8384_v1, 2  ;;  %v8421_v53 = vadd.f32 %v8420_v10, %v8419_v33 }
 0x86d   :  { %v8386_v42 = vadd.f32 %v8385_v37, %v8384_v1  ;;  %v8422_v30 = vrot.slane %v8421_v53, 2  ;;  %v8490_v37 = vld [vmem:[%s11518_s5] sm:$0x1]  ;;  %s9159_s5 = smov [#allocation10]  }
 0x86f   :  { %v8387_v44 = vrot.slane %v8386_v42, 1  ;;  %v8423_v23 = vadd.f32 %v8422_v30, %v8421_v53  ;;  %v8503_v30 = vld [vmem:[%s11519_s6] sm:$0x1]  ;;  %s8668_s6 = sshll.u32 %s9159_s5, 4  ;;  %s8669_s6 = int_to_ptr.vmem [resolvable:$true] %s8668_s6 }
 0x871   :  { %v8388_v0 = vadd.f32 %v8387_v44, %v8386_v42  ;;  %v8424_v22 = vrot.slane %v8423_v23, 1 }
 0x873   :  { %8446 = vrot.lane.b32.xlu1 %v8388_v0, %s9153_s16  ;;  %8438 = vrot.lane.b32.xlu2 %v8388_v0, %s9154_s17  ;;  %v8425_v19 = vadd.f32 %v8424_v22, %v8423_v23 }
 0x874   :  { %8429 = vrot.lane.b32.xlu0 %v8388_v0, %s9155_s18 }
 0x87b   :  { %8470 = vrot.lane.b32.xlu1 %v8388_v0, %s9156_s19  ;;  %8462 = vrot.lane.b32.xlu2 %v8388_v0, %s9157_s20 }
 0x87c   :  { %8454 = vrot.lane.b32.xlu0 %v8388_v0, %s9158_s21 }
 0x883   :  { %8434 = vrot.lane.b32.xlu1 %v8425_v19, %s9155_s18  ;;  %8450 = vrot.lane.b32.xlu2 %v8425_v19, %s9153_s16 }
 0x884   :  { %8442 = vrot.lane.b32.xlu0 %v8425_v19, %s9154_s17 }
 0x88b   :  { %8458 = vrot.lane.b32.xlu1 %v8425_v19, %s9158_s21  ;;  %8474 = vrot.lane.b32.xlu2 %v8425_v19, %s9156_s19 }
 0x88c   :  { %8466 = vrot.lane.b32.xlu0 %v8425_v19, %s9157_s20 }
 0x893   :  { %8482 = vrot.lane.b32.xlu1 %v8425_v19, %s9151_s4 }
 0x894   :  { %8478 = vrot.lane.b32.xlu0 %v8388_v0, %s9151_s4 }
 0x8cd   :  { %v8439_v58 = vpop.permute.xlu2 %8438 }
 0x8d5   :  { %v8463_v29 = vpop.permute.xlu2 %8462 }
 0x8dd   :  { %v8451_v57 = vpop.permute.xlu2 %8450 }
 0x8e5   :  { %v8447_v62 = vpop.permute.xlu1 %8446  ;;  %v8475_v16 = vpop.permute.xlu2 %8474 }
 0x8e6   :  { %v8430_v25 = vpop.permute.xlu0 %8429 }
 0x8e7   :  { %v8432_v52 = vadd.f32 %v8430_v25, %v8388_v0 }
 0x8e9   :  { %v8441_v60 = vadd.f32 %v8439_v58, %v8432_v52 }
 0x8eb   :  { %v8449_v9 = vadd.f32 %v8447_v62, %v8441_v60 }
 0x8ed   :  { %v8471_v39 = vpop.permute.xlu1 %8470 }
 0x8ee   :  { %v8455_v28 = vpop.permute.xlu0 %8454 }
 0x8ef   :  { %v8457_v20 = vadd.f32 %v8455_v28, %v8449_v9 }
 0x8f1   :  { %v8465_v5 = vadd.f32 %v8463_v29, %v8457_v20 }
 0x8f3   :  { %v8473_v7 = vadd.f32 %v8471_v39, %v8465_v5 }
 0x8f5   :  { %v8435_v49 = vpop.permute.xlu1 %8434 }
 0x8f6   :  { %v8437_v27 = vadd.f32 %v8435_v49, %v8425_v19  ;;  %v8443_v50 = vpop.permute.xlu0 %8442 }
 0x8f8   :  { %v8445_v31 = vadd.f32 %v8443_v50, %v8437_v27 }
 0x8fa   :  { %v8453_v3 = vadd.f32 %v8451_v57, %v8445_v31 }
 0x8fd   :  { %v8459_v12 = vpop.permute.xlu1 %8458 }
 0x8fe   :  { %v8461_v35 = vadd.f32 %v8459_v12, %v8453_v3  ;;  %v8467_v18 = vpop.permute.xlu0 %8466 }
 0x900   :  { %v8469_v15 = vadd.f32 %v8467_v18, %v8461_v35 }
 0x902   :  { %v8477_v32 = vadd.f32 %v8475_v16, %v8469_v15 }
 0x905   :  { %v8483_v43 = vpop.permute.xlu1 %8482 }
 0x906   :  { %v8479_v46 = vpop.permute.xlu0 %8478  ;;  %v8485_v34 = vadd.f32 %v8483_v43, %v8477_v32 }
 0x907   :  { %v8481_v56 = vadd.f32 %v8479_v46, %v8473_v7 }
 0x908   :  { %v8487_v45 = vmul.f32 0.0009765625, %v8485_v34 }
 0x909   :  { %v8486_v13 = vmul.f32 0.0009765625, %v8481_v56 }
 0x90b   :  { %v8488_v38 = vmul.f32 %v8486_v13, %v8486_v13 }
 0x90d   :  { %v8489_v47 = vsub.f32 %v8487_v45, %v8488_v38 }
 0x90f   :  { %v8491_v36 = vadd.f32 1e-05, %v8489_v47 }
 0x911   :  { %9039 = vrsqrt.f32 %v8491_v36  ;;  %vm8498_vm2 = vweird.f32 %v8491_v36 }
 0x917   :  { %v9040_v55 = vpop.eup %9039 }
 0x918   :  { %v8493_v59 = vmul.f32 %v9040_v55, %v8491_v36  ;;  %vm8499_vm1 = vweird.f32 %v9040_v55 }
 0x919   :  { %vm8500_vm3 = vmor %vm8498_vm2, %vm8499_vm1 }
 0x91a   :  { %v8494_v48 = vmul.f32 %v9040_v55, %v8493_v59 }
 0x91c   :  { %v8495_v1 = vmul.f32 0.5, %v8494_v48 }
 0x91e   :  { %v8496_v33 = vsub.f32 1.5, %v8495_v1 }
 0x920   :  { %v8497_v42 = vmul.f32 %v9040_v55, %v8496_v33 }
 0x922   :  { %v8501_v10 = vsel %vm8500_vm3, %v9040_v55, %v8497_v42  ;;  %v8600_v42 = vld [vmem:[#allocation4] sm:$0xff] }
 0x923   :  { %v8502_v44 = vmul.f32 %v8501_v10, %v8490_v37  ;;  %v8602_v10 = vld [vmem:[#allocation4 + $0x10] sm:$0xff] }
 0x925   :  { %v8507_v0 = vperm.slane %v8502_v44, 0  ;;  %v8504_v53 = vmul.f32 %v8502_v44, %v8486_v13 }
 0x927   :  { %8514 = vrot.lane.b32.xlu1 %v8507_v0, %s9157_s20  ;;  %8511 = vrot.lane.b32.xlu0 %v8507_v0, %s9156_s19  ;;  %v8505_v23 = vsub.f32 %v8503_v30, %v8504_v53  ;;  %v8604_v53 = vld [vmem:[#allocation4 + $0x20] sm:$0xff] }
 0x928   :  { %8508 = vrot.lane.b32.xlu2 %v8507_v0, %s9151_s4 }
 0x929   :  { %v8537_v22 = vperm.slane %v8505_v23, 0 }
 0x92f   :  { %8523 = vrot.lane.b32.xlu1 %v8507_v0, %s9154_s17  ;;  %8517 = vrot.lane.b32.xlu0 %v8507_v0, %s9158_s21 }
 0x930   :  { %8520 = vrot.lane.b32.xlu2 %v8507_v0, %s9153_s16 }
 0x937   :  { %8526 = vrot.lane.b32.xlu0 %v8507_v0, %s9155_s18  ;;  %8541 = vrot.lane.b32.xlu1 %v8537_v22, %s9156_s19 }
 0x938   :  { %8538 = vrot.lane.b32.xlu2 %v8537_v22, %s9151_s4 }
 0x93f   :  { %8544 = vrot.lane.b32.xlu0 %v8537_v22, %s9157_s20  ;;  %8550 = vrot.lane.b32.xlu1 %v8537_v22, %s9153_s16 }
 0x940   :  { %8547 = vrot.lane.b32.xlu2 %v8537_v22, %s9158_s21 }
 0x947   :  { %8556 = vrot.lane.b32.xlu0 %v8537_v22, %s9155_s18 }
 0x948   :  { %8553 = vrot.lane.b32.xlu2 %v8537_v22, %s9154_s17 }
 0x982   :  { %v8509_v19 = vpop.permute.xlu2 %8508 }
 0x983   :  { %v8529_v52 = vsel %vm273_vm4, %v8502_v44, %v8509_v19 }
 0x98a   :  { %v8521_v25 = vpop.permute.xlu2 %8520 }
 0x992   :  { %v8539_v29 = vpop.permute.xlu2 %8538 }
 0x993   :  { %v8559_v9 = vsel %vm273_vm4, %v8505_v23, %v8539_v29 }
 0x999   :  { %v8515_v62 = vpop.permute.xlu1 %8514  ;;  %v8512_v58 = vpop.permute.xlu0 %8511 }
 0x99a   :  { %v8530_v49 = vsel %vm75_vm0, %v8529_v52, %v8512_v58  ;;  %v8548_v57 = vpop.permute.xlu2 %8547 }
 0x99b   :  { %v8531_v60 = vsel %vm4328_vm11, %v8530_v49, %v8515_v62 }
 0x9a1   :  { %v8524_v39 = vpop.permute.xlu1 %8523  ;;  %v8518_v28 = vpop.permute.xlu0 %8517 }
 0x9a2   :  { %v8532_v31 = vsel %vm4330_vm12, %v8531_v60, %v8518_v28  ;;  %v8554_v7 = vpop.permute.xlu2 %8553  ;;  %v8607_v28 = vld [vmem:[#allocation4 + $0x38] sm:$0xff]  ;;  %v8609_v60 = vld [vmem:[#allocation4 + $0x48] sm:$0xff] }
 0x9a3   :  { %v8533_v3 = vsel %vm4332_vm13, %v8532_v31, %v8521_v25  ;;  %v8606_v25 = vld [vmem:[#allocation4 + $0x30] sm:$0xff] }
 0x9a4   :  { %v8534_v18 = vsel %vm4334_vm14, %v8533_v3, %v8524_v39 }
 0x9a9   :  { %v8527_v27 = vpop.permute.xlu0 %8526  ;;  %v8542_v50 = vpop.permute.xlu1 %8541 }
 0x9aa   :  { %v8560_v20 = vsel %vm75_vm0, %v8559_v9, %v8542_v50  ;;  %v8535_v15 = vsel %vm4336_vm15, %v8534_v18, %v8527_v27  ;;  %v8608_v50 = vld [vmem:[#allocation4 + $0x40] sm:$0xff] }
 0x9ab   :  { %v8566_v32 = vperm.slane %v8535_v15, 0 }
 0x9ad   :  { %v8567_v45 = vmul.f32 %v8566_v32, %v11330_v26  ;;  %v8568_v38 = vmul.f32 %v8566_v32, %v11333_v54  ;;  %v8569_v47 = vmul.f32 %v8566_v32, %v11336_v24  ;;  %v8570_v36 = vmul.f32 %v8566_v32, %v11339_v4  ;;  %v8601_v26 = vld [vmem:[#allocation4 + $0x8] sm:$0xff]  ;;  %v8603_v4 = vld [vmem:[#allocation4 + $0x18] sm:$0xff] }
 0x9ae   :  { %v8571_v55 = vmul.f32 %v8566_v32, %v11342_v41  ;;  %v8572_v33 = vmul.f32 %v8566_v32, %v11357_v51  ;;  %v8573_v54 = vmul.f32 %v8566_v32, %v11363_v2  ;;  %v8574_v41 = vmul.f32 %v8566_v32, %v11369_v63  ;;  %v8605_v51 = vld [vmem:[#allocation4 + $0x28] sm:$0xff] }
 0x9af   :  { %v8575_v44 = vmul.f32 %v8566_v32, %v11374_v40  ;;  %v8576_v62 = vmul.f32 %v8566_v32, %v11382_v61  ;;  %v8577_v2 = vmul.f32 %v8566_v32, %v11388_v17  ;;  %v8578_v63 = vmul.f32 %v8566_v32, %v11394_v21 }
 0x9b0   :  { %v8579_v52 = vmul.f32 %v8566_v32, %v11400_v11  ;;  %v8580_v3 = vmul.f32 %v8566_v32, %v11406_v6  ;;  %v8581_v11 = vmul.f32 %v8566_v32, %v11411_v14 }
 0x9b1   :  { %v8545_v12 = vpop.permute.xlu0 %8544  ;;  %v8551_v16 = vpop.permute.xlu1 %8550 }
 0x9b2   :  { %v8561_v35 = vsel %vm4328_vm11, %v8560_v20, %v8545_v12  ;;  %v8610_v20 = vld [vmem:[#allocation4 + $0x50] sm:$0xff] }
 0x9b3   :  { %v8562_v5 = vsel %vm4330_vm12, %v8561_v35, %v8548_v57 }
 0x9b4   :  { %v8563_v43 = vsel %vm4332_vm13, %v8562_v5, %v8551_v16  ;;  %v8611_v5 = vld [vmem:[#allocation4 + $0x58] sm:$0xff] }
 0x9b5   :  { %v8564_v34 = vsel %vm4334_vm14, %v8563_v43, %v8554_v7  ;;  %v8582_v43 = vmul.f32 %v8566_v32, %v11420_v8 }
 0x9b9   :  { %v8557_v46 = vpop.permute.xlu0 %8556 }
 0x9ba   :  { %v8565_v56 = vsel %vm4336_vm15, %v8564_v34, %v8557_v46  ;;  %v8612_v46 = vld [vmem:[#allocation4 + $0x60] sm:$0xff] }
 0x9bb   :  { %v11473_v13 = vperm.slane %v8565_v56, 0 }
 0x9bd   :  { %v8584_v59 = vadd.f32 %v11473_v13, %v8567_v45  ;;  %v8585_v48 = vadd.f32 %v11473_v13, %v8568_v38  ;;  %v8586_v1 = vadd.f32 %v11473_v13, %v8569_v47  ;;  %v8587_v37 = vadd.f32 %v11473_v13, %v8570_v36  ;;  %v8613_v45 = vld [vmem:[#allocation4 + $0x68] sm:$0xff]  ;;  %v8614_v36 = vld [vmem:[#allocation4 + $0x70] sm:$0xff] }
 0x9be   :  { %v8588_v24 = vadd.f32 %v11473_v13, %v8571_v55  ;;  %v8589_v0 = vadd.f32 %v11473_v13, %v8572_v33  ;;  %v8590_v30 = vadd.f32 %v11473_v13, %v8573_v54  ;;  %v8591_v58 = vadd.f32 %v11473_v13, %v8574_v41 }
 0x9bf   :  { %v8616_v23 = vadd.f32 %v8600_v42, %v8584_v59  ;;  %v8617_v22 = vadd.f32 %v8601_v26, %v8585_v48  ;;  %v8618_v19 = vadd.f32 %v8602_v10, %v8586_v1  ;;  %v8619_v39 = vadd.f32 %v8603_v4, %v8587_v37  ;;  %v8615_v48 = vld [vmem:[#allocation4 + $0x78] sm:$0xff] }
 0x9c0   :  { %v8592_v40 = vadd.f32 %v11473_v13, %v8575_v44  ;;  %v8620_v29 = vadd.f32 %v8604_v53, %v8588_v24  ;;  %v8593_v49 = vadd.f32 %v11473_v13, %v8576_v62  ;;  %v8594_v27 = vadd.f32 %v11473_v13, %v8577_v2 }
 0x9c1   :  { %v8621_v61 = vadd.f32 %v8605_v51, %v8589_v0  ;;  %v8622_v17 = vadd.f32 %v8606_v25, %v8590_v30  ;;  %v8632_v31 = vmax.f32 %v8616_v23, 0.0  ;;  %v8633_v57 = vmax.f32 %v8617_v22, 0.0 }
 0x9c2   :  { %v8634_v9 = vmax.f32 %v8618_v19, 0.0  ;;  %v8595_v21 = vadd.f32 %v11473_v13, %v8578_v63  ;;  %v8623_v12 = vadd.f32 %v8607_v28, %v8591_v58  ;;  %v8635_v35 = vmax.f32 %v8619_v39, 0.0 }
 0x9c3   :  { %v8596_v18 = vadd.f32 %v11473_v13, %v8579_v52  ;;  %v8624_v15 = vadd.f32 %v8608_v50, %v8592_v40  ;;  %v8636_v16 = vmax.f32 %v8620_v29, 0.0  ;;  %8648 = vst [vmem:[#allocation10] sm:$0xff] %v8632_v31  ;;  %v8597_v7 = vadd.f32 %v11473_v13, %v8580_v3 }
 0x9c4   :  { %v8625_v34 = vadd.f32 %v8609_v60, %v8593_v49  ;;  %v8637_v6 = vmax.f32 %v8621_v61, 0.0  ;;  %8649 = vst [vmem:[#allocation10 + $0x8] sm:$0xff] %v8633_v57  ;;  %v8598_v56 = vadd.f32 %v11473_v13, %v8581_v11  ;;  %v8626_v38 = vadd.f32 %v8610_v20, %v8594_v27 }
 0x9c5   :  { %v8638_v47 = vmax.f32 %v8622_v17, 0.0  ;;  %8650 = vst [vmem:[#allocation10 + $0x10] sm:$0xff] %v8634_v9  ;;  %v8599_v14 = vadd.f32 %v11473_v13, %v8582_v43  ;;  %v8627_v55 = vadd.f32 %v8611_v5, %v8595_v21  ;;  %v8639_v59 = vmax.f32 %v8623_v12, 0.0 }
 0x9c6   :  { %8651 = vst [vmem:[#allocation10 + $0x18] sm:$0xff] %v8635_v35  ;;  %v8628_v8 = vadd.f32 %v8612_v46, %v8596_v18  ;;  %v8640_v32 = vmax.f32 %v8624_v15, 0.0  ;;  %v8629_v1 = vadd.f32 %v8613_v45, %v8597_v7  ;;  %v8641_v33 = vmax.f32 %v8625_v34, 0.0 }
 0x9c7   :  { %8652 = vst [vmem:[#allocation10 + $0x20] sm:$0xff] %v8636_v16  ;;  %v8630_v37 = vadd.f32 %v8614_v36, %v8598_v56  ;;  %v8642_v42 = vmax.f32 %v8626_v38, 0.0  ;;  %v8631_v26 = vadd.f32 %v8615_v48, %v8599_v14  ;;  %v8643_v10 = vmax.f32 %v8627_v55, 0.0 }
 0x9c8   :  { %8653 = vst [vmem:[#allocation10 + $0x28] sm:$0xff] %v8637_v6  ;;  %v8644_v54 = vmax.f32 %v8628_v8, 0.0  ;;  %v8645_v13 = vmax.f32 %v8629_v1, 0.0 }
 0x9c9   :  { %8654 = vst [vmem:[#allocation10 + $0x30] sm:$0xff] %v8638_v47  ;;  %v8646_v24 = vmax.f32 %v8630_v37, 0.0  ;;  %v8647_v4 = vmax.f32 %v8631_v26, 0.0 }
 0x9ca   :  { %8655 = vst [vmem:[#allocation10 + $0x38] sm:$0xff] %v8639_v59 }
 0x9cb   :  { %8656 = vst [vmem:[#allocation10 + $0x40] sm:$0xff] %v8640_v32 }
 0x9cc   :  { %8657 = vst [vmem:[#allocation10 + $0x48] sm:$0xff] %v8641_v33 }
 0x9cd   :  { %8658 = vst [vmem:[#allocation10 + $0x50] sm:$0xff] %v8642_v42 }
 0x9ce   :  { %8659 = vst [vmem:[#allocation10 + $0x58] sm:$0xff] %v8643_v10 }
 0x9cf   :  { %8660 = vst [vmem:[#allocation10 + $0x60] sm:$0xff] %v8644_v54 }
 0x9d0   :  { %8661 = vst [vmem:[#allocation10 + $0x68] sm:$0xff] %v8645_v13 }
 0x9d1   :  { %8662 = vst [vmem:[#allocation10 + $0x70] sm:$0xff] %v8646_v24 }
 0x9d2   :  { %8663 = vst [vmem:[#allocation10 + $0x78] sm:$0xff] %v8647_v4 }
 0x9d3   :  { %8676 = dma.vmem_to_hbm [thread:$0]  %s8669_s6, 2048, %s8671_s30, [#allocation6], %s9147_s9, %s9147_s9, %s9148_s10  }
 0x9d4   :  { %9144 = dma.done.wait [#allocation6], 2048  }
 0x9d5   :  { %9145 = vsyncadd [#allocation6], 4294965248 }
 0x9d6   :  { %8681 = vsyncpa [#allocation5], 1 }
 0x9d7   :  { %8682 = vsyncpa [#allocation8], 1 }
 0x9d8   :  { %8683 = vsyncpa [#allocation6], 1 }

</bundles_post_ra>
